<compile_context>
chip_gen: v5e
topology: v5e:2x2
jax: 0.10.0
libtpu: 0.0.40
codegen_flags: <defaults>
</compile_context>

<pallas_src>
import functools

import jax
import jax.numpy as jnp
from jax.experimental import pallas as pl
from jax.experimental.pallas import tpu as pltpu

NEG_SLOPE = 0.01   # F.leaky_relu default
BN_EPS = 1e-5      # nn.BatchNorm2d default

_VMEM_SPEC = pl.BlockSpec(memory_space=pltpu.MemorySpace.VMEM)


# ---------------------------------------------------------------------------
# In-kernel helpers
# ---------------------------------------------------------------------------
def _leaky_relu(h):
    return jnp.where(h >= 0, h, NEG_SLOPE * h)


def _bn_lrelu(h, gamma, beta):
    # training-mode BatchNorm: biased batch statistics over all rows (N*OH*OW)
    mean = jnp.mean(h, axis=0, keepdims=True)
    var = jnp.mean(jnp.square(h - mean), axis=0, keepdims=True)
    hn = (h - mean) * jax.lax.rsqrt(var + BN_EPS)
    return _leaky_relu(hn * gamma + beta)


def _stash_rows_even_odd(ps_ref, act):
    """Store (N, H, W, C) activations into (N, ceil(H/2), 2, W, C) scratch with
    ps[n, i, p, x, c] = act[n, 2*i + p, x, c].

    Splitting H (a major dim) is a layout-preserving reshape, so this is one
    large contiguous store plus (for odd H) one small tail-row store."""
    n, h, w, c = act.shape
    h2 = h // 2
    ps_ref[:, 0:h2, :, :, :] = act[:, :2 * h2, :, :].reshape(n, h2, 2, w, c)
    if h % 2:
        # odd H: last row lands in slot (i = h2, p = 0); slot (h2, 1) is never read.
        ps_ref[:, h2:h2 + 1, 0:1, :, :] = act[:, h - 1:h, :, :].reshape(n, 1, 1, w, c)


def _read_tap(ps_ref, di, dj, n, oh, ow, c):
    """Gather the (di, dj) tap of a 3x3 / stride-2 VALID conv from even/odd-row
    split storage.  Rows of the result are ordered (n, oy, ox).

    The H stride is absorbed by the even/odd split (static slice + phase
    slot); the W stride is a sublane-strided ref read (pl.ds stride=2)."""
    p, i0 = di % 2, di // 2
    v = ps_ref[:, i0:i0 + oh, p:p + 1, pl.ds(dj, ow, 2), :]   # (n, oh, 1, ow, c)
    return v.reshape(n * oh * ow, c)


# ---------------------------------------------------------------------------
# Fused Pallas kernel: conv1 -> conv2+bn2 -> conv3+bn3 -> fc4+sigmoid
# ---------------------------------------------------------------------------
def _discriminator_kernel(
        p1_ref, w1_ref, b1_ref,
        w2_ref, b2_ref, g2_ref, be2_ref,
        w3_ref, b3_ref, g3_ref, be3_ref,
        w4_ref, b4_ref,
        out_ref,
        h1_ps, h2_ps,
        *, n, oh1, ow1, oh2, ow2, oh3, ow3):
    c1 = w1_ref.shape[1]     # 64
    c2 = w2_ref.shape[3]     # 128
    c3 = w3_ref.shape[3]     # 256

    # ---- conv1 (single matmul over pre-built im2col patches) + leaky_relu ----
    h1 = jnp.dot(p1_ref[...], w1_ref[...], preferred_element_type=jnp.float32)
    h1 = _leaky_relu(h1 + b1_ref[...])                       # (n*oh1*ow1, 64)
    _stash_rows_even_odd(h1_ps, h1.reshape(n, oh1, ow1, c1))

    # ---- conv2: 9 accumulating MXU matmuls on VMEM-resident h1, + bn2 + leaky ----
    acc = None
    for di in range(3):
        for dj in range(3):
            lhs = _read_tap(h1_ps, di, dj, n, oh2, ow2, c1)  # (n*oh2*ow2, 64)
            part = jnp.dot(lhs, w2_ref[di, dj, :, :],
                           preferred_element_type=jnp.float32)
            acc = part if acc is None else acc + part
    h2 = _bn_lrelu(acc + b2_ref[...], g2_ref[...], be2_ref[...])
    _stash_rows_even_odd(h2_ps, h2.reshape(n, oh2, ow2, c2))

    # ---- conv3: 9 accumulating MXU matmuls + bn3 + leaky ----
    acc = None
    for di in range(3):
        for dj in range(3):
            lhs = _read_tap(h2_ps, di, dj, n, oh3, ow3, c2)  # (n*oh3*ow3, 128)
            part = jnp.dot(lhs, w3_ref[di, dj, :, :],
                           preferred_element_type=jnp.float32)
            acc = part if acc is None else acc + part
    h3 = _bn_lrelu(acc + b3_ref[...], g3_ref[...], be3_ref[...])   # (n*oh3*ow3, 256)

    # ---- fc4 + sigmoid: NCHW flatten folded into w4 (rows ordered (h, w, c)),
    #      so the head is a pure in-VMEM multiply + reduction ----
    s3 = oh3 * ow3
    x3 = h3.reshape(n, s3, c3)
    red = jnp.sum(x3 * w4_ref[...][None, :, :], axis=1, keepdims=True)  # (n, 1, c3)
    red = jnp.sum(red, axis=2, keepdims=True)                           # (n, 1, 1)
    logits = red.reshape(n, 1) + b4_ref[...]
    sig = 1.0 / (1.0 + jnp.exp(-logits))                     # exact sigmoid (f32)
    # lane-dense output: broadcast across 128 lanes, sliced back to (n, 1) outside
    out_ref[...] = jnp.broadcast_to(sig, out_ref.shape)


# ---------------------------------------------------------------------------
# Host-side glue
# ---------------------------------------------------------------------------
def _conv_out(size):
    return (size - 3) // 2 + 1


def _im2col_conv1(x_nhwc, k=3, s=2):
    """VALID 3x3/stride-2 patches for conv1 only (input must stream from HBM anyway).
    Returns ((N*OH*OW, k*k*C), OH, OW) with rows (n, oy, ox), features (kh, kw, c)."""
    n, h, w, c = x_nhwc.shape
    oh = (h - k) // s + 1
    ow = (w - k) // s + 1
    cols = []
    for di in range(k):
        for dj in range(k):
            cols.append(x_nhwc[:, di:di + s * (oh - 1) + 1:s,
                               dj:dj + s * (ow - 1) + 1:s, :])
    p = jnp.stack(cols, axis=3)                               # (N, OH, OW, 9, C)
    return p.reshape(n * oh * ow, k * k * c), oh, ow


@jax.jit
def discriminator_forward(params, x_nchw):
    n = x_nchw.shape[0]
    x = jnp.transpose(x_nchw, (0, 2, 3, 1)).astype(jnp.float32)   # NCHW -> NHWC

    p1, oh1, ow1 = _im2col_conv1(x)
    oh2, ow2 = _conv_out(oh1), _conv_out(ow1)
    oh3, ow3 = _conv_out(oh2), _conv_out(ow2)

    kern = functools.partial(
        _discriminator_kernel,
        n=n, oh1=oh1, ow1=ow1, oh2=oh2, ow2=ow2, oh3=oh3, ow3=ow3)

    r1, r2, r3 = n * oh1 * ow1, n * oh2 * ow2, n * oh3 * ow3
    flops = 2 * (r1 * p1.shape[1] * 64
                 + r2 * 9 * 64 * 128
                 + r3 * 9 * 128 * 256
                 + n * oh3 * ow3 * 256)
    bytes_accessed = 4 * (p1.size + params["w1"].size + params["w2"].size
                          + params["w3"].size + params["w4"].size
                          + 64 + 3 * 128 + 3 * 256 + 1 + n * 128)

    out_pad = pl.pallas_call(
        kern,
        out_shape=jax.ShapeDtypeStruct((n, 128), jnp.float32),
        in_specs=[_VMEM_SPEC] * 13,
        out_specs=_VMEM_SPEC,
        scratch_shapes=[
            # even/odd-row split activation scratch (VMEM-resident between layers)
            pltpu.VMEM((n, (oh1 + 1) // 2, 2, ow1, 64), jnp.float32),
            pltpu.VMEM((n, (oh2 + 1) // 2, 2, ow2, 128), jnp.float32),
        ],
        compiler_params=pltpu.CompilerParams(vmem_limit_bytes=32 * 1024 * 1024),
        cost_estimate=pl.CostEstimate(flops=int(flops),
                                      transcendentals=int(n + 2 * (128 + 256)),
                                      bytes_accessed=int(bytes_accessed)),
    )(p1, params["w1"], params["b1"],
      params["w2"], params["b2"], params["g2"], params["be2"],
      params["w3"], params["b3"], params["g3"], params["be3"],
      params["w4"], params["b4"])
    return out_pad[:, :1]


# ---------------------------------------------------------------------------
# Parameter construction (deterministic, synthetic; shapes from __init__)
# ---------------------------------------------------------------------------
def init_params(key, in_ch, oh3, ow3):
    ks = jax.random.split(key, 8)

    def conv_w(k, oc, ic):
        # PyTorch layout (OC, IC, KH, KW) -> (KH, KW, IC, OC)
        w = jax.random.normal(k, (oc, ic, 3, 3), jnp.float32) * 0.05
        return jnp.transpose(w, (2, 3, 1, 0))

    s3 = oh3 * ow3
    fc_in = 256 * s3                           # 2304 for 3x32x32, 1024 for 1x28x28
    # PyTorch fc4.weight is (1, fc_in) over features flattened in (c, h, w)
    # order; fold that flatten into the weight: rows reordered to (h, w, c).
    w4_pt = jax.random.normal(ks[6], (1, fc_in), jnp.float32) * 0.02
    w4 = jnp.transpose(w4_pt.reshape(256, oh3, ow3), (1, 2, 0)).reshape(s3, 256)

    return dict(
        w1=conv_w(ks[0], 64, in_ch).reshape(9 * in_ch, 64),   # rows in (kh, kw, ic)
        b1=jax.random.normal(ks[1], (1, 64), jnp.float32) * 0.05,
        w2=conv_w(ks[2], 128, 64),                             # (3, 3, 64, 128)
        b2=jax.random.normal(ks[3], (1, 128), jnp.float32) * 0.05,
        w3=conv_w(ks[4], 256, 128),                            # (3, 3, 128, 256)
        b3=jax.random.normal(ks[5], (1, 256), jnp.float32) * 0.05,
        g2=jnp.ones((1, 128), jnp.float32), be2=jnp.zeros((1, 128), jnp.float32),
        g3=jnp.ones((1, 256), jnp.float32), be3=jnp.zeros((1, 256), jnp.float32),
        w4=w4,
        b4=jax.random.normal(ks[7], (1, 1), jnp.float32) * 0.02,
    )


if __name__ == "__main__":
    key = jax.random.PRNGKey(0)
    k_param, k_x = jax.random.split(key)

    in_ch, batch, spatial = 3, 2, 32   # 32x32 RGB -> fc4 input = 256*3*3 = 2304
    oh1 = _conv_out(spatial)
    oh3 = _conv_out(_conv_out(oh1))
    params = init_params(k_param, in_ch, oh3, oh3)
    x = jax.random.normal(k_x, (batch, in_ch, spatial, spatial), jnp.float32)

    out = discriminator_forward(params, x)
    out = jax.block_until_ready(out)

    assert out.shape == (batch, 1), out.shape
    assert bool(jnp.all(jnp.isfinite(out))), "non-finite output"
    assert bool(jnp.all((out >= 0.0) & (out <= 1.0))), "sigmoid range violated"
    # TODO(synk): BatchNorm running-stat updates (a training side effect, not part
    # of the returned forward value) are not emitted.
    print("KERNEL_OK")
</pallas_src>

<mosaic_0001>
module attributes {stable_mosaic.version = 11 : i64} {
  func.func @_discriminator_kernel(%arg0: memref<450x27xf32, #tpu.memory_space<vmem>>, %arg1: memref<27x64xf32, #tpu.memory_space<vmem>>, %arg2: memref<1x64xf32, #tpu.memory_space<vmem>>, %arg3: memref<3x3x64x128xf32, #tpu.memory_space<vmem>>, %arg4: memref<1x128xf32, #tpu.memory_space<vmem>>, %arg5: memref<1x128xf32, #tpu.memory_space<vmem>>, %arg6: memref<1x128xf32, #tpu.memory_space<vmem>>, %arg7: memref<3x3x128x256xf32, #tpu.memory_space<vmem>>, %arg8: memref<1x256xf32, #tpu.memory_space<vmem>>, %arg9: memref<1x256xf32, #tpu.memory_space<vmem>>, %arg10: memref<1x256xf32, #tpu.memory_space<vmem>>, %arg11: memref<9x256xf32, #tpu.memory_space<vmem>>, %arg12: memref<1x1xf32, #tpu.memory_space<vmem>>, %arg13: memref<2x128xf32, #tpu.memory_space<vmem>>, %arg14: memref<2x8x2x15x64xf32, #tpu.memory_space<vmem>>, %arg15: memref<2x4x2x7x128xf32, #tpu.memory_space<vmem>>) attributes {dimension_semantics = [], scalar_prefetch = 0 : i64, scratch_operands = 2 : i64, tpu.core_type = #tpu.core_type<tc>} {
    %c0 = arith.constant 0 : index
    %c0_0 = arith.constant 0 : index
    %0 = vector.load %arg0[%c0, %c0_0] : memref<450x27xf32, #tpu.memory_space<vmem>>, vector<450x27xf32>
    %c0_1 = arith.constant 0 : index
    %c0_2 = arith.constant 0 : index
    %1 = vector.load %arg1[%c0_1, %c0_2] : memref<27x64xf32, #tpu.memory_space<vmem>>, vector<27x64xf32>
    %cst = arith.constant dense<0.000000e+00> : vector<450x64xf32>
    %2 = tpu.matmul %0, %1, %cst {dimension_numbers = #tpu.dot_dimension_numbers<[1], [0], [0], [1], [0, 0, 1, 1], [], []>} : vector<450x27xf32>, vector<27x64xf32>, vector<450x64xf32> -> vector<450x64xf32>
    %c0_3 = arith.constant 0 : index
    %c0_4 = arith.constant 0 : index
    %3 = vector.load %arg2[%c0_3, %c0_4] : memref<1x64xf32, #tpu.memory_space<vmem>>, vector<1x64xf32>
    %4 = vector.broadcast %3 : vector<1x64xf32> to vector<450x64xf32>
    %5 = arith.addf %2, %4 : vector<450x64xf32>
    %cst_5 = arith.constant 0.000000e+00 : f32
    %6 = vector.broadcast %cst_5 : f32 to vector<450x64xf32>
    %7 = arith.cmpf oge, %5, %6 : vector<450x64xf32>
    %cst_6 = arith.constant 0.00999999977 : f32
    %8 = vector.broadcast %cst_6 : f32 to vector<450x64xf32>
    %9 = arith.mulf %8, %5 : vector<450x64xf32>
    %10 = arith.select %7, %5, %9 : vector<450x64xi1>, vector<450x64xf32>
    %11 = vector.shape_cast %10 : vector<450x64xf32> to vector<2x15x15x64xf32>
    %12 = vector.extract_strided_slice %11 {offsets = [0, 0, 0, 0], sizes = [2, 14, 15, 64], strides = [1, 1, 1, 1]} : vector<2x15x15x64xf32> to vector<2x14x15x64xf32>
    %13 = vector.shape_cast %12 : vector<2x14x15x64xf32> to vector<2x7x2x15x64xf32>
    %c0_7 = arith.constant 0 : index
    %c0_8 = arith.constant 0 : index
    %c0_9 = arith.constant 0 : index
    %c0_10 = arith.constant 0 : index
    %c0_11 = arith.constant 0 : index
    %14 = vector.load %arg14[%c0_7, %c0_8, %c0_9, %c0_10, %c0_11] : memref<2x8x2x15x64xf32, #tpu.memory_space<vmem>>, vector<2x7x2x15x64xf32>
    tpu.vector_store %arg14[%c0_7, %c0_8, %c0_9, %c0_10, %c0_11], %13 {strides = array<i32>} : memref<2x8x2x15x64xf32, #tpu.memory_space<vmem>>, vector<2x7x2x15x64xf32>,
    %15 = vector.extract_strided_slice %11 {offsets = [0, 14, 0, 0], sizes = [2, 1, 15, 64], strides = [1, 1, 1, 1]} : vector<2x15x15x64xf32> to vector<2x1x15x64xf32>
    %16 = vector.shape_cast %15 : vector<2x1x15x64xf32> to vector<2x1x1x15x64xf32>
    %c0_12 = arith.constant 0 : index
    %c7 = arith.constant 7 : index
    %c0_13 = arith.constant 0 : index
    %c0_14 = arith.constant 0 : index
    %c0_15 = arith.constant 0 : index
    %17 = vector.load %arg14[%c0_12, %c7, %c0_13, %c0_14, %c0_15] : memref<2x8x2x15x64xf32, #tpu.memory_space<vmem>>, vector<2x1x1x15x64xf32>
    tpu.vector_store %arg14[%c0_12, %c7, %c0_13, %c0_14, %c0_15], %16 {strides = array<i32>} : memref<2x8x2x15x64xf32, #tpu.memory_space<vmem>>, vector<2x1x1x15x64xf32>,
    %c0_16 = arith.constant 0 : index
    %c0_17 = arith.constant 0 : index
    %c0_18 = arith.constant 0 : index
    %c0_19 = arith.constant 0 : index
    %c0_20 = arith.constant 0 : index
    %18 = tpu.strided_load %arg14[%c0_16, %c0_17, %c0_18, %c0_19, %c0_20] {strides = array<i32: 1, 1, 1, 2, 1>} : memref<2x8x2x15x64xf32, #tpu.memory_space<vmem>>, vector<2x7x1x7x64xf32>
    %19 = vector.shape_cast %18 : vector<2x7x1x7x64xf32> to vector<98x64xf32>
    %c0_21 = arith.constant 0 : index
    %c0_22 = arith.constant 0 : index
    %c0_23 = arith.constant 0 : index
    %c0_24 = arith.constant 0 : index
    %20 = vector.load %arg3[%c0_21, %c0_22, %c0_23, %c0_24] : memref<3x3x64x128xf32, #tpu.memory_space<vmem>>, vector<1x1x64x128xf32>
    %21 = vector.shape_cast %20 : vector<1x1x64x128xf32> to vector<64x128xf32>
    %cst_25 = arith.constant dense<0.000000e+00> : vector<98x128xf32>
    %22 = tpu.matmul %19, %21, %cst_25 {dimension_numbers = #tpu.dot_dimension_numbers<[1], [0], [0], [1], [0, 0, 1, 1], [], []>} : vector<98x64xf32>, vector<64x128xf32>, vector<98x128xf32> -> vector<98x128xf32>
    %c0_26 = arith.constant 0 : index
    %c0_27 = arith.constant 0 : index
    %c0_28 = arith.constant 0 : index
    %c1 = arith.constant 1 : index
    %c0_29 = arith.constant 0 : index
    %23 = tpu.strided_load %arg14[%c0_26, %c0_27, %c0_28, %c1, %c0_29] {strides = array<i32: 1, 1, 1, 2, 1>} : memref<2x8x2x15x64xf32, #tpu.memory_space<vmem>>, vector<2x7x1x7x64xf32>
    %24 = vector.shape_cast %23 : vector<2x7x1x7x64xf32> to vector<98x64xf32>
    %c0_30 = arith.constant 0 : index
    %c1_31 = arith.constant 1 : index
    %c0_32 = arith.constant 0 : index
    %c0_33 = arith.constant 0 : index
    %25 = vector.load %arg3[%c0_30, %c1_31, %c0_32, %c0_33] : memref<3x3x64x128xf32, #tpu.memory_space<vmem>>, vector<1x1x64x128xf32>
    %26 = vector.shape_cast %25 : vector<1x1x64x128xf32> to vector<64x128xf32>
    %cst_34 = arith.constant dense<0.000000e+00> : vector<98x128xf32>
    %27 = tpu.matmul %24, %26, %cst_34 {dimension_numbers = #tpu.dot_dimension_numbers<[1], [0], [0], [1], [0, 0, 1, 1], [], []>} : vector<98x64xf32>, vector<64x128xf32>, vector<98x128xf32> -> vector<98x128xf32>
    %28 = arith.addf %22, %27 : vector<98x128xf32>
    %c0_35 = arith.constant 0 : index
    %c0_36 = arith.constant 0 : index
    %c0_37 = arith.constant 0 : index
    %c2 = arith.constant 2 : index
    %c0_38 = arith.constant 0 : index
    %29 = tpu.strided_load %arg14[%c0_35, %c0_36, %c0_37, %c2, %c0_38] {strides = array<i32: 1, 1, 1, 2, 1>} : memref<2x8x2x15x64xf32, #tpu.memory_space<vmem>>, vector<2x7x1x7x64xf32>
    %30 = vector.shape_cast %29 : vector<2x7x1x7x64xf32> to vector<98x64xf32>
    %c0_39 = arith.constant 0 : index
    %c2_40 = arith.constant 2 : index
    %c0_41 = arith.constant 0 : index
    %c0_42 = arith.constant 0 : index
    %31 = vector.load %arg3[%c0_39, %c2_40, %c0_41, %c0_42] : memref<3x3x64x128xf32, #tpu.memory_space<vmem>>, vector<1x1x64x128xf32>
    %32 = vector.shape_cast %31 : vector<1x1x64x128xf32> to vector<64x128xf32>
    %cst_43 = arith.constant dense<0.000000e+00> : vector<98x128xf32>
    %33 = tpu.matmul %30, %32, %cst_43 {dimension_numbers = #tpu.dot_dimension_numbers<[1], [0], [0], [1], [0, 0, 1, 1], [], []>} : vector<98x64xf32>, vector<64x128xf32>, vector<98x128xf32> -> vector<98x128xf32>
    %34 = arith.addf %28, %33 : vector<98x128xf32>
    %c0_44 = arith.constant 0 : index
    %c0_45 = arith.constant 0 : index
    %c1_46 = arith.constant 1 : index
    %c0_47 = arith.constant 0 : index
    %c0_48 = arith.constant 0 : index
    %35 = tpu.strided_load %arg14[%c0_44, %c0_45, %c1_46, %c0_47, %c0_48] {strides = array<i32: 1, 1, 1, 2, 1>} : memref<2x8x2x15x64xf32, #tpu.memory_space<vmem>>, vector<2x7x1x7x64xf32>
    %36 = vector.shape_cast %35 : vector<2x7x1x7x64xf32> to vector<98x64xf32>
    %c1_49 = arith.constant 1 : index
    %c0_50 = arith.constant 0 : index
    %c0_51 = arith.constant 0 : index
    %c0_52 = arith.constant 0 : index
    %37 = vector.load %arg3[%c1_49, %c0_50, %c0_51, %c0_52] : memref<3x3x64x128xf32, #tpu.memory_space<vmem>>, vector<1x1x64x128xf32>
    %38 = vector.shape_cast %37 : vector<1x1x64x128xf32> to vector<64x128xf32>
    %cst_53 = arith.constant dense<0.000000e+00> : vector<98x128xf32>
    %39 = tpu.matmul %36, %38, %cst_53 {dimension_numbers = #tpu.dot_dimension_numbers<[1], [0], [0], [1], [0, 0, 1, 1], [], []>} : vector<98x64xf32>, vector<64x128xf32>, vector<98x128xf32> -> vector<98x128xf32>
    %40 = arith.addf %34, %39 : vector<98x128xf32>
    %c0_54 = arith.constant 0 : index
    %c0_55 = arith.constant 0 : index
    %c1_56 = arith.constant 1 : index
    %c1_57 = arith.constant 1 : index
    %c0_58 = arith.constant 0 : index
    %41 = tpu.strided_load %arg14[%c0_54, %c0_55, %c1_56, %c1_57, %c0_58] {strides = array<i32: 1, 1, 1, 2, 1>} : memref<2x8x2x15x64xf32, #tpu.memory_space<vmem>>, vector<2x7x1x7x64xf32>
    %42 = vector.shape_cast %41 : vector<2x7x1x7x64xf32> to vector<98x64xf32>
    %c1_59 = arith.constant 1 : index
    %c1_60 = arith.constant 1 : index
    %c0_61 = arith.constant 0 : index
    %c0_62 = arith.constant 0 : index
    %43 = vector.load %arg3[%c1_59, %c1_60, %c0_61, %c0_62] : memref<3x3x64x128xf32, #tpu.memory_space<vmem>>, vector<1x1x64x128xf32>
    %44 = vector.shape_cast %43 : vector<1x1x64x128xf32> to vector<64x128xf32>
    %cst_63 = arith.constant dense<0.000000e+00> : vector<98x128xf32>
    %45 = tpu.matmul %42, %44, %cst_63 {dimension_numbers = #tpu.dot_dimension_numbers<[1], [0], [0], [1], [0, 0, 1, 1], [], []>} : vector<98x64xf32>, vector<64x128xf32>, vector<98x128xf32> -> vector<98x128xf32>
    %46 = arith.addf %40, %45 : vector<98x128xf32>
    %c0_64 = arith.constant 0 : index
    %c0_65 = arith.constant 0 : index
    %c1_66 = arith.constant 1 : index
    %c2_67 = arith.constant 2 : index
    %c0_68 = arith.constant 0 : index
    %47 = tpu.strided_load %arg14[%c0_64, %c0_65, %c1_66, %c2_67, %c0_68] {strides = array<i32: 1, 1, 1, 2, 1>} : memref<2x8x2x15x64xf32, #tpu.memory_space<vmem>>, vector<2x7x1x7x64xf32>
    %48 = vector.shape_cast %47 : vector<2x7x1x7x64xf32> to vector<98x64xf32>
    %c1_69 = arith.constant 1 : index
    %c2_70 = arith.constant 2 : index
    %c0_71 = arith.constant 0 : index
    %c0_72 = arith.constant 0 : index
    %49 = vector.load %arg3[%c1_69, %c2_70, %c0_71, %c0_72] : memref<3x3x64x128xf32, #tpu.memory_space<vmem>>, vector<1x1x64x128xf32>
    %50 = vector.shape_cast %49 : vector<1x1x64x128xf32> to vector<64x128xf32>
    %cst_73 = arith.constant dense<0.000000e+00> : vector<98x128xf32>
    %51 = tpu.matmul %48, %50, %cst_73 {dimension_numbers = #tpu.dot_dimension_numbers<[1], [0], [0], [1], [0, 0, 1, 1], [], []>} : vector<98x64xf32>, vector<64x128xf32>, vector<98x128xf32> -> vector<98x128xf32>
    %52 = arith.addf %46, %51 : vector<98x128xf32>
    %c0_74 = arith.constant 0 : index
    %c1_75 = arith.constant 1 : index
    %c0_76 = arith.constant 0 : index
    %c0_77 = arith.constant 0 : index
    %c0_78 = arith.constant 0 : index
    %53 = tpu.strided_load %arg14[%c0_74, %c1_75, %c0_76, %c0_77, %c0_78] {strides = array<i32: 1, 1, 1, 2, 1>} : memref<2x8x2x15x64xf32, #tpu.memory_space<vmem>>, vector<2x7x1x7x64xf32>
    %54 = vector.shape_cast %53 : vector<2x7x1x7x64xf32> to vector<98x64xf32>
    %c2_79 = arith.constant 2 : index
    %c0_80 = arith.constant 0 : index
    %c0_81 = arith.constant 0 : index
    %c0_82 = arith.constant 0 : index
    %55 = vector.load %arg3[%c2_79, %c0_80, %c0_81, %c0_82] : memref<3x3x64x128xf32, #tpu.memory_space<vmem>>, vector<1x1x64x128xf32>
    %56 = vector.shape_cast %55 : vector<1x1x64x128xf32> to vector<64x128xf32>
    %cst_83 = arith.constant dense<0.000000e+00> : vector<98x128xf32>
    %57 = tpu.matmul %54, %56, %cst_83 {dimension_numbers = #tpu.dot_dimension_numbers<[1], [0], [0], [1], [0, 0, 1, 1], [], []>} : vector<98x64xf32>, vector<64x128xf32>, vector<98x128xf32> -> vector<98x128xf32>
    %58 = arith.addf %52, %57 : vector<98x128xf32>
    %c0_84 = arith.constant 0 : index
    %c1_85 = arith.constant 1 : index
    %c0_86 = arith.constant 0 : index
    %c1_87 = arith.constant 1 : index
    %c0_88 = arith.constant 0 : index
    %59 = tpu.strided_load %arg14[%c0_84, %c1_85, %c0_86, %c1_87, %c0_88] {strides = array<i32: 1, 1, 1, 2, 1>} : memref<2x8x2x15x64xf32, #tpu.memory_space<vmem>>, vector<2x7x1x7x64xf32>
    %60 = vector.shape_cast %59 : vector<2x7x1x7x64xf32> to vector<98x64xf32>
    %c2_89 = arith.constant 2 : index
    %c1_90 = arith.constant 1 : index
    %c0_91 = arith.constant 0 : index
    %c0_92 = arith.constant 0 : index
    %61 = vector.load %arg3[%c2_89, %c1_90, %c0_91, %c0_92] : memref<3x3x64x128xf32, #tpu.memory_space<vmem>>, vector<1x1x64x128xf32>
    %62 = vector.shape_cast %61 : vector<1x1x64x128xf32> to vector<64x128xf32>
    %cst_93 = arith.constant dense<0.000000e+00> : vector<98x128xf32>
    %63 = tpu.matmul %60, %62, %cst_93 {dimension_numbers = #tpu.dot_dimension_numbers<[1], [0], [0], [1], [0, 0, 1, 1], [], []>} : vector<98x64xf32>, vector<64x128xf32>, vector<98x128xf32> -> vector<98x128xf32>
    %64 = arith.addf %58, %63 : vector<98x128xf32>
    %c0_94 = arith.constant 0 : index
    %c1_95 = arith.constant 1 : index
    %c0_96 = arith.constant 0 : index
    %c2_97 = arith.constant 2 : index
    %c0_98 = arith.constant 0 : index
    %65 = tpu.strided_load %arg14[%c0_94, %c1_95, %c0_96, %c2_97, %c0_98] {strides = array<i32: 1, 1, 1, 2, 1>} : memref<2x8x2x15x64xf32, #tpu.memory_space<vmem>>, vector<2x7x1x7x64xf32>
    %66 = vector.shape_cast %65 : vector<2x7x1x7x64xf32> to vector<98x64xf32>
    %c2_99 = arith.constant 2 : index
    %c2_100 = arith.constant 2 : index
    %c0_101 = arith.constant 0 : index
    %c0_102 = arith.constant 0 : index
    %67 = vector.load %arg3[%c2_99, %c2_100, %c0_101, %c0_102] : memref<3x3x64x128xf32, #tpu.memory_space<vmem>>, vector<1x1x64x128xf32>
    %68 = vector.shape_cast %67 : vector<1x1x64x128xf32> to vector<64x128xf32>
    %cst_103 = arith.constant dense<0.000000e+00> : vector<98x128xf32>
    %69 = tpu.matmul %66, %68, %cst_103 {dimension_numbers = #tpu.dot_dimension_numbers<[1], [0], [0], [1], [0, 0, 1, 1], [], []>} : vector<98x64xf32>, vector<64x128xf32>, vector<98x128xf32> -> vector<98x128xf32>
    %70 = arith.addf %64, %69 : vector<98x128xf32>
    %c0_104 = arith.constant 0 : index
    %c0_105 = arith.constant 0 : index
    %71 = vector.load %arg4[%c0_104, %c0_105] : memref<1x128xf32, #tpu.memory_space<vmem>>, vector<1x128xf32>
    %72 = vector.broadcast %71 : vector<1x128xf32> to vector<98x128xf32>
    %73 = arith.addf %70, %72 : vector<98x128xf32>
    %c0_106 = arith.constant 0 : index
    %c0_107 = arith.constant 0 : index
    %74 = vector.load %arg5[%c0_106, %c0_107] : memref<1x128xf32, #tpu.memory_space<vmem>>, vector<1x128xf32>
    %c0_108 = arith.constant 0 : index
    %c0_109 = arith.constant 0 : index
    %75 = vector.load %arg6[%c0_108, %c0_109] : memref<1x128xf32, #tpu.memory_space<vmem>>, vector<1x128xf32>
    %cst_110 = arith.constant dense<0.000000e+00> : vector<128xf32>
    %76 = vector.multi_reduction <add>, %73, %cst_110 [0] : vector<98x128xf32> to vector<128xf32>
    %77 = vector.shape_cast %76 : vector<128xf32> to vector<1x128xf32>
    %cst_111 = arith.constant 9.800000e+01 : f32
    %78 = vector.broadcast %cst_111 : f32 to vector<1x128xf32>
    %79 = arith.divf %77, %78 : vector<1x128xf32>
    %80 = vector.broadcast %79 : vector<1x128xf32> to vector<98x128xf32>
    %81 = arith.subf %73, %80 : vector<98x128xf32>
    %82 = arith.mulf %81, %81 : vector<98x128xf32>
    %cst_112 = arith.constant dense<0.000000e+00> : vector<128xf32>
    %83 = vector.multi_reduction <add>, %82, %cst_112 [0] : vector<98x128xf32> to vector<128xf32>
    %84 = vector.shape_cast %83 : vector<128xf32> to vector<1x128xf32>
    %cst_113 = arith.constant 9.800000e+01 : f32
    %85 = vector.broadcast %cst_113 : f32 to vector<1x128xf32>
    %86 = arith.divf %84, %85 : vector<1x128xf32>
    %87 = vector.broadcast %79 : vector<1x128xf32> to vector<98x128xf32>
    %88 = arith.subf %73, %87 : vector<98x128xf32>
    %cst_114 = arith.constant 9.99999974E-6 : f32
    %89 = vector.broadcast %cst_114 : f32 to vector<1x128xf32>
    %90 = arith.addf %86, %89 : vector<1x128xf32>
    %91 = math.rsqrt %90 : vector<1x128xf32>
    %92 = vector.broadcast %91 : vector<1x128xf32> to vector<98x128xf32>
    %93 = arith.mulf %88, %92 : vector<98x128xf32>
    %94 = vector.broadcast %74 : vector<1x128xf32> to vector<98x128xf32>
    %95 = arith.mulf %93, %94 : vector<98x128xf32>
    %96 = vector.broadcast %75 : vector<1x128xf32> to vector<98x128xf32>
    %97 = arith.addf %95, %96 : vector<98x128xf32>
    %cst_115 = arith.constant 0.000000e+00 : f32
    %98 = vector.broadcast %cst_115 : f32 to vector<98x128xf32>
    %99 = arith.cmpf oge, %97, %98 : vector<98x128xf32>
    %cst_116 = arith.constant 0.00999999977 : f32
    %100 = vector.broadcast %cst_116 : f32 to vector<98x128xf32>
    %101 = arith.mulf %100, %97 : vector<98x128xf32>
    %102 = arith.select %99, %97, %101 : vector<98x128xi1>, vector<98x128xf32>
    %103 = vector.shape_cast %102 : vector<98x128xf32> to vector<2x7x7x128xf32>
    %104 = vector.extract_strided_slice %103 {offsets = [0, 0, 0, 0], sizes = [2, 6, 7, 128], strides = [1, 1, 1, 1]} : vector<2x7x7x128xf32> to vector<2x6x7x128xf32>
    %105 = vector.shape_cast %104 : vector<2x6x7x128xf32> to vector<2x3x2x7x128xf32>
    %c0_117 = arith.constant 0 : index
    %c0_118 = arith.constant 0 : index
    %c0_119 = arith.constant 0 : index
    %c0_120 = arith.constant 0 : index
    %c0_121 = arith.constant 0 : index
    %106 = vector.load %arg15[%c0_117, %c0_118, %c0_119, %c0_120, %c0_121] : memref<2x4x2x7x128xf32, #tpu.memory_space<vmem>>, vector<2x3x2x7x128xf32>
    tpu.vector_store %arg15[%c0_117, %c0_118, %c0_119, %c0_120, %c0_121], %105 {strides = array<i32>} : memref<2x4x2x7x128xf32, #tpu.memory_space<vmem>>, vector<2x3x2x7x128xf32>,
    %107 = vector.extract_strided_slice %103 {offsets = [0, 6, 0, 0], sizes = [2, 1, 7, 128], strides = [1, 1, 1, 1]} : vector<2x7x7x128xf32> to vector<2x1x7x128xf32>
    %108 = vector.shape_cast %107 : vector<2x1x7x128xf32> to vector<2x1x1x7x128xf32>
    %c0_122 = arith.constant 0 : index
    %c3 = arith.constant 3 : index
    %c0_123 = arith.constant 0 : index
    %c0_124 = arith.constant 0 : index
    %c0_125 = arith.constant 0 : index
    %109 = vector.load %arg15[%c0_122, %c3, %c0_123, %c0_124, %c0_125] : memref<2x4x2x7x128xf32, #tpu.memory_space<vmem>>, vector<2x1x1x7x128xf32>
    tpu.vector_store %arg15[%c0_122, %c3, %c0_123, %c0_124, %c0_125], %108 {strides = array<i32>} : memref<2x4x2x7x128xf32, #tpu.memory_space<vmem>>, vector<2x1x1x7x128xf32>,
    %c0_126 = arith.constant 0 : index
    %c0_127 = arith.constant 0 : index
    %c0_128 = arith.constant 0 : index
    %c0_129 = arith.constant 0 : index
    %c0_130 = arith.constant 0 : index
    %110 = tpu.strided_load %arg15[%c0_126, %c0_127, %c0_128, %c0_129, %c0_130] {strides = array<i32: 1, 1, 1, 2, 1>} : memref<2x4x2x7x128xf32, #tpu.memory_space<vmem>>, vector<2x3x1x3x128xf32>
    %111 = vector.shape_cast %110 : vector<2x3x1x3x128xf32> to vector<18x128xf32>
    %c0_131 = arith.constant 0 : index
    %c0_132 = arith.constant 0 : index
    %c0_133 = arith.constant 0 : index
    %c0_134 = arith.constant 0 : index
    %112 = vector.load %arg7[%c0_131, %c0_132, %c0_133, %c0_134] : memref<3x3x128x256xf32, #tpu.memory_space<vmem>>, vector<1x1x128x256xf32>
    %113 = vector.shape_cast %112 : vector<1x1x128x256xf32> to vector<128x256xf32>
    %cst_135 = arith.constant dense<0.000000e+00> : vector<18x256xf32>
    %114 = tpu.matmul %111, %113, %cst_135 {dimension_numbers = #tpu.dot_dimension_numbers<[1], [0], [0], [1], [0, 0, 1, 1], [], []>} : vector<18x128xf32>, vector<128x256xf32>, vector<18x256xf32> -> vector<18x256xf32>
    %c0_136 = arith.constant 0 : index
    %c0_137 = arith.constant 0 : index
    %c0_138 = arith.constant 0 : index
    %c1_139 = arith.constant 1 : index
    %c0_140 = arith.constant 0 : index
    %115 = tpu.strided_load %arg15[%c0_136, %c0_137, %c0_138, %c1_139, %c0_140] {strides = array<i32: 1, 1, 1, 2, 1>} : memref<2x4x2x7x128xf32, #tpu.memory_space<vmem>>, vector<2x3x1x3x128xf32>
    %116 = vector.shape_cast %115 : vector<2x3x1x3x128xf32> to vector<18x128xf32>
    %c0_141 = arith.constant 0 : index
    %c1_142 = arith.constant 1 : index
    %c0_143 = arith.constant 0 : index
    %c0_144 = arith.constant 0 : index
    %117 = vector.load %arg7[%c0_141, %c1_142, %c0_143, %c0_144] : memref<3x3x128x256xf32, #tpu.memory_space<vmem>>, vector<1x1x128x256xf32>
    %118 = vector.shape_cast %117 : vector<1x1x128x256xf32> to vector<128x256xf32>
    %cst_145 = arith.constant dense<0.000000e+00> : vector<18x256xf32>
    %119 = tpu.matmul %116, %118, %cst_145 {dimension_numbers = #tpu.dot_dimension_numbers<[1], [0], [0], [1], [0, 0, 1, 1], [], []>} : vector<18x128xf32>, vector<128x256xf32>, vector<18x256xf32> -> vector<18x256xf32>
    %120 = arith.addf %114, %119 : vector<18x256xf32>
    %c0_146 = arith.constant 0 : index
    %c0_147 = arith.constant 0 : index
    %c0_148 = arith.constant 0 : index
    %c2_149 = arith.constant 2 : index
    %c0_150 = arith.constant 0 : index
    %121 = tpu.strided_load %arg15[%c0_146, %c0_147, %c0_148, %c2_149, %c0_150] {strides = array<i32: 1, 1, 1, 2, 1>} : memref<2x4x2x7x128xf32, #tpu.memory_space<vmem>>, vector<2x3x1x3x128xf32>
    %122 = vector.shape_cast %121 : vector<2x3x1x3x128xf32> to vector<18x128xf32>
    %c0_151 = arith.constant 0 : index
    %c2_152 = arith.constant 2 : index
    %c0_153 = arith.constant 0 : index
    %c0_154 = arith.constant 0 : index
    %123 = vector.load %arg7[%c0_151, %c2_152, %c0_153, %c0_154] : memref<3x3x128x256xf32, #tpu.memory_space<vmem>>, vector<1x1x128x256xf32>
    %124 = vector.shape_cast %123 : vector<1x1x128x256xf32> to vector<128x256xf32>
    %cst_155 = arith.constant dense<0.000000e+00> : vector<18x256xf32>
    %125 = tpu.matmul %122, %124, %cst_155 {dimension_numbers = #tpu.dot_dimension_numbers<[1], [0], [0], [1], [0, 0, 1, 1], [], []>} : vector<18x128xf32>, vector<128x256xf32>, vector<18x256xf32> -> vector<18x256xf32>
    %126 = arith.addf %120, %125 : vector<18x256xf32>
    %c0_156 = arith.constant 0 : index
    %c0_157 = arith.constant 0 : index
    %c1_158 = arith.constant 1 : index
    %c0_159 = arith.constant 0 : index
    %c0_160 = arith.constant 0 : index
    %127 = tpu.strided_load %arg15[%c0_156, %c0_157, %c1_158, %c0_159, %c0_160] {strides = array<i32: 1, 1, 1, 2, 1>} : memref<2x4x2x7x128xf32, #tpu.memory_space<vmem>>, vector<2x3x1x3x128xf32>
    %128 = vector.shape_cast %127 : vector<2x3x1x3x128xf32> to vector<18x128xf32>
    %c1_161 = arith.constant 1 : index
    %c0_162 = arith.constant 0 : index
    %c0_163 = arith.constant 0 : index
    %c0_164 = arith.constant 0 : index
    %129 = vector.load %arg7[%c1_161, %c0_162, %c0_163, %c0_164] : memref<3x3x128x256xf32, #tpu.memory_space<vmem>>, vector<1x1x128x256xf32>
    %130 = vector.shape_cast %129 : vector<1x1x128x256xf32> to vector<128x256xf32>
    %cst_165 = arith.constant dense<0.000000e+00> : vector<18x256xf32>
    %131 = tpu.matmul %128, %130, %cst_165 {dimension_numbers = #tpu.dot_dimension_numbers<[1], [0], [0], [1], [0, 0, 1, 1], [], []>} : vector<18x128xf32>, vector<128x256xf32>, vector<18x256xf32> -> vector<18x256xf32>
    %132 = arith.addf %126, %131 : vector<18x256xf32>
    %c0_166 = arith.constant 0 : index
    %c0_167 = arith.constant 0 : index
    %c1_168 = arith.constant 1 : index
    %c1_169 = arith.constant 1 : index
    %c0_170 = arith.constant 0 : index
    %133 = tpu.strided_load %arg15[%c0_166, %c0_167, %c1_168, %c1_169, %c0_170] {strides = array<i32: 1, 1, 1, 2, 1>} : memref<2x4x2x7x128xf32, #tpu.memory_space<vmem>>, vector<2x3x1x3x128xf32>
    %134 = vector.shape_cast %133 : vector<2x3x1x3x128xf32> to vector<18x128xf32>
    %c1_171 = arith.constant 1 : index
    %c1_172 = arith.constant 1 : index
    %c0_173 = arith.constant 0 : index
    %c0_174 = arith.constant 0 : index
    %135 = vector.load %arg7[%c1_171, %c1_172, %c0_173, %c0_174] : memref<3x3x128x256xf32, #tpu.memory_space<vmem>>, vector<1x1x128x256xf32>
    %136 = vector.shape_cast %135 : vector<1x1x128x256xf32> to vector<128x256xf32>
    %cst_175 = arith.constant dense<0.000000e+00> : vector<18x256xf32>
    %137 = tpu.matmul %134, %136, %cst_175 {dimension_numbers = #tpu.dot_dimension_numbers<[1], [0], [0], [1], [0, 0, 1, 1], [], []>} : vector<18x128xf32>, vector<128x256xf32>, vector<18x256xf32> -> vector<18x256xf32>
    %138 = arith.addf %132, %137 : vector<18x256xf32>
    %c0_176 = arith.constant 0 : index
    %c0_177 = arith.constant 0 : index
    %c1_178 = arith.constant 1 : index
    %c2_179 = arith.constant 2 : index
    %c0_180 = arith.constant 0 : index
    %139 = tpu.strided_load %arg15[%c0_176, %c0_177, %c1_178, %c2_179, %c0_180] {strides = array<i32: 1, 1, 1, 2, 1>} : memref<2x4x2x7x128xf32, #tpu.memory_space<vmem>>, vector<2x3x1x3x128xf32>
    %140 = vector.shape_cast %139 : vector<2x3x1x3x128xf32> to vector<18x128xf32>
    %c1_181 = arith.constant 1 : index
    %c2_182 = arith.constant 2 : index
    %c0_183 = arith.constant 0 : index
    %c0_184 = arith.constant 0 : index
    %141 = vector.load %arg7[%c1_181, %c2_182, %c0_183, %c0_184] : memref<3x3x128x256xf32, #tpu.memory_space<vmem>>, vector<1x1x128x256xf32>
    %142 = vector.shape_cast %141 : vector<1x1x128x256xf32> to vector<128x256xf32>
    %cst_185 = arith.constant dense<0.000000e+00> : vector<18x256xf32>
    %143 = tpu.matmul %140, %142, %cst_185 {dimension_numbers = #tpu.dot_dimension_numbers<[1], [0], [0], [1], [0, 0, 1, 1], [], []>} : vector<18x128xf32>, vector<128x256xf32>, vector<18x256xf32> -> vector<18x256xf32>
    %144 = arith.addf %138, %143 : vector<18x256xf32>
    %c0_186 = arith.constant 0 : index
    %c1_187 = arith.constant 1 : index
    %c0_188 = arith.constant 0 : index
    %c0_189 = arith.constant 0 : index
    %c0_190 = arith.constant 0 : index
    %145 = tpu.strided_load %arg15[%c0_186, %c1_187, %c0_188, %c0_189, %c0_190] {strides = array<i32: 1, 1, 1, 2, 1>} : memref<2x4x2x7x128xf32, #tpu.memory_space<vmem>>, vector<2x3x1x3x128xf32>
    %146 = vector.shape_cast %145 : vector<2x3x1x3x128xf32> to vector<18x128xf32>
    %c2_191 = arith.constant 2 : index
    %c0_192 = arith.constant 0 : index
    %c0_193 = arith.constant 0 : index
    %c0_194 = arith.constant 0 : index
    %147 = vector.load %arg7[%c2_191, %c0_192, %c0_193, %c0_194] : memref<3x3x128x256xf32, #tpu.memory_space<vmem>>, vector<1x1x128x256xf32>
    %148 = vector.shape_cast %147 : vector<1x1x128x256xf32> to vector<128x256xf32>
    %cst_195 = arith.constant dense<0.000000e+00> : vector<18x256xf32>
    %149 = tpu.matmul %146, %148, %cst_195 {dimension_numbers = #tpu.dot_dimension_numbers<[1], [0], [0], [1], [0, 0, 1, 1], [], []>} : vector<18x128xf32>, vector<128x256xf32>, vector<18x256xf32> -> vector<18x256xf32>
    %150 = arith.addf %144, %149 : vector<18x256xf32>
    %c0_196 = arith.constant 0 : index
    %c1_197 = arith.constant 1 : index
    %c0_198 = arith.constant 0 : index
    %c1_199 = arith.constant 1 : index
    %c0_200 = arith.constant 0 : index
    %151 = tpu.strided_load %arg15[%c0_196, %c1_197, %c0_198, %c1_199, %c0_200] {strides = array<i32: 1, 1, 1, 2, 1>} : memref<2x4x2x7x128xf32, #tpu.memory_space<vmem>>, vector<2x3x1x3x128xf32>
    %152 = vector.shape_cast %151 : vector<2x3x1x3x128xf32> to vector<18x128xf32>
    %c2_201 = arith.constant 2 : index
    %c1_202 = arith.constant 1 : index
    %c0_203 = arith.constant 0 : index
    %c0_204 = arith.constant 0 : index
    %153 = vector.load %arg7[%c2_201, %c1_202, %c0_203, %c0_204] : memref<3x3x128x256xf32, #tpu.memory_space<vmem>>, vector<1x1x128x256xf32>
    %154 = vector.shape_cast %153 : vector<1x1x128x256xf32> to vector<128x256xf32>
    %cst_205 = arith.constant dense<0.000000e+00> : vector<18x256xf32>
    %155 = tpu.matmul %152, %154, %cst_205 {dimension_numbers = #tpu.dot_dimension_numbers<[1], [0], [0], [1], [0, 0, 1, 1], [], []>} : vector<18x128xf32>, vector<128x256xf32>, vector<18x256xf32> -> vector<18x256xf32>
    %156 = arith.addf %150, %155 : vector<18x256xf32>
    %c0_206 = arith.constant 0 : index
    %c1_207 = arith.constant 1 : index
    %c0_208 = arith.constant 0 : index
    %c2_209 = arith.constant 2 : index
    %c0_210 = arith.constant 0 : index
    %157 = tpu.strided_load %arg15[%c0_206, %c1_207, %c0_208, %c2_209, %c0_210] {strides = array<i32: 1, 1, 1, 2, 1>} : memref<2x4x2x7x128xf32, #tpu.memory_space<vmem>>, vector<2x3x1x3x128xf32>
    %158 = vector.shape_cast %157 : vector<2x3x1x3x128xf32> to vector<18x128xf32>
    %c2_211 = arith.constant 2 : index
    %c2_212 = arith.constant 2 : index
    %c0_213 = arith.constant 0 : index
    %c0_214 = arith.constant 0 : index
    %159 = vector.load %arg7[%c2_211, %c2_212, %c0_213, %c0_214] : memref<3x3x128x256xf32, #tpu.memory_space<vmem>>, vector<1x1x128x256xf32>
    %160 = vector.shape_cast %159 : vector<1x1x128x256xf32> to vector<128x256xf32>
    %cst_215 = arith.constant dense<0.000000e+00> : vector<18x256xf32>
    %161 = tpu.matmul %158, %160, %cst_215 {dimension_numbers = #tpu.dot_dimension_numbers<[1], [0], [0], [1], [0, 0, 1, 1], [], []>} : vector<18x128xf32>, vector<128x256xf32>, vector<18x256xf32> -> vector<18x256xf32>
    %162 = arith.addf %156, %161 : vector<18x256xf32>
    %c0_216 = arith.constant 0 : index
    %c0_217 = arith.constant 0 : index
    %163 = vector.load %arg8[%c0_216, %c0_217] : memref<1x256xf32, #tpu.memory_space<vmem>>, vector<1x256xf32>
    %164 = vector.broadcast %163 : vector<1x256xf32> to vector<18x256xf32>
    %165 = arith.addf %162, %164 : vector<18x256xf32>
    %c0_218 = arith.constant 0 : index
    %c0_219 = arith.constant 0 : index
    %166 = vector.load %arg9[%c0_218, %c0_219] : memref<1x256xf32, #tpu.memory_space<vmem>>, vector<1x256xf32>
    %c0_220 = arith.constant 0 : index
    %c0_221 = arith.constant 0 : index
    %167 = vector.load %arg10[%c0_220, %c0_221] : memref<1x256xf32, #tpu.memory_space<vmem>>, vector<1x256xf32>
    %cst_222 = arith.constant dense<0.000000e+00> : vector<256xf32>
    %168 = vector.multi_reduction <add>, %165, %cst_222 [0] : vector<18x256xf32> to vector<256xf32>
    %169 = vector.shape_cast %168 : vector<256xf32> to vector<1x256xf32>
    %cst_223 = arith.constant 1.800000e+01 : f32
    %170 = vector.broadcast %cst_223 : f32 to vector<1x256xf32>
    %171 = arith.divf %169, %170 : vector<1x256xf32>
    %172 = vector.broadcast %171 : vector<1x256xf32> to vector<18x256xf32>
    %173 = arith.subf %165, %172 : vector<18x256xf32>
    %174 = arith.mulf %173, %173 : vector<18x256xf32>
    %cst_224 = arith.constant dense<0.000000e+00> : vector<256xf32>
    %175 = vector.multi_reduction <add>, %174, %cst_224 [0] : vector<18x256xf32> to vector<256xf32>
    %176 = vector.shape_cast %175 : vector<256xf32> to vector<1x256xf32>
    %cst_225 = arith.constant 1.800000e+01 : f32
    %177 = vector.broadcast %cst_225 : f32 to vector<1x256xf32>
    %178 = arith.divf %176, %177 : vector<1x256xf32>
    %179 = vector.broadcast %171 : vector<1x256xf32> to vector<18x256xf32>
    %180 = arith.subf %165, %179 : vector<18x256xf32>
    %cst_226 = arith.constant 9.99999974E-6 : f32
    %181 = vector.broadcast %cst_226 : f32 to vector<1x256xf32>
    %182 = arith.addf %178, %181 : vector<1x256xf32>
    %183 = math.rsqrt %182 : vector<1x256xf32>
    %184 = vector.broadcast %183 : vector<1x256xf32> to vector<18x256xf32>
    %185 = arith.mulf %180, %184 : vector<18x256xf32>
    %186 = vector.broadcast %166 : vector<1x256xf32> to vector<18x256xf32>
    %187 = arith.mulf %185, %186 : vector<18x256xf32>
    %188 = vector.broadcast %167 : vector<1x256xf32> to vector<18x256xf32>
    %189 = arith.addf %187, %188 : vector<18x256xf32>
    %cst_227 = arith.constant 0.000000e+00 : f32
    %190 = vector.broadcast %cst_227 : f32 to vector<18x256xf32>
    %191 = arith.cmpf oge, %189, %190 : vector<18x256xf32>
    %cst_228 = arith.constant 0.00999999977 : f32
    %192 = vector.broadcast %cst_228 : f32 to vector<18x256xf32>
    %193 = arith.mulf %192, %189 : vector<18x256xf32>
    %194 = arith.select %191, %189, %193 : vector<18x256xi1>, vector<18x256xf32>
    %195 = vector.shape_cast %194 : vector<18x256xf32> to vector<2x9x256xf32>
    %c0_229 = arith.constant 0 : index
    %c0_230 = arith.constant 0 : index
    %196 = vector.load %arg11[%c0_229, %c0_230] : memref<9x256xf32, #tpu.memory_space<vmem>>, vector<9x256xf32>
    %197 = vector.shape_cast %196 : vector<9x256xf32> to vector<1x9x256xf32>
    %198 = vector.broadcast %197 : vector<1x9x256xf32> to vector<2x9x256xf32>
    %199 = arith.mulf %195, %198 : vector<2x9x256xf32>
    %cst_231 = arith.constant dense<0.000000e+00> : vector<2x256xf32>
    %200 = vector.multi_reduction <add>, %199, %cst_231 [1] : vector<2x9x256xf32> to vector<2x256xf32>
    %201 = vector.shape_cast %200 : vector<2x256xf32> to vector<2x1x256xf32>
    %cst_232 = arith.constant dense<0.000000e+00> : vector<2x1xf32>
    %202 = vector.multi_reduction <add>, %201, %cst_232 [2] : vector<2x1x256xf32> to vector<2x1xf32>
    %203 = vector.shape_cast %202 : vector<2x1xf32> to vector<2x1x1xf32>
    %204 = vector.shape_cast %203 : vector<2x1x1xf32> to vector<2x1xf32>
    %c0_233 = arith.constant 0 : index
    %c0_234 = arith.constant 0 : index
    %205 = vector.load %arg12[%c0_233, %c0_234] : memref<1x1xf32, #tpu.memory_space<vmem>>, vector<1x1xf32>
    %206 = vector.broadcast %205 : vector<1x1xf32> to vector<2x1xf32>
    %207 = arith.addf %204, %206 : vector<2x1xf32>
    %cst_235 = arith.constant 0.000000e+00 : f32
    %208 = vector.broadcast %cst_235 : f32 to vector<2x1xf32>
    %209 = arith.subf %208, %207 : vector<2x1xf32>
    %210 = math.exp %209 : vector<2x1xf32>
    %cst_236 = arith.constant 1.000000e+00 : f32
    %211 = vector.broadcast %cst_236 : f32 to vector<2x1xf32>
    %212 = arith.addf %211, %210 : vector<2x1xf32>
    %cst_237 = arith.constant 1.000000e+00 : f32
    %213 = vector.broadcast %cst_237 : f32 to vector<2x1xf32>
    %214 = arith.divf %213, %212 : vector<2x1xf32>
    %215 = vector.shape_cast %214 : vector<2x1xf32> to vector<2x1xf32>
    %216 = vector.broadcast %215 : vector<2x1xf32> to vector<2x128xf32>
    %c0_238 = arith.constant 0 : index
    %c0_239 = arith.constant 0 : index
    %217 = vector.load %arg13[%c0_238, %c0_239] : memref<2x128xf32, #tpu.memory_space<vmem>>, vector<2x128xf32>
    tpu.vector_store %arg13[%c0_238, %c0_239], %216 {strides = array<i32>} : memref<2x128xf32, #tpu.memory_space<vmem>>, vector<2x128xf32>,
    return
  }
}

</mosaic_0001>

<bundles_post_ra>
// kernel: discriminator_forward.1
= control target key start
LH: loop header
LB: loop body
LE: loop exit
PB: predicated region body
PF: predicated region fallthrough
CT: control target
= control target key end

     0   :  { %vm283_vm0 = vcmask 1042432   ;;  %vm111_vm1 = vcmask 220160   ;;  %s10502_s1 = inlined_call_operand.vmem [shape: f32[27,64], index: 1, kind: input, shape index: {}]   ;;  %s10503_s0 = inlined_call_operand.vmem [shape: f32[450,27], index: 0, kind: input, shape index: {}]   ;;  %s10504_s2 = inlined_call_operand.vmem [shape: f32[1,64], index: 2, kind: input, shape index: {}]   ;;  %s10505_s3 = inlined_call_operand.vmem [shape: f32[3,3,64,128], index: 3, kind: input, shape index: {}]   ;;  %s10506_s4 = inlined_call_operand.vmem [shape: f32[1,128], index: 4, kind: input, shape index: {}]   ;;  %s10507_s5 = inlined_call_operand.vmem [shape: f32[1,128], index: 5, kind: input, shape index: {}]   ;;  %s10508_s6 = inlined_call_operand.vmem [shape: f32[1,128], index: 6, kind: input, shape index: {}]   ;;  %s10509_s7 = inlined_call_operand.vmem [shape: f32[3,3,128,256], index: 7, kind: input, shape index: {}]   ;;  %s10510_s8 = inlined_call_operand.vmem [shape: f32[1,256], index: 8, kind: input, shape index: {}]   ;;  %s10511_s9 = inlined_call_operand.vmem [shape: f32[1,256], index: 9, kind: input, shape index: {}]   ;;  %s10512_s10 = inlined_call_operand.vmem [shape: f32[1,256], index: 10, kind: input, shape index: {}]   ;;  %s10513_s11 = inlined_call_operand.vmem [shape: f32[9,256], index: 11, kind: input, shape index: {}]   ;;  %s10514_s12 = inlined_call_operand.<no memory space> [shape: f32[1,1], index: 12, kind: input, shape index: {}]   ;;  %s10515_s13 = inlined_call_operand.vmem [shape: f32[2,128], index: 13, kind: output, shape index: {}]  }
   0x1   :  { %v106_v0 = vld [vmem:[%s10502_s1 + $0x18] sm:$0x7]  ;;  %v105_v1 = vld [vmem:[%s10502_s1 + $0x10] sm:$0xff]  ;;  %v104_v2 = vld [vmem:[%s10502_s1 + $0x8] sm:$0xff] }
   0x2   :  { %7182 = vmatpush.msk.msra.mxu0 %vm283_vm0, %v106_v0  ;;  %v103_v3 = vld [vmem:[%s10502_s1] sm:$0xff]  ;;  %v47_v5 = vld [vmem:[%s10503_s0 + $0x8] sm:$0xff]  ;;  %v48_v6 = vld [vmem:[%s10503_s0 + $0x10] sm:$0xff] }
   0x3   :  { %v46_v4 = vld [vmem:[%s10503_s0] sm:$0xff]  ;;  %v49_v7 = vld [vmem:[%s10503_s0 + $0x18] sm:$0xff]  ;;  %v51_v9 = vld [vmem:[%s10503_s0 + $0x28] sm:$0xff] }
   0x4   :  { %300 = vmatpush.msra.mxu0 %v105_v1  ;;  %v50_v8 = vld [vmem:[%s10503_s0 + $0x20] sm:$0xff]  ;;  %v52_v10 = vld [vmem:[%s10503_s0 + $0x30] sm:$0xff]  ;;  %v53_v11 = vld [vmem:[%s10503_s0 + $0x38] sm:$0xff] }
   0x5   :  { %v54_v12 = vld [vmem:[%s10503_s0 + $0x40] sm:$0xff]  ;;  %v55_v13 = vld [vmem:[%s10503_s0 + $0x48] sm:$0xff]  ;;  %v56_v14 = vld [vmem:[%s10503_s0 + $0x50] sm:$0xff] }
   0x6   :  { %301 = vmatpush.msra.mxu0 %v104_v2  ;;  %v57_v15 = vld [vmem:[%s10503_s0 + $0x58] sm:$0xff]  ;;  %v58_v16 = vld [vmem:[%s10503_s0 + $0x60] sm:$0xff]  ;;  %v59_v17 = vld [vmem:[%s10503_s0 + $0x68] sm:$0xff] }
   0x7   :  { %v60_v18 = vld [vmem:[%s10503_s0 + $0x70] sm:$0xff]  ;;  %v61_v19 = vld [vmem:[%s10503_s0 + $0x78] sm:$0xff]  ;;  %v7893_v20 = vld [vmem:[%s10504_s2] ss:$0 sm:$0xff] }
   0x8   :  { %302 = vmatpush.msra.mxu0 %v103_v3  ;;  %v62_v22 = vld [vmem:[%s10503_s0 + $0x80] sm:$0xff]  ;;  %v63_v32 = vld [vmem:[%s10503_s0 + $0x88] sm:$0xff]  ;;  %v64_v38 = vld [vmem:[%s10503_s0 + $0x90] sm:$0xff] }
   0x9   :  { %7183 = vmatmul.msk.f32.vlgmr.msra.gmra.mxu0 %vm111_vm1, %v46_v4  ;;  %v65_v48 = vld [vmem:[%s10503_s0 + $0x98] sm:$0xff]  ;;  %v66_v56 = vld [vmem:[%s10503_s0 + $0xa0] sm:$0xff] }
  0x11   :  { %7184 = vmatmul.msk.f32.gmra.mxu0 %vm111_vm1, %v47_v5  ;;  %v67_v5 = vld [vmem:[%s10503_s0 + $0xa8] sm:$0xff] }
  0x19   :  { %7185 = vmatmul.msk.f32.gmra.mxu0 %vm111_vm1, %v48_v6 }
  0x21   :  { %7186 = vmatmul.msk.f32.gmra.mxu0 %vm111_vm1, %v49_v7 }
  0x29   :  { %7187 = vmatmul.msk.f32.gmra.mxu0 %vm111_vm1, %v50_v8 }
  0x31   :  { %7188 = vmatmul.msk.f32.gmra.mxu0 %vm111_vm1, %v51_v9 }
  0x39   :  { %7189 = vmatmul.msk.f32.gmra.mxu0 %vm111_vm1, %v52_v10 }
  0x41   :  { %7190 = vmatmul.msk.f32.gmra.mxu0 %vm111_vm1, %v53_v11 }
  0x49   :  { %7191 = vmatmul.msk.f32.gmra.mxu0 %vm111_vm1, %v54_v12 }
  0x51   :  { %7192 = vmatmul.msk.f32.gmra.mxu0 %vm111_vm1, %v55_v13 }
  0x59   :  { %7193 = vmatmul.msk.f32.gmra.mxu0 %vm111_vm1, %v56_v14 }
  0x61   :  { %7194 = vmatmul.msk.f32.gmra.mxu0 %vm111_vm1, %v57_v15 }
  0x69   :  { %7195 = vmatmul.msk.f32.gmra.mxu0 %vm111_vm1, %v58_v16 }
  0x71   :  { %7196 = vmatmul.msk.f32.gmra.mxu0 %vm111_vm1, %v59_v17 }
  0x79   :  { %7197 = vmatmul.msk.f32.gmra.mxu0 %vm111_vm1, %v60_v18  ;;  %v68_v18 = vld [vmem:[%s10503_s0 + $0xb0] sm:$0xff] }
  0x81   :  { %7198 = vmatmul.msk.f32.gmra.mxu0 %vm111_vm1, %v61_v19 }
  0x86   :  { %v304_v21 = vpop.f32.mrf.mxu0 }
  0x87   :  { %v305_v23 = vadd.f32 %v7893_v20, %v304_v21 }
  0x89   :  { %vm475_vm2 = vcmp.ge.f32.partialorder %v305_v23, 0.0  ;;  %v532_v24 = vmul.f32 0.01, %v305_v23  ;;  %7199 = vmatmul.msk.f32.gmra.mxu0 %vm111_vm1, %v62_v22 }
  0x8b   :  { %v589_v25 = vsel %vm475_vm2, %v305_v23, %v532_v24 }
  0x8c   :  { %v703_v26 = vrot.slane %v589_v25, 1  ;;  %v704_v27 = vrot.slane %v589_v25, 2  ;;  %v705_v28 = vrot.slane %v589_v25, 3  ;;  %1096 = vst [vmem:[#allocation1] ss:$9 sm:$0xff] %v589_v25  ;;  %v706_v29 = vrot.slane %v589_v25, 4 }
  0x8d   :  { %v707_v30 = vrot.slane %v589_v25, 5  ;;  %v708_v33 = vrot.slane %v589_v25, 6  ;;  %v709_v35 = vrot.slane %v589_v25, 7 }
  0x8e   :  { %1098 = vst [vmem:[#allocation1 + $0x1] ss:$9 sm:$0xff] %v703_v26  ;;  %v307_v31 = vpop.f32.mrf.mxu0 }
  0x8f   :  { %1100 = vst [vmem:[#allocation1 + $0x2] ss:$9 sm:$0xff] %v704_v27  ;;  %v308_v34 = vadd.f32 %v7893_v20, %v307_v31 }
  0x90   :  { %1102 = vst [vmem:[#allocation1 + $0x3] ss:$9 sm:$0xff] %v705_v28 }
  0x91   :  { %1104 = vst [vmem:[#allocation1 + $0x4] ss:$9 sm:$0xff] %v706_v29  ;;  %7200 = vmatmul.msk.f32.gmra.mxu0 %vm111_vm1, %v63_v32  ;;  %v533_v36 = vmul.f32 0.01, %v308_v34  ;;  %vm476_vm3 = vcmp.ge.f32.partialorder %v308_v34, 0.0  ;;  %v69_v32 = vld [vmem:[%s10503_s0 + $0xb8] sm:$0xff] }
  0x92   :  { %1106 = vst [vmem:[#allocation1 + $0x5] ss:$9 sm:$0xff] %v707_v30 }
  0x93   :  { %1108 = vst [vmem:[#allocation1 + $0x6] ss:$9 sm:$0xff] %v708_v33  ;;  %v590_v37 = vsel %vm476_vm3, %v308_v34, %v533_v36 }
  0x94   :  { %1110 = vst [vmem:[#allocation1 + $0x7] ss:$9 sm:$0xff] %v709_v35  ;;  %v710_v39 = vrot.slane %v590_v37, 1  ;;  %v711_v40 = vrot.slane %v590_v37, 2  ;;  %v712_v43 = vrot.slane %v590_v37, 3  ;;  %v713_v44 = vrot.slane %v590_v37, 4 }
  0x95   :  { %v714_v45 = vrot.slane %v590_v37, 5  ;;  %v715_v47 = vrot.slane %v590_v37, 6  ;;  %v716_v51 = vrot.slane %v590_v37, 7 }
  0x96   :  { %v310_v41 = vpop.f32.mrf.mxu0 }
  0x97   :  { %v311_v46 = vadd.f32 %v7893_v20, %v310_v41 }
  0x99   :  { %7201 = vmatmul.msk.f32.gmra.mxu0 %vm111_vm1, %v64_v38  ;;  %v534_v49 = vmul.f32 0.01, %v311_v46  ;;  %vm477_vm4 = vcmp.ge.f32.partialorder %v311_v46, 0.0 }
  0x9b   :  { %v7909_v42 = vld [vmem:[#allocation1] sm:$0xff]  ;;  %v591_v50 = vsel %vm477_vm4, %v311_v46, %v534_v49 }
  0x9c   :  { %1112 = vst [vmem:[#allocation1] ss:$9 sm:$0xff] %v590_v37  ;;  %v717_v52 = vrot.slane %v591_v50, 1  ;;  %v718_v54 = vrot.slane %v591_v50, 2  ;;  %v719_v57 = vrot.slane %v591_v50, 3  ;;  %v720_v58 = vrot.slane %v591_v50, 4 }
  0x9d   :  { %1113 = vst [vmem:[#allocation1 + $0x1] ss:$9 sm:$0xff] %v710_v39  ;;  %v721_v59 = vrot.slane %v591_v50, 5  ;;  %v722_v61 = vrot.slane %v591_v50, 6  ;;  %v723_v0 = vrot.slane %v591_v50, 7  ;;  %v70_v46 = vld [vmem:[%s10503_s0 + $0xc0] sm:$0xff] }
  0x9e   :  { %1114 = vst [vmem:[#allocation1 + $0x2] ss:$9 sm:$0xff] %v711_v40  ;;  %v313_v55 = vpop.f32.mrf.mxu0 }
  0x9f   :  { %1115 = vst [vmem:[#allocation1 + $0x3] ss:$9 sm:$0xff] %v712_v43  ;;  %v314_v60 = vadd.f32 %v7893_v20, %v313_v55 }
  0xa0   :  { %1116 = vst [vmem:[#allocation1 + $0x4] ss:$9 sm:$0xff] %v713_v44 }
  0xa1   :  { %1117 = vst [vmem:[#allocation1 + $0x5] ss:$9 sm:$0xff] %v714_v45  ;;  %7202 = vmatmul.msk.f32.gmra.mxu0 %vm111_vm1, %v65_v48  ;;  %v535_v62 = vmul.f32 0.01, %v314_v60  ;;  %vm478_vm5 = vcmp.ge.f32.partialorder %v314_v60, 0.0 }
  0xa2   :  { %1118 = vst [vmem:[#allocation1 + $0x6] ss:$9 sm:$0xff] %v715_v47 }
  0xa3   :  { %v592_v63 = vsel %vm478_vm5, %v314_v60, %v535_v62  ;;  %v71_v60 = vld [vmem:[%s10503_s0 + $0xc8] sm:$0xff] }
  0xa4   :  { %v724_v1 = vrot.slane %v592_v63, 1  ;;  %v725_v3 = vrot.slane %v592_v63, 2  ;;  %v726_v6 = vrot.slane %v592_v63, 3  ;;  %v727_v7 = vrot.slane %v592_v63, 4 }
  0xa5   :  { %v728_v8 = vrot.slane %v592_v63, 5  ;;  %v729_v12 = vrot.slane %v592_v63, 6  ;;  %v730_v13 = vrot.slane %v592_v63, 7 }
  0xa6   :  { %v316_v4 = vpop.f32.mrf.mxu0 }
  0xa7   :  { %v317_v9 = vadd.f32 %v7893_v20, %v316_v4 }
  0xa9   :  { %v7916_v53 = vld [vmem:[#allocation1] sm:$0xff]  ;;  %7203 = vmatmul.msk.f32.gmra.mxu0 %vm111_vm1, %v66_v56  ;;  %v536_v10 = vmul.f32 0.01, %v317_v9  ;;  %vm479_vm6 = vcmp.ge.f32.partialorder %v317_v9, 0.0 }
  0xaa   :  { %1120 = vst [vmem:[#allocation1] ss:$9 sm:$0xff] %v716_v51 }
  0xab   :  { %1121 = vst [vmem:[#allocation1 + $0x1] ss:$9 sm:$0xff] %v591_v50  ;;  %v593_v11 = vsel %vm479_vm6, %v317_v9, %v536_v10  ;;  %v72_v10 = vld [vmem:[%s10503_s0 + $0xd0] sm:$0xff] }
  0xac   :  { %1122 = vst [vmem:[#allocation1 + $0x2] ss:$9 sm:$0xff] %v717_v52  ;;  %v731_v15 = vrot.slane %v593_v11, 1  ;;  %v732_v16 = vrot.slane %v593_v11, 2  ;;  %v733_v19 = vrot.slane %v593_v11, 3  ;;  %v734_v21 = vrot.slane %v593_v11, 4 }
  0xad   :  { %1123 = vst [vmem:[#allocation1 + $0x3] ss:$9 sm:$0xff] %v718_v54  ;;  %v735_v22 = vrot.slane %v593_v11, 5  ;;  %v736_v26 = vrot.slane %v593_v11, 6  ;;  %v737_v27 = vrot.slane %v593_v11, 7 }
  0xae   :  { %1124 = vst [vmem:[#allocation1 + $0x4] ss:$9 sm:$0xff] %v719_v57  ;;  %v319_v17 = vpop.f32.mrf.mxu0 }
  0xaf   :  { %1125 = vst [vmem:[#allocation1 + $0x5] ss:$9 sm:$0xff] %v720_v58  ;;  %v320_v23 = vadd.f32 %v7893_v20, %v319_v17 }
  0xb0   :  { %1126 = vst [vmem:[#allocation1 + $0x6] ss:$9 sm:$0xff] %v721_v59 }
  0xb1   :  { %1127 = vst [vmem:[#allocation1 + $0x7] ss:$9 sm:$0xff] %v722_v61  ;;  %7204 = vmatmul.msk.f32.gmra.mxu0 %vm111_vm1, %v67_v5  ;;  %v537_v24 = vmul.f32 0.01, %v320_v23  ;;  %vm480_vm7 = vcmp.ge.f32.partialorder %v320_v23, 0.0 }
  0xb3   :  { %v594_v25 = vsel %vm480_vm7, %v320_v23, %v537_v24 }
  0xb4   :  { %v738_v29 = vrot.slane %v594_v25, 1  ;;  %v739_v30 = vrot.slane %v594_v25, 2  ;;  %v740_v33 = vrot.slane %v594_v25, 3  ;;  %v741_v34 = vrot.slane %v594_v25, 4 }
  0xb5   :  { %v742_v38 = vrot.slane %v594_v25, 5  ;;  %v743_v39 = vrot.slane %v594_v25, 6  ;;  %v744_v41 = vrot.slane %v594_v25, 7 }
  0xb6   :  { %v322_v31 = vpop.f32.mrf.mxu0 }
  0xb7   :  { %v323_v35 = vadd.f32 %v7893_v20, %v322_v31 }
  0xb8   :  { %v7923_v2 = vld [vmem:[#allocation1] sm:$0xff] }
  0xb9   :  { %1129 = vst [vmem:[#allocation1] ss:$9 sm:$0xff] %v723_v0  ;;  %7205 = vmatmul.msk.f32.gmra.mxu0 %vm111_vm1, %v68_v18  ;;  %v538_v36 = vmul.f32 0.01, %v323_v35  ;;  %vm481_vm8 = vcmp.ge.f32.partialorder %v323_v35, 0.0 }
  0xba   :  { %1130 = vst [vmem:[#allocation1 + $0x1] ss:$9 sm:$0xff] %v592_v63 }
  0xbb   :  { %1131 = vst [vmem:[#allocation1 + $0x2] ss:$9 sm:$0xff] %v724_v1  ;;  %v595_v37 = vsel %vm481_vm8, %v323_v35, %v538_v36 }
  0xbc   :  { %1132 = vst [vmem:[#allocation1 + $0x3] ss:$9 sm:$0xff] %v725_v3  ;;  %v745_v43 = vrot.slane %v595_v37, 1  ;;  %v746_v44 = vrot.slane %v595_v37, 2  ;;  %v747_v47 = vrot.slane %v595_v37, 3  ;;  %v748_v48 = vrot.slane %v595_v37, 4 }
  0xbd   :  { %1133 = vst [vmem:[#allocation1 + $0x4] ss:$9 sm:$0xff] %v726_v6  ;;  %v749_v52 = vrot.slane %v595_v37, 5  ;;  %v750_v54 = vrot.slane %v595_v37, 6  ;;  %v751_v56 = vrot.slane %v595_v37, 7 }
  0xbe   :  { %1134 = vst [vmem:[#allocation1 + $0x5] ss:$9 sm:$0xff] %v727_v7  ;;  %v325_v45 = vpop.f32.mrf.mxu0 }
  0xbf   :  { %1135 = vst [vmem:[#allocation1 + $0x6] ss:$9 sm:$0xff] %v728_v8  ;;  %v326_v49 = vadd.f32 %v7893_v20, %v325_v45 }
  0xc1   :  { %7206 = vmatmul.msk.f32.gmra.mxu0 %vm111_vm1, %v69_v32  ;;  %v539_v50 = vmul.f32 0.01, %v326_v49  ;;  %vm482_vm9 = vcmp.ge.f32.partialorder %v326_v49, 0.0 }
  0xc3   :  { %v596_v51 = vsel %vm482_vm9, %v326_v49, %v539_v50 }
  0xc4   :  { %v752_v57 = vrot.slane %v596_v51, 1  ;;  %v753_v58 = vrot.slane %v596_v51, 2  ;;  %v754_v61 = vrot.slane %v596_v51, 3  ;;  %v755_v0 = vrot.slane %v596_v51, 4 }
  0xc5   :  { %v756_v3 = vrot.slane %v596_v51, 5  ;;  %v757_v5 = vrot.slane %v596_v51, 6  ;;  %v758_v6 = vrot.slane %v596_v51, 7 }
  0xc6   :  { %v7930_v14 = vld [vmem:[#allocation1] sm:$0xff]  ;;  %v328_v59 = vpop.f32.mrf.mxu0 }
  0xc7   :  { %1137 = vst [vmem:[#allocation1] ss:$9 sm:$0xff] %v729_v12  ;;  %v329_v62 = vadd.f32 %v7893_v20, %v328_v59 }
  0xc8   :  { %1138 = vst [vmem:[#allocation1 + $0x1] ss:$9 sm:$0xff] %v730_v13 }
  0xc9   :  { %1139 = vst [vmem:[#allocation1 + $0x2] ss:$9 sm:$0xff] %v593_v11  ;;  %7207 = vmatmul.msk.f32.gmra.mxu0 %vm111_vm1, %v70_v46  ;;  %v540_v63 = vmul.f32 0.01, %v329_v62  ;;  %vm483_vm10 = vcmp.ge.f32.partialorder %v329_v62, 0.0 }
  0xca   :  { %1140 = vst [vmem:[#allocation1 + $0x3] ss:$9 sm:$0xff] %v731_v15 }
  0xcb   :  { %1141 = vst [vmem:[#allocation1 + $0x4] ss:$9 sm:$0xff] %v732_v16  ;;  %v597_v1 = vsel %vm483_vm10, %v329_v62, %v540_v63 }
  0xcc   :  { %1142 = vst [vmem:[#allocation1 + $0x5] ss:$9 sm:$0xff] %v733_v19  ;;  %v759_v7 = vrot.slane %v597_v1, 1  ;;  %v760_v8 = vrot.slane %v597_v1, 2  ;;  %v761_v11 = vrot.slane %v597_v1, 3  ;;  %v762_v15 = vrot.slane %v597_v1, 4 }
  0xcd   :  { %1143 = vst [vmem:[#allocation1 + $0x6] ss:$9 sm:$0xff] %v734_v21  ;;  %v763_v17 = vrot.slane %v597_v1, 5  ;;  %v764_v19 = vrot.slane %v597_v1, 6  ;;  %v765_v21 = vrot.slane %v597_v1, 7 }
  0xce   :  { %1144 = vst [vmem:[#allocation1 + $0x7] ss:$9 sm:$0xff] %v735_v22  ;;  %v331_v9 = vpop.f32.mrf.mxu0 }
  0xcf   :  { %v332_v12 = vadd.f32 %v7893_v20, %v331_v9 }
  0xd1   :  { %7208 = vmatmul.msk.f32.gmra.mxu0 %vm111_vm1, %v71_v60  ;;  %v541_v13 = vmul.f32 0.01, %v332_v12  ;;  %vm484_vm11 = vcmp.ge.f32.partialorder %v332_v12, 0.0 }
  0xd3   :  { %v598_v16 = vsel %vm484_vm11, %v332_v12, %v541_v13  ;;  %vm1635_vm11 = vcmask 523264  }
  0xd4   :  { %v766_v22 = vrot.slane %v598_v16, 1  ;;  %v767_v23 = vrot.slane %v598_v16, 2  ;;  %v772_v35 = vrot.slane %v598_v16, 7  ;;  %1636 = vst.msk [vmem:[#allocation2] sm:$0xff] %vm1635_vm11, %v7909_v42 }
  0xd5   :  { %v7937_v28 = vld [vmem:[#allocation1] sm:$0xff]  ;;  %1639 = vst.msk [vmem:[#allocation2 + $0x10] sm:$0xff] %vm1635_vm11, %v7923_v2 }
  0xd6   :  { %1146 = vst [vmem:[#allocation1] ss:$9 sm:$0xff] %v736_v26  ;;  %v334_v24 = vpop.f32.mrf.mxu0 }
  0xd7   :  { %1147 = vst [vmem:[#allocation1 + $0x1] ss:$9 sm:$0xff] %v737_v27  ;;  %v335_v26 = vadd.f32 %v7893_v20, %v334_v24 }
  0xd8   :  { %1148 = vst [vmem:[#allocation1 + $0x2] ss:$9 sm:$0xff] %v594_v25  ;;  %v73_v25 = vld [vmem:[%s10503_s0 + $0xd8] sm:$0xff] }
  0xd9   :  { %1149 = vst [vmem:[#allocation1 + $0x3] ss:$9 sm:$0xff] %v738_v29  ;;  %7209 = vmatmul.msk.f32.gmra.mxu0 %vm111_vm1, %v72_v10  ;;  %v542_v27 = vmul.f32 0.01, %v335_v26  ;;  %vm485_vm12 = vcmp.ge.f32.partialorder %v335_v26, 0.0  ;;  %v768_v29 = vrot.slane %v598_v16, 3 }
  0xda   :  { %1150 = vst [vmem:[#allocation1 + $0x4] ss:$9 sm:$0xff] %v739_v30  ;;  %v769_v30 = vrot.slane %v598_v16, 4 }
  0xdb   :  { %1151 = vst [vmem:[#allocation1 + $0x5] ss:$9 sm:$0xff] %v740_v33  ;;  %v599_v32 = vsel %vm485_vm12, %v335_v26, %v542_v27  ;;  %v770_v33 = vrot.slane %v598_v16, 5  ;;  %vm1637_vm12 = vcmask 522240  }
  0xdc   :  { %1152 = vst [vmem:[#allocation1 + $0x6] ss:$9 sm:$0xff] %v741_v34  ;;  %v771_v34 = vrot.slane %v598_v16, 6  ;;  %v773_v36 = vrot.slane %v599_v32, 1  ;;  %v776_v45 = vrot.slane %v599_v32, 4  ;;  %v778_v49 = vrot.slane %v599_v32, 6 }
  0xdd   :  { %v779_v50 = vrot.slane %v599_v32, 7  ;;  %1641 = vst.msk [vmem:[#allocation2 + $0x20] sm:$0xff] %vm1635_vm11, %v7937_v28 }
  0xde   :  { %1638 = vst.msk [vmem:[#allocation2 + $0x8] sm:$0x7f] %vm1637_vm12, %v7916_v53 }
  0xdf   :  { %1640 = vst.msk [vmem:[#allocation2 + $0x18] sm:$0x7f] %vm1637_vm12, %v7930_v14 }
  0xe1   :  { %7210 = vmatmul.msk.f32.gmra.mxu0 %vm111_vm1, %v73_v25 }
  0xe3   :  { %v7944_v40 = vld [vmem:[#allocation1] sm:$0xff] }
  0xe4   :  { %1154 = vst [vmem:[#allocation1] ss:$9 sm:$0xff] %v742_v38  ;;  %v337_v38 = vpop.f32.mrf.mxu0 }
  0xe5   :  { %1155 = vst [vmem:[#allocation1 + $0x1] ss:$9 sm:$0xff] %v743_v39  ;;  %v74_v39 = vld [vmem:[%s10503_s0 + $0xe0] sm:$0xff] }
  0xe6   :  { %1156 = vst [vmem:[#allocation1 + $0x2] ss:$9 sm:$0xff] %v744_v41  ;;  %v338_v41 = vadd.f32 %v7893_v20, %v337_v38 }
  0xe7   :  { %1157 = vst [vmem:[#allocation1 + $0x3] ss:$9 sm:$0xff] %v595_v37  ;;  %v774_v37 = vrot.slane %v599_v32, 2 }
  0xe8   :  { %1158 = vst [vmem:[#allocation1 + $0x4] ss:$9 sm:$0xff] %v745_v43  ;;  %v543_v43 = vmul.f32 0.01, %v338_v41  ;;  %vm486_vm13 = vcmp.ge.f32.partialorder %v338_v41, 0.0 }
  0xe9   :  { %1159 = vst [vmem:[#allocation1 + $0x5] ss:$9 sm:$0xff] %v746_v44  ;;  %7211 = vmatmul.msk.f32.gmra.mxu0 %vm111_vm1, %v74_v39  ;;  %v775_v44 = vrot.slane %v599_v32, 3 }
  0xea   :  { %1160 = vst [vmem:[#allocation1 + $0x6] ss:$9 sm:$0xff] %v747_v47  ;;  %v600_v47 = vsel %vm486_vm13, %v338_v41, %v543_v43 }
  0xeb   :  { %1161 = vst [vmem:[#allocation1 + $0x7] ss:$9 sm:$0xff] %v748_v48  ;;  %v777_v48 = vrot.slane %v599_v32, 5  ;;  %v782_v59 = vrot.slane %v600_v47, 3  ;;  %v784_v63 = vrot.slane %v600_v47, 5 }
  0xec   :  { %1642 = vst.msk [vmem:[#allocation2 + $0x28] sm:$0x7f] %vm1637_vm12, %v7944_v40 }
  0xf2   :  { %v7951_v55 = vld [vmem:[#allocation1] sm:$0xff] }
  0xf3   :  { %1163 = vst [vmem:[#allocation1] ss:$9 sm:$0xff] %v749_v52  ;;  %v340_v52 = vpop.f32.mrf.mxu0 }
  0xf4   :  { %1164 = vst [vmem:[#allocation1 + $0x1] ss:$9 sm:$0xff] %v750_v54  ;;  %v75_v54 = vld [vmem:[%s10503_s0 + $0xe8] sm:$0xff] }
  0xf5   :  { %1165 = vst [vmem:[#allocation1 + $0x2] ss:$9 sm:$0xff] %v751_v56  ;;  %7212 = vmatmul.msk.f32.gmra.mxu0 %vm111_vm1, %v75_v54  ;;  %v341_v56 = vadd.f32 %v7893_v20, %v340_v52 }
  0xf6   :  { %1166 = vst [vmem:[#allocation1 + $0x3] ss:$9 sm:$0xff] %v596_v51  ;;  %v780_v51 = vrot.slane %v600_v47, 1 }
  0xf7   :  { %1167 = vst [vmem:[#allocation1 + $0x4] ss:$9 sm:$0xff] %v752_v57  ;;  %v544_v57 = vmul.f32 0.01, %v341_v56  ;;  %vm487_vm14 = vcmp.ge.f32.partialorder %v341_v56, 0.0 }
  0xf8   :  { %1168 = vst [vmem:[#allocation1 + $0x5] ss:$9 sm:$0xff] %v753_v58  ;;  %v781_v58 = vrot.slane %v600_v47, 2 }
  0xf9   :  { %1169 = vst [vmem:[#allocation1 + $0x6] ss:$9 sm:$0xff] %v754_v61  ;;  %v783_v61 = vrot.slane %v600_v47, 4  ;;  %v601_v62 = vsel %vm487_vm14, %v341_v56, %v544_v57 }
  0xfa   :  { %v789_v9 = vrot.slane %v601_v62, 3  ;;  %v791_v12 = vrot.slane %v601_v62, 5  ;;  %1643 = vst.msk [vmem:[#allocation2 + $0x30] sm:$0xff] %vm1635_vm11, %v7951_v55  ;;  %v89_v55 = vld [vmem:[%s10503_s0 + $0x158] sm:$0xff] }
 0x100   :  { %v7958_v4 = vld [vmem:[#allocation1] sm:$0xff] }
 0x101   :  { %1171 = vst [vmem:[#allocation1] ss:$9 sm:$0xff] %v755_v0  ;;  %v785_v0 = vrot.slane %v600_v47, 6 }
 0x102   :  { %1172 = vst [vmem:[#allocation1 + $0x1] ss:$9 sm:$0xff] %v756_v3  ;;  %v787_v3 = vrot.slane %v601_v62, 1 }
 0x103   :  { %1173 = vst [vmem:[#allocation1 + $0x2] ss:$9 sm:$0xff] %v757_v5  ;;  %v76_v5 = vld [vmem:[%s10503_s0 + $0xf0] sm:$0xff] }
 0x104   :  { %1174 = vst [vmem:[#allocation1 + $0x3] ss:$9 sm:$0xff] %v758_v6  ;;  %v343_v6 = vpop.f32.mrf.mxu0  ;;  %7213 = vmatmul.msk.f32.gmra.mxu0 %vm111_vm1, %v76_v5 }
 0x105   :  { %1175 = vst [vmem:[#allocation1 + $0x4] ss:$9 sm:$0xff] %v597_v1  ;;  %v786_v1 = vrot.slane %v600_v47, 7 }
 0x106   :  { %1176 = vst [vmem:[#allocation1 + $0x5] ss:$9 sm:$0xff] %v759_v7  ;;  %v344_v7 = vadd.f32 %v7893_v20, %v343_v6 }
 0x107   :  { %1177 = vst [vmem:[#allocation1 + $0x6] ss:$9 sm:$0xff] %v760_v8  ;;  %v788_v8 = vrot.slane %v601_v62, 2 }
 0x108   :  { %1178 = vst [vmem:[#allocation1 + $0x7] ss:$9 sm:$0xff] %v761_v11  ;;  %v790_v11 = vrot.slane %v601_v62, 4  ;;  %v545_v13 = vmul.f32 0.01, %v344_v7  ;;  %vm488_vm15 = vcmp.ge.f32.partialorder %v344_v7, 0.0 }
 0x109   :  { %1644 = vst.msk [vmem:[#allocation2 + $0x38] sm:$0x7f] %vm1637_vm12, %v7958_v4 }
 0x10f   :  { %v7965_v18 = vld [vmem:[#allocation1] sm:$0xff] }
 0x110   :  { %1180 = vst [vmem:[#allocation1] ss:$9 sm:$0xff] %v762_v15  ;;  %v792_v15 = vrot.slane %v601_v62, 6 }
 0x111   :  { %1181 = vst [vmem:[#allocation1 + $0x1] ss:$9 sm:$0xff] %v763_v17  ;;  %v602_v17 = vsel %vm488_vm15, %v344_v7, %v545_v13 }
 0x112   :  { %1182 = vst [vmem:[#allocation1 + $0x2] ss:$9 sm:$0xff] %v764_v19  ;;  %v77_v19 = vld [vmem:[%s10503_s0 + $0xf8] sm:$0xff]  ;;  %v795_v24 = vrot.slane %v602_v17, 2  ;;  %v796_v26 = vrot.slane %v602_v17, 3  ;;  %v797_v27 = vrot.slane %v602_v17, 4 }
 0x113   :  { %1183 = vst [vmem:[#allocation1 + $0x3] ss:$9 sm:$0xff] %v765_v21  ;;  %v346_v21 = vpop.f32.mrf.mxu0  ;;  %7214 = vmatmul.msk.f32.gmra.mxu0 %vm111_vm1, %v77_v19  ;;  %v81_v19 = vld [vmem:[%s10503_s0 + $0x118] sm:$0xff] }
 0x114   :  { %1184 = vst [vmem:[#allocation1 + $0x4] ss:$9 sm:$0xff] %v598_v16  ;;  %v793_v16 = vrot.slane %v601_v62, 7 }
 0x115   :  { %1185 = vst [vmem:[#allocation1 + $0x5] ss:$9 sm:$0xff] %v766_v22  ;;  %v794_v22 = vrot.slane %v602_v17, 1 }
 0x116   :  { %1186 = vst [vmem:[#allocation1 + $0x6] ss:$9 sm:$0xff] %v767_v23  ;;  %v347_v23 = vadd.f32 %v7893_v20, %v346_v21 }
 0x117   :  { %1645 = vst.msk [vmem:[#allocation2 + $0x40] sm:$0xff] %vm1635_vm11, %v7965_v18 }
 0x118   :  { %vm489_vm0 = vcmp.ge.f32.partialorder %v347_v23, 0.0 }
 0x11b   :  { %v349_v39 = vpop.f32.mrf.mxu0 }
 0x11d   :  { %v7972_v31 = vld [vmem:[#allocation1] sm:$0xff] }
 0x11e   :  { %1188 = vst [vmem:[#allocation1] ss:$9 sm:$0xff] %v768_v29  ;;  %v798_v29 = vrot.slane %v602_v17, 5 }
 0x11f   :  { %1189 = vst [vmem:[#allocation1 + $0x1] ss:$9 sm:$0xff] %v769_v30  ;;  %v546_v30 = vmul.f32 0.01, %v347_v23 }
 0x120   :  { %1190 = vst [vmem:[#allocation1 + $0x2] ss:$9 sm:$0xff] %v770_v33  ;;  %v800_v33 = vrot.slane %v602_v17, 7 }
 0x121   :  { %1191 = vst [vmem:[#allocation1 + $0x3] ss:$9 sm:$0xff] %v771_v34  ;;  %v603_v34 = vsel %vm489_vm0, %v347_v23, %v546_v30 }
 0x122   :  { %1192 = vst [vmem:[#allocation1 + $0x4] ss:$9 sm:$0xff] %v772_v35  ;;  %v78_v35 = vld [vmem:[%s10503_s0 + $0x100] sm:$0xff]  ;;  %v803_v41 = vrot.slane %v603_v34, 3  ;;  %v804_v43 = vrot.slane %v603_v34, 4 }
 0x123   :  { %1193 = vst [vmem:[#allocation1 + $0x5] ss:$9 sm:$0xff] %v599_v32  ;;  %v799_v32 = vrot.slane %v602_v17, 6  ;;  %7215 = vmatmul.msk.f32.gmra.mxu0 %vm111_vm1, %v78_v35  ;;  %v352_v57 = vpop.f32.mrf.mxu0 }
 0x124   :  { %1194 = vst [vmem:[#allocation1 + $0x6] ss:$9 sm:$0xff] %v773_v36  ;;  %v801_v36 = vrot.slane %v603_v34, 1 }
 0x125   :  { %1195 = vst [vmem:[#allocation1 + $0x7] ss:$9 sm:$0xff] %v774_v37  ;;  %v802_v37 = vrot.slane %v603_v34, 2 }
 0x126   :  { %1646 = vst.msk [vmem:[#allocation2 + $0x48] sm:$0x7f] %vm1637_vm12, %v7972_v31 }
 0x12c   :  { %v7979_v46 = vld [vmem:[#allocation1] sm:$0xff] }
 0x12d   :  { %1197 = vst [vmem:[#allocation1] ss:$9 sm:$0xff] %v775_v44  ;;  %v805_v44 = vrot.slane %v603_v34, 5 }
 0x12e   :  { %1198 = vst [vmem:[#allocation1 + $0x1] ss:$9 sm:$0xff] %v776_v45  ;;  %v350_v45 = vadd.f32 %v7893_v20, %v349_v39 }
 0x12f   :  { %1199 = vst [vmem:[#allocation1 + $0x2] ss:$9 sm:$0xff] %v777_v48  ;;  %v807_v48 = vrot.slane %v603_v34, 7 }
 0x130   :  { %1200 = vst [vmem:[#allocation1 + $0x3] ss:$9 sm:$0xff] %v778_v49  ;;  %v547_v49 = vmul.f32 0.01, %v350_v45  ;;  %vm490_vm2 = vcmp.ge.f32.partialorder %v350_v45, 0.0 }
 0x131   :  { %1201 = vst [vmem:[#allocation1 + $0x4] ss:$9 sm:$0xff] %v779_v50  ;;  %v79_v50 = vld [vmem:[%s10503_s0 + $0x108] sm:$0xff] }
 0x132   :  { %1202 = vst [vmem:[#allocation1 + $0x5] ss:$9 sm:$0xff] %v600_v47  ;;  %v806_v47 = vrot.slane %v603_v34, 6  ;;  %7216 = vmatmul.msk.f32.gmra.mxu0 %vm111_vm1, %v79_v50 }
 0x133   :  { %1203 = vst [vmem:[#allocation1 + $0x6] ss:$9 sm:$0xff] %v780_v51  ;;  %v604_v51 = vsel %vm490_vm2, %v350_v45, %v547_v49 }
 0x134   :  { %v808_v54 = vrot.slane %v604_v51, 1  ;;  %v809_v56 = vrot.slane %v604_v51, 2  ;;  %1647 = vst.msk [vmem:[#allocation2 + $0x50] sm:$0xff] %vm1635_vm11, %v7979_v46 }
 0x13a   :  { %v7986_v60 = vld [vmem:[#allocation1] sm:$0xff] }
 0x13b   :  { %1205 = vst [vmem:[#allocation1] ss:$9 sm:$0xff] %v781_v58  ;;  %v810_v58 = vrot.slane %v604_v51, 3 }
 0x13c   :  { %1206 = vst [vmem:[#allocation1 + $0x1] ss:$9 sm:$0xff] %v782_v59  ;;  %v811_v59 = vrot.slane %v604_v51, 4 }
 0x13d   :  { %1207 = vst [vmem:[#allocation1 + $0x2] ss:$9 sm:$0xff] %v783_v61  ;;  %v812_v61 = vrot.slane %v604_v51, 5 }
 0x13e   :  { %1208 = vst [vmem:[#allocation1 + $0x3] ss:$9 sm:$0xff] %v784_v63  ;;  %v813_v63 = vrot.slane %v604_v51, 6 }
 0x13f   :  { %1209 = vst [vmem:[#allocation1 + $0x4] ss:$9 sm:$0xff] %v785_v0  ;;  %v814_v0 = vrot.slane %v604_v51, 7 }
 0x140   :  { %1210 = vst [vmem:[#allocation1 + $0x5] ss:$9 sm:$0xff] %v786_v1 }
 0x141   :  { %1211 = vst [vmem:[#allocation1 + $0x6] ss:$9 sm:$0xff] %v601_v62  ;;  %v353_v62 = vadd.f32 %v7893_v20, %v352_v57 }
 0x142   :  { %1212 = vst [vmem:[#allocation1 + $0x7] ss:$9 sm:$0xff] %v787_v3  ;;  %v80_v3 = vld [vmem:[%s10503_s0 + $0x110] sm:$0xff] }
 0x143   :  { %v548_v1 = vmul.f32 0.01, %v353_v62  ;;  %vm491_vm3 = vcmp.ge.f32.partialorder %v353_v62, 0.0  ;;  %7217 = vmatmul.msk.f32.gmra.mxu0 %vm111_vm1, %v80_v3  ;;  %1648 = vst.msk [vmem:[#allocation2 + $0x58] sm:$0x7f] %vm1637_vm12, %v7986_v60 }
 0x145   :  { %v605_v5 = vsel %vm491_vm3, %v353_v62, %v548_v1 }
 0x146   :  { %v815_v7 = vrot.slane %v605_v5, 1  ;;  %v819_v13 = vrot.slane %v605_v5, 5 }
 0x149   :  { %v7993_v10 = vld [vmem:[#allocation1] sm:$0xff] }
 0x14a   :  { %1214 = vst [vmem:[#allocation1] ss:$9 sm:$0xff] %v788_v8  ;;  %v816_v8 = vrot.slane %v605_v5, 2 }
 0x14b   :  { %1215 = vst [vmem:[#allocation1 + $0x1] ss:$9 sm:$0xff] %v789_v9  ;;  %v355_v9 = vpop.f32.mrf.mxu0  ;;  %7218 = vmatmul.msk.f32.gmra.mxu0 %vm111_vm1, %v81_v19 }
 0x14c   :  { %1216 = vst [vmem:[#allocation1 + $0x2] ss:$9 sm:$0xff] %v790_v11  ;;  %v817_v11 = vrot.slane %v605_v5, 3 }
 0x14d   :  { %1217 = vst [vmem:[#allocation1 + $0x3] ss:$9 sm:$0xff] %v791_v12  ;;  %v818_v12 = vrot.slane %v605_v5, 4 }
 0x14e   :  { %1218 = vst [vmem:[#allocation1 + $0x4] ss:$9 sm:$0xff] %v792_v15  ;;  %v356_v15 = vadd.f32 %v7893_v20, %v355_v9 }
 0x14f   :  { %1219 = vst [vmem:[#allocation1 + $0x5] ss:$9 sm:$0xff] %v793_v16  ;;  %v820_v16 = vrot.slane %v605_v5, 6 }
 0x150   :  { %1220 = vst [vmem:[#allocation1 + $0x6] ss:$9 sm:$0xff] %v602_v17  ;;  %v549_v17 = vmul.f32 0.01, %v356_v15  ;;  %vm492_vm4 = vcmp.ge.f32.partialorder %v356_v15, 0.0 }
 0x151   :  { %1649 = vst.msk [vmem:[#allocation2 + $0x60] sm:$0xff] %vm1635_vm11, %v7993_v10  ;;  %v90_v10 = vld [vmem:[%s10503_s0 + $0x160] sm:$0xff] }
 0x152   :  { %v606_v21 = vsel %vm492_vm4, %v356_v15, %v549_v17 }
 0x153   :  { %v825_v30 = vrot.slane %v606_v21, 4  ;;  %v828_v39 = vrot.slane %v606_v21, 7 }
 0x157   :  { %v8000_v25 = vld [vmem:[#allocation1] sm:$0xff] }
 0x158   :  { %1222 = vst [vmem:[#allocation1] ss:$9 sm:$0xff] %v794_v22  ;;  %v821_v22 = vrot.slane %v605_v5, 7 }
 0x159   :  { %1223 = vst [vmem:[#allocation1 + $0x1] ss:$9 sm:$0xff] %v795_v24  ;;  %v822_v24 = vrot.slane %v606_v21, 1 }
 0x15a   :  { %1224 = vst [vmem:[#allocation1 + $0x2] ss:$9 sm:$0xff] %v796_v26  ;;  %v823_v26 = vrot.slane %v606_v21, 2 }
 0x15b   :  { %1225 = vst [vmem:[#allocation1 + $0x3] ss:$9 sm:$0xff] %v797_v27  ;;  %v358_v27 = vpop.f32.mrf.mxu0 }
 0x15c   :  { %1226 = vst [vmem:[#allocation1 + $0x4] ss:$9 sm:$0xff] %v798_v29  ;;  %v824_v29 = vrot.slane %v606_v21, 3 }
 0x15d   :  { %1227 = vst [vmem:[#allocation1 + $0x5] ss:$9 sm:$0xff] %v799_v32  ;;  %v826_v32 = vrot.slane %v606_v21, 5 }
 0x15e   :  { %1228 = vst [vmem:[#allocation1 + $0x6] ss:$9 sm:$0xff] %v800_v33  ;;  %v359_v33 = vadd.f32 %v7893_v20, %v358_v27 }
 0x15f   :  { %1229 = vst [vmem:[#allocation1 + $0x7] ss:$9 sm:$0xff] %v603_v34  ;;  %v827_v34 = vrot.slane %v606_v21, 6 }
 0x160   :  { %v550_v35 = vmul.f32 0.01, %v359_v33  ;;  %vm493_vm5 = vcmp.ge.f32.partialorder %v359_v33, 0.0  ;;  %1650 = vst.msk [vmem:[#allocation2 + $0x68] sm:$0x7f] %vm1637_vm12, %v8000_v25 }
 0x163   :  { %v361_v45 = vpop.f32.mrf.mxu0 }
 0x164   :  { %v362_v50 = vadd.f32 %v7893_v20, %v361_v45  ;;  %v86_v45 = vld [vmem:[%s10503_s0 + $0x140] sm:$0xff] }
 0x166   :  { %v8006_v38 = vld [vmem:[#allocation1] sm:$0xff]  ;;  %vm494_vm6 = vcmp.ge.f32.partialorder %v362_v50, 0.0 }
 0x167   :  { %1231 = vst [vmem:[#allocation1] ss:$9 sm:$0xff] %v801_v36  ;;  %v82_v36 = vld [vmem:[%s10503_s0 + $0x120] sm:$0xff] }
 0x168   :  { %1232 = vst [vmem:[#allocation1 + $0x1] ss:$9 sm:$0xff] %v802_v37  ;;  %7219 = vmatmul.msk.f32.gmra.mxu0 %vm111_vm1, %v82_v36  ;;  %v607_v37 = vsel %vm493_vm5, %v359_v33, %v550_v35 }
 0x169   :  { %1233 = vst [vmem:[#allocation1 + $0x2] ss:$9 sm:$0xff] %v803_v41  ;;  %v833_v49 = vrot.slane %v607_v37, 5 }
 0x16a   :  { %1234 = vst [vmem:[#allocation1 + $0x3] ss:$9 sm:$0xff] %v804_v43  ;;  %v829_v43 = vrot.slane %v607_v37, 1 }
 0x16b   :  { %1235 = vst [vmem:[#allocation1 + $0x4] ss:$9 sm:$0xff] %v805_v44  ;;  %v830_v44 = vrot.slane %v607_v37, 2 }
 0x16c   :  { %1236 = vst [vmem:[#allocation1 + $0x5] ss:$9 sm:$0xff] %v806_v47  ;;  %v831_v47 = vrot.slane %v607_v37, 3 }
 0x16d   :  { %1237 = vst [vmem:[#allocation1 + $0x6] ss:$9 sm:$0xff] %v807_v48  ;;  %v832_v48 = vrot.slane %v607_v37, 4 }
 0x16e   :  { %1651 = vst.msk [vmem:[#allocation2 + $0x70] sm:$0xff] %vm1635_vm11, %v8006_v38 }
 0x174   :  { %v8013_v52 = vld [vmem:[#allocation1] sm:$0xff] }
 0x175   :  { %1239 = vst [vmem:[#allocation1] ss:$9 sm:$0xff] %v604_v51  ;;  %v551_v51 = vmul.f32 0.01, %v362_v50 }
 0x176   :  { %1240 = vst [vmem:[#allocation1 + $0x1] ss:$9 sm:$0xff] %v808_v54  ;;  %v83_v54 = vld [vmem:[%s10503_s0 + $0x128] sm:$0xff] }
 0x177   :  { %1241 = vst [vmem:[#allocation1 + $0x2] ss:$9 sm:$0xff] %v809_v56  ;;  %7220 = vmatmul.msk.f32.gmra.mxu0 %vm111_vm1, %v83_v54  ;;  %v834_v56 = vrot.slane %v607_v37, 6  ;;  %v608_v57 = vsel %vm494_vm6, %v362_v50, %v551_v51 }
 0x178   :  { %1242 = vst [vmem:[#allocation1 + $0x3] ss:$9 sm:$0xff] %v810_v58  ;;  %v835_v58 = vrot.slane %v607_v37, 7  ;;  %v837_v62 = vrot.slane %v608_v57, 2  ;;  %v839_v1 = vrot.slane %v608_v57, 4  ;;  %v840_v3 = vrot.slane %v608_v57, 5 }
 0x179   :  { %1243 = vst [vmem:[#allocation1 + $0x4] ss:$9 sm:$0xff] %v811_v59  ;;  %v841_v9 = vrot.slane %v608_v57, 6 }
 0x17a   :  { %1244 = vst [vmem:[#allocation1 + $0x5] ss:$9 sm:$0xff] %v812_v61  ;;  %v836_v61 = vrot.slane %v608_v57, 1 }
 0x17b   :  { %1245 = vst [vmem:[#allocation1 + $0x6] ss:$9 sm:$0xff] %v813_v63  ;;  %v364_v63 = vpop.f32.mrf.mxu0 }
 0x17c   :  { %1246 = vst [vmem:[#allocation1 + $0x7] ss:$9 sm:$0xff] %v814_v0  ;;  %v838_v0 = vrot.slane %v608_v57, 3 }
 0x17d   :  { %1652 = vst.msk [vmem:[#allocation2 + $0x78] sm:$0x7f] %vm1637_vm12, %v8013_v52 }
 0x183   :  { %v8020_v6 = vld [vmem:[#allocation1] sm:$0xff]  ;;  %v367_v17 = vpop.f32.mrf.mxu0 }
 0x184   :  { %1248 = vst [vmem:[#allocation1] ss:$9 sm:$0xff] %v605_v5  ;;  %v365_v5 = vadd.f32 %v7893_v20, %v364_v63 }
 0x185   :  { %1249 = vst [vmem:[#allocation1 + $0x1] ss:$9 sm:$0xff] %v815_v7 }
 0x186   :  { %1250 = vst [vmem:[#allocation1 + $0x2] ss:$9 sm:$0xff] %v816_v8  ;;  %v552_v7 = vmul.f32 0.01, %v365_v5  ;;  %vm495_vm7 = vcmp.ge.f32.partialorder %v365_v5, 0.0  ;;  %v84_v8 = vld [vmem:[%s10503_s0 + $0x130] sm:$0xff] }
 0x187   :  { %1251 = vst [vmem:[#allocation1 + $0x3] ss:$9 sm:$0xff] %v817_v11  ;;  %7221 = vmatmul.msk.f32.gmra.mxu0 %vm111_vm1, %v84_v8 }
 0x188   :  { %1252 = vst [vmem:[#allocation1 + $0x4] ss:$9 sm:$0xff] %v818_v12  ;;  %v609_v11 = vsel %vm495_vm7, %v365_v5, %v552_v7  ;;  %v842_v12 = vrot.slane %v608_v57, 7 }
 0x189   :  { %1253 = vst [vmem:[#allocation1 + $0x5] ss:$9 sm:$0xff] %v819_v13  ;;  %v843_v15 = vrot.slane %v609_v11, 1  ;;  %v845_v19 = vrot.slane %v609_v11, 3  ;;  %v847_v27 = vrot.slane %v609_v11, 5  ;;  %v849_v33 = vrot.slane %v609_v11, 7 }
 0x18a   :  { %1254 = vst [vmem:[#allocation1 + $0x6] ss:$9 sm:$0xff] %v820_v16  ;;  %v844_v16 = vrot.slane %v609_v11, 2 }
 0x18b   :  { %v370_v36 = vpop.f32.mrf.mxu0  ;;  %1653 = vst.msk [vmem:[#allocation2 + $0x80] sm:$0xff] %vm1635_vm11, %v8020_v6 }
 0x191   :  { %v8027_v23 = vld [vmem:[#allocation1] sm:$0xff] }
 0x192   :  { %1256 = vst [vmem:[#allocation1] ss:$9 sm:$0xff] %v821_v22  ;;  %v368_v22 = vadd.f32 %v7893_v20, %v367_v17  ;;  %v88_v17 = vld [vmem:[%s10503_s0 + $0x150] sm:$0xff] }
 0x193   :  { %1257 = vst [vmem:[#allocation1 + $0x1] ss:$9 sm:$0xff] %v606_v21  ;;  %v846_v21 = vrot.slane %v609_v11, 4 }
 0x194   :  { %1258 = vst [vmem:[#allocation1 + $0x2] ss:$9 sm:$0xff] %v822_v24  ;;  %v553_v24 = vmul.f32 0.01, %v368_v22  ;;  %vm496_vm8 = vcmp.ge.f32.partialorder %v368_v22, 0.0 }
 0x195   :  { %1259 = vst [vmem:[#allocation1 + $0x3] ss:$9 sm:$0xff] %v823_v26  ;;  %v85_v26 = vld [vmem:[%s10503_s0 + $0x138] sm:$0xff] }
 0x196   :  { %1260 = vst [vmem:[#allocation1 + $0x4] ss:$9 sm:$0xff] %v824_v29  ;;  %7222 = vmatmul.msk.f32.gmra.mxu0 %vm111_vm1, %v85_v26  ;;  %v848_v29 = vrot.slane %v609_v11, 6 }
 0x197   :  { %1261 = vst [vmem:[#allocation1 + $0x5] ss:$9 sm:$0xff] %v825_v30 }
 0x198   :  { %1262 = vst [vmem:[#allocation1 + $0x6] ss:$9 sm:$0xff] %v826_v32  ;;  %v610_v32 = vsel %vm496_vm8, %v368_v22, %v553_v24 }
 0x199   :  { %1263 = vst [vmem:[#allocation1 + $0x7] ss:$9 sm:$0xff] %v827_v34  ;;  %v850_v34 = vrot.slane %v610_v32, 1  ;;  %v851_v35 = vrot.slane %v610_v32, 2  ;;  %v856_v51 = vrot.slane %v610_v32, 7 }
 0x19a   :  { %1654 = vst.msk [vmem:[#allocation2 + $0x88] sm:$0x7f] %vm1637_vm12, %v8027_v23 }
 0x19e   :  { %7223 = vmatmul.msk.f32.gmra.mxu0 %vm111_vm1, %v86_v45 }
 0x1a0   :  { %v8034_v41 = vld [vmem:[#allocation1] sm:$0xff] }
 0x1a1   :  { %1265 = vst [vmem:[#allocation1] ss:$9 sm:$0xff] %v828_v39  ;;  %v853_v39 = vrot.slane %v610_v32, 4 }
 0x1a2   :  { %1266 = vst [vmem:[#allocation1 + $0x1] ss:$9 sm:$0xff] %v607_v37  ;;  %v852_v37 = vrot.slane %v610_v32, 3 }
 0x1a3   :  { %1267 = vst [vmem:[#allocation1 + $0x2] ss:$9 sm:$0xff] %v829_v43  ;;  %v371_v43 = vadd.f32 %v7893_v20, %v370_v36 }
 0x1a4   :  { %1268 = vst [vmem:[#allocation1 + $0x3] ss:$9 sm:$0xff] %v830_v44 }
 0x1a5   :  { %1269 = vst [vmem:[#allocation1 + $0x4] ss:$9 sm:$0xff] %v831_v47  ;;  %v554_v44 = vmul.f32 0.01, %v371_v43  ;;  %vm497_vm9 = vcmp.ge.f32.partialorder %v371_v43, 0.0  ;;  %v854_v47 = vrot.slane %v610_v32, 5 }
 0x1a6   :  { %1270 = vst [vmem:[#allocation1 + $0x5] ss:$9 sm:$0xff] %v832_v48  ;;  %v855_v48 = vrot.slane %v610_v32, 6 }
 0x1a7   :  { %1271 = vst [vmem:[#allocation1 + $0x6] ss:$9 sm:$0xff] %v833_v49  ;;  %v611_v50 = vsel %vm497_vm9, %v371_v43, %v554_v44 }
 0x1a8   :  { %v857_v54 = vrot.slane %v611_v50, 1  ;;  %v858_v20 = vrot.slane %v611_v50, 2  ;;  %v860_v63 = vrot.slane %v611_v50, 4  ;;  %v862_v5 = vrot.slane %v611_v50, 6  ;;  %1655 = vst.msk [vmem:[#allocation2 + $0x90] sm:$0xff] %vm1635_vm11, %v8034_v41 }
 0x1ae   :  { %v8041_v59 = vld [vmem:[#allocation1] sm:$0xff] }
 0x1af   :  { %1273 = vst [vmem:[#allocation1] ss:$9 sm:$0xff] %v834_v56  ;;  %v373_v56 = vpop.f32.mrf.mxu0 }
 0x1b0   :  { %1274 = vst [vmem:[#allocation1 + $0x1] ss:$9 sm:$0xff] %v835_v58  ;;  %v8067_v58 = vld [vmem:[%s10504_s2] ss:$0 sm:$0xff] }
 0x1b1   :  { %1275 = vst [vmem:[#allocation1 + $0x2] ss:$9 sm:$0xff] %v608_v57  ;;  %v859_v57 = vrot.slane %v611_v50, 3 }
 0x1b2   :  { %1276 = vst [vmem:[#allocation1 + $0x3] ss:$9 sm:$0xff] %v836_v61  ;;  %v374_v61 = vadd.f32 %v8067_v58, %v373_v56 }
 0x1b3   :  { %1277 = vst [vmem:[#allocation1 + $0x4] ss:$9 sm:$0xff] %v837_v62 }
 0x1b4   :  { %1278 = vst [vmem:[#allocation1 + $0x5] ss:$9 sm:$0xff] %v838_v0  ;;  %v555_v62 = vmul.f32 0.01, %v374_v61  ;;  %vm498_vm10 = vcmp.ge.f32.partialorder %v374_v61, 0.0  ;;  %v87_v0 = vld [vmem:[%s10503_s0 + $0x148] sm:$0xff] }
 0x1b5   :  { %1279 = vst [vmem:[#allocation1 + $0x6] ss:$9 sm:$0xff] %v839_v1  ;;  %v861_v1 = vrot.slane %v611_v50, 5  ;;  %7224 = vmatmul.msk.f32.gmra.mxu0 %vm111_vm1, %v87_v0 }
 0x1b6   :  { %1280 = vst [vmem:[#allocation1 + $0x7] ss:$9 sm:$0xff] %v840_v3  ;;  %v612_v7 = vsel %vm498_vm10, %v374_v61, %v555_v62 }
 0x1b7   :  { %v376_v8 = vpop.f32.mrf.mxu0  ;;  %v867_v22 = vrot.slane %v612_v7, 4  ;;  %v868_v42 = vrot.slane %v612_v7, 5  ;;  %v869_v2 = vrot.slane %v612_v7, 6  ;;  %v870_v26 = vrot.slane %v612_v7, 7  ;;  %1656 = vst.msk [vmem:[#allocation2 + $0x98] sm:$0x7f] %vm1637_vm12, %v8041_v59 }
 0x1bd   :  { %v8048_v13 = vld [vmem:[#allocation1] sm:$0xff]  ;;  %7225 = vmatmul.msk.f32.gmra.mxu0 %vm111_vm1, %v88_v17 }
 0x1be   :  { %1282 = vst [vmem:[#allocation1] ss:$9 sm:$0xff] %v841_v9  ;;  %v863_v9 = vrot.slane %v611_v50, 7 }
 0x1bf   :  { %1283 = vst [vmem:[#allocation1 + $0x1] ss:$9 sm:$0xff] %v842_v12  ;;  %v865_v12 = vrot.slane %v612_v7, 2 }
 0x1c0   :  { %1284 = vst [vmem:[#allocation1 + $0x2] ss:$9 sm:$0xff] %v609_v11  ;;  %v864_v11 = vrot.slane %v612_v7, 1 }
 0x1c1   :  { %1285 = vst [vmem:[#allocation1 + $0x3] ss:$9 sm:$0xff] %v843_v15  ;;  %v866_v15 = vrot.slane %v612_v7, 3 }
 0x1c2   :  { %1286 = vst [vmem:[#allocation1 + $0x4] ss:$9 sm:$0xff] %v844_v16  ;;  %v377_v16 = vadd.f32 %v8067_v58, %v376_v8 }
 0x1c3   :  { %1287 = vst [vmem:[#allocation1 + $0x5] ss:$9 sm:$0xff] %v845_v19  ;;  %v379_v19 = vpop.f32.mrf.mxu0 }
 0x1c4   :  { %1288 = vst [vmem:[#allocation1 + $0x6] ss:$9 sm:$0xff] %v846_v21  ;;  %v556_v21 = vmul.f32 0.01, %v377_v16  ;;  %vm499_vm13 = vcmp.ge.f32.partialorder %v377_v16, 0.0  ;;  %v380_v40 = vadd.f32 %v8067_v58, %v379_v19 }
 0x1c5   :  { %7226 = vmatmul.msk.f32.gmra.mxu0 %vm111_vm1, %v89_v55  ;;  %1657 = vst.msk [vmem:[#allocation2 + $0xa0] sm:$0xff] %vm1635_vm11, %v8048_v13 }
 0x1c6   :  { %v613_v28 = vsel %vm499_vm13, %v377_v16, %v556_v21  ;;  %vm500_vm14 = vcmp.ge.f32.partialorder %v380_v40, 0.0 }
 0x1c7   :  { %v871_v53 = vrot.slane %v613_v28, 1  ;;  %v873_v4 = vrot.slane %v613_v28, 3  ;;  %v874_v18 = vrot.slane %v613_v28, 4  ;;  %v875_v46 = vrot.slane %v613_v28, 5 }
 0x1cb   :  { %v8055_v30 = vld [vmem:[#allocation1] sm:$0xff]  ;;  %v382_v14 = vpop.f32.mrf.mxu0 }
 0x1cc   :  { %1290 = vst [vmem:[#allocation1] ss:$9 sm:$0xff] %v847_v27  ;;  %v872_v27 = vrot.slane %v613_v28, 2  ;;  %v383_v25 = vadd.f32 %v8067_v58, %v382_v14 }
 0x1cd   :  { %1291 = vst [vmem:[#allocation1 + $0x1] ss:$9 sm:$0xff] %v848_v29  ;;  %v557_v29 = vmul.f32 0.01, %v380_v40  ;;  %7227 = vmatmul.msk.f32.gmra.mxu0 %vm111_vm1, %v90_v10 }
 0x1ce   :  { %1292 = vst [vmem:[#allocation1 + $0x2] ss:$9 sm:$0xff] %v849_v33  ;;  %v876_v33 = vrot.slane %v613_v28, 6  ;;  %vm501_vm15 = vcmp.ge.f32.partialorder %v383_v25, 0.0 }
 0x1cf   :  { %1293 = vst [vmem:[#allocation1 + $0x3] ss:$9 sm:$0xff] %v610_v32 }
 0x1d0   :  { %1294 = vst [vmem:[#allocation1 + $0x4] ss:$9 sm:$0xff] %v850_v34  ;;  %v614_v34 = vsel %vm500_vm14, %v380_v40, %v557_v29 }
 0x1d1   :  { %1295 = vst [vmem:[#allocation1 + $0x5] ss:$9 sm:$0xff] %v851_v35  ;;  %v877_v35 = vrot.slane %v613_v28, 7  ;;  %v878_v60 = vrot.slane %v614_v34, 1  ;;  %v879_v36 = vrot.slane %v614_v34, 2  ;;  %v880_v43 = vrot.slane %v614_v34, 3 }
 0x1d2   :  { %1296 = vst [vmem:[#allocation1 + $0x6] ss:$9 sm:$0xff] %v852_v37  ;;  %v881_v38 = vrot.slane %v614_v34, 4  ;;  %v882_v6 = vrot.slane %v614_v34, 5  ;;  %v883_v45 = vrot.slane %v614_v34, 6 }
 0x1d3   :  { %1297 = vst [vmem:[#allocation1 + $0x7] ss:$9 sm:$0xff] %v853_v39  ;;  %v8116_v31 = vpop.f32.mrf.mxu0  ;;  %v558_v39 = vmul.f32 0.01, %v383_v25 }
 0x1d4   :  { %1658 = vst.msk [vmem:[#allocation2 + $0xa8] sm:$0x7f] %vm1637_vm12, %v8055_v30 }
 0x1d5   :  { %v8138_v23 = vsel %vm501_vm15, %v383_v25, %v558_v39 }
 0x1d6   :  { %v885_v59 = vrot.slane %v8138_v23, 1 }
 0x1da   :  { %v8062_v49 = vld [vmem:[#allocation1] sm:$0xff] }
 0x1db   :  { %1299 = vst [vmem:[#allocation1] ss:$9 sm:$0xff] %v854_v47  ;;  %v388_v37 = vpop.f32.mrf.mxu0  ;;  %v884_v47 = vrot.slane %v614_v34, 7 }
 0x1dc   :  { %1300 = vst [vmem:[#allocation1 + $0x1] ss:$9 sm:$0xff] %v855_v48  ;;  %v389_v52 = vadd.f32 %v8067_v58, %v388_v37 }
 0x1dd   :  { %1301 = vst [vmem:[#allocation1 + $0x2] ss:$9 sm:$0xff] %v856_v51 }
 0x1de   :  { %1302 = vst [vmem:[#allocation1 + $0x3] ss:$9 sm:$0xff] %v611_v50  ;;  %v560_v41 = vmul.f32 0.01, %v389_v52  ;;  %vm503_vm0 = vcmp.ge.f32.partialorder %v389_v52, 0.0 }
 0x1df   :  { %1303 = vst [vmem:[#allocation1 + $0x4] ss:$9 sm:$0xff] %v857_v54  ;;  %v91_v54 = vld [vmem:[%s10503_s0 + $0x168] sm:$0xff] }
 0x1e0   :  { %1304 = vst [vmem:[#allocation1 + $0x5] ss:$9 sm:$0xff] %v858_v20  ;;  %v8142_v48 = vsel %vm503_vm0, %v389_v52, %v560_v41  ;;  %7228 = vmatmul.msk.f32.gmra.mxu0 %vm111_vm1, %v91_v54 }
 0x1e1   :  { %1305 = vst [vmem:[#allocation1 + $0x6] ss:$9 sm:$0xff] %v859_v57  ;;  %v899_v50 = vrot.slane %v8142_v48, 1  ;;  %v900_v20 = vrot.slane %v8142_v48, 2  ;;  %v901_v30 = vrot.slane %v8142_v48, 3  ;;  %v902_v56 = vrot.slane %v8142_v48, 4 }
 0x1e2   :  { %1659 = vst.msk [vmem:[#allocation2 + $0xb0] sm:$0xff] %vm1635_vm11, %v8062_v49  ;;  %v903_v57 = vrot.slane %v8142_v48, 5  ;;  %v904_v62 = vrot.slane %v8142_v48, 6 }
 0x1e3   :  { %v391_v13 = vpop.f32.mrf.mxu0 }
 0x1e4   :  { %v392_v51 = vadd.f32 %v8067_v58, %v391_v13 }
 0x1e6   :  { %v561_v61 = vmul.f32 0.01, %v392_v51  ;;  %vm504_vm2 = vcmp.ge.f32.partialorder %v392_v51, 0.0 }
 0x1e8   :  { %v8073_v3 = vld [vmem:[#allocation1] sm:$0xff]  ;;  %v618_v0 = vsel %vm504_vm2, %v392_v51, %v561_v61 }
 0x1e9   :  { %1307 = vst [vmem:[#allocation1] ss:$9 sm:$0xff] %v860_v63  ;;  %v905_v63 = vrot.slane %v8142_v48, 7  ;;  %v911_v16 = vrot.slane %v618_v0, 6  ;;  %v912_v17 = vrot.slane %v618_v0, 7 }
 0x1ea   :  { %1308 = vst [vmem:[#allocation1 + $0x1] ss:$9 sm:$0xff] %v861_v1  ;;  %v92_v1 = vld [vmem:[%s10503_s0 + $0x170] sm:$0xff] }
 0x1eb   :  { %1309 = vst [vmem:[#allocation1 + $0x2] ss:$9 sm:$0xff] %v862_v5  ;;  %7229 = vmatmul.msk.f32.gmra.mxu0 %vm111_vm1, %v92_v1  ;;  %v907_v5 = vrot.slane %v618_v0, 2  ;;  %v394_v8 = vpop.f32.mrf.mxu0 }
 0x1ec   :  { %1310 = vst [vmem:[#allocation1 + $0x3] ss:$9 sm:$0xff] %v863_v9  ;;  %v908_v9 = vrot.slane %v618_v0, 3 }
 0x1ed   :  { %1311 = vst [vmem:[#allocation1 + $0x4] ss:$9 sm:$0xff] %v612_v7 }
 0x1ee   :  { %1312 = vst [vmem:[#allocation1 + $0x5] ss:$9 sm:$0xff] %v864_v11  ;;  %v909_v11 = vrot.slane %v618_v0, 4 }
 0x1ef   :  { %1313 = vst [vmem:[#allocation1 + $0x6] ss:$9 sm:$0xff] %v865_v12  ;;  %v910_v12 = vrot.slane %v618_v0, 5 }
 0x1f0   :  { %1314 = vst [vmem:[#allocation1 + $0x7] ss:$9 sm:$0xff] %v866_v15  ;;  %v395_v15 = vadd.f32 %v8067_v58, %v394_v8  ;;  %v97_v8 = vld [vmem:[%s10503_s0 + $0x198] sm:$0xff] }
 0x1f1   :  { %1660 = vst.msk [vmem:[#allocation2 + $0xb8] sm:$0x7f] %vm1637_vm12, %v8073_v3  ;;  %v906_v3 = vrot.slane %v618_v0, 1 }
 0x1f2   :  { %v562_v19 = vmul.f32 0.01, %v395_v15  ;;  %vm505_vm3 = vcmp.ge.f32.partialorder %v395_v15, 0.0 }
 0x1f4   :  { %v619_v21 = vsel %vm505_vm3, %v395_v15, %v562_v19 }
 0x1f5   :  { %v918_v40 = vrot.slane %v619_v21, 6  ;;  %v919_v55 = vrot.slane %v619_v21, 7 }
 0x1f7   :  { %v8093_v24 = vld [vmem:[#allocation1] sm:$0xff] }
 0x1f8   :  { %1316 = vst [vmem:[#allocation1] ss:$9 sm:$0xff] %v867_v22  ;;  %v93_v22 = vld [vmem:[%s10503_s0 + $0x178] sm:$0xff] }
 0x1f9   :  { %1317 = vst [vmem:[#allocation1 + $0x1] ss:$9 sm:$0xff] %v868_v42  ;;  %7230 = vmatmul.msk.f32.gmra.mxu0 %vm111_vm1, %v93_v22 }
 0x1fa   :  { %1318 = vst [vmem:[#allocation1 + $0x2] ss:$9 sm:$0xff] %v869_v2  ;;  %v914_v2 = vrot.slane %v619_v21, 2 }
 0x1fb   :  { %1319 = vst [vmem:[#allocation1 + $0x3] ss:$9 sm:$0xff] %v870_v26  ;;  %v915_v26 = vrot.slane %v619_v21, 3 }
 0x1fc   :  { %1320 = vst [vmem:[#allocation1 + $0x4] ss:$9 sm:$0xff] %v613_v28  ;;  %v397_v28 = vpop.f32.mrf.mxu0 }
 0x1fd   :  { %1321 = vst [vmem:[#allocation1 + $0x5] ss:$9 sm:$0xff] %v871_v53  ;;  %v916_v53 = vrot.slane %v619_v21, 4  ;;  %v398_v14 = vadd.f32 %v8067_v58, %v397_v28  ;;  %v98_v28 = vld [vmem:[%s10503_s0 + $0x1a0] sm:$0xff] }
 0x1fe   :  { %1322 = vst [vmem:[#allocation1 + $0x6] ss:$9 sm:$0xff] %v872_v27  ;;  %v917_v27 = vrot.slane %v619_v21, 5 }
 0x1ff   :  { %1661 = vst.msk [vmem:[#allocation2 + $0xc0] sm:$0xff] %vm1635_vm11, %v8093_v24  ;;  %v913_v24 = vrot.slane %v619_v21, 1  ;;  %v563_v29 = vmul.f32 0.01, %v398_v14  ;;  %vm506_vm4 = vcmp.ge.f32.partialorder %v398_v14, 0.0 }
 0x205   :  { %v1323_v32 = vld [vmem:[#allocation1] sm:$0xff] }
 0x206   :  { %1324 = vst [vmem:[#allocation1] ss:$9 sm:$0xff] %v873_v4  ;;  %v620_v4 = vsel %vm506_vm4, %v398_v14, %v563_v29 }
 0x207   :  { %1325 = vst [vmem:[#allocation1 + $0x1] ss:$9 sm:$0xff] %v874_v18  ;;  %v94_v18 = vld [vmem:[%s10503_s0 + $0x180] sm:$0xff]  ;;  %v924_v10 = vrot.slane %v620_v4, 5  ;;  %v925_v25 = vrot.slane %v620_v4, 6 }
 0x208   :  { %1326 = vst [vmem:[#allocation1 + $0x2] ss:$9 sm:$0xff] %v875_v46  ;;  %7231 = vmatmul.msk.f32.gmra.mxu0 %vm111_vm1, %v94_v18  ;;  %v920_v46 = vrot.slane %v620_v4, 1 }
 0x209   :  { %1327 = vst [vmem:[#allocation1 + $0x3] ss:$9 sm:$0xff] %v876_v33  ;;  %v921_v33 = vrot.slane %v620_v4, 2 }
 0x20a   :  { %1328 = vst [vmem:[#allocation1 + $0x4] ss:$9 sm:$0xff] %v877_v35  ;;  %v922_v35 = vrot.slane %v620_v4, 3 }
 0x20b   :  { %1329 = vst [vmem:[#allocation1 + $0x5] ss:$9 sm:$0xff] %v614_v34  ;;  %v400_v34 = vpop.f32.mrf.mxu0 }
 0x20c   :  { %1330 = vst [vmem:[#allocation1 + $0x6] ss:$9 sm:$0xff] %v878_v60  ;;  %v923_v60 = vrot.slane %v620_v4, 4 }
 0x20d   :  { %1331 = vst [vmem:[#allocation1 + $0x7] ss:$9 sm:$0xff] %v879_v36  ;;  %v401_v36 = vadd.f32 %v8067_v58, %v400_v34 }
 0x20e   :  { %1662 = vst.msk [vmem:[#allocation2 + $0xc8] sm:$0x7f] %vm1637_vm12, %v1323_v32 }
 0x20f   :  { %v564_v37 = vmul.f32 0.01, %v401_v36  ;;  %vm507_vm5 = vcmp.ge.f32.partialorder %v401_v36, 0.0 }
 0x211   :  { %v621_v39 = vsel %vm507_vm5, %v401_v36, %v564_v37 }
 0x212   :  { %v927_v52 = vrot.slane %v621_v39, 1  ;;  %v930_v41 = vrot.slane %v621_v39, 4 }
 0x214   :  { %v1332_v44 = vld [vmem:[#allocation1] sm:$0xff] }
 0x215   :  { %1333 = vst [vmem:[#allocation1] ss:$9 sm:$0xff] %v880_v43  ;;  %v95_v43 = vld [vmem:[%s10503_s0 + $0x188] sm:$0xff] }
 0x216   :  { %1334 = vst [vmem:[#allocation1 + $0x1] ss:$9 sm:$0xff] %v881_v38  ;;  %v926_v38 = vrot.slane %v620_v4, 7  ;;  %7232 = vmatmul.msk.f32.gmra.mxu0 %vm111_vm1, %v95_v43 }
 0x217   :  { %1335 = vst [vmem:[#allocation1 + $0x2] ss:$9 sm:$0xff] %v882_v6  ;;  %v928_v6 = vrot.slane %v621_v39, 2 }
 0x218   :  { %1336 = vst [vmem:[#allocation1 + $0x3] ss:$9 sm:$0xff] %v883_v45  ;;  %v403_v45 = vpop.f32.mrf.mxu0 }
 0x219   :  { %1337 = vst [vmem:[#allocation1 + $0x4] ss:$9 sm:$0xff] %v884_v47  ;;  %v929_v47 = vrot.slane %v621_v39, 3  ;;  %v404_v13 = vadd.f32 %v8067_v58, %v403_v45 }
 0x21a   :  { %1338 = vst [vmem:[#allocation1 + $0x5] ss:$9 sm:$0xff] %v8138_v23 }
 0x21b   :  { %1339 = vst [vmem:[#allocation1 + $0x6] ss:$9 sm:$0xff] %v885_v59  ;;  %v931_v59 = vrot.slane %v621_v39, 5  ;;  %v565_v51 = vmul.f32 0.01, %v404_v13  ;;  %vm508_vm6 = vcmp.ge.f32.partialorder %v404_v13, 0.0 }
 0x21c   :  { %1663 = vst.msk [vmem:[#allocation2 + $0xd0] sm:$0xff] %vm1635_vm11, %v1332_v44 }
 0x21d   :  { %v622_v54 = vsel %vm508_vm6, %v404_v13, %v565_v51 }
 0x220   :  { %v406_v61 = vpop.f32.mrf.mxu0 }
 0x221   :  { %v407_v1 = vadd.f32 %v8067_v58, %v406_v61 }
 0x222   :  { %v1340_v49 = vld [vmem:[#allocation1] sm:$0xff] }
 0x223   :  { %1341 = vst [vmem:[#allocation1] ss:$9 sm:$0xff] %v899_v50  ;;  %v932_v50 = vrot.slane %v621_v39, 6  ;;  %vm509_vm7 = vcmp.ge.f32.partialorder %v407_v1, 0.0 }
 0x224   :  { %1342 = vst [vmem:[#allocation1 + $0x1] ss:$9 sm:$0xff] %v900_v20  ;;  %v96_v20 = vld [vmem:[%s10503_s0 + $0x190] sm:$0xff] }
 0x225   :  { %1343 = vst [vmem:[#allocation1 + $0x2] ss:$9 sm:$0xff] %v901_v30  ;;  %v933_v30 = vrot.slane %v621_v39, 7  ;;  %7233 = vmatmul.msk.f32.gmra.mxu0 %vm111_vm1, %v96_v20 }
 0x226   :  { %1344 = vst [vmem:[#allocation1 + $0x3] ss:$9 sm:$0xff] %v902_v56  ;;  %v934_v56 = vrot.slane %v622_v54, 1 }
 0x227   :  { %1345 = vst [vmem:[#allocation1 + $0x4] ss:$9 sm:$0xff] %v903_v57  ;;  %v935_v57 = vrot.slane %v622_v54, 2 }
 0x228   :  { %1346 = vst [vmem:[#allocation1 + $0x5] ss:$9 sm:$0xff] %v904_v62  ;;  %v936_v62 = vrot.slane %v622_v54, 3 }
 0x229   :  { %1347 = vst [vmem:[#allocation1 + $0x6] ss:$9 sm:$0xff] %v905_v63  ;;  %v937_v63 = vrot.slane %v622_v54, 4 }
 0x22a   :  { %1348 = vst [vmem:[#allocation1 + $0x7] ss:$9 sm:$0xff] %v618_v0  ;;  %v938_v0 = vrot.slane %v622_v54, 5 }
 0x22b   :  { %1664 = vst.msk [vmem:[#allocation2 + $0xd8] sm:$0x7f] %vm1637_vm12, %v1340_v49 }
 0x22d   :  { %7234 = vmatmul.msk.f32.gmra.mxu0 %vm111_vm1, %v97_v8 }
 0x231   :  { %v1349_v7 = vld [vmem:[#allocation1] sm:$0xff] }
 0x232   :  { %1350 = vst [vmem:[#allocation1] ss:$9 sm:$0xff] %v906_v3  ;;  %v566_v3 = vmul.f32 0.01, %v407_v1 }
 0x233   :  { %1351 = vst [vmem:[#allocation1 + $0x1] ss:$9 sm:$0xff] %v907_v5  ;;  %v939_v5 = vrot.slane %v622_v54, 6 }
 0x234   :  { %1352 = vst [vmem:[#allocation1 + $0x2] ss:$9 sm:$0xff] %v908_v9  ;;  %v940_v9 = vrot.slane %v622_v54, 7 }
 0x235   :  { %1353 = vst [vmem:[#allocation1 + $0x3] ss:$9 sm:$0xff] %v909_v11  ;;  %7235 = vmatmul.msk.f32.gmra.mxu0 %vm111_vm1, %v98_v28 }
 0x236   :  { %1354 = vst [vmem:[#allocation1 + $0x4] ss:$9 sm:$0xff] %v910_v12 }
 0x237   :  { %1355 = vst [vmem:[#allocation1 + $0x5] ss:$9 sm:$0xff] %v911_v16  ;;  %v409_v16 = vpop.f32.mrf.mxu0 }
 0x238   :  { %1356 = vst [vmem:[#allocation1 + $0x6] ss:$9 sm:$0xff] %v912_v17  ;;  %v410_v22 = vadd.f32 %v8067_v58, %v409_v16 }
 0x239   :  { %1665 = vst.msk [vmem:[#allocation2 + $0x100] sm:$0xff] %vm1635_vm11, %v1349_v7  ;;  %v623_v7 = vsel %vm509_vm7, %v407_v1, %v566_v3 }
 0x23a   :  { %v941_v12 = vrot.slane %v623_v7, 1  ;;  %v942_v15 = vrot.slane %v623_v7, 2  ;;  %v943_v17 = vrot.slane %v623_v7, 3  ;;  %v944_v19 = vrot.slane %v623_v7, 4 }
 0x23b   :  { %vm510_vm8 = vcmp.ge.f32.partialorder %v410_v22, 0.0 }
 0x23f   :  { %v1357_v42 = vld [vmem:[#allocation1] sm:$0xff] }
 0x240   :  { %1358 = vst [vmem:[#allocation1] ss:$9 sm:$0xff] %v619_v21  ;;  %v945_v21 = vrot.slane %v623_v7, 5 }
 0x241   :  { %1359 = vst [vmem:[#allocation1 + $0x1] ss:$9 sm:$0xff] %v913_v24  ;;  %v946_v24 = vrot.slane %v623_v7, 6 }
 0x242   :  { %1360 = vst [vmem:[#allocation1 + $0x2] ss:$9 sm:$0xff] %v914_v2 }
 0x243   :  { %1361 = vst [vmem:[#allocation1 + $0x3] ss:$9 sm:$0xff] %v915_v26  ;;  %v947_v26 = vrot.slane %v623_v7, 7 }
 0x244   :  { %1362 = vst [vmem:[#allocation1 + $0x4] ss:$9 sm:$0xff] %v916_v53 }
 0x245   :  { %1363 = vst [vmem:[#allocation1 + $0x5] ss:$9 sm:$0xff] %v917_v27 }
 0x246   :  { %1364 = vst [vmem:[#allocation1 + $0x6] ss:$9 sm:$0xff] %v918_v40  ;;  %v412_v40 = vpop.f32.mrf.mxu0 }
 0x247   :  { %1365 = vst [vmem:[#allocation1 + $0x7] ss:$9 sm:$0xff] %v919_v55 }
 0x248   :  { %1666 = vst.msk [vmem:[#allocation2 + $0x108] sm:$0x7f] %vm1637_vm12, %v1357_v42  ;;  %v567_v42 = vmul.f32 0.01, %v410_v22 }
 0x24a   :  { %v624_v2 = vsel %vm510_vm8, %v410_v22, %v567_v42 }
 0x24b   :  { %v948_v27 = vrot.slane %v624_v2, 1  ;;  %v949_v14 = vrot.slane %v624_v2, 2  ;;  %v950_v55 = vrot.slane %v624_v2, 3  ;;  %v951_v29 = vrot.slane %v624_v2, 4 }
 0x24e   :  { %v1366_v32 = vld [vmem:[#allocation1] sm:$0xff] }
 0x24f   :  { %1367 = vst [vmem:[#allocation1] ss:$9 sm:$0xff] %v620_v4  ;;  %v413_v4 = vadd.f32 %v8067_v58, %v412_v40 }
 0x250   :  { %1368 = vst [vmem:[#allocation1 + $0x1] ss:$9 sm:$0xff] %v920_v46  ;;  %v953_v46 = vrot.slane %v624_v2, 6 }
 0x251   :  { %1369 = vst [vmem:[#allocation1 + $0x2] ss:$9 sm:$0xff] %v921_v33  ;;  %v568_v18 = vmul.f32 0.01, %v413_v4  ;;  %vm511_vm9 = vcmp.ge.f32.partialorder %v413_v4, 0.0 }
 0x252   :  { %1370 = vst [vmem:[#allocation1 + $0x3] ss:$9 sm:$0xff] %v922_v35  ;;  %v99_v35 = vld [vmem:[%s10503_s0 + $0x1a8] sm:$0xff] }
 0x253   :  { %1371 = vst [vmem:[#allocation1 + $0x4] ss:$9 sm:$0xff] %v923_v60  ;;  %v625_v34 = vsel %vm511_vm9, %v413_v4, %v568_v18  ;;  %v954_v60 = vrot.slane %v624_v2, 7  ;;  %7236 = vmatmul.msk.f32.gmra.mxu0 %vm111_vm1, %v99_v35 }
 0x254   :  { %1372 = vst [vmem:[#allocation1 + $0x5] ss:$9 sm:$0xff] %v924_v10  ;;  %v955_v10 = vrot.slane %v625_v34, 1  ;;  %v956_v36 = vrot.slane %v625_v34, 2  ;;  %v957_v37 = vrot.slane %v625_v34, 3 }
 0x255   :  { %1373 = vst [vmem:[#allocation1 + $0x6] ss:$9 sm:$0xff] %v925_v25  ;;  %v415_v25 = vpop.f32.mrf.mxu0 }
 0x256   :  { %1667 = vst.msk [vmem:[#allocation2 + $0x110] sm:$0xff] %vm1635_vm11, %v1366_v32  ;;  %v952_v32 = vrot.slane %v624_v2, 5  ;;  %v416_v43 = vadd.f32 %v8067_v58, %v415_v25  ;;  %v102_v25 = vld [vmem:[%s10503_s0 + $0x1c0] sm:$0x3] }
 0x258   :  { %vm512_vm10 = vcmp.ge.f32.partialorder %v416_v43, 0.0 }
 0x25c   :  { %v1374_v44 = vld [vmem:[#allocation1] sm:$0xff] }
 0x25d   :  { %1375 = vst [vmem:[#allocation1] ss:$9 sm:$0xff] %v926_v38  ;;  %v569_v38 = vmul.f32 0.01, %v416_v43 }
 0x25e   :  { %1376 = vst [vmem:[#allocation1 + $0x1] ss:$9 sm:$0xff] %v621_v39  ;;  %v958_v39 = vrot.slane %v625_v34, 4 }
 0x25f   :  { %1377 = vst [vmem:[#allocation1 + $0x2] ss:$9 sm:$0xff] %v927_v52  ;;  %v960_v52 = vrot.slane %v625_v34, 6  ;;  %v626_v45 = vsel %vm512_vm10, %v416_v43, %v569_v38 }
 0x260   :  { %1378 = vst [vmem:[#allocation1 + $0x3] ss:$9 sm:$0xff] %v928_v6  ;;  %v963_v13 = vrot.slane %v626_v45, 2  ;;  %v964_v51 = vrot.slane %v626_v45, 3 }
 0x261   :  { %1379 = vst [vmem:[#allocation1 + $0x4] ss:$9 sm:$0xff] %v929_v47  ;;  %v100_v47 = vld [vmem:[%s10503_s0 + $0x1b0] sm:$0xff] }
 0x262   :  { %1380 = vst [vmem:[#allocation1 + $0x5] ss:$9 sm:$0xff] %v930_v41  ;;  %v961_v41 = vrot.slane %v625_v34, 7  ;;  %7237 = vmatmul.msk.f32.gmra.mxu0 %vm111_vm1, %v100_v47 }
 0x263   :  { %1381 = vst [vmem:[#allocation1 + $0x6] ss:$9 sm:$0xff] %v931_v59  ;;  %v962_v59 = vrot.slane %v626_v45, 1 }
 0x264   :  { %1382 = vst [vmem:[#allocation1 + $0x7] ss:$9 sm:$0xff] %v932_v50  ;;  %v418_v50 = vpop.f32.mrf.mxu0 }
 0x265   :  { %1668 = vst.msk [vmem:[#allocation2 + $0x118] sm:$0x7f] %vm1637_vm12, %v1374_v44  ;;  %v959_v44 = vrot.slane %v625_v34, 5 }
 0x26b   :  { %v1383_v49 = vld [vmem:[#allocation1] sm:$0xff] }
 0x26c   :  { %1384 = vst [vmem:[#allocation1] ss:$9 sm:$0xff] %v933_v30  ;;  %v965_v30 = vrot.slane %v626_v45, 4  ;;  %v421_v1 = vpop.f32.mrf.mxu0 }
 0x26d   :  { %1385 = vst [vmem:[#allocation1 + $0x1] ss:$9 sm:$0xff] %v622_v54  ;;  %v419_v54 = vadd.f32 %v8067_v58, %v418_v50 }
 0x26e   :  { %1386 = vst [vmem:[#allocation1 + $0x2] ss:$9 sm:$0xff] %v934_v56 }
 0x26f   :  { %1387 = vst [vmem:[#allocation1 + $0x3] ss:$9 sm:$0xff] %v935_v57  ;;  %v570_v20 = vmul.f32 0.01, %v419_v54  ;;  %vm513_vm13 = vcmp.ge.f32.partialorder %v419_v54, 0.0  ;;  %v967_v57 = vrot.slane %v626_v45, 6 }
 0x270   :  { %1388 = vst [vmem:[#allocation1 + $0x4] ss:$9 sm:$0xff] %v936_v62  ;;  %v968_v62 = vrot.slane %v626_v45, 7 }
 0x271   :  { %1389 = vst [vmem:[#allocation1 + $0x5] ss:$9 sm:$0xff] %v937_v63  ;;  %v627_v61 = vsel %vm513_vm13, %v419_v54, %v570_v20 }
 0x272   :  { %1390 = vst [vmem:[#allocation1 + $0x6] ss:$9 sm:$0xff] %v938_v0  ;;  %v969_v63 = vrot.slane %v627_v61, 1  ;;  %v970_v0 = vrot.slane %v627_v61, 2  ;;  %v971_v3 = vrot.slane %v627_v61, 3  ;;  %v972_v8 = vrot.slane %v627_v61, 4 }
 0x273   :  { %1669 = vst.msk [vmem:[#allocation2 + $0x120] sm:$0xff] %vm1635_vm11, %v1383_v49  ;;  %v966_v49 = vrot.slane %v626_v45, 5  ;;  %v975_v16 = vrot.slane %v627_v61, 7 }
 0x279   :  { %v1391_v11 = vld [vmem:[#allocation1] sm:$0xff] }
 0x27a   :  { %1392 = vst [vmem:[#allocation1] ss:$9 sm:$0xff] %v939_v5  ;;  %v422_v5 = vadd.f32 %v8067_v58, %v421_v1 }
 0x27b   :  { %1393 = vst [vmem:[#allocation1 + $0x1] ss:$9 sm:$0xff] %v940_v9  ;;  %v973_v9 = vrot.slane %v627_v61, 5 }
 0x27c   :  { %1394 = vst [vmem:[#allocation1 + $0x2] ss:$9 sm:$0xff] %v623_v7  ;;  %v571_v7 = vmul.f32 0.01, %v422_v5  ;;  %vm514_vm14 = vcmp.ge.f32.partialorder %v422_v5, 0.0 }
 0x27d   :  { %1395 = vst [vmem:[#allocation1 + $0x3] ss:$9 sm:$0xff] %v941_v12  ;;  %v974_v12 = vrot.slane %v627_v61, 6 }
 0x27e   :  { %1396 = vst [vmem:[#allocation1 + $0x4] ss:$9 sm:$0xff] %v942_v15  ;;  %v628_v15 = vsel %vm514_vm14, %v422_v5, %v571_v7 }
 0x27f   :  { %1397 = vst [vmem:[#allocation1 + $0x5] ss:$9 sm:$0xff] %v943_v17  ;;  %v976_v17 = vrot.slane %v628_v15, 1  ;;  %v982_v40 = vrot.slane %v628_v15, 7 }
 0x280   :  { %1398 = vst [vmem:[#allocation1 + $0x6] ss:$9 sm:$0xff] %v944_v19  ;;  %v977_v19 = vrot.slane %v628_v15, 2 }
 0x281   :  { %1399 = vst [vmem:[#allocation1 + $0x7] ss:$9 sm:$0xff] %v945_v21  ;;  %v424_v21 = vpop.f32.mrf.mxu0 }
 0x282   :  { %1670 = vst.msk [vmem:[#allocation2 + $0x128] sm:$0x7f] %vm1637_vm12, %v1391_v11  ;;  %v425_v22 = vadd.f32 %v8067_v58, %v424_v21 }
 0x284   :  { %v572_v42 = vmul.f32 0.01, %v425_v22  ;;  %vm515_vm15 = vcmp.ge.f32.partialorder %v425_v22, 0.0 }
 0x288   :  { %v1400_v53 = vld [vmem:[#allocation1] sm:$0xff] }
 0x289   :  { %1401 = vst [vmem:[#allocation1] ss:$9 sm:$0xff] %v946_v24  ;;  %v978_v24 = vrot.slane %v628_v15, 3  ;;  %v427_v4 = vpop.f32.mrf.mxu0 }
 0x28a   :  { %1402 = vst [vmem:[#allocation1 + $0x1] ss:$9 sm:$0xff] %v947_v26  ;;  %v980_v26 = vrot.slane %v628_v15, 5  ;;  %v428_v18 = vadd.f32 %v8067_v58, %v427_v4 }
 0x28b   :  { %1403 = vst [vmem:[#allocation1 + $0x2] ss:$9 sm:$0xff] %v624_v2  ;;  %v979_v2 = vrot.slane %v628_v15, 4 }
 0x28c   :  { %1404 = vst [vmem:[#allocation1 + $0x3] ss:$9 sm:$0xff] %v948_v27  ;;  %v629_v27 = vsel %vm515_vm15, %v425_v22, %v572_v42  ;;  %vm516_vm0 = vcmp.ge.f32.partialorder %v428_v18, 0.0 }
 0x28d   :  { %1405 = vst [vmem:[#allocation1 + $0x4] ss:$9 sm:$0xff] %v949_v14  ;;  %v101_v14 = vld [vmem:[%s10503_s0 + $0x1b8] sm:$0xff]  ;;  %v987_v35 = vrot.slane %v629_v27, 5 }
 0x28e   :  { %1406 = vst [vmem:[#allocation1 + $0x5] ss:$9 sm:$0xff] %v950_v55  ;;  %7238 = vmatmul.msk.f32.gmra.mxu0 %vm111_vm1, %v101_v14  ;;  %v983_v55 = vrot.slane %v629_v27, 1 }
 0x28f   :  { %1407 = vst [vmem:[#allocation1 + $0x6] ss:$9 sm:$0xff] %v951_v29  ;;  %v984_v29 = vrot.slane %v629_v27, 2 }
 0x290   :  { %1671 = vst.msk [vmem:[#allocation2 + $0x130] sm:$0xff] %vm1635_vm11, %v1400_v53  ;;  %v981_v53 = vrot.slane %v628_v15, 6 }
 0x296   :  { %v1408_v33 = vld [vmem:[#allocation1] sm:$0xff]  ;;  %7239 = vmatmul.msk.f32.gmra.mxu0 %vm111_vm1, %v102_v25 }
 0x297   :  { %1409 = vst [vmem:[#allocation1] ss:$9 sm:$0xff] %v952_v32  ;;  %v573_v32 = vmul.f32 0.01, %v428_v18 }
 0x298   :  { %1410 = vst [vmem:[#allocation1 + $0x1] ss:$9 sm:$0xff] %v953_v46  ;;  %v985_v46 = vrot.slane %v629_v27, 3 }
 0x299   :  { %1411 = vst [vmem:[#allocation1 + $0x2] ss:$9 sm:$0xff] %v954_v60  ;;  %v988_v60 = vrot.slane %v629_v27, 6 }
 0x29a   :  { %1412 = vst [vmem:[#allocation1 + $0x3] ss:$9 sm:$0xff] %v625_v34 }
 0x29b   :  { %1413 = vst [vmem:[#allocation1 + $0x4] ss:$9 sm:$0xff] %v955_v10  ;;  %v630_v10 = vsel %vm516_vm0, %v428_v18, %v573_v32 }
 0x29c   :  { %1414 = vst [vmem:[#allocation1 + $0x5] ss:$9 sm:$0xff] %v956_v36  ;;  %v989_v36 = vrot.slane %v629_v27, 7  ;;  %v991_v38 = vrot.slane %v630_v10, 2  ;;  %v994_v47 = vrot.slane %v630_v10, 5 }
 0x29d   :  { %1415 = vst [vmem:[#allocation1 + $0x6] ss:$9 sm:$0xff] %v957_v37  ;;  %v990_v37 = vrot.slane %v630_v10, 1 }
 0x29e   :  { %1416 = vst [vmem:[#allocation1 + $0x7] ss:$9 sm:$0xff] %v958_v39  ;;  %v430_v39 = vpop.f32.mrf.mxu0 }
 0x29f   :  { %1672 = vst.msk [vmem:[#allocation2 + $0x138] sm:$0x7f] %vm1637_vm12, %v1408_v33  ;;  %v986_v33 = vrot.slane %v629_v27, 4  ;;  %v431_v43 = vadd.f32 %v8067_v58, %v430_v39 }
 0x2a1   :  { %vm517_vm2 = vcmp.ge.f32.partialorder %v431_v43, 0.0 }
 0x2a5   :  { %v1417_v6 = vld [vmem:[#allocation1] sm:$0xff] }
 0x2a6   :  { %1418 = vst [vmem:[#allocation1] ss:$9 sm:$0xff] %v959_v44  ;;  %v574_v44 = vmul.f32 0.01, %v431_v43 }
 0x2a7   :  { %1419 = vst [vmem:[#allocation1 + $0x1] ss:$9 sm:$0xff] %v960_v52  ;;  %v992_v52 = vrot.slane %v630_v10, 3 }
 0x2a8   :  { %1420 = vst [vmem:[#allocation1 + $0x2] ss:$9 sm:$0xff] %v961_v41  ;;  %v995_v41 = vrot.slane %v630_v10, 6 }
 0x2a9   :  { %1421 = vst [vmem:[#allocation1 + $0x3] ss:$9 sm:$0xff] %v626_v45  ;;  %v993_v45 = vrot.slane %v630_v10, 4 }
 0x2aa   :  { %1422 = vst [vmem:[#allocation1 + $0x4] ss:$9 sm:$0xff] %v962_v59  ;;  %v631_v59 = vsel %vm517_vm2, %v431_v43, %v574_v44 }
 0x2ab   :  { %1423 = vst [vmem:[#allocation1 + $0x5] ss:$9 sm:$0xff] %v963_v13  ;;  %v996_v13 = vrot.slane %v630_v10, 7  ;;  %v997_v50 = vrot.slane %v631_v59, 1  ;;  %v998_v20 = vrot.slane %v631_v59, 2 }
 0x2ac   :  { %1424 = vst [vmem:[#allocation1 + $0x6] ss:$9 sm:$0xff] %v964_v51  ;;  %v433_v51 = vpop.f32.mrf.mxu0 }
 0x2ad   :  { %1673 = vst.msk [vmem:[#allocation2 + $0x140] sm:$0xff] %vm1635_vm11, %v1417_v6  ;;  %v434_v54 = vadd.f32 %v8067_v58, %v433_v51 }
 0x2af   :  { %vm518_vm1 = vcmp.ge.f32.partialorder %v434_v54, 0.0 }
 0x2b3   :  { %v1425_v56 = vld [vmem:[#allocation1] sm:$0xff] }
 0x2b4   :  { %1426 = vst [vmem:[#allocation1] ss:$9 sm:$0xff] %v965_v30  ;;  %v999_v30 = vrot.slane %v631_v59, 3  ;;  %v436_v1 = vpop.f32.mrf.mxu0 }
 0x2b5   :  { %1427 = vst [vmem:[#allocation1 + $0x1] ss:$9 sm:$0xff] %v966_v49  ;;  %v437_v5 = vadd.f32 %v8067_v58, %v436_v1 }
 0x2b6   :  { %1428 = vst [vmem:[#allocation1 + $0x2] ss:$9 sm:$0xff] %v967_v57  ;;  %v1001_v57 = vrot.slane %v631_v59, 5 }
 0x2b7   :  { %1429 = vst [vmem:[#allocation1 + $0x3] ss:$9 sm:$0xff] %v968_v62  ;;  %v1002_v62 = vrot.slane %v631_v59, 6  ;;  %vm519_vm3 = vcmp.ge.f32.partialorder %v437_v5, 0.0 }
 0x2b8   :  { %1430 = vst [vmem:[#allocation1 + $0x4] ss:$9 sm:$0xff] %v627_v61  ;;  %v575_v61 = vmul.f32 0.01, %v434_v54 }
 0x2b9   :  { %1431 = vst [vmem:[#allocation1 + $0x5] ss:$9 sm:$0xff] %v969_v63  ;;  %v1003_v63 = vrot.slane %v631_v59, 7 }
 0x2ba   :  { %1432 = vst [vmem:[#allocation1 + $0x6] ss:$9 sm:$0xff] %v970_v0  ;;  %v632_v0 = vsel %vm518_vm1, %v434_v54, %v575_v61 }
 0x2bb   :  { %1433 = vst [vmem:[#allocation1 + $0x7] ss:$9 sm:$0xff] %v971_v3  ;;  %v1004_v3 = vrot.slane %v632_v0, 1  ;;  %v1005_v7 = vrot.slane %v632_v0, 2 }
 0x2bc   :  { %1674 = vst.msk [vmem:[#allocation2 + $0x148] sm:$0x7f] %vm1637_vm12, %v1425_v56  ;;  %v1000_v56 = vrot.slane %v631_v59, 4 }
 0x2c2   :  { %v1434_v11 = vld [vmem:[#allocation1] sm:$0xff] }
 0x2c3   :  { %1435 = vst [vmem:[#allocation1] ss:$9 sm:$0xff] %v972_v8 }
 0x2c4   :  { %1436 = vst [vmem:[#allocation1 + $0x1] ss:$9 sm:$0xff] %v973_v9  ;;  %v1006_v9 = vrot.slane %v632_v0, 3 }
 0x2c5   :  { %1437 = vst [vmem:[#allocation1 + $0x2] ss:$9 sm:$0xff] %v974_v12  ;;  %v1008_v12 = vrot.slane %v632_v0, 5 }
 0x2c6   :  { %1438 = vst [vmem:[#allocation1 + $0x3] ss:$9 sm:$0xff] %v975_v16  ;;  %v1009_v16 = vrot.slane %v632_v0, 6 }
 0x2c7   :  { %1439 = vst [vmem:[#allocation1 + $0x4] ss:$9 sm:$0xff] %v628_v15  ;;  %v576_v15 = vmul.f32 0.01, %v437_v5 }
 0x2c8   :  { %1440 = vst [vmem:[#allocation1 + $0x5] ss:$9 sm:$0xff] %v976_v17  ;;  %v1010_v17 = vrot.slane %v632_v0, 7 }
 0x2c9   :  { %1441 = vst [vmem:[#allocation1 + $0x6] ss:$9 sm:$0xff] %v977_v19  ;;  %v633_v19 = vsel %vm519_vm3, %v437_v5, %v576_v15 }
 0x2ca   :  { %1675 = vst.msk [vmem:[#allocation2 + $0x150] sm:$0xff] %vm1635_vm11, %v1434_v11  ;;  %v1007_v11 = vrot.slane %v632_v0, 4  ;;  %v1011_v21 = vrot.slane %v633_v19, 1  ;;  %v1012_v22 = vrot.slane %v633_v19, 2  ;;  %v1017_v14 = vrot.slane %v633_v19, 7 }
 0x2d0   :  { %v1442_v28 = vld [vmem:[#allocation1] sm:$0xff] }
 0x2d1   :  { %1443 = vst [vmem:[#allocation1] ss:$9 sm:$0xff] %v978_v24  ;;  %v439_v24 = vpop.f32.mrf.mxu0 }
 0x2d2   :  { %1444 = vst [vmem:[#allocation1 + $0x1] ss:$9 sm:$0xff] %v979_v2  ;;  %v1013_v2 = vrot.slane %v633_v19, 3 }
 0x2d3   :  { %1445 = vst [vmem:[#allocation1 + $0x2] ss:$9 sm:$0xff] %v980_v26  ;;  %v1015_v26 = vrot.slane %v633_v19, 5 }
 0x2d4   :  { %1446 = vst [vmem:[#allocation1 + $0x3] ss:$9 sm:$0xff] %v981_v53  ;;  %v440_v53 = vadd.f32 %v8067_v58, %v439_v24 }
 0x2d5   :  { %1447 = vst [vmem:[#allocation1 + $0x4] ss:$9 sm:$0xff] %v982_v40 }
 0x2d6   :  { %1448 = vst [vmem:[#allocation1 + $0x5] ss:$9 sm:$0xff] %v629_v27  ;;  %v1016_v27 = vrot.slane %v633_v19, 6  ;;  %v577_v40 = vmul.f32 0.01, %v440_v53  ;;  %vm520_vm4 = vcmp.ge.f32.partialorder %v440_v53, 0.0 }
 0x2d7   :  { %1449 = vst [vmem:[#allocation1 + $0x6] ss:$9 sm:$0xff] %v983_v55 }
 0x2d8   :  { %1450 = vst [vmem:[#allocation1 + $0x7] ss:$9 sm:$0xff] %v984_v29  ;;  %v634_v55 = vsel %vm520_vm4, %v440_v53, %v577_v40 }
 0x2d9   :  { %1676 = vst.msk [vmem:[#allocation2 + $0x158] sm:$0x7f] %vm1637_vm12, %v1442_v28  ;;  %v1014_v28 = vrot.slane %v633_v19, 4  ;;  %v1018_v4 = vrot.slane %v634_v55, 1  ;;  %v1019_v18 = vrot.slane %v634_v55, 2  ;;  %v442_v32 = vpop.f32.mrf.mxu0  ;;  %v1022_v58 = vrot.slane %v634_v55, 5 }
 0x2df   :  { %v1451_v34 = vld [vmem:[#allocation1] sm:$0xff] }
 0x2e0   :  { %1452 = vst [vmem:[#allocation1] ss:$9 sm:$0xff] %v985_v46  ;;  %v1020_v46 = vrot.slane %v634_v55, 3 }
 0x2e1   :  { %1453 = vst [vmem:[#allocation1 + $0x1] ss:$9 sm:$0xff] %v986_v33  ;;  %v1021_v33 = vrot.slane %v634_v55, 4 }
 0x2e2   :  { %1454 = vst [vmem:[#allocation1 + $0x2] ss:$9 sm:$0xff] %v987_v35 }
 0x2e3   :  { %1455 = vst [vmem:[#allocation1 + $0x3] ss:$9 sm:$0xff] %v988_v60  ;;  %v1023_v60 = vrot.slane %v634_v55, 6 }
 0x2e4   :  { %1456 = vst [vmem:[#allocation1 + $0x4] ss:$9 sm:$0xff] %v989_v36 }
 0x2e5   :  { %1457 = vst [vmem:[#allocation1 + $0x5] ss:$9 sm:$0xff] %v630_v10  ;;  %v1024_v10 = vrot.slane %v634_v55, 7 }
 0x2e6   :  { %1458 = vst [vmem:[#allocation1 + $0x6] ss:$9 sm:$0xff] %v990_v37 }
 0x2e7   :  { %1677 = vst.msk [vmem:[#allocation2 + $0x160] sm:$0xff] %vm1635_vm11, %v1451_v34  ;;  %v8247_v34 = vld [vmem:[%s10504_s2] ss:$0 sm:$0xff] }
 0x2e8   :  { %v443_v35 = vadd.f32 %v8247_v34, %v442_v32 }
 0x2ea   :  { %v578_v36 = vmul.f32 0.01, %v443_v35  ;;  %vm521_vm5 = vcmp.ge.f32.partialorder %v443_v35, 0.0 }
 0x2ec   :  { %v635_v25 = vsel %vm521_vm5, %v443_v35, %v578_v36 }
 0x2ed   :  { %v1459_v6 = vld [vmem:[#allocation1] sm:$0xff]  ;;  %v1025_v39 = vrot.slane %v635_v25, 1  ;;  %v1026_v43 = vrot.slane %v635_v25, 2  ;;  %v1027_v44 = vrot.slane %v635_v25, 3 }
 0x2ee   :  { %1460 = vst [vmem:[#allocation1] ss:$9 sm:$0xff] %v991_v38  ;;  %v445_v38 = vpop.f32.mrf.mxu0 }
 0x2ef   :  { %1461 = vst [vmem:[#allocation1 + $0x1] ss:$9 sm:$0xff] %v992_v52  ;;  %v1028_v52 = vrot.slane %v635_v25, 4 }
 0x2f0   :  { %1462 = vst [vmem:[#allocation1 + $0x2] ss:$9 sm:$0xff] %v993_v45  ;;  %v446_v45 = vadd.f32 %v8247_v34, %v445_v38 }
 0x2f1   :  { %1463 = vst [vmem:[#allocation1 + $0x3] ss:$9 sm:$0xff] %v994_v47  ;;  %v1030_v47 = vrot.slane %v635_v25, 6 }
 0x2f2   :  { %1464 = vst [vmem:[#allocation1 + $0x4] ss:$9 sm:$0xff] %v995_v41  ;;  %v579_v41 = vmul.f32 0.01, %v446_v45  ;;  %vm522_vm6 = vcmp.ge.f32.partialorder %v446_v45, 0.0 }
 0x2f3   :  { %1465 = vst [vmem:[#allocation1 + $0x5] ss:$9 sm:$0xff] %v996_v13  ;;  %v1031_v13 = vrot.slane %v635_v25, 7 }
 0x2f4   :  { %1466 = vst [vmem:[#allocation1 + $0x6] ss:$9 sm:$0xff] %v631_v59  ;;  %v636_v59 = vsel %vm522_vm6, %v446_v45, %v579_v41 }
 0x2f5   :  { %1467 = vst [vmem:[#allocation1 + $0x7] ss:$9 sm:$0xff] %v997_v50  ;;  %v1032_v51 = vrot.slane %v636_v59, 1  ;;  %v1033_v54 = vrot.slane %v636_v59, 2  ;;  %v1037_v61 = vrot.slane %v636_v59, 6 }
 0x2f6   :  { %1678 = vst.msk [vmem:[#allocation2 + $0x168] sm:$0x7f] %vm1637_vm12, %v1459_v6  ;;  %v1029_v6 = vrot.slane %v635_v25, 5 }
 0x2fc   :  { %v1468_v49 = vld [vmem:[#allocation1] sm:$0xff] }
 0x2fd   :  { %1469 = vst [vmem:[#allocation1] ss:$9 sm:$0xff] %v998_v20  ;;  %v448_v20 = vpop.f32.mrf.mxu0 }
 0x2fe   :  { %1470 = vst [vmem:[#allocation1 + $0x1] ss:$9 sm:$0xff] %v999_v30  ;;  %v1034_v30 = vrot.slane %v636_v59, 3 }
 0x2ff   :  { %1471 = vst [vmem:[#allocation1 + $0x2] ss:$9 sm:$0xff] %v1000_v56  ;;  %v1036_v56 = vrot.slane %v636_v59, 5 }
 0x300   :  { %1472 = vst [vmem:[#allocation1 + $0x3] ss:$9 sm:$0xff] %v1001_v57  ;;  %v449_v57 = vadd.f32 %v8247_v34, %v448_v20 }
 0x301   :  { %1473 = vst [vmem:[#allocation1 + $0x4] ss:$9 sm:$0xff] %v1002_v62 }
 0x302   :  { %1474 = vst [vmem:[#allocation1 + $0x5] ss:$9 sm:$0xff] %v1003_v63  ;;  %v580_v62 = vmul.f32 0.01, %v449_v57  ;;  %vm523_vm7 = vcmp.ge.f32.partialorder %v449_v57, 0.0 }
 0x303   :  { %1475 = vst [vmem:[#allocation1 + $0x6] ss:$9 sm:$0xff] %v632_v0  ;;  %v1038_v0 = vrot.slane %v636_v59, 7 }
 0x304   :  { %1679 = vst.msk [vmem:[#allocation2 + $0x170] sm:$0xff] %vm1635_vm11, %v1468_v49  ;;  %v1035_v49 = vrot.slane %v636_v59, 4  ;;  %v637_v63 = vsel %vm523_vm7, %v449_v57, %v580_v62 }
 0x305   :  { %v1040_v5 = vrot.slane %v637_v63, 2 }
 0x30a   :  { %v1476_v8 = vld [vmem:[#allocation1] sm:$0xff] }
 0x30b   :  { %1477 = vst [vmem:[#allocation1] ss:$9 sm:$0xff] %v1004_v3  ;;  %v1039_v3 = vrot.slane %v637_v63, 1 }
 0x30c   :  { %1478 = vst [vmem:[#allocation1 + $0x1] ss:$9 sm:$0xff] %v1005_v7  ;;  %v451_v7 = vpop.f32.mrf.mxu0 }
 0x30d   :  { %1479 = vst [vmem:[#allocation1 + $0x2] ss:$9 sm:$0xff] %v1006_v9  ;;  %v1042_v9 = vrot.slane %v637_v63, 4 }
 0x30e   :  { %1480 = vst [vmem:[#allocation1 + $0x3] ss:$9 sm:$0xff] %v1007_v11  ;;  %v1043_v11 = vrot.slane %v637_v63, 5 }
 0x30f   :  { %1481 = vst [vmem:[#allocation1 + $0x4] ss:$9 sm:$0xff] %v1008_v12  ;;  %v452_v12 = vadd.f32 %v8247_v34, %v451_v7 }
 0x310   :  { %1482 = vst [vmem:[#allocation1 + $0x5] ss:$9 sm:$0xff] %v1009_v16  ;;  %v1044_v16 = vrot.slane %v637_v63, 6 }
 0x311   :  { %1483 = vst [vmem:[#allocation1 + $0x6] ss:$9 sm:$0xff] %v1010_v17  ;;  %v581_v15 = vmul.f32 0.01, %v452_v12  ;;  %vm524_vm8 = vcmp.ge.f32.partialorder %v452_v12, 0.0 }
 0x312   :  { %1484 = vst [vmem:[#allocation1 + $0x7] ss:$9 sm:$0xff] %v633_v19  ;;  %v1045_v19 = vrot.slane %v637_v63, 7 }
 0x313   :  { %1680 = vst.msk [vmem:[#allocation2 + $0x178] sm:$0x7f] %vm1637_vm12, %v1476_v8  ;;  %v1041_v8 = vrot.slane %v637_v63, 3  ;;  %v638_v17 = vsel %vm524_vm8, %v452_v12, %v581_v15 }
 0x314   :  { %v454_v24 = vpop.f32.mrf.mxu0 }
 0x315   :  { %v455_v53 = vadd.f32 %v8247_v34, %v454_v24  ;;  %v386_v24 = vadd.f32 %v8247_v34, %v8116_v31 }
 0x317   :  { %vm525_vm9 = vcmp.ge.f32.partialorder %v455_v53, 0.0  ;;  %vm502_vm0 = vcmp.ge.f32.partialorder %v386_v24, 0.0 }
 0x319   :  { %v1485_v42 = vld [vmem:[#allocation1] sm:$0xff] }
 0x31a   :  { %1486 = vst [vmem:[#allocation1] ss:$9 sm:$0xff] %v1011_v21 }
 0x31b   :  { %1487 = vst [vmem:[#allocation1 + $0x1] ss:$9 sm:$0xff] %v1012_v22  ;;  %v1046_v22 = vrot.slane %v638_v17, 1 }
 0x31c   :  { %1488 = vst [vmem:[#allocation1 + $0x2] ss:$9 sm:$0xff] %v1013_v2  ;;  %v1048_v2 = vrot.slane %v638_v17, 3  ;;  %v457_v32 = vpop.f32.mrf.mxu0 }
 0x31d   :  { %1489 = vst [vmem:[#allocation1 + $0x3] ss:$9 sm:$0xff] %v1014_v28  ;;  %v1049_v28 = vrot.slane %v638_v17, 4 }
 0x31e   :  { %1490 = vst [vmem:[#allocation1 + $0x4] ss:$9 sm:$0xff] %v1015_v26  ;;  %v1050_v26 = vrot.slane %v638_v17, 5 }
 0x31f   :  { %1491 = vst [vmem:[#allocation1 + $0x5] ss:$9 sm:$0xff] %v1016_v27  ;;  %v582_v27 = vmul.f32 0.01, %v455_v53 }
 0x320   :  { %1492 = vst [vmem:[#allocation1 + $0x6] ss:$9 sm:$0xff] %v1017_v14  ;;  %v1051_v14 = vrot.slane %v638_v17, 6 }
 0x321   :  { %1681 = vst.msk [vmem:[#allocation2 + $0x180] sm:$0xff] %vm1635_vm11, %v1485_v42  ;;  %v1047_v42 = vrot.slane %v638_v17, 2  ;;  %v639_v40 = vsel %vm525_vm9, %v455_v53, %v582_v27  ;;  %v888_v27 = vrot.slane %v8138_v23, 4 }
 0x324   :  { %v460_v38 = vpop.f32.mrf.mxu0 }
 0x327   :  { %v1493_v29 = vld [vmem:[#allocation1] sm:$0xff] }
 0x328   :  { %1494 = vst [vmem:[#allocation1] ss:$9 sm:$0xff] %v634_v55  ;;  %v1052_v55 = vrot.slane %v638_v17, 7 }
 0x329   :  { %1495 = vst [vmem:[#allocation1 + $0x1] ss:$9 sm:$0xff] %v1018_v4  ;;  %v1053_v4 = vrot.slane %v639_v40, 1 }
 0x32a   :  { %1496 = vst [vmem:[#allocation1 + $0x2] ss:$9 sm:$0xff] %v1019_v18  ;;  %v1054_v18 = vrot.slane %v639_v40, 2 }
 0x32b   :  { %1497 = vst [vmem:[#allocation1 + $0x3] ss:$9 sm:$0xff] %v1020_v46  ;;  %v1055_v46 = vrot.slane %v639_v40, 3 }
 0x32c   :  { %1498 = vst [vmem:[#allocation1 + $0x4] ss:$9 sm:$0xff] %v1021_v33  ;;  %v1056_v33 = vrot.slane %v639_v40, 4  ;;  %v463_v20 = vpop.f32.mrf.mxu0 }
 0x32d   :  { %1499 = vst [vmem:[#allocation1 + $0x5] ss:$9 sm:$0xff] %v1022_v58  ;;  %v458_v58 = vadd.f32 %v8247_v34, %v457_v32 }
 0x32e   :  { %1500 = vst [vmem:[#allocation1 + $0x6] ss:$9 sm:$0xff] %v1023_v60  ;;  %v1057_v60 = vrot.slane %v639_v40, 5 }
 0x32f   :  { %1501 = vst [vmem:[#allocation1 + $0x7] ss:$9 sm:$0xff] %v1024_v10  ;;  %v583_v35 = vmul.f32 0.01, %v458_v58  ;;  %vm526_vm10 = vcmp.ge.f32.partialorder %v458_v58, 0.0  ;;  %v1058_v10 = vrot.slane %v639_v40, 6 }
 0x330   :  { %1682 = vst.msk [vmem:[#allocation2 + $0x188] sm:$0x7f] %vm1637_vm12, %v1493_v29 }
 0x334   :  { %v466_v7 = vpop.f32.mrf.mxu0 }
 0x336   :  { %v1502_v37 = vld [vmem:[#allocation1] sm:$0xff] }
 0x337   :  { %1503 = vst [vmem:[#allocation1] ss:$9 sm:$0xff] %v635_v25  ;;  %v640_v25 = vsel %vm526_vm10, %v458_v58, %v583_v35 }
 0x338   :  { %1504 = vst [vmem:[#allocation1 + $0x1] ss:$9 sm:$0xff] %v1025_v39  ;;  %v1060_v39 = vrot.slane %v640_v25, 1  ;;  %v1065_v41 = vrot.slane %v640_v25, 6 }
 0x339   :  { %1505 = vst [vmem:[#allocation1 + $0x2] ss:$9 sm:$0xff] %v1026_v43  ;;  %v1061_v43 = vrot.slane %v640_v25, 2 }
 0x33a   :  { %1506 = vst [vmem:[#allocation1 + $0x3] ss:$9 sm:$0xff] %v1027_v44  ;;  %v1062_v44 = vrot.slane %v640_v25, 3 }
 0x33b   :  { %1507 = vst [vmem:[#allocation1 + $0x4] ss:$9 sm:$0xff] %v1028_v52  ;;  %v1063_v52 = vrot.slane %v640_v25, 4 }
 0x33c   :  { %1508 = vst [vmem:[#allocation1 + $0x5] ss:$9 sm:$0xff] %v1029_v6  ;;  %v461_v6 = vadd.f32 %v8247_v34, %v460_v38 }
 0x33d   :  { %1509 = vst [vmem:[#allocation1 + $0x6] ss:$9 sm:$0xff] %v1030_v47  ;;  %v1064_v47 = vrot.slane %v640_v25, 5 }
 0x33e   :  { %1683 = vst.msk [vmem:[#allocation2 + $0x190] sm:$0xff] %vm1635_vm11, %v1502_v37  ;;  %v1059_v37 = vrot.slane %v639_v40, 7  ;;  %v584_v45 = vmul.f32 0.01, %v461_v6  ;;  %vm527_vm13 = vcmp.ge.f32.partialorder %v461_v6, 0.0 }
 0x344   :  { %v1510_v50 = vld [vmem:[#allocation1] sm:$0xff] }
 0x345   :  { %1511 = vst [vmem:[#allocation1] ss:$9 sm:$0xff] %v1031_v13  ;;  %v641_v13 = vsel %vm527_vm13, %v461_v6, %v584_v45 }
 0x346   :  { %1512 = vst [vmem:[#allocation1 + $0x1] ss:$9 sm:$0xff] %v636_v59  ;;  %v1070_v57 = vrot.slane %v641_v13, 4 }
 0x347   :  { %1513 = vst [vmem:[#allocation1 + $0x2] ss:$9 sm:$0xff] %v1032_v51  ;;  %v1067_v51 = vrot.slane %v641_v13, 1 }
 0x348   :  { %1514 = vst [vmem:[#allocation1 + $0x3] ss:$9 sm:$0xff] %v1033_v54  ;;  %v1068_v54 = vrot.slane %v641_v13, 2 }
 0x349   :  { %1515 = vst [vmem:[#allocation1 + $0x4] ss:$9 sm:$0xff] %v1034_v30  ;;  %v1069_v30 = vrot.slane %v641_v13, 3 }
 0x34a   :  { %1516 = vst [vmem:[#allocation1 + $0x5] ss:$9 sm:$0xff] %v1035_v49  ;;  %v464_v49 = vadd.f32 %v8247_v34, %v463_v20 }
 0x34b   :  { %1517 = vst [vmem:[#allocation1 + $0x6] ss:$9 sm:$0xff] %v1036_v56 }
 0x34c   :  { %1518 = vst [vmem:[#allocation1 + $0x7] ss:$9 sm:$0xff] %v1037_v61  ;;  %v585_v56 = vmul.f32 0.01, %v464_v49  ;;  %vm528_vm14 = vcmp.ge.f32.partialorder %v464_v49, 0.0  ;;  %v1071_v61 = vrot.slane %v641_v13, 5 }
 0x34d   :  { %1684 = vst.msk [vmem:[#allocation2 + $0x198] sm:$0x7f] %vm1637_vm12, %v1510_v50  ;;  %v1066_v50 = vrot.slane %v640_v25, 7 }
 0x353   :  { %v1519_v1 = vld [vmem:[#allocation1] sm:$0xff] }
 0x354   :  { %1520 = vst [vmem:[#allocation1] ss:$9 sm:$0xff] %v1038_v0  ;;  %v642_v0 = vsel %vm528_vm14, %v464_v49, %v585_v56 }
 0x355   :  { %1521 = vst [vmem:[#allocation1 + $0x1] ss:$9 sm:$0xff] %v637_v63  ;;  %v1072_v63 = vrot.slane %v641_v13, 6  ;;  %v1077_v12 = vrot.slane %v642_v0, 4  ;;  %v1078_v15 = vrot.slane %v642_v0, 5 }
 0x356   :  { %1522 = vst [vmem:[#allocation1 + $0x2] ss:$9 sm:$0xff] %v1039_v3  ;;  %v1074_v3 = vrot.slane %v642_v0, 1 }
 0x357   :  { %1523 = vst [vmem:[#allocation1 + $0x3] ss:$9 sm:$0xff] %v1040_v5  ;;  %v1075_v5 = vrot.slane %v642_v0, 2 }
 0x358   :  { %1524 = vst [vmem:[#allocation1 + $0x4] ss:$9 sm:$0xff] %v1041_v8  ;;  %v1076_v8 = vrot.slane %v642_v0, 3 }
 0x359   :  { %1525 = vst [vmem:[#allocation1 + $0x5] ss:$9 sm:$0xff] %v1042_v9  ;;  %v467_v9 = vadd.f32 %v8247_v34, %v466_v7 }
 0x35a   :  { %1526 = vst [vmem:[#allocation1 + $0x6] ss:$9 sm:$0xff] %v1043_v11 }
 0x35b   :  { %1685 = vst.msk [vmem:[#allocation2 + $0x1a0] sm:$0xff] %vm1635_vm11, %v1519_v1  ;;  %v1073_v1 = vrot.slane %v641_v13, 7  ;;  %v586_v11 = vmul.f32 0.01, %v467_v9  ;;  %vm529_vm15 = vcmp.ge.f32.partialorder %v467_v9, 0.0 }
 0x361   :  { %v1527_v21 = vld [vmem:[#allocation1] sm:$0xff] }
 0x362   :  { %1528 = vst [vmem:[#allocation1] ss:$9 sm:$0xff] %v1044_v16 }
 0x363   :  { %1529 = vst [vmem:[#allocation1 + $0x1] ss:$9 sm:$0xff] %v1045_v19  ;;  %v643_v19 = vsel %vm529_vm15, %v467_v9, %v586_v11  ;;  %v1881_v11 = vld [vmem:[#allocation2 + $0x41] ss:$2 sm:$0x7f] }
 0x364   :  { %1530 = vst [vmem:[#allocation1 + $0x2] ss:$9 sm:$0xff] %v638_v17  ;;  %v1079_v17 = vrot.slane %v642_v0, 6 }
 0x365   :  { %1531 = vst [vmem:[#allocation1 + $0x3] ss:$9 sm:$0xff] %v1046_v22  ;;  %v1081_v22 = vrot.slane %v643_v19, 1 }
 0x366   :  { %1532 = vst [vmem:[#allocation1 + $0x4] ss:$9 sm:$0xff] %v1047_v42  ;;  %v1082_v42 = vrot.slane %v643_v19, 2 }
 0x367   :  { %1533 = vst [vmem:[#allocation1 + $0x5] ss:$9 sm:$0xff] %v1048_v2  ;;  %v886_v2 = vrot.slane %v8138_v23, 2 }
 0x368   :  { %1534 = vst [vmem:[#allocation1 + $0x6] ss:$9 sm:$0xff] %v1049_v28  ;;  %v559_v28 = vmul.f32 0.01, %v386_v24 }
 0x369   :  { %1535 = vst [vmem:[#allocation1 + $0x7] ss:$9 sm:$0xff] %v1050_v26  ;;  %v887_v26 = vrot.slane %v8138_v23, 3 }
 0x36a   :  { %1686 = vst.msk [vmem:[#allocation2 + $0x1a8] sm:$0x7f] %vm1637_vm12, %v1527_v21  ;;  %v1080_v21 = vrot.slane %v642_v0, 7 }
 0x370   :  { %v1536_v29 = vld [vmem:[#allocation1] sm:$0xff] }
 0x371   :  { %1537 = vst [vmem:[#allocation1] ss:$9 sm:$0xff] %v1051_v14  ;;  %v889_v14 = vrot.slane %v8138_v23, 5 }
 0x372   :  { %1538 = vst [vmem:[#allocation1 + $0x1] ss:$9 sm:$0xff] %v1052_v55  ;;  %v616_v55 = vsel %vm502_vm0, %v386_v24, %v559_v28  ;;  %v1934_v24 = vrot.slane %v1881_v11, 5 }
 0x373   :  { %1539 = vst [vmem:[#allocation1 + $0x2] ss:$9 sm:$0xff] %v639_v40  ;;  %v890_v40 = vrot.slane %v8138_v23, 6  ;;  %v892_v31 = vrot.slane %v616_v55, 1  ;;  %v897_v58 = vrot.slane %v616_v55, 6  ;;  %v898_v35 = vrot.slane %v616_v55, 7 }
 0x374   :  { %1540 = vst [vmem:[#allocation1 + $0x3] ss:$9 sm:$0xff] %v1053_v4  ;;  %v893_v4 = vrot.slane %v616_v55, 2 }
 0x375   :  { %1541 = vst [vmem:[#allocation1 + $0x4] ss:$9 sm:$0xff] %v1054_v18  ;;  %v894_v18 = vrot.slane %v616_v55, 3 }
 0x376   :  { %1542 = vst [vmem:[#allocation1 + $0x5] ss:$9 sm:$0xff] %v1055_v46  ;;  %v895_v46 = vrot.slane %v616_v55, 4 }
 0x377   :  { %1543 = vst [vmem:[#allocation1 + $0x6] ss:$9 sm:$0xff] %v1056_v33  ;;  %v896_v33 = vrot.slane %v616_v55, 5 }
 0x378   :  { %1687 = vst.msk [vmem:[#allocation2 + $0x1b0] sm:$0xff] %vm1635_vm11, %v1536_v29  ;;  %v891_v29 = vrot.slane %v8138_v23, 7  ;;  %v469_v23 = vpop.f32.mrf.mxu0 }
 0x37e   :  { %v1544_v36 = vld [vmem:[#allocation1] sm:$0xff] }
 0x37f   :  { %1545 = vst [vmem:[#allocation1] ss:$9 sm:$0xff] %v1057_v60  ;;  %v470_v60 = vadd.f32 %v8247_v34, %v469_v23 }
 0x380   :  { %1546 = vst [vmem:[#allocation1 + $0x1] ss:$9 sm:$0xff] %v1058_v10  ;;  %v472_v6 = vpop.f32.mrf.mxu0 }
 0x381   :  { %1547 = vst [vmem:[#allocation1 + $0x2] ss:$9 sm:$0xff] %v1059_v37  ;;  %v587_v10 = vmul.f32 0.01, %v470_v60  ;;  %vm530_vm2 = vcmp.ge.f32.partialorder %v470_v60, 0.0  ;;  %v473_v45 = vadd.f32 %v8247_v34, %v472_v6 }
 0x382   :  { %1548 = vst [vmem:[#allocation1 + $0x3] ss:$9 sm:$0xff] %v640_v25  ;;  %v1084_v25 = vrot.slane %v643_v19, 4  ;;  %v1877_v34 = vld [vmem:[#allocation2 + $0x1] ss:$2 sm:$0x7f] }
 0x383   :  { %1549 = vst [vmem:[#allocation1 + $0x4] ss:$9 sm:$0xff] %v1060_v39  ;;  %v1085_v39 = vrot.slane %v643_v19, 5  ;;  %v644_v38 = vsel %vm530_vm2, %v470_v60, %v587_v10  ;;  %vm531_vm1 = vcmp.ge.f32.partialorder %v473_v45, 0.0  ;;  %v1918_v49 = vrot.slane %v1877_v34, 1 }
 0x384   :  { %1550 = vst [vmem:[#allocation1 + $0x5] ss:$9 sm:$0xff] %v1061_v43  ;;  %v1086_v43 = vrot.slane %v643_v19, 6 }
 0x385   :  { %1551 = vst [vmem:[#allocation1 + $0x6] ss:$9 sm:$0xff] %v1062_v44  ;;  %v1087_v44 = vrot.slane %v643_v19, 7 }
 0x386   :  { %1552 = vst [vmem:[#allocation1 + $0x7] ss:$9 sm:$0xff] %v1063_v52  ;;  %v1088_v52 = vrot.slane %v644_v38, 1 }
 0x387   :  { %1688 = vst.msk [vmem:[#allocation2 + $0x1b8] sm:$0x7f] %vm1637_vm12, %v1544_v36  ;;  %v1083_v36 = vrot.slane %v643_v19, 3 }
 0x38d   :  { %v1553_v59 = vld [vmem:[#allocation1] sm:$0xff] }
 0x38e   :  { %1554 = vst [vmem:[#allocation1] ss:$9 sm:$0xff] %v1064_v47  ;;  %v1090_v47 = vrot.slane %v644_v38, 3 }
 0x38f   :  { %1555 = vst [vmem:[#allocation1 + $0x1] ss:$9 sm:$0xff] %v1065_v41  ;;  %v588_v41 = vmul.f32 0.01, %v473_v45 }
 0x390   :  { %1556 = vst [vmem:[#allocation1 + $0x2] ss:$9 sm:$0xff] %v1066_v50  ;;  %v1092_v50 = vrot.slane %v644_v38, 5 }
 0x391   :  { %1557 = vst [vmem:[#allocation1 + $0x3] ss:$9 sm:$0xff] %v641_v13  ;;  %v645_v20 = vsel %vm531_vm1, %v473_v45, %v588_v41  ;;  %v1891_v45 = vld [vmem:[#allocation2 + $0x101] ss:$2 sm:$0x7f] }
 0x392   :  { %1558 = vst [vmem:[#allocation1 + $0x4] ss:$9 sm:$0xff] %v1067_v51  ;;  %v1093_v51 = vrot.slane %v644_v38, 6 }
 0x393   :  { %1559 = vst [vmem:[#allocation1 + $0x5] ss:$9 sm:$0xff] %v1068_v54  ;;  %v1094_v54 = vrot.slane %v644_v38, 7 }
 0x394   :  { %1560 = vst [vmem:[#allocation1 + $0x6] ss:$9 sm:$0xff] %v1069_v30  ;;  %v1095_v30 = vrot.slane %v645_v20, 1 }
 0x395   :  { %1689 = vst.msk [vmem:[#allocation2 + $0x1c0] sm:$0xff] %vm1635_vm11, %v1553_v59  ;;  %v1091_v59 = vrot.slane %v644_v38, 4 }
 0x39b   :  { %v1561_v62 = vld [vmem:[#allocation1] sm:$0xff] }
 0x39c   :  { %1562 = vst [vmem:[#allocation1] ss:$9 sm:$0xff] %v1070_v57  ;;  %v1919_v57 = vrot.slane %v1877_v34, 2 }
 0x39d   :  { %1563 = vst [vmem:[#allocation1 + $0x1] ss:$9 sm:$0xff] %v1071_v61  ;;  %v1920_v61 = vrot.slane %v1877_v34, 3 }
 0x39e   :  { %1564 = vst [vmem:[#allocation1 + $0x2] ss:$9 sm:$0xff] %v1072_v63  ;;  %v1922_v63 = vrot.slane %v1877_v34, 5 }
 0x39f   :  { %1565 = vst [vmem:[#allocation1 + $0x3] ss:$9 sm:$0xff] %v1073_v1  ;;  %v1879_v1 = vld [vmem:[#allocation2 + $0x21] ss:$2 sm:$0x7f] }
 0x3a0   :  { %1566 = vst [vmem:[#allocation1 + $0x4] ss:$9 sm:$0xff] %v642_v0  ;;  %v1923_v0 = vrot.slane %v1877_v34, 6  ;;  %v1927_v9 = vrot.slane %v1879_v1, 4 }
 0x3a1   :  { %1567 = vst [vmem:[#allocation1 + $0x5] ss:$9 sm:$0xff] %v1074_v3  ;;  %v1924_v3 = vrot.slane %v1879_v1, 1 }
 0x3a2   :  { %1568 = vst [vmem:[#allocation1 + $0x6] ss:$9 sm:$0xff] %v1075_v5  ;;  %v1925_v5 = vrot.slane %v1879_v1, 2 }
 0x3a3   :  { %1569 = vst [vmem:[#allocation1 + $0x7] ss:$9 sm:$0xff] %v1076_v8  ;;  %v1926_v8 = vrot.slane %v1879_v1, 3 }
 0x3a4   :  { %1690 = vst.msk [vmem:[#allocation2 + $0x1c8] sm:$0x7f] %vm1637_vm12, %v1561_v62  ;;  %v1921_v62 = vrot.slane %v1877_v34, 4 }
 0x3aa   :  { %v1570_v16 = vld [vmem:[#allocation1] sm:$0xff] }
 0x3ab   :  { %1571 = vst [vmem:[#allocation1] ss:$9 sm:$0xff] %v1077_v12  ;;  %v1928_v12 = vrot.slane %v1879_v1, 5 }
 0x3ac   :  { %1572 = vst [vmem:[#allocation1 + $0x1] ss:$9 sm:$0xff] %v1078_v15  ;;  %v1929_v15 = vrot.slane %v1879_v1, 6 }
 0x3ad   :  { %1573 = vst [vmem:[#allocation1 + $0x2] ss:$9 sm:$0xff] %v1079_v17  ;;  %v1931_v17 = vrot.slane %v1881_v11, 2 }
 0x3ae   :  { %1574 = vst [vmem:[#allocation1 + $0x3] ss:$9 sm:$0xff] %v1080_v21 }
 0x3af   :  { %1575 = vst [vmem:[#allocation1 + $0x4] ss:$9 sm:$0xff] %v643_v19  ;;  %v1932_v19 = vrot.slane %v1881_v11, 3 }
 0x3b0   :  { %1576 = vst [vmem:[#allocation1 + $0x5] ss:$9 sm:$0xff] %v1081_v22  ;;  %v1933_v22 = vrot.slane %v1881_v11, 4 }
 0x3b1   :  { %1577 = vst [vmem:[#allocation1 + $0x6] ss:$9 sm:$0xff] %v1082_v42  ;;  %v1883_v42 = vld [vmem:[#allocation2 + $0x61] ss:$2 sm:$0x7f] }
 0x3b2   :  { %1691 = vst.msk [vmem:[#allocation2 + $0x1d0] sm:$0xff] %vm1635_vm11, %v1570_v16  ;;  %v1930_v16 = vrot.slane %v1881_v11, 1  ;;  %v1936_v28 = vrot.slane %v1883_v42, 1 }
 0x3b8   :  { %v1578_v53 = vld [vmem:[#allocation1] sm:$0xff] }
 0x3b9   :  { %1693 = vst [vmem:[#allocation1] ss:$9 sm:$0xff] %v886_v2  ;;  %v1935_v2 = vrot.slane %v1881_v11, 6 }
 0x3ba   :  { %1695 = vst [vmem:[#allocation1 + $0x1] ss:$9 sm:$0xff] %v887_v26  ;;  %v1937_v26 = vrot.slane %v1883_v42, 2 }
 0x3bb   :  { %1697 = vst [vmem:[#allocation1 + $0x2] ss:$9 sm:$0xff] %v888_v27  ;;  %v1939_v27 = vrot.slane %v1883_v42, 4 }
 0x3bc   :  { %1699 = vst [vmem:[#allocation1 + $0x3] ss:$9 sm:$0xff] %v889_v14 }
 0x3bd   :  { %1701 = vst [vmem:[#allocation1 + $0x4] ss:$9 sm:$0xff] %v890_v40  ;;  %v1885_v40 = vld [vmem:[#allocation2 + $0x81] ss:$2 sm:$0x7f] }
 0x3be   :  { %1703 = vst [vmem:[#allocation1 + $0x5] ss:$9 sm:$0xff] %v891_v29  ;;  %v1941_v29 = vrot.slane %v1883_v42, 6 }
 0x3bf   :  { %1705 = vst [vmem:[#allocation1 + $0x6] ss:$9 sm:$0xff] %v616_v55  ;;  %v1940_v55 = vrot.slane %v1883_v42, 5 }
 0x3c0   :  { %1707 = vst [vmem:[#allocation1 + $0x7] ss:$9 sm:$0xff] %v892_v31  ;;  %v1942_v31 = vrot.slane %v1885_v40, 1 }
 0x3c1   :  { %1692 = vst.msk [vmem:[#allocation2 + $0x1d8] sm:$0x7f] %vm1637_vm12, %v1578_v53  ;;  %v1938_v53 = vrot.slane %v1883_v42, 3 }
 0x3c7   :  { %v1708_v32 = vld [vmem:[#allocation1] sm:$0xff] }
 0x3c8   :  { %1709 = vst [vmem:[#allocation1] ss:$9 sm:$0xff] %v893_v4  ;;  %v1943_v4 = vrot.slane %v1885_v40, 2 }
 0x3c9   :  { %1710 = vst [vmem:[#allocation1 + $0x1] ss:$9 sm:$0xff] %v894_v18  ;;  %v1944_v18 = vrot.slane %v1885_v40, 3 }
 0x3ca   :  { %1711 = vst [vmem:[#allocation1 + $0x2] ss:$9 sm:$0xff] %v895_v46  ;;  %v1887_v46 = vld [vmem:[#allocation2 + $0xa1] ss:$2 sm:$0x7f] }
 0x3cb   :  { %1712 = vst [vmem:[#allocation1 + $0x3] ss:$9 sm:$0xff] %v896_v33  ;;  %v1946_v33 = vrot.slane %v1885_v40, 5  ;;  %v1948_v23 = vrot.slane %v1887_v46, 1  ;;  %v1949_v60 = vrot.slane %v1887_v46, 2  ;;  %v1950_v10 = vrot.slane %v1887_v46, 3 }
 0x3cc   :  { %1713 = vst [vmem:[#allocation1 + $0x4] ss:$9 sm:$0xff] %v897_v58 }
 0x3cd   :  { %1714 = vst [vmem:[#allocation1 + $0x5] ss:$9 sm:$0xff] %v898_v35  ;;  %v1947_v35 = vrot.slane %v1885_v40, 6 }
 0x3ce   :  { %1715 = vst [vmem:[#allocation1 + $0x6] ss:$9 sm:$0xff] %v8142_v48  ;;  %v1089_v48 = vrot.slane %v644_v38, 2 }
 0x3cf   :  { %1739 = vst.msk [vmem:[#allocation2 + $0xe0] sm:$0xff] %vm1635_vm11, %v1708_v32  ;;  %v1945_v32 = vrot.slane %v1885_v40, 4 }
 0x3d5   :  { %v1716_v37 = vld [vmem:[#allocation1] sm:$0xff] }
 0x3d6   :  { %1717 = vst [vmem:[#allocation1] ss:$9 sm:$0xff] %v1083_v36  ;;  %v1951_v36 = vrot.slane %v1887_v46, 4 }
 0x3d7   :  { %1718 = vst [vmem:[#allocation1 + $0x1] ss:$9 sm:$0xff] %v1084_v25  ;;  %v1889_v25 = vld [vmem:[#allocation2 + $0xc1] ss:$2 sm:$0x7f] }
 0x3d8   :  { %1719 = vst [vmem:[#allocation1 + $0x2] ss:$9 sm:$0xff] %v1085_v39  ;;  %v1953_v39 = vrot.slane %v1887_v46, 6  ;;  %v1958_v6 = vrot.slane %v1889_v25, 5 }
 0x3d9   :  { %1720 = vst [vmem:[#allocation1 + $0x3] ss:$9 sm:$0xff] %v1086_v43 }
 0x3da   :  { %1721 = vst [vmem:[#allocation1 + $0x4] ss:$9 sm:$0xff] %v1087_v44  ;;  %v1955_v44 = vrot.slane %v1889_v25, 2 }
 0x3db   :  { %1722 = vst [vmem:[#allocation1 + $0x5] ss:$9 sm:$0xff] %v644_v38  ;;  %v1954_v38 = vrot.slane %v1889_v25, 1 }
 0x3dc   :  { %1723 = vst [vmem:[#allocation1 + $0x6] ss:$9 sm:$0xff] %v1088_v52  ;;  %v1956_v52 = vrot.slane %v1889_v25, 3 }
 0x3dd   :  { %1724 = vst [vmem:[#allocation1 + $0x7] ss:$9 sm:$0xff] %v1089_v48  ;;  %v1957_v48 = vrot.slane %v1889_v25, 4 }
 0x3de   :  { %1740 = vst.msk [vmem:[#allocation2 + $0xe8] sm:$0x7f] %vm1637_vm12, %v1716_v37  ;;  %v1952_v37 = vrot.slane %v1887_v46, 5 }
 0x3e4   :  { %v1725_v13 = vld [vmem:[#allocation1] sm:$0xff] }
 0x3e5   :  { %1726 = vst [vmem:[#allocation1] ss:$9 sm:$0xff] %v1090_v47  ;;  %v1959_v47 = vrot.slane %v1889_v25, 6 }
 0x3e6   :  { %1727 = vst [vmem:[#allocation1 + $0x1] ss:$9 sm:$0xff] %v1091_v59  ;;  %v1960_v59 = vrot.slane %v1891_v45, 1 }
 0x3e7   :  { %1728 = vst [vmem:[#allocation1 + $0x2] ss:$9 sm:$0xff] %v1092_v50  ;;  %v1962_v50 = vrot.slane %v1891_v45, 3 }
 0x3e8   :  { %1729 = vst [vmem:[#allocation1 + $0x3] ss:$9 sm:$0xff] %v1093_v51  ;;  %v1963_v51 = vrot.slane %v1891_v45, 4 }
 0x3e9   :  { %1730 = vst [vmem:[#allocation1 + $0x4] ss:$9 sm:$0xff] %v1094_v54  ;;  %v1964_v54 = vrot.slane %v1891_v45, 5 }
 0x3ea   :  { %1741 = vst.msk [vmem:[#allocation2 + $0x1e0] sm:$0xff] %vm1635_vm11, %v1725_v13  ;;  %v1961_v13 = vrot.slane %v1891_v45, 2 }
 0x3eb   :  { %1731 = vst [vmem:[#allocation1 + $0x5] ss:$9 sm:$0xff] %v645_v20  ;;  %v1965_v20 = vrot.slane %v1891_v45, 6 }
 0x3ec   :  { %1732 = vst [vmem:[#allocation1 + $0x6] ss:$9 sm:$0xff] %v1095_v30  ;;  %v1893_v30 = vld [vmem:[#allocation2 + $0x121] ss:$2 sm:$0x7f] }
 0x3f3   :  { %v1733_v56 = vld [vmem:[#allocation1] sm:$0xff] }
 0x3f4   :  { %2011 = vst [vmem:[#allocation1] ss:$9 sm:$0xff] %v1877_v34  ;;  %v1966_v34 = vrot.slane %v1893_v30, 1 }
 0x3f5   :  { %2013 = vst [vmem:[#allocation1 + $0x1] ss:$9 sm:$0xff] %v1918_v49 }
 0x3f6   :  { %2015 = vst [vmem:[#allocation1 + $0x2] ss:$9 sm:$0xff] %v1919_v57  ;;  %v1968_v57 = vrot.slane %v1893_v30, 3 }
 0x3f7   :  { %2017 = vst [vmem:[#allocation1 + $0x3] ss:$9 sm:$0xff] %v1920_v61  ;;  %v1969_v61 = vrot.slane %v1893_v30, 4 }
 0x3f8   :  { %2019 = vst [vmem:[#allocation1 + $0x4] ss:$9 sm:$0xff] %v1921_v62  ;;  %v1970_v62 = vrot.slane %v1893_v30, 5 }
 0x3f9   :  { %2021 = vst [vmem:[#allocation1 + $0x5] ss:$9 sm:$0xff] %v1922_v63  ;;  %v1971_v63 = vrot.slane %v1893_v30, 6 }
 0x3fa   :  { %2023 = vst [vmem:[#allocation1 + $0x6] ss:$9 sm:$0xff] %v1923_v0  ;;  %v1895_v0 = vld [vmem:[#allocation2 + $0x141] ss:$2 sm:$0x7f] }
 0x3fb   :  { %2025 = vst [vmem:[#allocation1 + $0x7] ss:$9 sm:$0xff] %v1879_v1  ;;  %v1972_v1 = vrot.slane %v1895_v0, 1 }
 0x3fc   :  { %1742 = vst.msk [vmem:[#allocation2 + $0x1e8] sm:$0x7f] %vm1637_vm12, %v1733_v56  ;;  %v1967_v56 = vrot.slane %v1893_v30, 2 }
 0x402   :  { %v8284_v7 = vld [vmem:[#allocation1] sm:$0xff] }
 0x403   :  { %2027 = vst [vmem:[#allocation1] ss:$9 sm:$0xff] %v1924_v3  ;;  %v1973_v3 = vrot.slane %v1895_v0, 2 }
 0x404   :  { %2028 = vst [vmem:[#allocation1 + $0x1] ss:$9 sm:$0xff] %v1925_v5 }
 0x405   :  { %2029 = vst [vmem:[#allocation1 + $0x2] ss:$9 sm:$0xff] %v1926_v8  ;;  %v1974_v8 = vrot.slane %v1895_v0, 3 }
 0x406   :  { %2030 = vst [vmem:[#allocation1 + $0x3] ss:$9 sm:$0xff] %v1927_v9  ;;  %v1975_v9 = vrot.slane %v1895_v0, 4 }
 0x407   :  { %2031 = vst [vmem:[#allocation1 + $0x4] ss:$9 sm:$0xff] %v1928_v12  ;;  %v1976_v12 = vrot.slane %v1895_v0, 5 }
 0x408   :  { %2032 = vst [vmem:[#allocation1 + $0x5] ss:$9 sm:$0xff] %v1929_v15  ;;  %v1977_v15 = vrot.slane %v1895_v0, 6 }
 0x409   :  { %2033 = vst [vmem:[#allocation1 + $0x6] ss:$9 sm:$0xff] %v1881_v11  ;;  %v1897_v11 = vld [vmem:[#allocation2 + $0x161] ss:$2 sm:$0x7f] }
 0x40a   :  { %2034 = vst [vmem:[#allocation1 + $0x7] ss:$9 sm:$0xff] %v1930_v16  ;;  %v1978_v16 = vrot.slane %v1897_v11, 1 }
 0x411   :  { %v8286_v21 = vld [vmem:[#allocation1] sm:$0xff] }
 0x412   :  { %2036 = vst [vmem:[#allocation1] ss:$9 sm:$0xff] %v1931_v17  ;;  %v1979_v17 = vrot.slane %v1897_v11, 2 }
 0x413   :  { %2037 = vst [vmem:[#allocation1 + $0x1] ss:$9 sm:$0xff] %v1932_v19  ;;  %v1980_v19 = vrot.slane %v1897_v11, 3 }
 0x414   :  { %2038 = vst [vmem:[#allocation1 + $0x2] ss:$9 sm:$0xff] %v1933_v22 }
 0x415   :  { %2039 = vst [vmem:[#allocation1 + $0x3] ss:$9 sm:$0xff] %v1934_v24  ;;  %v1899_v24 = vld [vmem:[#allocation2 + $0x181] ss:$2 sm:$0x7f] }
 0x416   :  { %2040 = vst [vmem:[#allocation1 + $0x4] ss:$9 sm:$0xff] %v1935_v2  ;;  %v1982_v2 = vrot.slane %v1897_v11, 5 }
 0x417   :  { %2041 = vst [vmem:[#allocation1 + $0x5] ss:$9 sm:$0xff] %v1883_v42  ;;  %v1981_v42 = vrot.slane %v1897_v11, 4 }
 0x418   :  { %2042 = vst [vmem:[#allocation1 + $0x6] ss:$9 sm:$0xff] %v1936_v28  ;;  %v1983_v28 = vrot.slane %v1897_v11, 6 }
 0x419   :  { %2043 = vst [vmem:[#allocation1 + $0x7] ss:$9 sm:$0xff] %v1937_v26  ;;  %v1984_v26 = vrot.slane %v1899_v24, 1 }
 0x420   :  { %v8288_v14 = vld [vmem:[#allocation1] sm:$0xff] }
 0x421   :  { %2045 = vst [vmem:[#allocation1] ss:$9 sm:$0xff] %v1938_v53  ;;  %v1985_v53 = vrot.slane %v1899_v24, 2 }
 0x422   :  { %2046 = vst [vmem:[#allocation1 + $0x1] ss:$9 sm:$0xff] %v1939_v27  ;;  %v1986_v27 = vrot.slane %v1899_v24, 3 }
 0x423   :  { %2047 = vst [vmem:[#allocation1 + $0x2] ss:$9 sm:$0xff] %v1940_v55 }
 0x424   :  { %2048 = vst [vmem:[#allocation1 + $0x3] ss:$9 sm:$0xff] %v1941_v29  ;;  %v1901_v29 = vld [vmem:[#allocation2 + $0x1a1] ss:$2 sm:$0x7f] }
 0x425   :  { %2049 = vst [vmem:[#allocation1 + $0x4] ss:$9 sm:$0xff] %v1885_v40  ;;  %v1987_v40 = vrot.slane %v1899_v24, 4 }
 0x426   :  { %2050 = vst [vmem:[#allocation1 + $0x5] ss:$9 sm:$0xff] %v1942_v31  ;;  %v1988_v31 = vrot.slane %v1899_v24, 5 }
 0x427   :  { %2051 = vst [vmem:[#allocation1 + $0x6] ss:$9 sm:$0xff] %v1943_v4  ;;  %v1989_v4 = vrot.slane %v1899_v24, 6 }
 0x428   :  { %2052 = vst [vmem:[#allocation1 + $0x7] ss:$9 sm:$0xff] %v1944_v18  ;;  %v1990_v18 = vrot.slane %v1901_v29, 1 }
 0x42f   :  { %v8290_v58 = vld [vmem:[#allocation1] sm:$0xff] }
 0x430   :  { %2054 = vst [vmem:[#allocation1] ss:$9 sm:$0xff] %v1945_v32  ;;  %v1991_v32 = vrot.slane %v1901_v29, 2 }
 0x431   :  { %2055 = vst [vmem:[#allocation1 + $0x1] ss:$9 sm:$0xff] %v1946_v33  ;;  %v1993_v33 = vrot.slane %v1901_v29, 4 }
 0x432   :  { %2056 = vst [vmem:[#allocation1 + $0x2] ss:$9 sm:$0xff] %v1947_v35  ;;  %v1903_v35 = vld [vmem:[#allocation2 + $0x1c1] ss:$2 sm:$0x7f] }
 0x433   :  { %2057 = vst [vmem:[#allocation1 + $0x3] ss:$9 sm:$0xff] %v1887_v46  ;;  %v1992_v46 = vrot.slane %v1901_v29, 3 }
 0x434   :  { %2058 = vst [vmem:[#allocation1 + $0x4] ss:$9 sm:$0xff] %v1948_v23  ;;  %v1994_v23 = vrot.slane %v1901_v29, 5 }
 0x435   :  { %2059 = vst [vmem:[#allocation1 + $0x5] ss:$9 sm:$0xff] %v1949_v60 }
 0x436   :  { %2060 = vst [vmem:[#allocation1 + $0x6] ss:$9 sm:$0xff] %v1950_v10  ;;  %v1995_v10 = vrot.slane %v1901_v29, 6 }
 0x437   :  { %2061 = vst [vmem:[#allocation1 + $0x7] ss:$9 sm:$0xff] %v1951_v36  ;;  %v1996_v36 = vrot.slane %v1903_v35, 1 }
 0x43e   :  { %v8292_v43 = vld [vmem:[#allocation1] sm:$0xff] }
 0x43f   :  { %2063 = vst [vmem:[#allocation1] ss:$9 sm:$0xff] %v1952_v37  ;;  %v1998_v37 = vrot.slane %v1903_v35, 3 }
 0x440   :  { %2064 = vst [vmem:[#allocation1 + $0x1] ss:$9 sm:$0xff] %v1953_v39  ;;  %v1999_v39 = vrot.slane %v1903_v35, 4 }
 0x441   :  { %2065 = vst [vmem:[#allocation1 + $0x2] ss:$9 sm:$0xff] %v1889_v25  ;;  %v1997_v25 = vrot.slane %v1903_v35, 2 }
 0x442   :  { %2066 = vst [vmem:[#allocation1 + $0x3] ss:$9 sm:$0xff] %v1954_v38  ;;  %v2000_v38 = vrot.slane %v1903_v35, 5 }
 0x443   :  { %2067 = vst [vmem:[#allocation1 + $0x4] ss:$9 sm:$0xff] %v1955_v44  ;;  %v2001_v44 = vrot.slane %v1903_v35, 6 }
 0x444   :  { %2068 = vst [vmem:[#allocation1 + $0x5] ss:$9 sm:$0xff] %v1956_v52 }
 0x445   :  { %2069 = vst [vmem:[#allocation1 + $0x6] ss:$9 sm:$0xff] %v1957_v48  ;;  %v1743_v48 = vld [vmem:[#allocation2] ss:$2 sm:$0x7f] }
 0x446   :  { %2070 = vst [vmem:[#allocation1 + $0x7] ss:$9 sm:$0xff] %v1958_v6  ;;  %v1784_v6 = vrot.slane %v1743_v48, 1 }
 0x44d   :  { %v8294_v41 = vld [vmem:[#allocation1] sm:$0xff] }
 0x44e   :  { %2072 = vst [vmem:[#allocation1] ss:$9 sm:$0xff] %v1959_v47  ;;  %v1785_v47 = vrot.slane %v1743_v48, 2 }
 0x44f   :  { %2073 = vst [vmem:[#allocation1 + $0x1] ss:$9 sm:$0xff] %v1891_v45 }
 0x450   :  { %2074 = vst [vmem:[#allocation1 + $0x2] ss:$9 sm:$0xff] %v1960_v59  ;;  %v1786_v59 = vrot.slane %v1743_v48, 3 }
 0x451   :  { %2075 = vst [vmem:[#allocation1 + $0x3] ss:$9 sm:$0xff] %v1961_v13  ;;  %v1787_v13 = vrot.slane %v1743_v48, 4 }
 0x452   :  { %2076 = vst [vmem:[#allocation1 + $0x4] ss:$9 sm:$0xff] %v1962_v50  ;;  %v1788_v50 = vrot.slane %v1743_v48, 5 }
 0x453   :  { %2077 = vst [vmem:[#allocation1 + $0x5] ss:$9 sm:$0xff] %v1963_v51  ;;  %v1789_v51 = vrot.slane %v1743_v48, 6 }
 0x454   :  { %2078 = vst [vmem:[#allocation1 + $0x6] ss:$9 sm:$0xff] %v1964_v54  ;;  %v1745_v54 = vld [vmem:[#allocation2 + $0x20] ss:$2 sm:$0x7f] }
 0x455   :  { %2079 = vst [vmem:[#allocation1 + $0x7] ss:$9 sm:$0xff] %v1965_v20  ;;  %v1790_v20 = vrot.slane %v1745_v54, 1 }
 0x45c   :  { %v8296_v49 = vld [vmem:[#allocation1] sm:$0xff] }
 0x45d   :  { %2081 = vst [vmem:[#allocation1] ss:$9 sm:$0xff] %v1893_v30  ;;  %v1791_v30 = vrot.slane %v1745_v54, 2 }
 0x45e   :  { %2082 = vst [vmem:[#allocation1 + $0x1] ss:$9 sm:$0xff] %v1966_v34 }
 0x45f   :  { %2083 = vst [vmem:[#allocation1 + $0x2] ss:$9 sm:$0xff] %v1967_v56  ;;  %v1792_v56 = vrot.slane %v1745_v54, 3 }
 0x460   :  { %2084 = vst [vmem:[#allocation1 + $0x3] ss:$9 sm:$0xff] %v1968_v57  ;;  %v1793_v57 = vrot.slane %v1745_v54, 4 }
 0x461   :  { %2085 = vst [vmem:[#allocation1 + $0x4] ss:$9 sm:$0xff] %v1969_v61  ;;  %v1747_v61 = vld [vmem:[#allocation2 + $0x40] ss:$2 sm:$0x7f] }
 0x462   :  { %2086 = vst [vmem:[#allocation1 + $0x5] ss:$9 sm:$0xff] %v1970_v62  ;;  %v1794_v62 = vrot.slane %v1745_v54, 5 }
 0x463   :  { %2087 = vst [vmem:[#allocation1 + $0x6] ss:$9 sm:$0xff] %v1971_v63  ;;  %v1795_v63 = vrot.slane %v1745_v54, 6 }
 0x464   :  { %2088 = vst [vmem:[#allocation1 + $0x7] ss:$9 sm:$0xff] %v1895_v0  ;;  %v1796_v0 = vrot.slane %v1747_v61, 1 }
 0x46b   :  { %v8298_v5 = vld [vmem:[#allocation1] sm:$0xff] }
 0x46c   :  { %2090 = vst [vmem:[#allocation1] ss:$9 sm:$0xff] %v1972_v1  ;;  %v1797_v1 = vrot.slane %v1747_v61, 2 }
 0x46d   :  { %2091 = vst [vmem:[#allocation1 + $0x1] ss:$9 sm:$0xff] %v1973_v3  ;;  %v1798_v3 = vrot.slane %v1747_v61, 3 }
 0x46e   :  { %2092 = vst [vmem:[#allocation1 + $0x2] ss:$9 sm:$0xff] %v1974_v8 }
 0x46f   :  { %2093 = vst [vmem:[#allocation1 + $0x3] ss:$9 sm:$0xff] %v1975_v9  ;;  %v1799_v9 = vrot.slane %v1747_v61, 4 }
 0x470   :  { %2094 = vst [vmem:[#allocation1 + $0x4] ss:$9 sm:$0xff] %v1976_v12  ;;  %v1800_v12 = vrot.slane %v1747_v61, 5 }
 0x471   :  { %2095 = vst [vmem:[#allocation1 + $0x5] ss:$9 sm:$0xff] %v1977_v15  ;;  %v1801_v15 = vrot.slane %v1747_v61, 6 }
 0x472   :  { %2096 = vst [vmem:[#allocation1 + $0x6] ss:$9 sm:$0xff] %v1897_v11  ;;  %v1749_v11 = vld [vmem:[#allocation2 + $0x60] ss:$2 sm:$0x7f] }
 0x473   :  { %2097 = vst [vmem:[#allocation1 + $0x7] ss:$9 sm:$0xff] %v1978_v16  ;;  %v1802_v16 = vrot.slane %v1749_v11, 1 }
 0x47a   :  { %v8300_v22 = vld [vmem:[#allocation1] sm:$0xff] }
 0x47b   :  { %2099 = vst [vmem:[#allocation1] ss:$9 sm:$0xff] %v1979_v17  ;;  %v1803_v17 = vrot.slane %v1749_v11, 2 }
 0x47c   :  { %2100 = vst [vmem:[#allocation1 + $0x1] ss:$9 sm:$0xff] %v1980_v19  ;;  %v1804_v19 = vrot.slane %v1749_v11, 3 }
 0x47d   :  { %2101 = vst [vmem:[#allocation1 + $0x2] ss:$9 sm:$0xff] %v1981_v42  ;;  %v1805_v42 = vrot.slane %v1749_v11, 4 }
 0x47e   :  { %2102 = vst [vmem:[#allocation1 + $0x3] ss:$9 sm:$0xff] %v1982_v2  ;;  %v1751_v2 = vld [vmem:[#allocation2 + $0x80] ss:$2 sm:$0x7f] }
 0x47f   :  { %2103 = vst [vmem:[#allocation1 + $0x4] ss:$9 sm:$0xff] %v1983_v28  ;;  %v1806_v28 = vrot.slane %v1749_v11, 5 }
 0x480   :  { %2104 = vst [vmem:[#allocation1 + $0x5] ss:$9 sm:$0xff] %v1899_v24 }
 0x481   :  { %2105 = vst [vmem:[#allocation1 + $0x6] ss:$9 sm:$0xff] %v1984_v26  ;;  %v1807_v26 = vrot.slane %v1749_v11, 6 }
 0x482   :  { %2106 = vst [vmem:[#allocation1 + $0x7] ss:$9 sm:$0xff] %v1985_v53  ;;  %v1808_v53 = vrot.slane %v1751_v2, 1 }
 0x489   :  { %v8302_v55 = vld [vmem:[#allocation1] sm:$0xff] }
 0x48a   :  { %2108 = vst [vmem:[#allocation1] ss:$9 sm:$0xff] %v1986_v27  ;;  %v1809_v27 = vrot.slane %v1751_v2, 2 }
 0x48b   :  { %2109 = vst [vmem:[#allocation1 + $0x1] ss:$9 sm:$0xff] %v1987_v40  ;;  %v1810_v40 = vrot.slane %v1751_v2, 3 }
 0x48c   :  { %2110 = vst [vmem:[#allocation1 + $0x2] ss:$9 sm:$0xff] %v1988_v31  ;;  %v1753_v31 = vld [vmem:[#allocation2 + $0xa0] ss:$2 sm:$0x7f] }
 0x48d   :  { %2111 = vst [vmem:[#allocation1 + $0x3] ss:$9 sm:$0xff] %v1989_v4  ;;  %v1812_v4 = vrot.slane %v1751_v2, 5 }
 0x48e   :  { %2112 = vst [vmem:[#allocation1 + $0x4] ss:$9 sm:$0xff] %v1901_v29  ;;  %v1811_v29 = vrot.slane %v1751_v2, 4 }
 0x48f   :  { %2113 = vst [vmem:[#allocation1 + $0x5] ss:$9 sm:$0xff] %v1990_v18 }
 0x490   :  { %2114 = vst [vmem:[#allocation1 + $0x6] ss:$9 sm:$0xff] %v1991_v32  ;;  %v1813_v32 = vrot.slane %v1751_v2, 6 }
 0x491   :  { %2115 = vst [vmem:[#allocation1 + $0x7] ss:$9 sm:$0xff] %v1992_v46  ;;  %v1814_v46 = vrot.slane %v1753_v31, 1 }
 0x498   :  { %v8304_v60 = vld [vmem:[#allocation1] sm:$0xff] }
 0x499   :  { %2117 = vst [vmem:[#allocation1] ss:$9 sm:$0xff] %v1993_v33  ;;  %v1815_v33 = vrot.slane %v1753_v31, 2 }
 0x49a   :  { %2118 = vst [vmem:[#allocation1 + $0x1] ss:$9 sm:$0xff] %v1994_v23  ;;  %v1817_v23 = vrot.slane %v1753_v31, 4 }
 0x49b   :  { %2119 = vst [vmem:[#allocation1 + $0x2] ss:$9 sm:$0xff] %v1995_v10  ;;  %v1755_v10 = vld [vmem:[#allocation2 + $0xc0] ss:$2 sm:$0x7f] }
 0x49c   :  { %2120 = vst [vmem:[#allocation1 + $0x3] ss:$9 sm:$0xff] %v1903_v35  ;;  %v1816_v35 = vrot.slane %v1753_v31, 3 }
 0x49d   :  { %2121 = vst [vmem:[#allocation1 + $0x4] ss:$9 sm:$0xff] %v1996_v36  ;;  %v1818_v36 = vrot.slane %v1753_v31, 5 }
 0x49e   :  { %2122 = vst [vmem:[#allocation1 + $0x5] ss:$9 sm:$0xff] %v1997_v25  ;;  %v1819_v25 = vrot.slane %v1753_v31, 6 }
 0x49f   :  { %2123 = vst [vmem:[#allocation1 + $0x6] ss:$9 sm:$0xff] %v1998_v37 }
 0x4a0   :  { %2124 = vst [vmem:[#allocation1 + $0x7] ss:$9 sm:$0xff] %v1999_v39  ;;  %v1820_v39 = vrot.slane %v1755_v10, 1 }
 0x4a7   :  { %v8306_v52 = vld [vmem:[#allocation1] sm:$0xff] }
 0x4a8   :  { %2126 = vst [vmem:[#allocation1] ss:$9 sm:$0xff] %v2000_v38  ;;  %v1821_v38 = vrot.slane %v1755_v10, 2 }
 0x4a9   :  { %2127 = vst [vmem:[#allocation1 + $0x1] ss:$9 sm:$0xff] %v2001_v44  ;;  %v1822_v44 = vrot.slane %v1755_v10, 3 }
 0x4b0   :  { %v8308_v45 = vld [vmem:[#allocation1] sm:$0xff] }
 0x4b1   :  { %2211 = vst [vmem:[#allocation1] ss:$9 sm:$0xff] %v1743_v48  ;;  %v1823_v48 = vrot.slane %v1755_v10, 4 }
 0x4b2   :  { %2213 = vst [vmem:[#allocation1 + $0x1] ss:$9 sm:$0xff] %v1784_v6  ;;  %v1824_v6 = vrot.slane %v1755_v10, 5 }
 0x4b3   :  { %2215 = vst [vmem:[#allocation1 + $0x2] ss:$9 sm:$0xff] %v1785_v47  ;;  %v1757_v47 = vld [vmem:[#allocation2 + $0x100] ss:$2 sm:$0x7f] }
 0x4b4   :  { %2217 = vst [vmem:[#allocation1 + $0x3] ss:$9 sm:$0xff] %v1786_v59  ;;  %v1825_v59 = vrot.slane %v1755_v10, 6 }
 0x4b5   :  { %2219 = vst [vmem:[#allocation1 + $0x4] ss:$9 sm:$0xff] %v1787_v13 }
 0x4b6   :  { %2221 = vst [vmem:[#allocation1 + $0x5] ss:$9 sm:$0xff] %v1788_v50  ;;  %v1826_v50 = vrot.slane %v1757_v47, 1 }
 0x4b7   :  { %2223 = vst [vmem:[#allocation1 + $0x6] ss:$9 sm:$0xff] %v1789_v51  ;;  %v1827_v51 = vrot.slane %v1757_v47, 2 }
 0x4b8   :  { %2225 = vst [vmem:[#allocation1 + $0x7] ss:$9 sm:$0xff] %v1745_v54  ;;  %v1828_v54 = vrot.slane %v1757_v47, 3 }
 0x4bf   :  { %v8310_v34 = vld [vmem:[#allocation1] sm:$0xff] }
 0x4c0   :  { %2227 = vst [vmem:[#allocation1] ss:$9 sm:$0xff] %v1790_v20  ;;  %v1829_v20 = vrot.slane %v1757_v47, 4 }
 0x4c1   :  { %2228 = vst [vmem:[#allocation1 + $0x1] ss:$9 sm:$0xff] %v1791_v30  ;;  %v1830_v30 = vrot.slane %v1757_v47, 5 }
 0x4c2   :  { %2229 = vst [vmem:[#allocation1 + $0x2] ss:$9 sm:$0xff] %v1792_v56  ;;  %v1831_v56 = vrot.slane %v1757_v47, 6 }
 0x4c3   :  { %2230 = vst [vmem:[#allocation1 + $0x3] ss:$9 sm:$0xff] %v1793_v57  ;;  %v1759_v57 = vld [vmem:[#allocation2 + $0x120] ss:$2 sm:$0x7f] }
 0x4c4   :  { %2231 = vst [vmem:[#allocation1 + $0x4] ss:$9 sm:$0xff] %v1794_v62 }
 0x4c5   :  { %2232 = vst [vmem:[#allocation1 + $0x5] ss:$9 sm:$0xff] %v1795_v63  ;;  %v1833_v63 = vrot.slane %v1759_v57, 2 }
 0x4c6   :  { %2233 = vst [vmem:[#allocation1 + $0x6] ss:$9 sm:$0xff] %v1747_v61  ;;  %v1832_v61 = vrot.slane %v1759_v57, 1 }
 0x4c7   :  { %2234 = vst [vmem:[#allocation1 + $0x7] ss:$9 sm:$0xff] %v1796_v0  ;;  %v1834_v0 = vrot.slane %v1759_v57, 3 }
 0x4ce   :  { %v8312_v8 = vld [vmem:[#allocation1] sm:$0xff] }
 0x4cf   :  { %2236 = vst [vmem:[#allocation1] ss:$9 sm:$0xff] %v1797_v1  ;;  %v1835_v1 = vrot.slane %v1759_v57, 4 }
 0x4d0   :  { %2237 = vst [vmem:[#allocation1 + $0x1] ss:$9 sm:$0xff] %v1798_v3  ;;  %v1836_v3 = vrot.slane %v1759_v57, 5 }
 0x4d1   :  { %2238 = vst [vmem:[#allocation1 + $0x2] ss:$9 sm:$0xff] %v1799_v9  ;;  %v1837_v9 = vrot.slane %v1759_v57, 6 }
 0x4d2   :  { %2239 = vst [vmem:[#allocation1 + $0x3] ss:$9 sm:$0xff] %v1800_v12 }
 0x4d3   :  { %2240 = vst [vmem:[#allocation1 + $0x4] ss:$9 sm:$0xff] %v1801_v15 }
 0x4d4   :  { %2241 = vst [vmem:[#allocation1 + $0x5] ss:$9 sm:$0xff] %v1749_v11  ;;  %v1761_v11 = vld [vmem:[#allocation2 + $0x140] ss:$2 sm:$0x7f] }
 0x4d5   :  { %2242 = vst [vmem:[#allocation1 + $0x6] ss:$9 sm:$0xff] %v1802_v16  ;;  %v1838_v12 = vrot.slane %v1761_v11, 1  ;;  %v1839_v15 = vrot.slane %v1761_v11, 2 }
 0x4d6   :  { %2243 = vst [vmem:[#allocation1 + $0x7] ss:$9 sm:$0xff] %v1803_v17  ;;  %v1840_v17 = vrot.slane %v1761_v11, 3 }
 0x4dd   :  { %v8314_v24 = vld [vmem:[#allocation1] sm:$0xff] }
 0x4de   :  { %2245 = vst [vmem:[#allocation1] ss:$9 sm:$0xff] %v1804_v19  ;;  %v1841_v19 = vrot.slane %v1761_v11, 4 }
 0x4df   :  { %2246 = vst [vmem:[#allocation1 + $0x1] ss:$9 sm:$0xff] %v1805_v42  ;;  %v1763_v42 = vld [vmem:[#allocation2 + $0x160] ss:$2 sm:$0x7f] }
 0x4e0   :  { %2247 = vst [vmem:[#allocation1 + $0x2] ss:$9 sm:$0xff] %v1806_v28  ;;  %v1843_v28 = vrot.slane %v1761_v11, 6 }
 0x4e1   :  { %2248 = vst [vmem:[#allocation1 + $0x3] ss:$9 sm:$0xff] %v1807_v26  ;;  %v1844_v26 = vrot.slane %v1763_v42, 1 }
 0x4e2   :  { %2249 = vst [vmem:[#allocation1 + $0x4] ss:$9 sm:$0xff] %v1751_v2  ;;  %v1842_v2 = vrot.slane %v1761_v11, 5 }
 0x4e3   :  { %2250 = vst [vmem:[#allocation1 + $0x5] ss:$9 sm:$0xff] %v1808_v53  ;;  %v1845_v53 = vrot.slane %v1763_v42, 2 }
 0x4e4   :  { %2251 = vst [vmem:[#allocation1 + $0x6] ss:$9 sm:$0xff] %v1809_v27  ;;  %v1846_v27 = vrot.slane %v1763_v42, 3 }
 0x4e5   :  { %2252 = vst [vmem:[#allocation1 + $0x7] ss:$9 sm:$0xff] %v1810_v40 }
 0x4ec   :  { %v8316_v18 = vld [vmem:[#allocation1] sm:$0xff] }
 0x4ed   :  { %2254 = vst [vmem:[#allocation1] ss:$9 sm:$0xff] %v1811_v29  ;;  %v1847_v29 = vrot.slane %v1763_v42, 4 }
 0x4ee   :  { %2255 = vst [vmem:[#allocation1 + $0x1] ss:$9 sm:$0xff] %v1812_v4  ;;  %v1848_v4 = vrot.slane %v1763_v42, 5 }
 0x4ef   :  { %2256 = vst [vmem:[#allocation1 + $0x2] ss:$9 sm:$0xff] %v1813_v32  ;;  %v1849_v32 = vrot.slane %v1763_v42, 6 }
 0x4f0   :  { %2257 = vst [vmem:[#allocation1 + $0x3] ss:$9 sm:$0xff] %v1753_v31  ;;  %v1765_v31 = vld [vmem:[#allocation2 + $0x180] ss:$2 sm:$0x7f] }
 0x4f1   :  { %2258 = vst [vmem:[#allocation1 + $0x4] ss:$9 sm:$0xff] %v1814_v46  ;;  %v1850_v46 = vrot.slane %v1765_v31, 1 }
 0x4f2   :  { %2259 = vst [vmem:[#allocation1 + $0x5] ss:$9 sm:$0xff] %v1815_v33  ;;  %v1851_v33 = vrot.slane %v1765_v31, 2 }
 0x4f3   :  { %2260 = vst [vmem:[#allocation1 + $0x6] ss:$9 sm:$0xff] %v1816_v35  ;;  %v1852_v35 = vrot.slane %v1765_v31, 3 }
 0x4f4   :  { %2261 = vst [vmem:[#allocation1 + $0x7] ss:$9 sm:$0xff] %v1817_v23  ;;  %v1853_v23 = vrot.slane %v1765_v31, 4 }
 0x4fb   :  { %v8318_v37 = vld [vmem:[#allocation1] sm:$0xff] }
 0x4fc   :  { %2263 = vst [vmem:[#allocation1] ss:$9 sm:$0xff] %v1818_v36  ;;  %v1767_v36 = vld [vmem:[#allocation2 + $0x1a0] ss:$2 sm:$0x7f] }
 0x4fd   :  { %2264 = vst [vmem:[#allocation1 + $0x1] ss:$9 sm:$0xff] %v1819_v25  ;;  %v1854_v25 = vrot.slane %v1765_v31, 5 }
 0x4fe   :  { %2265 = vst [vmem:[#allocation1 + $0x2] ss:$9 sm:$0xff] %v1755_v10 }
 0x4ff   :  { %2266 = vst [vmem:[#allocation1 + $0x3] ss:$9 sm:$0xff] %v1820_v39  ;;  %v1855_v39 = vrot.slane %v1765_v31, 6 }
 0x500   :  { %2267 = vst [vmem:[#allocation1 + $0x4] ss:$9 sm:$0xff] %v1821_v38  ;;  %v1856_v38 = vrot.slane %v1767_v36, 1 }
 0x501   :  { %2268 = vst [vmem:[#allocation1 + $0x5] ss:$9 sm:$0xff] %v1822_v44  ;;  %v1857_v44 = vrot.slane %v1767_v36, 2 }
 0x502   :  { %2269 = vst [vmem:[#allocation1 + $0x6] ss:$9 sm:$0xff] %v1823_v48  ;;  %v1858_v48 = vrot.slane %v1767_v36, 3 }
 0x503   :  { %2270 = vst [vmem:[#allocation1 + $0x7] ss:$9 sm:$0xff] %v1824_v6  ;;  %v1859_v6 = vrot.slane %v1767_v36, 4 }
 0x50a   :  { %v8320_v13 = vld [vmem:[#allocation1] sm:$0xff] }
 0x50b   :  { %2272 = vst [vmem:[#allocation1] ss:$9 sm:$0xff] %v1825_v59  ;;  %v1860_v59 = vrot.slane %v1767_v36, 5 }
 0x50c   :  { %2273 = vst [vmem:[#allocation1 + $0x1] ss:$9 sm:$0xff] %v1757_v47  ;;  %v1769_v47 = vld [vmem:[#allocation2 + $0x1c0] ss:$2 sm:$0x7f] }
 0x50d   :  { %2274 = vst [vmem:[#allocation1 + $0x2] ss:$9 sm:$0xff] %v1826_v50 }
 0x50e   :  { %2275 = vst [vmem:[#allocation1 + $0x3] ss:$9 sm:$0xff] %v1827_v51  ;;  %v1861_v51 = vrot.slane %v1767_v36, 6 }
 0x50f   :  { %2276 = vst [vmem:[#allocation1 + $0x4] ss:$9 sm:$0xff] %v1828_v54  ;;  %v1862_v54 = vrot.slane %v1769_v47, 1 }
 0x510   :  { %2277 = vst [vmem:[#allocation1 + $0x5] ss:$9 sm:$0xff] %v1829_v20  ;;  %v1863_v20 = vrot.slane %v1769_v47, 2 }
 0x511   :  { %2278 = vst [vmem:[#allocation1 + $0x6] ss:$9 sm:$0xff] %v1830_v30  ;;  %v1864_v30 = vrot.slane %v1769_v47, 3 }
 0x512   :  { %2279 = vst [vmem:[#allocation1 + $0x7] ss:$9 sm:$0xff] %v1831_v56  ;;  %v1865_v56 = vrot.slane %v1769_v47, 4 }
 0x519   :  { %v8322_v62 = vld [vmem:[#allocation1] sm:$0xff] }
 0x51a   :  { %2281 = vst [vmem:[#allocation1] ss:$9 sm:$0xff] %v1759_v57  ;;  %v1866_v57 = vrot.slane %v1769_v47, 5 }
 0x51b   :  { %2282 = vst [vmem:[#allocation1 + $0x1] ss:$9 sm:$0xff] %v1832_v61  ;;  %v1867_v61 = vrot.slane %v1769_v47, 6 }
 0x51c   :  { %2283 = vst [vmem:[#allocation1 + $0x2] ss:$9 sm:$0xff] %v1833_v63 }
 0x51d   :  { %2284 = vst [vmem:[#allocation1 + $0x3] ss:$9 sm:$0xff] %v1834_v0  ;;  %v7247_v0 = vld [vmem:[%s10505_s3 + $0x78] sm:$0xff] }
 0x51e   :  { %2285 = vst [vmem:[#allocation1 + $0x4] ss:$9 sm:$0xff] %v1835_v1  ;;  %2163 = vmatpush.msra.mxu1 %v7247_v0  ;;  %v7246_v1 = vld [vmem:[%s10505_s3 + $0x70] sm:$0xff] }
 0x51f   :  { %2286 = vst [vmem:[#allocation1 + $0x5] ss:$9 sm:$0xff] %v1836_v3  ;;  %v2412_v3 = vld [vmem:[#allocation2 + $0x2] ss:$2 sm:$0x7f] }
 0x520   :  { %2287 = vst [vmem:[#allocation1 + $0x6] ss:$9 sm:$0xff] %v1837_v9  ;;  %2164 = vmatpush.msra.mxu1 %v7246_v1  ;;  %v2453_v9 = vrot.slane %v2412_v3, 1 }
 0x521   :  { %2288 = vst [vmem:[#allocation1 + $0x7] ss:$9 sm:$0xff] %v1761_v11 }
 0x528   :  { %v8324_v16 = vld [vmem:[#allocation1] sm:$0xff] }
 0x529   :  { %2290 = vst [vmem:[#allocation1] ss:$9 sm:$0xff] %v1838_v12  ;;  %v2454_v12 = vrot.slane %v2412_v3, 2 }
 0x52a   :  { %2291 = vst [vmem:[#allocation1 + $0x1] ss:$9 sm:$0xff] %v1839_v15  ;;  %v2455_v15 = vrot.slane %v2412_v3, 3 }
 0x52b   :  { %2292 = vst [vmem:[#allocation1 + $0x2] ss:$9 sm:$0xff] %v1840_v17  ;;  %v2456_v17 = vrot.slane %v2412_v3, 4 }
 0x52c   :  { %2293 = vst [vmem:[#allocation1 + $0x3] ss:$9 sm:$0xff] %v1841_v19  ;;  %v2457_v19 = vrot.slane %v2412_v3, 5 }
 0x52d   :  { %2294 = vst [vmem:[#allocation1 + $0x4] ss:$9 sm:$0xff] %v1842_v2  ;;  %v2458_v2 = vrot.slane %v2412_v3, 6 }
 0x52e   :  { %2295 = vst [vmem:[#allocation1 + $0x5] ss:$9 sm:$0xff] %v1843_v28  ;;  %v7244_v28 = vld [vmem:[%s10505_s3 + $0x60] sm:$0xff] }
 0x52f   :  { %2296 = vst [vmem:[#allocation1 + $0x6] ss:$9 sm:$0xff] %v1763_v42  ;;  %v7245_v42 = vld [vmem:[%s10505_s3 + $0x68] sm:$0xff] }
 0x530   :  { %2297 = vst [vmem:[#allocation1 + $0x7] ss:$9 sm:$0xff] %v1844_v26  ;;  %2165 = vmatpush.msra.mxu1 %v7245_v42  ;;  %v2414_v26 = vld [vmem:[#allocation2 + $0x22] ss:$2 sm:$0x7f] }
 0x532   :  { %2166 = vmatpush.msra.mxu1 %v7244_v28 }
 0x537   :  { %v8326_v40 = vld [vmem:[#allocation1] sm:$0xff] }
 0x538   :  { %2299 = vst [vmem:[#allocation1] ss:$9 sm:$0xff] %v1845_v53  ;;  %v2459_v53 = vrot.slane %v2414_v26, 1 }
 0x539   :  { %2300 = vst [vmem:[#allocation1 + $0x1] ss:$9 sm:$0xff] %v1846_v27  ;;  %v2460_v27 = vrot.slane %v2414_v26, 2 }
 0x53a   :  { %2301 = vst [vmem:[#allocation1 + $0x2] ss:$9 sm:$0xff] %v1847_v29 }
 0x53b   :  { %2302 = vst [vmem:[#allocation1 + $0x3] ss:$9 sm:$0xff] %v1848_v4  ;;  %v2461_v4 = vrot.slane %v2414_v26, 3 }
 0x53c   :  { %2303 = vst [vmem:[#allocation1 + $0x4] ss:$9 sm:$0xff] %v1849_v32  ;;  %v2462_v32 = vrot.slane %v2414_v26, 4 }
 0x53d   :  { %2304 = vst [vmem:[#allocation1 + $0x5] ss:$9 sm:$0xff] %v1765_v31  ;;  %v7243_v31 = vld [vmem:[%s10505_s3 + $0x58] sm:$0xff] }
 0x53e   :  { %2305 = vst [vmem:[#allocation1 + $0x6] ss:$9 sm:$0xff] %v1850_v46  ;;  %2167 = vmatpush.msra.mxu1 %v7243_v31  ;;  %v2416_v46 = vld [vmem:[#allocation2 + $0x42] ss:$2 sm:$0x7f] }
 0x53f   :  { %2306 = vst [vmem:[#allocation1 + $0x7] ss:$9 sm:$0xff] %v1851_v33  ;;  %v2463_v33 = vrot.slane %v2414_v26, 5 }
 0x546   :  { %v8328_v10 = vld [vmem:[#allocation1] sm:$0xff] }
 0x547   :  { %2308 = vst [vmem:[#allocation1] ss:$9 sm:$0xff] %v1852_v35  ;;  %v2464_v35 = vrot.slane %v2414_v26, 6 }
 0x548   :  { %2309 = vst [vmem:[#allocation1 + $0x1] ss:$9 sm:$0xff] %v1853_v23  ;;  %v7242_v23 = vld [vmem:[%s10505_s3 + $0x50] sm:$0xff] }
 0x549   :  { %2310 = vst [vmem:[#allocation1 + $0x2] ss:$9 sm:$0xff] %v1854_v25  ;;  %v2465_v25 = vrot.slane %v2416_v46, 1  ;;  %2168 = vmatpush.msra.mxu1 %v7242_v23 }
 0x54a   :  { %2311 = vst [vmem:[#allocation1 + $0x3] ss:$9 sm:$0xff] %v1855_v39  ;;  %v7240_v39 = vld [vmem:[%s10505_s3 + $0x40] sm:$0xff] }
 0x54b   :  { %2312 = vst [vmem:[#allocation1 + $0x4] ss:$9 sm:$0xff] %v1767_v36  ;;  %v7241_v36 = vld [vmem:[%s10505_s3 + $0x48] sm:$0xff] }
 0x54c   :  { %2313 = vst [vmem:[#allocation1 + $0x5] ss:$9 sm:$0xff] %v1856_v38  ;;  %2169 = vmatpush.msra.mxu1 %v7241_v36  ;;  %v2466_v38 = vrot.slane %v2416_v46, 2 }
 0x54d   :  { %2314 = vst [vmem:[#allocation1 + $0x6] ss:$9 sm:$0xff] %v1857_v44  ;;  %v2467_v44 = vrot.slane %v2416_v46, 3 }
 0x54e   :  { %2315 = vst [vmem:[#allocation1 + $0x7] ss:$9 sm:$0xff] %v1858_v48  ;;  %2170 = vmatpush.msra.mxu1 %v7240_v39 }
 0x54f   :  { %7248 = vmatmul.msk.f32.vlgmr.msra.gmra.mxu1 %vm1635_vm11, %v8284_v7 }
 0x555   :  { %v8330_v50 = vld [vmem:[#allocation1] sm:$0xff] }
 0x556   :  { %2317 = vst [vmem:[#allocation1] ss:$9 sm:$0xff] %v1859_v6  ;;  %v2468_v6 = vrot.slane %v2416_v46, 4 }
 0x557   :  { %2318 = vst [vmem:[#allocation1 + $0x1] ss:$9 sm:$0xff] %v1860_v59  ;;  %v2469_v59 = vrot.slane %v2416_v46, 5  ;;  %7249 = vmatmul.msk.f32.gmra.mxu1 %vm1635_vm11, %v8286_v21 }
 0x558   :  { %2319 = vst [vmem:[#allocation1 + $0x2] ss:$9 sm:$0xff] %v1861_v51  ;;  %v2470_v51 = vrot.slane %v2416_v46, 6 }
 0x559   :  { %2320 = vst [vmem:[#allocation1 + $0x3] ss:$9 sm:$0xff] %v1769_v47  ;;  %v2418_v47 = vld [vmem:[#allocation2 + $0x62] ss:$2 sm:$0x7f] }
 0x55a   :  { %2321 = vst [vmem:[#allocation1 + $0x4] ss:$9 sm:$0xff] %v1862_v54  ;;  %v2471_v54 = vrot.slane %v2418_v47, 1  ;;  %v2473_v7 = vrot.slane %v2418_v47, 3  ;;  %v2476_v0 = vrot.slane %v2418_v47, 6 }
 0x55b   :  { %2322 = vst [vmem:[#allocation1 + $0x5] ss:$9 sm:$0xff] %v1863_v20  ;;  %v2472_v20 = vrot.slane %v2418_v47, 2 }
 0x55c   :  { %2323 = vst [vmem:[#allocation1 + $0x6] ss:$9 sm:$0xff] %v1864_v30  ;;  %v2474_v30 = vrot.slane %v2418_v47, 4 }
 0x55d   :  { %2324 = vst [vmem:[#allocation1 + $0x7] ss:$9 sm:$0xff] %v1865_v56 }
 0x55f   :  { %7250 = vmatmul.msk.f32.gmra.mxu1 %vm1635_vm11, %v8288_v14 }
 0x564   :  { %v8332_v63 = vld [vmem:[#allocation1] sm:$0xff] }
 0x565   :  { %2326 = vst [vmem:[#allocation1] ss:$9 sm:$0xff] %v1866_v57  ;;  %v2420_v57 = vld [vmem:[#allocation2 + $0x82] ss:$2 sm:$0x7f] }
 0x566   :  { %2327 = vst [vmem:[#allocation1 + $0x1] ss:$9 sm:$0xff] %v1867_v61  ;;  %v2475_v61 = vrot.slane %v2418_v47, 5  ;;  %v2477_v21 = vrot.slane %v2420_v57, 1  ;;  %v2478_v1 = vrot.slane %v2420_v57, 2  ;;  %v2480_v14 = vrot.slane %v2420_v57, 4 }
 0x567   :  { %7251 = vmatmul.msk.f32.gmra.mxu1 %vm1635_vm11, %v8290_v58 }
 0x56d   :  { %v8340_v11 = vld [vmem:[#allocation1] sm:$0xff] }
 0x56e   :  { %2546 = vst [vmem:[#allocation1] ss:$9 sm:$0xff] %v2412_v3  ;;  %v2479_v3 = vrot.slane %v2420_v57, 3 }
 0x56f   :  { %2548 = vst [vmem:[#allocation1 + $0x1] ss:$9 sm:$0xff] %v2453_v9  ;;  %7252 = vmatmul.msk.f32.gmra.mxu1 %vm1635_vm11, %v8292_v43  ;;  %v2422_v9 = vld [vmem:[#allocation2 + $0xa2] ss:$2 sm:$0x7f] }
 0x570   :  { %2550 = vst [vmem:[#allocation1 + $0x2] ss:$9 sm:$0xff] %v2454_v12  ;;  %v2481_v12 = vrot.slane %v2420_v57, 5  ;;  %v2484_v42 = vrot.slane %v2422_v9, 2  ;;  %v2485_v58 = vrot.slane %v2422_v9, 3  ;;  %v2487_v28 = vrot.slane %v2422_v9, 5 }
 0x571   :  { %2552 = vst [vmem:[#allocation1 + $0x3] ss:$9 sm:$0xff] %v2455_v15  ;;  %v2424_v43 = vld [vmem:[#allocation2 + $0xc2] ss:$2 sm:$0x7f] }
 0x572   :  { %2554 = vst [vmem:[#allocation1 + $0x4] ss:$9 sm:$0xff] %v2456_v17  ;;  %v2482_v17 = vrot.slane %v2420_v57, 6  ;;  %v2490_v31 = vrot.slane %v2424_v43, 2 }
 0x573   :  { %2556 = vst [vmem:[#allocation1 + $0x5] ss:$9 sm:$0xff] %v2457_v19  ;;  %v2483_v19 = vrot.slane %v2422_v9, 1 }
 0x574   :  { %2558 = vst [vmem:[#allocation1 + $0x6] ss:$9 sm:$0xff] %v2458_v2  ;;  %v2486_v2 = vrot.slane %v2422_v9, 4 }
 0x575   :  { %2560 = vst [vmem:[#allocation1 + $0x7] ss:$9 sm:$0xff] %v2414_v26  ;;  %v2488_v26 = vrot.slane %v2422_v9, 6 }
 0x577   :  { %7253 = vmatmul.msk.f32.gmra.mxu1 %vm1635_vm11, %v8294_v41  ;;  %v2493_v41 = vrot.slane %v2424_v43, 5 }
 0x57c   :  { %v8348_v29 = vld [vmem:[#allocation1] sm:$0xff] }
 0x57d   :  { %2562 = vst [vmem:[#allocation1] ss:$9 sm:$0xff] %v2459_v53 }
 0x57e   :  { %2563 = vst [vmem:[#allocation1 + $0x1] ss:$9 sm:$0xff] %v2460_v27  ;;  %v2489_v27 = vrot.slane %v2424_v43, 1 }
 0x57f   :  { %2564 = vst [vmem:[#allocation1 + $0x2] ss:$9 sm:$0xff] %v2461_v4  ;;  %7254 = vmatmul.msk.f32.gmra.mxu1 %vm1635_vm11, %v8296_v49  ;;  %v2491_v4 = vrot.slane %v2424_v43, 3  ;;  %v2426_v49 = vld [vmem:[#allocation2 + $0x102] ss:$2 sm:$0x7f] }
 0x580   :  { %2565 = vst [vmem:[#allocation1 + $0x3] ss:$9 sm:$0xff] %v2462_v32  ;;  %v2492_v32 = vrot.slane %v2424_v43, 4  ;;  %v2496_v23 = vrot.slane %v2426_v49, 2  ;;  %v2497_v36 = vrot.slane %v2426_v49, 3  ;;  %v2499_v39 = vrot.slane %v2426_v49, 5 }
 0x581   :  { %2566 = vst [vmem:[#allocation1 + $0x4] ss:$9 sm:$0xff] %v2463_v33 }
 0x582   :  { %2567 = vst [vmem:[#allocation1 + $0x5] ss:$9 sm:$0xff] %v2464_v35  ;;  %v2495_v35 = vrot.slane %v2426_v49, 1 }
 0x583   :  { %2568 = vst [vmem:[#allocation1 + $0x6] ss:$9 sm:$0xff] %v2416_v46  ;;  %v2494_v46 = vrot.slane %v2424_v43, 6 }
 0x584   :  { %2569 = vst [vmem:[#allocation1 + $0x7] ss:$9 sm:$0xff] %v2465_v25  ;;  %v2498_v25 = vrot.slane %v2426_v49, 4 }
 0x587   :  { %7255 = vmatmul.msk.f32.gmra.mxu1 %vm1635_vm11, %v8298_v5  ;;  %v2428_v5 = vld [vmem:[#allocation2 + $0x122] ss:$2 sm:$0x7f] }
 0x58b   :  { %v8364_v48 = vld [vmem:[#allocation1] sm:$0xff] }
 0x58c   :  { %2571 = vst [vmem:[#allocation1] ss:$9 sm:$0xff] %v2466_v38  ;;  %v2500_v38 = vrot.slane %v2426_v49, 6 }
 0x58d   :  { %2572 = vst [vmem:[#allocation1 + $0x1] ss:$9 sm:$0xff] %v2467_v44  ;;  %v2501_v44 = vrot.slane %v2428_v5, 1 }
 0x58e   :  { %2573 = vst [vmem:[#allocation1 + $0x2] ss:$9 sm:$0xff] %v2468_v6  ;;  %v2502_v6 = vrot.slane %v2428_v5, 2 }
 0x58f   :  { %2574 = vst [vmem:[#allocation1 + $0x3] ss:$9 sm:$0xff] %v2469_v59  ;;  %7256 = vmatmul.msk.f32.gmra.mxu1 %vm1635_vm11, %v8300_v22  ;;  %v2504_v59 = vrot.slane %v2428_v5, 4 }
 0x590   :  { %2575 = vst [vmem:[#allocation1 + $0x4] ss:$9 sm:$0xff] %v2470_v51  ;;  %v2505_v51 = vrot.slane %v2428_v5, 5 }
 0x591   :  { %2576 = vst [vmem:[#allocation1 + $0x5] ss:$9 sm:$0xff] %v2418_v47  ;;  %v2503_v47 = vrot.slane %v2428_v5, 3 }
 0x592   :  { %2577 = vst [vmem:[#allocation1 + $0x6] ss:$9 sm:$0xff] %v2471_v54  ;;  %v2506_v54 = vrot.slane %v2428_v5, 6 }
 0x593   :  { %2578 = vst [vmem:[#allocation1 + $0x7] ss:$9 sm:$0xff] %v2472_v20  ;;  %v2430_v20 = vld [vmem:[#allocation2 + $0x142] ss:$2 sm:$0x7f] }
 0x597   :  { %7257 = vmatmul.msk.f32.gmra.mxu1 %vm1635_vm11, %v8302_v55  ;;  %v2507_v55 = vrot.slane %v2430_v20, 1 }
 0x59a   :  { %v8370_v56 = vld [vmem:[#allocation1] sm:$0xff] }
 0x59b   :  { %2580 = vst [vmem:[#allocation1] ss:$9 sm:$0xff] %v2473_v7  ;;  %v2508_v7 = vrot.slane %v2430_v20, 2 }
 0x59c   :  { %2581 = vst [vmem:[#allocation1 + $0x1] ss:$9 sm:$0xff] %v2474_v30 }
 0x59d   :  { %2582 = vst [vmem:[#allocation1 + $0x2] ss:$9 sm:$0xff] %v2475_v61  ;;  %v2432_v61 = vld [vmem:[#allocation2 + $0x162] ss:$2 sm:$0x7f] }
 0x59e   :  { %2583 = vst [vmem:[#allocation1 + $0x3] ss:$9 sm:$0xff] %v2476_v0  ;;  %v2511_v0 = vrot.slane %v2430_v20, 5 }
 0x59f   :  { %2584 = vst [vmem:[#allocation1 + $0x4] ss:$9 sm:$0xff] %v2420_v57  ;;  %7258 = vmatmul.msk.f32.gmra.mxu1 %vm1635_vm11, %v8304_v60  ;;  %v2509_v60 = vrot.slane %v2430_v20, 3  ;;  %v2510_v57 = vrot.slane %v2430_v20, 4 }
 0x5a0   :  { %2585 = vst [vmem:[#allocation1 + $0x5] ss:$9 sm:$0xff] %v2477_v21  ;;  %v2512_v21 = vrot.slane %v2430_v20, 6 }
 0x5a1   :  { %2586 = vst [vmem:[#allocation1 + $0x6] ss:$9 sm:$0xff] %v2478_v1  ;;  %v2513_v1 = vrot.slane %v2432_v61, 1 }
 0x5a2   :  { %2587 = vst [vmem:[#allocation1 + $0x7] ss:$9 sm:$0xff] %v2479_v3  ;;  %v2515_v3 = vrot.slane %v2432_v61, 3 }
 0x5a7   :  { %7259 = vmatmul.msk.f32.gmra.mxu1 %vm1635_vm11, %v8306_v52  ;;  %v2514_v52 = vrot.slane %v2432_v61, 2 }
 0x5a9   :  { %v8376_v15 = vld [vmem:[#allocation1] sm:$0xff] }
 0x5aa   :  { %2589 = vst [vmem:[#allocation1] ss:$9 sm:$0xff] %v2480_v14 }
 0x5ab   :  { %2590 = vst [vmem:[#allocation1 + $0x1] ss:$9 sm:$0xff] %v2481_v12  ;;  %v2434_v12 = vld [vmem:[#allocation2 + $0x182] ss:$2 sm:$0x7f] }
 0x5ac   :  { %2591 = vst [vmem:[#allocation1 + $0x2] ss:$9 sm:$0xff] %v2482_v17  ;;  %v2517_v17 = vrot.slane %v2432_v61, 5 }
 0x5ad   :  { %2592 = vst [vmem:[#allocation1 + $0x3] ss:$9 sm:$0xff] %v2422_v9  ;;  %v2516_v9 = vrot.slane %v2432_v61, 4 }
 0x5ae   :  { %2593 = vst [vmem:[#allocation1 + $0x4] ss:$9 sm:$0xff] %v2483_v19  ;;  %v2519_v19 = vrot.slane %v2434_v12, 1 }
 0x5af   :  { %2594 = vst [vmem:[#allocation1 + $0x5] ss:$9 sm:$0xff] %v2484_v42  ;;  %7260 = vmatmul.msk.f32.gmra.mxu1 %vm1635_vm11, %v8308_v45  ;;  %v2518_v45 = vrot.slane %v2432_v61, 6  ;;  %v2520_v42 = vrot.slane %v2434_v12, 2 }
 0x5b0   :  { %2595 = vst [vmem:[#allocation1 + $0x6] ss:$9 sm:$0xff] %v2485_v58  ;;  %v2521_v58 = vrot.slane %v2434_v12, 3 }
 0x5b1   :  { %2596 = vst [vmem:[#allocation1 + $0x7] ss:$9 sm:$0xff] %v2486_v2  ;;  %v2522_v2 = vrot.slane %v2434_v12, 4 }
 0x5b8   :  { %v8382_v53 = vld [vmem:[#allocation1] sm:$0xff] }
 0x5b9   :  { %2598 = vst [vmem:[#allocation1] ss:$9 sm:$0xff] %v2487_v28  ;;  %v2436_v28 = vld [vmem:[#allocation2 + $0x1a2] ss:$2 sm:$0x7f] }
 0x5ba   :  { %2599 = vst [vmem:[#allocation1 + $0x1] ss:$9 sm:$0xff] %v2488_v26  ;;  %v2523_v26 = vrot.slane %v2434_v12, 5 }
 0x5bb   :  { %2600 = vst [vmem:[#allocation1 + $0x2] ss:$9 sm:$0xff] %v2424_v43 }
 0x5bc   :  { %2601 = vst [vmem:[#allocation1 + $0x3] ss:$9 sm:$0xff] %v2489_v27  ;;  %v2524_v27 = vrot.slane %v2434_v12, 6 }
 0x5bd   :  { %2602 = vst [vmem:[#allocation1 + $0x4] ss:$9 sm:$0xff] %v2490_v31  ;;  %v2525_v31 = vrot.slane %v2436_v28, 1 }
 0x5be   :  { %2603 = vst [vmem:[#allocation1 + $0x5] ss:$9 sm:$0xff] %v2491_v4  ;;  %v2526_v4 = vrot.slane %v2436_v28, 2 }
 0x5bf   :  { %2604 = vst [vmem:[#allocation1 + $0x6] ss:$9 sm:$0xff] %v2492_v32  ;;  %v2527_v32 = vrot.slane %v2436_v28, 3 }
 0x5c0   :  { %2605 = vst [vmem:[#allocation1 + $0x7] ss:$9 sm:$0xff] %v2493_v41  ;;  %v1875_v41 = vld [vmem:[%s10505_s3 + $0x38] sm:$0xff] }
 0x5c1   :  { %2363 = vmatpush.msra.mxu2 %v1875_v41  ;;  %v2766_v41 = vld [vmem:[#allocation2 + $0x70] ss:$2 sm:$0x7f] }
 0x5c7   :  { %v8386_v33 = vld [vmem:[#allocation1] sm:$0xff] }
 0x5c8   :  { %2607 = vst [vmem:[#allocation1] ss:$9 sm:$0xff] %v2494_v46  ;;  %v2528_v46 = vrot.slane %v2436_v28, 4 }
 0x5c9   :  { %2608 = vst [vmem:[#allocation1 + $0x1] ss:$9 sm:$0xff] %v2426_v49  ;;  %v1874_v49 = vld [vmem:[%s10505_s3 + $0x30] sm:$0xff] }
 0x5ca   :  { %2609 = vst [vmem:[#allocation1 + $0x2] ss:$9 sm:$0xff] %v2495_v35  ;;  %2364 = vmatpush.msra.mxu2 %v1874_v49  ;;  %v2438_v35 = vld [vmem:[#allocation2 + $0x1c2] ss:$2 sm:$0x7f] }
 0x5cb   :  { %2610 = vst [vmem:[#allocation1 + $0x3] ss:$9 sm:$0xff] %v2496_v23  ;;  %v2529_v23 = vrot.slane %v2436_v28, 5 }
 0x5cc   :  { %2611 = vst [vmem:[#allocation1 + $0x4] ss:$9 sm:$0xff] %v2497_v36 }
 0x5cd   :  { %2612 = vst [vmem:[#allocation1 + $0x5] ss:$9 sm:$0xff] %v2498_v25  ;;  %v2530_v25 = vrot.slane %v2436_v28, 6 }
 0x5ce   :  { %2613 = vst [vmem:[#allocation1 + $0x6] ss:$9 sm:$0xff] %v2499_v39  ;;  %v2531_v39 = vrot.slane %v2438_v35, 1 }
 0x5cf   :  { %2614 = vst [vmem:[#allocation1 + $0x7] ss:$9 sm:$0xff] %v2500_v38  ;;  %v2532_v38 = vrot.slane %v2438_v35, 2 }
 0x5d6   :  { %v8392_v22 = vld [vmem:[#allocation1] sm:$0xff] }
 0x5d7   :  { %2616 = vst [vmem:[#allocation1] ss:$9 sm:$0xff] %v2428_v5  ;;  %v2533_v5 = vrot.slane %v2438_v35, 3 }
 0x5d8   :  { %2617 = vst [vmem:[#allocation1 + $0x1] ss:$9 sm:$0xff] %v2501_v44  ;;  %v2534_v44 = vrot.slane %v2438_v35, 4 }
 0x5d9   :  { %2618 = vst [vmem:[#allocation1 + $0x2] ss:$9 sm:$0xff] %v2502_v6  ;;  %v1873_v6 = vld [vmem:[%s10505_s3 + $0x28] sm:$0xff] }
 0x5da   :  { %2619 = vst [vmem:[#allocation1 + $0x3] ss:$9 sm:$0xff] %v2503_v47  ;;  %2365 = vmatpush.msra.mxu2 %v1873_v6  ;;  %v1872_v47 = vld [vmem:[%s10505_s3 + $0x20] sm:$0xff] }
 0x5db   :  { %2620 = vst [vmem:[#allocation1 + $0x4] ss:$9 sm:$0xff] %v2504_v59  ;;  %v2535_v59 = vrot.slane %v2438_v35, 5 }
 0x5dc   :  { %2621 = vst [vmem:[#allocation1 + $0x5] ss:$9 sm:$0xff] %v2505_v51  ;;  %2366 = vmatpush.msra.mxu2 %v1872_v47  ;;  %v2536_v51 = vrot.slane %v2438_v35, 6 }
 0x5dd   :  { %2622 = vst [vmem:[#allocation1 + $0x6] ss:$9 sm:$0xff] %v2506_v54 }
 0x5de   :  { %2623 = vst [vmem:[#allocation1 + $0x7] ss:$9 sm:$0xff] %v2430_v20  ;;  %v1871_v20 = vld [vmem:[%s10505_s3 + $0x18] sm:$0xff] }
 0x5df   :  { %2367 = vmatpush.msra.mxu2 %v1871_v20 }
 0x5e5   :  { %v8398_v30 = vld [vmem:[#allocation1] sm:$0xff] }
 0x5e6   :  { %2625 = vst [vmem:[#allocation1] ss:$9 sm:$0xff] %v2507_v55  ;;  %v2760_v55 = vld [vmem:[#allocation2 + $0x10] ss:$2 sm:$0x7f] }
 0x5e7   :  { %2626 = vst [vmem:[#allocation1 + $0x1] ss:$9 sm:$0xff] %v2508_v7  ;;  %v2801_v7 = vrot.slane %v2760_v55, 1 }
 0x5e8   :  { %2627 = vst [vmem:[#allocation1 + $0x2] ss:$9 sm:$0xff] %v2509_v60 }
 0x5e9   :  { %2628 = vst [vmem:[#allocation1 + $0x3] ss:$9 sm:$0xff] %v2510_v57  ;;  %v2802_v57 = vrot.slane %v2760_v55, 2 }
 0x5ea   :  { %2629 = vst [vmem:[#allocation1 + $0x4] ss:$9 sm:$0xff] %v2511_v0  ;;  %v2804_v0 = vrot.slane %v2760_v55, 4 }
 0x5eb   :  { %2630 = vst [vmem:[#allocation1 + $0x5] ss:$9 sm:$0xff] %v2512_v21  ;;  %v1870_v21 = vld [vmem:[%s10505_s3 + $0x10] sm:$0xff] }
 0x5ec   :  { %2631 = vst [vmem:[#allocation1 + $0x6] ss:$9 sm:$0xff] %v2432_v61  ;;  %v2803_v61 = vrot.slane %v2760_v55, 3  ;;  %2368 = vmatpush.msra.mxu2 %v1870_v21 }
 0x5ed   :  { %2632 = vst [vmem:[#allocation1 + $0x7] ss:$9 sm:$0xff] %v2513_v1  ;;  %v2805_v1 = vrot.slane %v2760_v55, 5 }
 0x5f4   :  { %v8402_v14 = vld [vmem:[#allocation1] sm:$0xff] }
 0x5f5   :  { %2634 = vst [vmem:[#allocation1] ss:$9 sm:$0xff] %v2514_v52  ;;  %v2806_v52 = vrot.slane %v2760_v55, 6 }
 0x5f6   :  { %2635 = vst [vmem:[#allocation1 + $0x1] ss:$9 sm:$0xff] %v2515_v3  ;;  %v1869_v3 = vld [vmem:[%s10505_s3 + $0x8] sm:$0xff] }
 0x5f7   :  { %2636 = vst [vmem:[#allocation1 + $0x2] ss:$9 sm:$0xff] %v2516_v9  ;;  %2369 = vmatpush.msra.mxu2 %v1869_v3  ;;  %v2762_v9 = vld [vmem:[#allocation2 + $0x30] ss:$2 sm:$0x7f] }
 0x5f8   :  { %2637 = vst [vmem:[#allocation1 + $0x3] ss:$9 sm:$0xff] %v2517_v17  ;;  %v1868_v17 = vld [vmem:[%s10505_s3] sm:$0xff] }
 0x5f9   :  { %2638 = vst [vmem:[#allocation1 + $0x4] ss:$9 sm:$0xff] %v2518_v45  ;;  %v2808_v45 = vrot.slane %v2762_v9, 2  ;;  %2370 = vmatpush.msra.mxu2 %v1868_v17 }
 0x5fa   :  { %2639 = vst [vmem:[#allocation1 + $0x5] ss:$9 sm:$0xff] %v2434_v12  ;;  %v2807_v12 = vrot.slane %v2762_v9, 1  ;;  %7261 = vmatmul.msk.f32.vlgmr.msra.gmra.mxu2 %vm1635_vm11, %v8310_v34 }
 0x5fb   :  { %2640 = vst [vmem:[#allocation1 + $0x6] ss:$9 sm:$0xff] %v2519_v19 }
 0x5fc   :  { %2641 = vst [vmem:[#allocation1 + $0x7] ss:$9 sm:$0xff] %v2520_v42  ;;  %v2809_v42 = vrot.slane %v2762_v9, 3 }
 0x602   :  { %7262 = vmatmul.msk.f32.gmra.mxu2 %vm1635_vm11, %v8312_v8  ;;  %v2821_v8 = vrot.slane %v2766_v41, 3 }
 0x603   :  { %v8404_v43 = vld [vmem:[#allocation1] sm:$0xff] }
 0x604   :  { %2643 = vst [vmem:[#allocation1] ss:$9 sm:$0xff] %v2521_v58  ;;  %v2810_v58 = vrot.slane %v2762_v9, 4 }
 0x605   :  { %2644 = vst [vmem:[#allocation1 + $0x1] ss:$9 sm:$0xff] %v2522_v2  ;;  %v2764_v2 = vld [vmem:[#allocation2 + $0x50] ss:$2 sm:$0x7f] }
 0x606   :  { %2645 = vst [vmem:[#allocation1 + $0x2] ss:$9 sm:$0xff] %v2523_v26  ;;  %v2812_v26 = vrot.slane %v2762_v9, 6  ;;  %v2816_v34 = vrot.slane %v2764_v2, 4  ;;  %v2817_v49 = vrot.slane %v2764_v2, 5 }
 0x607   :  { %2646 = vst [vmem:[#allocation1 + $0x3] ss:$9 sm:$0xff] %v2524_v27  ;;  %v2813_v27 = vrot.slane %v2764_v2, 1 }
 0x608   :  { %2647 = vst [vmem:[#allocation1 + $0x4] ss:$9 sm:$0xff] %v2436_v28  ;;  %v2811_v28 = vrot.slane %v2762_v9, 5 }
 0x609   :  { %2648 = vst [vmem:[#allocation1 + $0x5] ss:$9 sm:$0xff] %v2525_v31  ;;  %v2814_v31 = vrot.slane %v2764_v2, 2 }
 0x60a   :  { %2649 = vst [vmem:[#allocation1 + $0x6] ss:$9 sm:$0xff] %v2526_v4  ;;  %v2815_v4 = vrot.slane %v2764_v2, 3  ;;  %7263 = vmatmul.msk.f32.gmra.mxu2 %vm1635_vm11, %v8314_v24  ;;  %v2824_v24 = vrot.slane %v2766_v41, 6 }
 0x60b   :  { %2650 = vst [vmem:[#allocation1 + $0x7] ss:$9 sm:$0xff] %v2527_v32 }
 0x612   :  { %v8412_v36 = vld [vmem:[#allocation1] sm:$0xff]  ;;  %7264 = vmatmul.msk.f32.gmra.mxu2 %vm1635_vm11, %v8316_v18 }
 0x613   :  { %2652 = vst [vmem:[#allocation1] ss:$9 sm:$0xff] %v2528_v46  ;;  %v2818_v46 = vrot.slane %v2764_v2, 6 }
 0x614   :  { %2653 = vst [vmem:[#allocation1 + $0x1] ss:$9 sm:$0xff] %v2529_v23  ;;  %v2820_v23 = vrot.slane %v2766_v41, 2 }
 0x615   :  { %2654 = vst [vmem:[#allocation1 + $0x2] ss:$9 sm:$0xff] %v2530_v25  ;;  %v2822_v25 = vrot.slane %v2766_v41, 4 }
 0x616   :  { %2655 = vst [vmem:[#allocation1 + $0x3] ss:$9 sm:$0xff] %v2438_v35  ;;  %v2819_v35 = vrot.slane %v2766_v41, 1 }
 0x617   :  { %2656 = vst [vmem:[#allocation1 + $0x4] ss:$9 sm:$0xff] %v2531_v39 }
 0x618   :  { %2657 = vst [vmem:[#allocation1 + $0x5] ss:$9 sm:$0xff] %v2532_v38  ;;  %v2768_v38 = vld [vmem:[#allocation2 + $0x90] ss:$2 sm:$0x7f] }
 0x619   :  { %2658 = vst [vmem:[#allocation1 + $0x6] ss:$9 sm:$0xff] %v2533_v5  ;;  %v2823_v5 = vrot.slane %v2766_v41, 5  ;;  %v2826_v6 = vrot.slane %v2768_v38, 2  ;;  %v2827_v47 = vrot.slane %v2768_v38, 3  ;;  %v2828_v18 = vrot.slane %v2768_v38, 4 }
 0x61a   :  { %2659 = vst [vmem:[#allocation1 + $0x7] ss:$9 sm:$0xff] %v2534_v44  ;;  %7265 = vmatmul.msk.f32.gmra.mxu2 %vm1635_vm11, %v8318_v37  ;;  %v2825_v44 = vrot.slane %v2768_v38, 1 }
 0x621   :  { %v8420_v54 = vld [vmem:[#allocation1] sm:$0xff] }
 0x622   :  { %2661 = vst [vmem:[#allocation1] ss:$9 sm:$0xff] %v2535_v59  ;;  %7266 = vmatmul.msk.f32.gmra.mxu2 %vm1635_vm11, %v8320_v13  ;;  %v2770_v59 = vld [vmem:[#allocation2 + $0xb0] ss:$2 sm:$0x7f] }
 0x623   :  { %2662 = vst [vmem:[#allocation1 + $0x1] ss:$9 sm:$0xff] %v2536_v51  ;;  %v2829_v51 = vrot.slane %v2768_v38, 5  ;;  %v2831_v37 = vrot.slane %v2770_v59, 1  ;;  %v2836_v21 = vrot.slane %v2770_v59, 6 }
 0x624   :  { %v2772_v13 = vld [vmem:[#allocation2 + $0xd0] ss:$2 sm:$0x7f] }
 0x625   :  { %v2838_v3 = vrot.slane %v2772_v13, 2  ;;  %v2842_v17 = vrot.slane %v2772_v13, 6 }
 0x62a   :  { %v8425_v60 = vld [vmem:[#allocation1] sm:$0xff]  ;;  %7267 = vmatmul.msk.f32.gmra.mxu2 %vm1635_vm11, %v8322_v62  ;;  %v2839_v62 = vrot.slane %v2772_v13, 3 }
 0x62b   :  { %2894 = vst [vmem:[#allocation1] ss:$9 sm:$0xff] %v2760_v55  ;;  %v2830_v55 = vrot.slane %v2768_v38, 6 }
 0x62c   :  { %2896 = vst [vmem:[#allocation1 + $0x1] ss:$9 sm:$0xff] %v2801_v7  ;;  %v2832_v7 = vrot.slane %v2770_v59, 2 }
 0x62d   :  { %2898 = vst [vmem:[#allocation1 + $0x2] ss:$9 sm:$0xff] %v2802_v57  ;;  %v2833_v57 = vrot.slane %v2770_v59, 3 }
 0x62e   :  { %2900 = vst [vmem:[#allocation1 + $0x3] ss:$9 sm:$0xff] %v2803_v61  ;;  %v2834_v61 = vrot.slane %v2770_v59, 4 }
 0x62f   :  { %2902 = vst [vmem:[#allocation1 + $0x4] ss:$9 sm:$0xff] %v2804_v0  ;;  %v2835_v0 = vrot.slane %v2770_v59, 5 }
 0x630   :  { %2904 = vst [vmem:[#allocation1 + $0x5] ss:$9 sm:$0xff] %v2805_v1 }
 0x631   :  { %2906 = vst [vmem:[#allocation1 + $0x6] ss:$9 sm:$0xff] %v2806_v52  ;;  %v2837_v52 = vrot.slane %v2772_v13, 1 }
 0x632   :  { %2908 = vst [vmem:[#allocation1 + $0x7] ss:$9 sm:$0xff] %v2762_v9  ;;  %7268 = vmatmul.msk.f32.gmra.mxu2 %vm1635_vm11, %v8324_v16  ;;  %v2840_v9 = vrot.slane %v2772_v13, 4  ;;  %v2774_v16 = vld [vmem:[#allocation2 + $0x110] ss:$2 sm:$0x7f] }
 0x639   :  { %v8436_v19 = vld [vmem:[#allocation1] sm:$0xff] }
 0x63a   :  { %2910 = vst [vmem:[#allocation1] ss:$9 sm:$0xff] %v2807_v12  ;;  %7269 = vmatmul.msk.f32.gmra.mxu2 %vm1635_vm11, %v8326_v40  ;;  %v2841_v12 = vrot.slane %v2772_v13, 5  ;;  %v2847_v40 = vrot.slane %v2774_v16, 5 }
 0x63b   :  { %2911 = vst [vmem:[#allocation1 + $0x1] ss:$9 sm:$0xff] %v2808_v45 }
 0x63c   :  { %2912 = vst [vmem:[#allocation1 + $0x2] ss:$9 sm:$0xff] %v2809_v42  ;;  %v2843_v42 = vrot.slane %v2774_v16, 1 }
 0x63d   :  { %2913 = vst [vmem:[#allocation1 + $0x3] ss:$9 sm:$0xff] %v2810_v58  ;;  %v2844_v58 = vrot.slane %v2774_v16, 2 }
 0x63e   :  { %2914 = vst [vmem:[#allocation1 + $0x4] ss:$9 sm:$0xff] %v2811_v28  ;;  %v2846_v28 = vrot.slane %v2774_v16, 4 }
 0x63f   :  { %2915 = vst [vmem:[#allocation1 + $0x5] ss:$9 sm:$0xff] %v2812_v26  ;;  %v2848_v26 = vrot.slane %v2774_v16, 6 }
 0x640   :  { %2916 = vst [vmem:[#allocation1 + $0x6] ss:$9 sm:$0xff] %v2764_v2  ;;  %v2845_v2 = vrot.slane %v2774_v16, 3 }
 0x641   :  { %2917 = vst [vmem:[#allocation1 + $0x7] ss:$9 sm:$0xff] %v2813_v27 }
 0x642   :  { %7270 = vmatmul.msk.f32.gmra.mxu2 %vm1635_vm11, %v8328_v10  ;;  %v2776_v10 = vld [vmem:[#allocation2 + $0x130] ss:$2 sm:$0x7f] }
 0x643   :  { %v2849_v27 = vrot.slane %v2776_v10, 1 }
 0x648   :  { %v8442_v32 = vld [vmem:[#allocation1] sm:$0xff] }
 0x649   :  { %2919 = vst [vmem:[#allocation1] ss:$9 sm:$0xff] %v2814_v31 }
 0x64a   :  { %2920 = vst [vmem:[#allocation1 + $0x1] ss:$9 sm:$0xff] %v2815_v4  ;;  %7271 = vmatmul.msk.f32.gmra.mxu2 %vm1635_vm11, %v8330_v50  ;;  %v2850_v4 = vrot.slane %v2776_v10, 2  ;;  %v2778_v50 = vld [vmem:[#allocation2 + $0x150] ss:$2 sm:$0x7f] }
 0x64b   :  { %2921 = vst [vmem:[#allocation1 + $0x2] ss:$9 sm:$0xff] %v2816_v34  ;;  %v2851_v34 = vrot.slane %v2776_v10, 3 }
 0x64c   :  { %2922 = vst [vmem:[#allocation1 + $0x3] ss:$9 sm:$0xff] %v2817_v49  ;;  %v2853_v49 = vrot.slane %v2776_v10, 5 }
 0x64d   :  { %2923 = vst [vmem:[#allocation1 + $0x4] ss:$9 sm:$0xff] %v2818_v46  ;;  %v2854_v46 = vrot.slane %v2776_v10, 6 }
 0x64e   :  { %2924 = vst [vmem:[#allocation1 + $0x5] ss:$9 sm:$0xff] %v2766_v41  ;;  %v2852_v41 = vrot.slane %v2776_v10, 4 }
 0x64f   :  { %2925 = vst [vmem:[#allocation1 + $0x6] ss:$9 sm:$0xff] %v2819_v35  ;;  %v2856_v35 = vrot.slane %v2778_v50, 2 }
 0x650   :  { %2926 = vst [vmem:[#allocation1 + $0x7] ss:$9 sm:$0xff] %v2820_v23 }
 0x652   :  { %7272 = vmatmul.msk.f32.gmra.mxu2 %vm1635_vm11, %v8332_v63  ;;  %v2855_v63 = vrot.slane %v2778_v50, 1 }
 0x657   :  { %v8448_v39 = vld [vmem:[#allocation1] sm:$0xff] }
 0x658   :  { %2928 = vst [vmem:[#allocation1] ss:$9 sm:$0xff] %v2821_v8  ;;  %v2857_v8 = vrot.slane %v2778_v50, 3 }
 0x659   :  { %2929 = vst [vmem:[#allocation1 + $0x1] ss:$9 sm:$0xff] %v2822_v25  ;;  %v2858_v25 = vrot.slane %v2778_v50, 4 }
 0x65a   :  { %2930 = vst [vmem:[#allocation1 + $0x2] ss:$9 sm:$0xff] %v2823_v5  ;;  %7273 = vmatmul.msk.f32.gmra.mxu2 %vm1635_vm11, %v8340_v11  ;;  %v2859_v5 = vrot.slane %v2778_v50, 5 }
 0x65b   :  { %2931 = vst [vmem:[#allocation1 + $0x3] ss:$9 sm:$0xff] %v2824_v24  ;;  %v2860_v24 = vrot.slane %v2778_v50, 6 }
 0x65c   :  { %2932 = vst [vmem:[#allocation1 + $0x4] ss:$9 sm:$0xff] %v2768_v38  ;;  %v2780_v38 = vld [vmem:[#allocation2 + $0x170] ss:$2 sm:$0x7f] }
 0x65d   :  { %2933 = vst [vmem:[#allocation1 + $0x5] ss:$9 sm:$0xff] %v2825_v44  ;;  %v2861_v44 = vrot.slane %v2780_v38, 1  ;;  %v2862_v11 = vrot.slane %v2780_v38, 2 }
 0x65e   :  { %2934 = vst [vmem:[#allocation1 + $0x6] ss:$9 sm:$0xff] %v2826_v6  ;;  %v2863_v6 = vrot.slane %v2780_v38, 3 }
 0x65f   :  { %2935 = vst [vmem:[#allocation1 + $0x7] ss:$9 sm:$0xff] %v2827_v47 }
 0x666   :  { %v8454_v20 = vld [vmem:[#allocation1] sm:$0xff] }
 0x667   :  { %2937 = vst [vmem:[#allocation1] ss:$9 sm:$0xff] %v2828_v18  ;;  %v2864_v18 = vrot.slane %v2780_v38, 4 }
 0x668   :  { %2938 = vst [vmem:[#allocation1 + $0x1] ss:$9 sm:$0xff] %v2829_v51  ;;  %v2865_v51 = vrot.slane %v2780_v38, 5 }
 0x669   :  { %2939 = vst [vmem:[#allocation1 + $0x2] ss:$9 sm:$0xff] %v2830_v55  ;;  %v2866_v55 = vrot.slane %v2780_v38, 6 }
 0x66a   :  { %2940 = vst [vmem:[#allocation1 + $0x3] ss:$9 sm:$0xff] %v2770_v59  ;;  %v2782_v59 = vld [vmem:[#allocation2 + $0x190] ss:$2 sm:$0x7f] }
 0x66b   :  { %2941 = vst [vmem:[#allocation1 + $0x4] ss:$9 sm:$0xff] %v2831_v37  ;;  %v2867_v37 = vrot.slane %v2782_v59, 1 }
 0x66c   :  { %2942 = vst [vmem:[#allocation1 + $0x5] ss:$9 sm:$0xff] %v2832_v7  ;;  %v2868_v7 = vrot.slane %v2782_v59, 2 }
 0x66d   :  { %2943 = vst [vmem:[#allocation1 + $0x6] ss:$9 sm:$0xff] %v2833_v57  ;;  %v2869_v57 = vrot.slane %v2782_v59, 3 }
 0x66e   :  { %2944 = vst [vmem:[#allocation1 + $0x7] ss:$9 sm:$0xff] %v2834_v61  ;;  %v2870_v61 = vrot.slane %v2782_v59, 4 }
 0x675   :  { %v8460_v1 = vld [vmem:[#allocation1] sm:$0xff] }
 0x676   :  { %2946 = vst [vmem:[#allocation1] ss:$9 sm:$0xff] %v2835_v0  ;;  %v2784_v0 = vld [vmem:[#allocation2 + $0x1b0] ss:$2 sm:$0x7f] }
 0x677   :  { %2947 = vst [vmem:[#allocation1 + $0x1] ss:$9 sm:$0xff] %v2836_v21  ;;  %v2871_v21 = vrot.slane %v2782_v59, 5 }
 0x678   :  { %2948 = vst [vmem:[#allocation1 + $0x2] ss:$9 sm:$0xff] %v2772_v13 }
 0x679   :  { %2949 = vst [vmem:[#allocation1 + $0x3] ss:$9 sm:$0xff] %v2837_v52  ;;  %v2872_v52 = vrot.slane %v2782_v59, 6 }
 0x67a   :  { %2950 = vst [vmem:[#allocation1 + $0x4] ss:$9 sm:$0xff] %v2838_v3  ;;  %v2873_v3 = vrot.slane %v2784_v0, 1 }
 0x67b   :  { %2951 = vst [vmem:[#allocation1 + $0x5] ss:$9 sm:$0xff] %v2839_v62  ;;  %v2874_v62 = vrot.slane %v2784_v0, 2 }
 0x67c   :  { %2952 = vst [vmem:[#allocation1 + $0x6] ss:$9 sm:$0xff] %v2840_v9  ;;  %v2875_v9 = vrot.slane %v2784_v0, 3 }
 0x67d   :  { %2953 = vst [vmem:[#allocation1 + $0x7] ss:$9 sm:$0xff] %v2841_v12  ;;  %v2876_v12 = vrot.slane %v2784_v0, 4 }
 0x684   :  { %v8466_v45 = vld [vmem:[#allocation1] sm:$0xff] }
 0x685   :  { %2955 = vst [vmem:[#allocation1] ss:$9 sm:$0xff] %v2842_v17  ;;  %v2877_v17 = vrot.slane %v2784_v0, 5 }
 0x686   :  { %2956 = vst [vmem:[#allocation1 + $0x1] ss:$9 sm:$0xff] %v2774_v16  ;;  %v2786_v16 = vld [vmem:[#allocation2 + $0x1d0] ss:$2 sm:$0x7f] }
 0x687   :  { %2957 = vst [vmem:[#allocation1 + $0x2] ss:$9 sm:$0xff] %v2843_v42 }
 0x688   :  { %2958 = vst [vmem:[#allocation1 + $0x3] ss:$9 sm:$0xff] %v2844_v58  ;;  %v2878_v58 = vrot.slane %v2784_v0, 6 }
 0x689   :  { %2959 = vst [vmem:[#allocation1 + $0x4] ss:$9 sm:$0xff] %v2845_v2  ;;  %v2879_v2 = vrot.slane %v2786_v16, 1 }
 0x68a   :  { %2960 = vst [vmem:[#allocation1 + $0x5] ss:$9 sm:$0xff] %v2846_v28  ;;  %v2880_v28 = vrot.slane %v2786_v16, 2 }
 0x68b   :  { %2961 = vst [vmem:[#allocation1 + $0x6] ss:$9 sm:$0xff] %v2847_v40  ;;  %v2881_v40 = vrot.slane %v2786_v16, 3 }
 0x68c   :  { %2962 = vst [vmem:[#allocation1 + $0x7] ss:$9 sm:$0xff] %v2848_v26  ;;  %v2882_v26 = vrot.slane %v2786_v16, 4 }
 0x693   :  { %v8472_v31 = vld [vmem:[#allocation1] sm:$0xff] }
 0x694   :  { %2964 = vst [vmem:[#allocation1] ss:$9 sm:$0xff] %v2776_v10  ;;  %v7281_v10 = vld [vmem:[%s10505_s3 + $0xb8] sm:$0xff] }
 0x695   :  { %2965 = vst [vmem:[#allocation1 + $0x1] ss:$9 sm:$0xff] %v2849_v27  ;;  %2698 = vmatpush.msra.mxu3 %v7281_v10  ;;  %v7280_v27 = vld [vmem:[%s10505_s3 + $0xb0] sm:$0xff] }
 0x696   :  { %2966 = vst [vmem:[#allocation1 + $0x2] ss:$9 sm:$0xff] %v2850_v4  ;;  %v2883_v4 = vrot.slane %v2786_v16, 5 }
 0x697   :  { %2967 = vst [vmem:[#allocation1 + $0x3] ss:$9 sm:$0xff] %v2851_v34  ;;  %2699 = vmatpush.msra.mxu3 %v7280_v27  ;;  %v2884_v34 = vrot.slane %v2786_v16, 6 }
 0x698   :  { %2968 = vst [vmem:[#allocation1 + $0x4] ss:$9 sm:$0xff] %v2852_v41 }
 0x699   :  { %2969 = vst [vmem:[#allocation1 + $0x5] ss:$9 sm:$0xff] %v2853_v49  ;;  %v3108_v49 = vld [vmem:[#allocation2 + $0x11] ss:$2 sm:$0x7f] }
 0x69a   :  { %2970 = vst [vmem:[#allocation1 + $0x6] ss:$9 sm:$0xff] %v2854_v46  ;;  %v7279_v46 = vld [vmem:[%s10505_s3 + $0xa8] sm:$0xff] }
 0x69b   :  { %2971 = vst [vmem:[#allocation1 + $0x7] ss:$9 sm:$0xff] %v2778_v50  ;;  %2700 = vmatpush.msra.mxu3 %v7279_v46  ;;  %v3149_v50 = vrot.slane %v3108_v49, 1 }
 0x6a2   :  { %v8476_v23 = vld [vmem:[#allocation1] sm:$0xff] }
 0x6a3   :  { %2973 = vst [vmem:[#allocation1] ss:$9 sm:$0xff] %v2855_v63 }
 0x6a4   :  { %2974 = vst [vmem:[#allocation1 + $0x1] ss:$9 sm:$0xff] %v2856_v35  ;;  %v3150_v35 = vrot.slane %v3108_v49, 2 }
 0x6a5   :  { %2975 = vst [vmem:[#allocation1 + $0x2] ss:$9 sm:$0xff] %v2857_v8  ;;  %v3151_v8 = vrot.slane %v3108_v49, 3 }
 0x6a6   :  { %2976 = vst [vmem:[#allocation1 + $0x3] ss:$9 sm:$0xff] %v2858_v25  ;;  %v3152_v25 = vrot.slane %v3108_v49, 4 }
 0x6a7   :  { %2977 = vst [vmem:[#allocation1 + $0x4] ss:$9 sm:$0xff] %v2859_v5  ;;  %v3154_v5 = vrot.slane %v3108_v49, 6 }
 0x6a8   :  { %2978 = vst [vmem:[#allocation1 + $0x5] ss:$9 sm:$0xff] %v2860_v24  ;;  %v7278_v24 = vld [vmem:[%s10505_s3 + $0xa0] sm:$0xff] }
 0x6a9   :  { %2979 = vst [vmem:[#allocation1 + $0x6] ss:$9 sm:$0xff] %v2780_v38  ;;  %v3153_v38 = vrot.slane %v3108_v49, 5  ;;  %2701 = vmatpush.msra.mxu3 %v7278_v24 }
 0x6aa   :  { %2980 = vst [vmem:[#allocation1 + $0x7] ss:$9 sm:$0xff] %v2861_v44  ;;  %v3110_v44 = vld [vmem:[#allocation2 + $0x31] ss:$2 sm:$0x7f] }
 0x6b1   :  { %v8478_v47 = vld [vmem:[#allocation1] sm:$0xff] }
 0x6b2   :  { %2982 = vst [vmem:[#allocation1] ss:$9 sm:$0xff] %v2862_v11  ;;  %v3155_v11 = vrot.slane %v3110_v44, 1 }
 0x6b3   :  { %2983 = vst [vmem:[#allocation1 + $0x1] ss:$9 sm:$0xff] %v2863_v6  ;;  %v3156_v6 = vrot.slane %v3110_v44, 2 }
 0x6b4   :  { %2984 = vst [vmem:[#allocation1 + $0x2] ss:$9 sm:$0xff] %v2864_v18 }
 0x6b5   :  { %2985 = vst [vmem:[#allocation1 + $0x3] ss:$9 sm:$0xff] %v2865_v51  ;;  %v3157_v51 = vrot.slane %v3110_v44, 3 }
 0x6b6   :  { %2986 = vst [vmem:[#allocation1 + $0x4] ss:$9 sm:$0xff] %v2866_v55  ;;  %v3158_v55 = vrot.slane %v3110_v44, 4 }
 0x6b7   :  { %2987 = vst [vmem:[#allocation1 + $0x5] ss:$9 sm:$0xff] %v2782_v59  ;;  %v7277_v59 = vld [vmem:[%s10505_s3 + $0x98] sm:$0xff] }
 0x6b8   :  { %2988 = vst [vmem:[#allocation1 + $0x6] ss:$9 sm:$0xff] %v2867_v37  ;;  %2702 = vmatpush.msra.mxu3 %v7277_v59  ;;  %v7276_v37 = vld [vmem:[%s10505_s3 + $0x90] sm:$0xff] }
 0x6b9   :  { %2989 = vst [vmem:[#allocation1 + $0x7] ss:$9 sm:$0xff] %v2868_v7  ;;  %v3112_v7 = vld [vmem:[#allocation2 + $0x51] ss:$2 sm:$0x7f] }
 0x6ba   :  { %2703 = vmatpush.msra.mxu3 %v7276_v37 }
 0x6c0   :  { %v8480_v13 = vld [vmem:[#allocation1] sm:$0xff] }
 0x6c1   :  { %2991 = vst [vmem:[#allocation1] ss:$9 sm:$0xff] %v2869_v57  ;;  %v3159_v57 = vrot.slane %v3110_v44, 5 }
 0x6c2   :  { %2992 = vst [vmem:[#allocation1 + $0x1] ss:$9 sm:$0xff] %v2870_v61  ;;  %v3160_v61 = vrot.slane %v3110_v44, 6 }
 0x6c3   :  { %2993 = vst [vmem:[#allocation1 + $0x2] ss:$9 sm:$0xff] %v2871_v21  ;;  %v3161_v21 = vrot.slane %v3112_v7, 1 }
 0x6c4   :  { %2994 = vst [vmem:[#allocation1 + $0x3] ss:$9 sm:$0xff] %v2872_v52  ;;  %v3162_v52 = vrot.slane %v3112_v7, 2 }
 0x6c5   :  { %2995 = vst [vmem:[#allocation1 + $0x4] ss:$9 sm:$0xff] %v2784_v0  ;;  %v7275_v0 = vld [vmem:[%s10505_s3 + $0x88] sm:$0xff] }
 0x6c6   :  { %2996 = vst [vmem:[#allocation1 + $0x5] ss:$9 sm:$0xff] %v2873_v3  ;;  %2704 = vmatpush.msra.mxu3 %v7275_v0  ;;  %v7274_v3 = vld [vmem:[%s10505_s3 + $0x80] sm:$0xff] }
 0x6c7   :  { %2997 = vst [vmem:[#allocation1 + $0x6] ss:$9 sm:$0xff] %v2874_v62  ;;  %v3163_v62 = vrot.slane %v3112_v7, 3 }
 0x6c8   :  { %2998 = vst [vmem:[#allocation1 + $0x7] ss:$9 sm:$0xff] %v2875_v9  ;;  %2705 = vmatpush.msra.mxu3 %v7274_v3 }
 0x6c9   :  { %7282 = vmatmul.msk.f32.vlgmr.msra.gmra.mxu3 %vm1635_vm11, %v8348_v29  ;;  %v3116_v29 = vld [vmem:[#allocation2 + $0x91] ss:$2 sm:$0x7f] }
 0x6ca   :  { %v3175_v46 = vrot.slane %v3116_v29, 3 }
 0x6cf   :  { %v8482_v42 = vld [vmem:[#allocation1] sm:$0xff] }
 0x6d0   :  { %3000 = vst [vmem:[#allocation1] ss:$9 sm:$0xff] %v2876_v12  ;;  %v3164_v12 = vrot.slane %v3112_v7, 4 }
 0x6d1   :  { %3001 = vst [vmem:[#allocation1 + $0x1] ss:$9 sm:$0xff] %v2877_v17  ;;  %v3165_v17 = vrot.slane %v3112_v7, 5  ;;  %7283 = vmatmul.msk.f32.gmra.mxu3 %vm1635_vm11, %v8364_v48  ;;  %v3176_v48 = vrot.slane %v3116_v29, 4 }
 0x6d2   :  { %3002 = vst [vmem:[#allocation1 + $0x2] ss:$9 sm:$0xff] %v2878_v58  ;;  %v3166_v58 = vrot.slane %v3112_v7, 6 }
 0x6d3   :  { %3003 = vst [vmem:[#allocation1 + $0x3] ss:$9 sm:$0xff] %v2786_v16  ;;  %v3114_v16 = vld [vmem:[#allocation2 + $0x71] ss:$2 sm:$0x7f] }
 0x6d4   :  { %3004 = vst [vmem:[#allocation1 + $0x4] ss:$9 sm:$0xff] %v2879_v2  ;;  %v3167_v2 = vrot.slane %v3114_v16, 1  ;;  %v3171_v27 = vrot.slane %v3114_v16, 5 }
 0x6d5   :  { %3005 = vst [vmem:[#allocation1 + $0x5] ss:$9 sm:$0xff] %v2880_v28  ;;  %v3168_v28 = vrot.slane %v3114_v16, 2 }
 0x6d6   :  { %3006 = vst [vmem:[#allocation1 + $0x6] ss:$9 sm:$0xff] %v2881_v40  ;;  %v3169_v40 = vrot.slane %v3114_v16, 3 }
 0x6d7   :  { %3007 = vst [vmem:[#allocation1 + $0x7] ss:$9 sm:$0xff] %v2882_v26  ;;  %v3170_v26 = vrot.slane %v3114_v16, 4 }
 0x6d9   :  { %7284 = vmatmul.msk.f32.gmra.mxu3 %vm1635_vm11, %v8370_v56 }
 0x6de   :  { %v8490_v41 = vld [vmem:[#allocation1] sm:$0xff] }
 0x6df   :  { %3009 = vst [vmem:[#allocation1] ss:$9 sm:$0xff] %v2883_v4  ;;  %v3172_v4 = vrot.slane %v3114_v16, 6 }
 0x6e0   :  { %3010 = vst [vmem:[#allocation1 + $0x1] ss:$9 sm:$0xff] %v2884_v34  ;;  %v3173_v34 = vrot.slane %v3116_v29, 1 }
 0x6e1   :  { %7285 = vmatmul.msk.f32.gmra.mxu3 %vm1635_vm11, %v8376_v15  ;;  %v3120_v15 = vld [vmem:[#allocation2 + $0xd1] ss:$2 sm:$0x7f] }
 0x6e2   :  { %v3185_v59 = vrot.slane %v3120_v15, 1  ;;  %v3189_v37 = vrot.slane %v3120_v15, 5 }
 0x6e7   :  { %v8495_v63 = vld [vmem:[#allocation1] sm:$0xff] }
 0x6e8   :  { %3242 = vst [vmem:[#allocation1] ss:$9 sm:$0xff] %v3108_v49  ;;  %v3174_v49 = vrot.slane %v3116_v29, 2 }
 0x6e9   :  { %3244 = vst [vmem:[#allocation1 + $0x1] ss:$9 sm:$0xff] %v3149_v50  ;;  %v3118_v50 = vld [vmem:[#allocation2 + $0xb1] ss:$2 sm:$0x7f]  ;;  %7286 = vmatmul.msk.f32.gmra.mxu3 %vm1635_vm11, %v8382_v53  ;;  %v3186_v53 = vrot.slane %v3120_v15, 2 }
 0x6ea   :  { %3246 = vst [vmem:[#allocation1 + $0x2] ss:$9 sm:$0xff] %v3150_v35  ;;  %v3177_v35 = vrot.slane %v3116_v29, 5  ;;  %v3179_v56 = vrot.slane %v3118_v50, 1  ;;  %v3182_v24 = vrot.slane %v3118_v50, 4 }
 0x6eb   :  { %3248 = vst [vmem:[#allocation1 + $0x3] ss:$9 sm:$0xff] %v3151_v8 }
 0x6ec   :  { %3250 = vst [vmem:[#allocation1 + $0x4] ss:$9 sm:$0xff] %v3152_v25  ;;  %v3178_v25 = vrot.slane %v3116_v29, 6 }
 0x6ed   :  { %3252 = vst [vmem:[#allocation1 + $0x5] ss:$9 sm:$0xff] %v3153_v38  ;;  %v3180_v38 = vrot.slane %v3118_v50, 2 }
 0x6ee   :  { %3254 = vst [vmem:[#allocation1 + $0x6] ss:$9 sm:$0xff] %v3154_v5  ;;  %v3181_v5 = vrot.slane %v3118_v50, 3 }
 0x6ef   :  { %3256 = vst [vmem:[#allocation1 + $0x7] ss:$9 sm:$0xff] %v3110_v44  ;;  %v3183_v44 = vrot.slane %v3118_v50, 5 }
 0x6f1   :  { %7287 = vmatmul.msk.f32.gmra.mxu3 %vm1635_vm11, %v8386_v33  ;;  %v3122_v33 = vld [vmem:[#allocation2 + $0x111] ss:$2 sm:$0x7f] }
 0x6f2   :  { %v3192_v0 = vrot.slane %v3122_v33, 2  ;;  %v3196_v3 = vrot.slane %v3122_v33, 6 }
 0x6f6   :  { %v8500_v18 = vld [vmem:[#allocation1] sm:$0xff] }
 0x6f7   :  { %3258 = vst [vmem:[#allocation1] ss:$9 sm:$0xff] %v3155_v11  ;;  %v3184_v11 = vrot.slane %v3118_v50, 6 }
 0x6f8   :  { %3259 = vst [vmem:[#allocation1 + $0x1] ss:$9 sm:$0xff] %v3156_v6 }
 0x6f9   :  { %3260 = vst [vmem:[#allocation1 + $0x2] ss:$9 sm:$0xff] %v3157_v51  ;;  %v3187_v51 = vrot.slane %v3120_v15, 3  ;;  %7288 = vmatmul.msk.f32.gmra.mxu3 %vm1635_vm11, %v8392_v22  ;;  %v3194_v22 = vrot.slane %v3122_v33, 4 }
 0x6fa   :  { %3261 = vst [vmem:[#allocation1 + $0x3] ss:$9 sm:$0xff] %v3158_v55  ;;  %v3188_v55 = vrot.slane %v3120_v15, 4 }
 0x6fb   :  { %3262 = vst [vmem:[#allocation1 + $0x4] ss:$9 sm:$0xff] %v3159_v57 }
 0x6fc   :  { %3263 = vst [vmem:[#allocation1 + $0x5] ss:$9 sm:$0xff] %v3160_v61  ;;  %v3191_v61 = vrot.slane %v3122_v33, 1 }
 0x6fd   :  { %3264 = vst [vmem:[#allocation1 + $0x6] ss:$9 sm:$0xff] %v3112_v7  ;;  %v3190_v7 = vrot.slane %v3120_v15, 6 }
 0x6fe   :  { %3265 = vst [vmem:[#allocation1 + $0x7] ss:$9 sm:$0xff] %v3161_v21  ;;  %v3193_v21 = vrot.slane %v3122_v33, 3 }
 0x701   :  { %7289 = vmatmul.msk.f32.gmra.mxu3 %vm1635_vm11, %v8398_v30  ;;  %v3124_v30 = vld [vmem:[#allocation2 + $0x131] ss:$2 sm:$0x7f] }
 0x705   :  { %v8514_v9 = vld [vmem:[#allocation1] sm:$0xff] }
 0x706   :  { %3267 = vst [vmem:[#allocation1] ss:$9 sm:$0xff] %v3162_v52  ;;  %v3195_v52 = vrot.slane %v3122_v33, 5 }
 0x707   :  { %3268 = vst [vmem:[#allocation1 + $0x1] ss:$9 sm:$0xff] %v3163_v62  ;;  %v3197_v62 = vrot.slane %v3124_v30, 1 }
 0x708   :  { %3269 = vst [vmem:[#allocation1 + $0x2] ss:$9 sm:$0xff] %v3164_v12 }
 0x709   :  { %3270 = vst [vmem:[#allocation1 + $0x3] ss:$9 sm:$0xff] %v3165_v17  ;;  %7290 = vmatmul.msk.f32.gmra.mxu3 %vm1635_vm11, %v8402_v14  ;;  %v3199_v17 = vrot.slane %v3124_v30, 3  ;;  %v3202_v14 = vrot.slane %v3124_v30, 6 }
 0x70a   :  { %3271 = vst [vmem:[#allocation1 + $0x4] ss:$9 sm:$0xff] %v3166_v58  ;;  %v3200_v58 = vrot.slane %v3124_v30, 4 }
 0x70b   :  { %3272 = vst [vmem:[#allocation1 + $0x5] ss:$9 sm:$0xff] %v3114_v16  ;;  %v3198_v16 = vrot.slane %v3124_v30, 2 }
 0x70c   :  { %3273 = vst [vmem:[#allocation1 + $0x6] ss:$9 sm:$0xff] %v3167_v2  ;;  %v3201_v2 = vrot.slane %v3124_v30, 5 }
 0x70d   :  { %3274 = vst [vmem:[#allocation1 + $0x7] ss:$9 sm:$0xff] %v3168_v28  ;;  %v3126_v28 = vld [vmem:[#allocation2 + $0x151] ss:$2 sm:$0x7f] }
 0x711   :  { %7291 = vmatmul.msk.f32.gmra.mxu3 %vm1635_vm11, %v8404_v43  ;;  %v3203_v43 = vrot.slane %v3126_v28, 1 }
 0x714   :  { %v8520_v10 = vld [vmem:[#allocation1] sm:$0xff] }
 0x715   :  { %3276 = vst [vmem:[#allocation1] ss:$9 sm:$0xff] %v3169_v40  ;;  %v3204_v40 = vrot.slane %v3126_v28, 2 }
 0x716   :  { %3277 = vst [vmem:[#allocation1 + $0x1] ss:$9 sm:$0xff] %v3170_v26 }
 0x717   :  { %3278 = vst [vmem:[#allocation1 + $0x2] ss:$9 sm:$0xff] %v3171_v27  ;;  %v3206_v27 = vrot.slane %v3126_v28, 4 }
 0x718   :  { %3279 = vst [vmem:[#allocation1 + $0x3] ss:$9 sm:$0xff] %v3172_v4  ;;  %v3128_v4 = vld [vmem:[#allocation2 + $0x171] ss:$2 sm:$0x7f] }
 0x719   :  { %3280 = vst [vmem:[#allocation1 + $0x4] ss:$9 sm:$0xff] %v3116_v29  ;;  %7292 = vmatmul.msk.f32.gmra.mxu3 %vm1635_vm11, %v8412_v36  ;;  %v3205_v29 = vrot.slane %v3126_v28, 3  ;;  %v3209_v36 = vrot.slane %v3128_v4, 1 }
 0x71a   :  { %3281 = vst [vmem:[#allocation1 + $0x5] ss:$9 sm:$0xff] %v3173_v34  ;;  %v3207_v34 = vrot.slane %v3126_v28, 5 }
 0x71b   :  { %3282 = vst [vmem:[#allocation1 + $0x6] ss:$9 sm:$0xff] %v3174_v49  ;;  %v3208_v49 = vrot.slane %v3126_v28, 6 }
 0x71c   :  { %3283 = vst [vmem:[#allocation1 + $0x7] ss:$9 sm:$0xff] %v3175_v46  ;;  %v3211_v46 = vrot.slane %v3128_v4, 3 }
 0x721   :  { %7293 = vmatmul.msk.f32.gmra.mxu3 %vm1635_vm11, %v8420_v54  ;;  %v3210_v54 = vrot.slane %v3128_v4, 2 }
 0x723   :  { %v8526_v8 = vld [vmem:[#allocation1] sm:$0xff] }
 0x724   :  { %3285 = vst [vmem:[#allocation1] ss:$9 sm:$0xff] %v3176_v48 }
 0x725   :  { %3286 = vst [vmem:[#allocation1 + $0x1] ss:$9 sm:$0xff] %v3177_v35  ;;  %v3130_v35 = vld [vmem:[#allocation2 + $0x191] ss:$2 sm:$0x7f] }
 0x726   :  { %3287 = vst [vmem:[#allocation1 + $0x2] ss:$9 sm:$0xff] %v3178_v25  ;;  %v3213_v25 = vrot.slane %v3128_v4, 5 }
 0x727   :  { %3288 = vst [vmem:[#allocation1 + $0x3] ss:$9 sm:$0xff] %v3118_v50  ;;  %v3212_v50 = vrot.slane %v3128_v4, 4 }
 0x728   :  { %3289 = vst [vmem:[#allocation1 + $0x4] ss:$9 sm:$0xff] %v3179_v56  ;;  %v3214_v56 = vrot.slane %v3128_v4, 6 }
 0x729   :  { %3290 = vst [vmem:[#allocation1 + $0x5] ss:$9 sm:$0xff] %v3180_v38  ;;  %7294 = vmatmul.msk.f32.gmra.mxu3 %vm1635_vm11, %v8425_v60  ;;  %v3215_v38 = vrot.slane %v3130_v35, 1  ;;  %v3217_v60 = vrot.slane %v3130_v35, 3 }
 0x72a   :  { %3291 = vst [vmem:[#allocation1 + $0x6] ss:$9 sm:$0xff] %v3181_v5  ;;  %v3216_v5 = vrot.slane %v3130_v35, 2 }
 0x72b   :  { %3292 = vst [vmem:[#allocation1 + $0x7] ss:$9 sm:$0xff] %v3182_v24  ;;  %v3218_v24 = vrot.slane %v3130_v35, 4 }
 0x732   :  { %v8532_v6 = vld [vmem:[#allocation1] sm:$0xff] }
 0x733   :  { %3294 = vst [vmem:[#allocation1] ss:$9 sm:$0xff] %v3183_v44  ;;  %v3132_v44 = vld [vmem:[#allocation2 + $0x1b1] ss:$2 sm:$0x7f] }
 0x734   :  { %3295 = vst [vmem:[#allocation1 + $0x1] ss:$9 sm:$0xff] %v3184_v11  ;;  %v3219_v11 = vrot.slane %v3130_v35, 5 }
 0x735   :  { %3296 = vst [vmem:[#allocation1 + $0x2] ss:$9 sm:$0xff] %v3120_v15 }
 0x736   :  { %3297 = vst [vmem:[#allocation1 + $0x3] ss:$9 sm:$0xff] %v3185_v59  ;;  %v3220_v59 = vrot.slane %v3130_v35, 6 }
 0x737   :  { %3298 = vst [vmem:[#allocation1 + $0x4] ss:$9 sm:$0xff] %v3186_v53  ;;  %v3221_v53 = vrot.slane %v3132_v44, 1 }
 0x738   :  { %3299 = vst [vmem:[#allocation1 + $0x5] ss:$9 sm:$0xff] %v3187_v51  ;;  %v3222_v51 = vrot.slane %v3132_v44, 2 }
 0x739   :  { %3300 = vst [vmem:[#allocation1 + $0x6] ss:$9 sm:$0xff] %v3188_v55  ;;  %v3223_v55 = vrot.slane %v3132_v44, 3 }
 0x73a   :  { %3301 = vst [vmem:[#allocation1 + $0x7] ss:$9 sm:$0xff] %v3189_v37  ;;  %v3224_v37 = vrot.slane %v3132_v44, 4 }
 0x741   :  { %v8538_v57 = vld [vmem:[#allocation1] sm:$0xff] }
 0x742   :  { %3303 = vst [vmem:[#allocation1] ss:$9 sm:$0xff] %v3190_v7  ;;  %v3225_v7 = vrot.slane %v3132_v44, 5 }
 0x743   :  { %3304 = vst [vmem:[#allocation1 + $0x1] ss:$9 sm:$0xff] %v3122_v33  ;;  %v3134_v33 = vld [vmem:[#allocation2 + $0x1d1] ss:$2 sm:$0x7f] }
 0x744   :  { %3305 = vst [vmem:[#allocation1 + $0x2] ss:$9 sm:$0xff] %v3191_v61 }
 0x745   :  { %3306 = vst [vmem:[#allocation1 + $0x3] ss:$9 sm:$0xff] %v3192_v0  ;;  %v3226_v0 = vrot.slane %v3132_v44, 6 }
 0x746   :  { %3307 = vst [vmem:[#allocation1 + $0x4] ss:$9 sm:$0xff] %v3193_v21  ;;  %v3227_v21 = vrot.slane %v3134_v33, 1 }
 0x747   :  { %3308 = vst [vmem:[#allocation1 + $0x5] ss:$9 sm:$0xff] %v3194_v22  ;;  %v3228_v22 = vrot.slane %v3134_v33, 2 }
 0x748   :  { %3309 = vst [vmem:[#allocation1 + $0x6] ss:$9 sm:$0xff] %v3195_v52  ;;  %v3229_v52 = vrot.slane %v3134_v33, 3 }
 0x749   :  { %3310 = vst [vmem:[#allocation1 + $0x7] ss:$9 sm:$0xff] %v3196_v3  ;;  %v3230_v3 = vrot.slane %v3134_v33, 4 }
 0x750   :  { %v8544_v12 = vld [vmem:[#allocation1] sm:$0xff] }
 0x751   :  { %3312 = vst [vmem:[#allocation1] ss:$9 sm:$0xff] %v3124_v30  ;;  %v3231_v30 = vrot.slane %v3134_v33, 5 }
 0x752   :  { %3313 = vst [vmem:[#allocation1 + $0x1] ss:$9 sm:$0xff] %v3197_v62  ;;  %v3232_v62 = vrot.slane %v3134_v33, 6 }
 0x753   :  { %3314 = vst [vmem:[#allocation1 + $0x2] ss:$9 sm:$0xff] %v3198_v16 }
 0x754   :  { %3315 = vst [vmem:[#allocation1 + $0x3] ss:$9 sm:$0xff] %v3199_v17  ;;  %v3456_v17 = vld [vmem:[#allocation2 + $0x12] ss:$2 sm:$0x7f] }
 0x755   :  { %3316 = vst [vmem:[#allocation1 + $0x4] ss:$9 sm:$0xff] %v3200_v58  ;;  %v3497_v58 = vrot.slane %v3456_v17, 1 }
 0x756   :  { %3317 = vst [vmem:[#allocation1 + $0x5] ss:$9 sm:$0xff] %v3201_v2 }
 0x757   :  { %3318 = vst [vmem:[#allocation1 + $0x6] ss:$9 sm:$0xff] %v3202_v14  ;;  %v3498_v14 = vrot.slane %v3456_v17, 2 }
 0x758   :  { %3319 = vst [vmem:[#allocation1 + $0x7] ss:$9 sm:$0xff] %v3126_v28  ;;  %v3499_v28 = vrot.slane %v3456_v17, 3 }
 0x75f   :  { %v8550_v26 = vld [vmem:[#allocation1] sm:$0xff] }
 0x760   :  { %3321 = vst [vmem:[#allocation1] ss:$9 sm:$0xff] %v3203_v43  ;;  %v3500_v43 = vrot.slane %v3456_v17, 4 }
 0x761   :  { %3322 = vst [vmem:[#allocation1 + $0x1] ss:$9 sm:$0xff] %v3204_v40  ;;  %v3501_v40 = vrot.slane %v3456_v17, 5 }
 0x762   :  { %3323 = vst [vmem:[#allocation1 + $0x2] ss:$9 sm:$0xff] %v3205_v29  ;;  %v3502_v29 = vrot.slane %v3456_v17, 6 }
 0x763   :  { %3324 = vst [vmem:[#allocation1 + $0x3] ss:$9 sm:$0xff] %v3206_v27  ;;  %v3458_v27 = vld [vmem:[#allocation2 + $0x32] ss:$2 sm:$0x7f] }
 0x764   :  { %3325 = vst [vmem:[#allocation1 + $0x4] ss:$9 sm:$0xff] %v3207_v34  ;;  %v7301_v34 = vld [vmem:[%s10505_s3 + $0xf0] sm:$0xff] }
 0x765   :  { %3326 = vst [vmem:[#allocation1 + $0x5] ss:$9 sm:$0xff] %v3208_v49  ;;  %v3503_v49 = vrot.slane %v3458_v27, 1 }
 0x766   :  { %3327 = vst [vmem:[#allocation1 + $0x6] ss:$9 sm:$0xff] %v3128_v4  ;;  %v7302_v4 = vld [vmem:[%s10505_s3 + $0xf8] sm:$0xff] }
 0x767   :  { %3328 = vst [vmem:[#allocation1 + $0x7] ss:$9 sm:$0xff] %v3209_v36  ;;  %3046 = vmatpush.msrb.mxu1 %v7302_v4  ;;  %v3504_v36 = vrot.slane %v3458_v27, 2 }
 0x769   :  { %3047 = vmatpush.msrb.mxu1 %v7301_v34 }
 0x76e   :  { %v8554_v48 = vld [vmem:[#allocation1] sm:$0xff] }
 0x76f   :  { %3330 = vst [vmem:[#allocation1] ss:$9 sm:$0xff] %v3210_v54 }
 0x770   :  { %3331 = vst [vmem:[#allocation1 + $0x1] ss:$9 sm:$0xff] %v3211_v46  ;;  %v3505_v46 = vrot.slane %v3458_v27, 3 }
 0x771   :  { %3332 = vst [vmem:[#allocation1 + $0x2] ss:$9 sm:$0xff] %v3212_v50  ;;  %v3506_v50 = vrot.slane %v3458_v27, 4 }
 0x772   :  { %3333 = vst [vmem:[#allocation1 + $0x3] ss:$9 sm:$0xff] %v3213_v25  ;;  %v3507_v25 = vrot.slane %v3458_v27, 5 }
 0x773   :  { %3334 = vst [vmem:[#allocation1 + $0x4] ss:$9 sm:$0xff] %v3214_v56  ;;  %v3508_v56 = vrot.slane %v3458_v27, 6 }
 0x774   :  { %3335 = vst [vmem:[#allocation1 + $0x5] ss:$9 sm:$0xff] %v3130_v35  ;;  %v3460_v35 = vld [vmem:[#allocation2 + $0x52] ss:$2 sm:$0x7f] }
 0x775   :  { %3336 = vst [vmem:[#allocation1 + $0x6] ss:$9 sm:$0xff] %v3215_v38  ;;  %v7300_v38 = vld [vmem:[%s10505_s3 + $0xe8] sm:$0xff] }
 0x776   :  { %3337 = vst [vmem:[#allocation1 + $0x7] ss:$9 sm:$0xff] %v3216_v5  ;;  %3048 = vmatpush.msrb.mxu1 %v7300_v38  ;;  %v3509_v5 = vrot.slane %v3460_v35, 1 }
 0x77d   :  { %v8556_v15 = vld [vmem:[#allocation1] sm:$0xff] }
 0x77e   :  { %3339 = vst [vmem:[#allocation1] ss:$9 sm:$0xff] %v3217_v60  ;;  %v7299_v60 = vld [vmem:[%s10505_s3 + $0xe0] sm:$0xff] }
 0x77f   :  { %3340 = vst [vmem:[#allocation1 + $0x1] ss:$9 sm:$0xff] %v3218_v24  ;;  %3049 = vmatpush.msrb.mxu1 %v7299_v60  ;;  %v3510_v24 = vrot.slane %v3460_v35, 2 }
 0x780   :  { %3341 = vst [vmem:[#allocation1 + $0x2] ss:$9 sm:$0xff] %v3219_v11 }
 0x781   :  { %3342 = vst [vmem:[#allocation1 + $0x3] ss:$9 sm:$0xff] %v3220_v59  ;;  %v7298_v59 = vld [vmem:[%s10505_s3 + $0xd8] sm:$0xff] }
 0x782   :  { %3343 = vst [vmem:[#allocation1 + $0x4] ss:$9 sm:$0xff] %v3132_v44  ;;  %v3511_v44 = vrot.slane %v3460_v35, 3  ;;  %3050 = vmatpush.msrb.mxu1 %v7298_v59 }
 0x783   :  { %3344 = vst [vmem:[#allocation1 + $0x5] ss:$9 sm:$0xff] %v3221_v53  ;;  %v3512_v53 = vrot.slane %v3460_v35, 4 }
 0x784   :  { %3345 = vst [vmem:[#allocation1 + $0x6] ss:$9 sm:$0xff] %v3222_v51  ;;  %v3462_v51 = vld [vmem:[#allocation2 + $0x72] ss:$2 sm:$0x7f] }
 0x785   :  { %3346 = vst [vmem:[#allocation1 + $0x7] ss:$9 sm:$0xff] %v3223_v55  ;;  %v3513_v55 = vrot.slane %v3460_v35, 5 }
 0x78c   :  { %v8558_v61 = vld [vmem:[#allocation1] sm:$0xff] }
 0x78d   :  { %3348 = vst [vmem:[#allocation1] ss:$9 sm:$0xff] %v3224_v37  ;;  %v3514_v37 = vrot.slane %v3460_v35, 6 }
 0x78e   :  { %3349 = vst [vmem:[#allocation1 + $0x1] ss:$9 sm:$0xff] %v3225_v7  ;;  %v3516_v7 = vrot.slane %v3462_v51, 2 }
 0x78f   :  { %3350 = vst [vmem:[#allocation1 + $0x2] ss:$9 sm:$0xff] %v3226_v0  ;;  %v7297_v0 = vld [vmem:[%s10505_s3 + $0xd0] sm:$0xff] }
 0x790   :  { %3351 = vst [vmem:[#allocation1 + $0x3] ss:$9 sm:$0xff] %v3134_v33  ;;  %v3515_v33 = vrot.slane %v3462_v51, 1  ;;  %3051 = vmatpush.msrb.mxu1 %v7297_v0 }
 0x791   :  { %3352 = vst [vmem:[#allocation1 + $0x4] ss:$9 sm:$0xff] %v3227_v21  ;;  %v3517_v21 = vrot.slane %v3462_v51, 3 }
 0x792   :  { %3353 = vst [vmem:[#allocation1 + $0x5] ss:$9 sm:$0xff] %v3228_v22  ;;  %v3518_v22 = vrot.slane %v3462_v51, 4 }
 0x793   :  { %3354 = vst [vmem:[#allocation1 + $0x6] ss:$9 sm:$0xff] %v3229_v52 }
 0x794   :  { %3355 = vst [vmem:[#allocation1 + $0x7] ss:$9 sm:$0xff] %v3230_v3  ;;  %v3464_v3 = vld [vmem:[#allocation2 + $0x92] ss:$2 sm:$0x7f] }
 0x795   :  { %v3526_v34 = vrot.slane %v3464_v3, 6 }
 0x79b   :  { %v8560_v16 = vld [vmem:[#allocation1] sm:$0xff] }
 0x79c   :  { %3357 = vst [vmem:[#allocation1] ss:$9 sm:$0xff] %v3231_v30  ;;  %v3519_v30 = vrot.slane %v3462_v51, 5 }
 0x79d   :  { %3358 = vst [vmem:[#allocation1 + $0x1] ss:$9 sm:$0xff] %v3232_v62  ;;  %v3520_v62 = vrot.slane %v3462_v51, 6 }
 0x7a4   :  { %v8562_v2 = vld [vmem:[#allocation1] sm:$0xff] }
 0x7a5   :  { %3590 = vst [vmem:[#allocation1] ss:$9 sm:$0xff] %v3456_v17  ;;  %v7296_v17 = vld [vmem:[%s10505_s3 + $0xc8] sm:$0xff] }
 0x7a6   :  { %3592 = vst [vmem:[#allocation1 + $0x1] ss:$9 sm:$0xff] %v3497_v58  ;;  %v3521_v58 = vrot.slane %v3464_v3, 1  ;;  %3052 = vmatpush.msrb.mxu1 %v7296_v17 }
 0x7a7   :  { %3594 = vst [vmem:[#allocation1 + $0x2] ss:$9 sm:$0xff] %v3498_v14  ;;  %v3522_v14 = vrot.slane %v3464_v3, 2 }
 0x7a8   :  { %3596 = vst [vmem:[#allocation1 + $0x3] ss:$9 sm:$0xff] %v3499_v28  ;;  %v7295_v28 = vld [vmem:[%s10505_s3 + $0xc0] sm:$0xff] }
 0x7a9   :  { %3598 = vst [vmem:[#allocation1 + $0x4] ss:$9 sm:$0xff] %v3500_v43  ;;  %v3523_v43 = vrot.slane %v3464_v3, 3  ;;  %3053 = vmatpush.msrb.mxu1 %v7295_v28 }
 0x7aa   :  { %3600 = vst [vmem:[#allocation1 + $0x5] ss:$9 sm:$0xff] %v3501_v40  ;;  %7303 = vmatmul.msk.f32.vlgmr.msrb.gmra.mxu1 %vm1635_vm11, %v8436_v19  ;;  %v3524_v40 = vrot.slane %v3464_v3, 4  ;;  %v3468_v19 = vld [vmem:[#allocation2 + $0xd2] ss:$2 sm:$0x7f] }
 0x7ab   :  { %3602 = vst [vmem:[#allocation1 + $0x6] ss:$9 sm:$0xff] %v3502_v29  ;;  %v3466_v29 = vld [vmem:[#allocation2 + $0xb2] ss:$2 sm:$0x7f]  ;;  %v3534_v38 = vrot.slane %v3468_v19, 2 }
 0x7ac   :  { %3604 = vst [vmem:[#allocation1 + $0x7] ss:$9 sm:$0xff] %v3458_v27  ;;  %v3525_v27 = vrot.slane %v3464_v3, 5  ;;  %v3536_v60 = vrot.slane %v3468_v19, 4 }
 0x7b2   :  { %7304 = vmatmul.msk.f32.gmra.mxu1 %vm1635_vm11, %v8442_v32 }
 0x7b3   :  { %v8570_v54 = vld [vmem:[#allocation1] sm:$0xff] }
 0x7b4   :  { %3606 = vst [vmem:[#allocation1] ss:$9 sm:$0xff] %v3503_v49  ;;  %v3527_v49 = vrot.slane %v3466_v29, 1 }
 0x7b5   :  { %3607 = vst [vmem:[#allocation1 + $0x1] ss:$9 sm:$0xff] %v3504_v36  ;;  %v3528_v36 = vrot.slane %v3466_v29, 2 }
 0x7b6   :  { %3608 = vst [vmem:[#allocation1 + $0x2] ss:$9 sm:$0xff] %v3505_v46  ;;  %v3529_v46 = vrot.slane %v3466_v29, 3 }
 0x7b7   :  { %3609 = vst [vmem:[#allocation1 + $0x3] ss:$9 sm:$0xff] %v3506_v50  ;;  %v3530_v50 = vrot.slane %v3466_v29, 4 }
 0x7b8   :  { %3610 = vst [vmem:[#allocation1 + $0x4] ss:$9 sm:$0xff] %v3507_v25  ;;  %v3532_v25 = vrot.slane %v3466_v29, 6 }
 0x7b9   :  { %3611 = vst [vmem:[#allocation1 + $0x5] ss:$9 sm:$0xff] %v3508_v56  ;;  %v3533_v56 = vrot.slane %v3468_v19, 1 }
 0x7ba   :  { %3612 = vst [vmem:[#allocation1 + $0x6] ss:$9 sm:$0xff] %v3460_v35  ;;  %7305 = vmatmul.msk.f32.gmra.mxu1 %vm1635_vm11, %v8448_v39  ;;  %v3531_v35 = vrot.slane %v3466_v29, 5  ;;  %v3470_v39 = vld [vmem:[#allocation2 + $0x112] ss:$2 sm:$0x7f] }
 0x7bb   :  { %3613 = vst [vmem:[#allocation1 + $0x7] ss:$9 sm:$0xff] %v3509_v5  ;;  %v3535_v5 = vrot.slane %v3468_v19, 3 }
 0x7c2   :  { %v8578_v11 = vld [vmem:[#allocation1] sm:$0xff]  ;;  %7306 = vmatmul.msk.f32.gmra.mxu1 %vm1635_vm11, %v8454_v20  ;;  %v3539_v20 = vrot.slane %v3470_v39, 1 }
 0x7c3   :  { %3615 = vst [vmem:[#allocation1] ss:$9 sm:$0xff] %v3510_v24  ;;  %v3537_v24 = vrot.slane %v3468_v19, 5 }
 0x7c4   :  { %3616 = vst [vmem:[#allocation1 + $0x1] ss:$9 sm:$0xff] %v3511_v44  ;;  %v3538_v44 = vrot.slane %v3468_v19, 6 }
 0x7c5   :  { %3617 = vst [vmem:[#allocation1 + $0x2] ss:$9 sm:$0xff] %v3512_v53  ;;  %v3540_v53 = vrot.slane %v3470_v39, 2 }
 0x7c6   :  { %3618 = vst [vmem:[#allocation1 + $0x3] ss:$9 sm:$0xff] %v3513_v55  ;;  %v3542_v55 = vrot.slane %v3470_v39, 4 }
 0x7c7   :  { %3619 = vst [vmem:[#allocation1 + $0x4] ss:$9 sm:$0xff] %v3514_v37  ;;  %v3543_v37 = vrot.slane %v3470_v39, 5 }
 0x7c8   :  { %3620 = vst [vmem:[#allocation1 + $0x5] ss:$9 sm:$0xff] %v3462_v51  ;;  %v3541_v51 = vrot.slane %v3470_v39, 3 }
 0x7c9   :  { %3621 = vst [vmem:[#allocation1 + $0x6] ss:$9 sm:$0xff] %v3515_v33  ;;  %v3544_v33 = vrot.slane %v3470_v39, 6 }
 0x7ca   :  { %3622 = vst [vmem:[#allocation1 + $0x7] ss:$9 sm:$0xff] %v3516_v7  ;;  %7307 = vmatmul.msk.f32.gmra.mxu1 %vm1635_vm11, %v8460_v1  ;;  %v3472_v1 = vld [vmem:[#allocation2 + $0x132] ss:$2 sm:$0x7f] }
 0x7cb   :  { %v3545_v7 = vrot.slane %v3472_v1, 1 }
 0x7d1   :  { %v8586_v52 = vld [vmem:[#allocation1] sm:$0xff] }
 0x7d2   :  { %3624 = vst [vmem:[#allocation1] ss:$9 sm:$0xff] %v3517_v21  ;;  %7308 = vmatmul.msk.f32.gmra.mxu1 %vm1635_vm11, %v8466_v45  ;;  %v3546_v21 = vrot.slane %v3472_v1, 2  ;;  %v3547_v45 = vrot.slane %v3472_v1, 3 }
 0x7d3   :  { %3625 = vst [vmem:[#allocation1 + $0x1] ss:$9 sm:$0xff] %v3518_v22  ;;  %v3548_v22 = vrot.slane %v3472_v1, 4 }
 0x7d4   :  { %3626 = vst [vmem:[#allocation1 + $0x2] ss:$9 sm:$0xff] %v3519_v30  ;;  %v3550_v30 = vrot.slane %v3472_v1, 6 }
 0x7d5   :  { %3627 = vst [vmem:[#allocation1 + $0x3] ss:$9 sm:$0xff] %v3520_v62  ;;  %v3474_v62 = vld [vmem:[#allocation2 + $0x152] ss:$2 sm:$0x7f] }
 0x7d6   :  { %3628 = vst [vmem:[#allocation1 + $0x4] ss:$9 sm:$0xff] %v3464_v3  ;;  %v3549_v3 = vrot.slane %v3472_v1, 5  ;;  %v3552_v17 = vrot.slane %v3474_v62, 2  ;;  %v3554_v28 = vrot.slane %v3474_v62, 4 }
 0x7d7   :  { %3629 = vst [vmem:[#allocation1 + $0x5] ss:$9 sm:$0xff] %v3521_v58 }
 0x7d8   :  { %3630 = vst [vmem:[#allocation1 + $0x6] ss:$9 sm:$0xff] %v3522_v14  ;;  %v3553_v14 = vrot.slane %v3474_v62, 3 }
 0x7d9   :  { %3631 = vst [vmem:[#allocation1 + $0x7] ss:$9 sm:$0xff] %v3523_v43  ;;  %v3555_v43 = vrot.slane %v3474_v62, 5 }
 0x7da   :  { %7309 = vmatmul.msk.f32.gmra.mxu1 %vm1635_vm11, %v8472_v31  ;;  %v3551_v31 = vrot.slane %v3474_v62, 1 }
 0x7e0   :  { %v8596_v4 = vld [vmem:[#allocation1] sm:$0xff] }
 0x7e1   :  { %3633 = vst [vmem:[#allocation1] ss:$9 sm:$0xff] %v3524_v40  ;;  %v3556_v40 = vrot.slane %v3474_v62, 6 }
 0x7e2   :  { %3634 = vst [vmem:[#allocation1 + $0x1] ss:$9 sm:$0xff] %v3525_v27  ;;  %7310 = vmatmul.msk.f32.gmra.mxu1 %vm1635_vm11, %v8476_v23  ;;  %v3476_v23 = vld [vmem:[#allocation2 + $0x172] ss:$2 sm:$0x7f] }
 0x7e3   :  { %3635 = vst [vmem:[#allocation1 + $0x2] ss:$9 sm:$0xff] %v3526_v34  ;;  %v3559_v27 = vrot.slane %v3476_v23, 3 }
 0x7e4   :  { %3636 = vst [vmem:[#allocation1 + $0x3] ss:$9 sm:$0xff] %v3466_v29  ;;  %v3557_v29 = vrot.slane %v3476_v23, 1 }
 0x7e5   :  { %3637 = vst [vmem:[#allocation1 + $0x4] ss:$9 sm:$0xff] %v3527_v49  ;;  %v3560_v49 = vrot.slane %v3476_v23, 4 }
 0x7e6   :  { %3638 = vst [vmem:[#allocation1 + $0x5] ss:$9 sm:$0xff] %v3528_v36  ;;  %v3478_v36 = vld [vmem:[#allocation2 + $0x192] ss:$2 sm:$0x7f] }
 0x7e7   :  { %3639 = vst [vmem:[#allocation1 + $0x6] ss:$9 sm:$0xff] %v3529_v46  ;;  %v3561_v46 = vrot.slane %v3476_v23, 5 }
 0x7e8   :  { %3640 = vst [vmem:[#allocation1 + $0x7] ss:$9 sm:$0xff] %v3530_v50  ;;  %v3562_v50 = vrot.slane %v3476_v23, 6 }
 0x7ea   :  { %7311 = vmatmul.msk.f32.gmra.mxu1 %vm1635_vm11, %v8478_v47  ;;  %v3558_v47 = vrot.slane %v3476_v23, 2 }
 0x7ef   :  { %v8602_v32 = vld [vmem:[#allocation1] sm:$0xff] }
 0x7f0   :  { %3642 = vst [vmem:[#allocation1] ss:$9 sm:$0xff] %v3531_v35 }
 0x7f1   :  { %3643 = vst [vmem:[#allocation1 + $0x1] ss:$9 sm:$0xff] %v3532_v25  ;;  %v3565_v25 = vrot.slane %v3478_v36, 3 }
 0x7f2   :  { %3644 = vst [vmem:[#allocation1 + $0x2] ss:$9 sm:$0xff] %v3468_v19  ;;  %7312 = vmatmul.msk.f32.gmra.mxu1 %vm1635_vm11, %v8480_v13  ;;  %v8628_v13 = vpop.f32.mrf.mxu1  ;;  %v3563_v19 = vrot.slane %v3478_v36, 1 }
 0x7f3   :  { %3645 = vst [vmem:[#allocation1 + $0x3] ss:$9 sm:$0xff] %v3533_v56  ;;  %v3566_v56 = vrot.slane %v3478_v36, 4 }
 0x7f4   :  { %3646 = vst [vmem:[#allocation1 + $0x4] ss:$9 sm:$0xff] %v3534_v38 }
 0x7f5   :  { %3647 = vst [vmem:[#allocation1 + $0x5] ss:$9 sm:$0xff] %v3535_v5  ;;  %v3480_v5 = vld [vmem:[#allocation2 + $0x1b2] ss:$2 sm:$0x7f] }
 0x7f6   :  { %3648 = vst [vmem:[#allocation1 + $0x6] ss:$9 sm:$0xff] %v3536_v60  ;;  %v3567_v60 = vrot.slane %v3478_v36, 5 }
 0x7f7   :  { %3649 = vst [vmem:[#allocation1 + $0x7] ss:$9 sm:$0xff] %v3537_v24  ;;  %v3568_v24 = vrot.slane %v3478_v36, 6 }
 0x7fa   :  { %7313 = vmatmul.msk.f32.gmra.mxu1 %vm1635_vm11, %v8482_v42  ;;  %v3564_v42 = vrot.slane %v3478_v36, 2  ;;  %v8632_v35 = vpop.f32.mrf.mxu1 }
 0x7fe   :  { %v8608_v59 = vld [vmem:[#allocation1] sm:$0xff] }
 0x7ff   :  { %3651 = vst [vmem:[#allocation1] ss:$9 sm:$0xff] %v3538_v44  ;;  %v3571_v44 = vrot.slane %v3480_v5, 3 }
 0x800   :  { %3652 = vst [vmem:[#allocation1 + $0x1] ss:$9 sm:$0xff] %v3470_v39  ;;  %v3570_v39 = vrot.slane %v3480_v5, 2 }
 0x801   :  { %3653 = vst [vmem:[#allocation1 + $0x2] ss:$9 sm:$0xff] %v3539_v20  ;;  %v3572_v20 = vrot.slane %v3480_v5, 4 }
 0x802   :  { %3654 = vst [vmem:[#allocation1 + $0x3] ss:$9 sm:$0xff] %v3540_v53  ;;  %7314 = vmatmul.msk.f32.gmra.mxu1 %vm1635_vm11, %v8490_v41  ;;  %v3569_v41 = vrot.slane %v3480_v5, 1  ;;  %v3573_v53 = vrot.slane %v3480_v5, 5 }
 0x803   :  { %3655 = vst [vmem:[#allocation1 + $0x4] ss:$9 sm:$0xff] %v3541_v51 }
 0x804   :  { %3656 = vst [vmem:[#allocation1 + $0x5] ss:$9 sm:$0xff] %v3542_v55  ;;  %v3574_v55 = vrot.slane %v3480_v5, 6 }
 0x805   :  { %3657 = vst [vmem:[#allocation1 + $0x6] ss:$9 sm:$0xff] %v3543_v37 }
 0x806   :  { %3658 = vst [vmem:[#allocation1 + $0x7] ss:$9 sm:$0xff] %v3544_v33 }
 0x80a   :  { %7315 = vmatmul.msk.f32.gmra.mxu1 %vm1635_vm11, %v8495_v63  ;;  %v3482_v63 = vld [vmem:[#allocation2 + $0x1d2] ss:$2 sm:$0x7f] }
 0x80b   :  { %v3575_v37 = vrot.slane %v3482_v63, 1  ;;  %v3576_v33 = vrot.slane %v3482_v63, 2 }
 0x80d   :  { %v8614_v0 = vld [vmem:[#allocation1] sm:$0xff] }
 0x80e   :  { %3660 = vst [vmem:[#allocation1] ss:$9 sm:$0xff] %v3472_v1  ;;  %v3577_v1 = vrot.slane %v3482_v63, 3 }
 0x80f   :  { %3661 = vst [vmem:[#allocation1 + $0x1] ss:$9 sm:$0xff] %v3545_v7  ;;  %v3578_v7 = vrot.slane %v3482_v63, 4 }
 0x810   :  { %3662 = vst [vmem:[#allocation1 + $0x2] ss:$9 sm:$0xff] %v3546_v21  ;;  %v3579_v21 = vrot.slane %v3482_v63, 5 }
 0x811   :  { %3663 = vst [vmem:[#allocation1 + $0x3] ss:$9 sm:$0xff] %v3547_v45  ;;  %v3580_v45 = vrot.slane %v3482_v63, 6 }
 0x812   :  { %3664 = vst [vmem:[#allocation1 + $0x4] ss:$9 sm:$0xff] %v3548_v22 }
 0x813   :  { %3665 = vst [vmem:[#allocation1 + $0x5] ss:$9 sm:$0xff] %v3549_v3  ;;  %v3804_v3 = vld [vmem:[#allocation2 + $0x20] ss:$2 sm:$0x7f] }
 0x814   :  { %3666 = vst [vmem:[#allocation1 + $0x6] ss:$9 sm:$0xff] %v3550_v30  ;;  %v3845_v30 = vrot.slane %v3804_v3, 1 }
 0x815   :  { %3667 = vst [vmem:[#allocation1 + $0x7] ss:$9 sm:$0xff] %v3474_v62 }
 0x81c   :  { %v8620_v58 = vld [vmem:[#allocation1] sm:$0xff] }
 0x81d   :  { %3669 = vst [vmem:[#allocation1] ss:$9 sm:$0xff] %v3551_v31  ;;  %v7323_v31 = vld [vmem:[%s10505_s3 + $0x138] sm:$0xff] }
 0x81e   :  { %3670 = vst [vmem:[#allocation1 + $0x1] ss:$9 sm:$0xff] %v3552_v17  ;;  %v3846_v17 = vrot.slane %v3804_v3, 2  ;;  %3394 = vmatpush.msrb.mxu2 %v7323_v31 }
 0x81f   :  { %3671 = vst [vmem:[#allocation1 + $0x2] ss:$9 sm:$0xff] %v3553_v14  ;;  %v3847_v14 = vrot.slane %v3804_v3, 3 }
 0x820   :  { %3672 = vst [vmem:[#allocation1 + $0x3] ss:$9 sm:$0xff] %v3554_v28  ;;  %v7322_v28 = vld [vmem:[%s10505_s3 + $0x130] sm:$0xff] }
 0x821   :  { %3673 = vst [vmem:[#allocation1 + $0x4] ss:$9 sm:$0xff] %v3555_v43  ;;  %3395 = vmatpush.msrb.mxu2 %v7322_v28  ;;  %v3849_v43 = vrot.slane %v3804_v3, 5 }
 0x822   :  { %3674 = vst [vmem:[#allocation1 + $0x5] ss:$9 sm:$0xff] %v3556_v40  ;;  %v7321_v40 = vld [vmem:[%s10505_s3 + $0x128] sm:$0xff] }
 0x823   :  { %3675 = vst [vmem:[#allocation1 + $0x6] ss:$9 sm:$0xff] %v3476_v23  ;;  %v3848_v23 = vrot.slane %v3804_v3, 4  ;;  %3396 = vmatpush.msrb.mxu2 %v7321_v40 }
 0x824   :  { %3676 = vst [vmem:[#allocation1 + $0x7] ss:$9 sm:$0xff] %v3557_v29  ;;  %v3850_v29 = vrot.slane %v3804_v3, 6 }
 0x82b   :  { %v8626_v34 = vld [vmem:[#allocation1] sm:$0xff] }
 0x82c   :  { %3678 = vst [vmem:[#allocation1] ss:$9 sm:$0xff] %v3558_v47  ;;  %v7320_v47 = vld [vmem:[%s10505_s3 + $0x120] sm:$0xff] }
 0x82d   :  { %3679 = vst [vmem:[#allocation1 + $0x1] ss:$9 sm:$0xff] %v3559_v27  ;;  %v3806_v27 = vld [vmem:[#allocation2 + $0x40] ss:$2 sm:$0x7f]  ;;  %3397 = vmatpush.msrb.mxu2 %v7320_v47 }
 0x82e   :  { %3680 = vst [vmem:[#allocation1 + $0x2] ss:$9 sm:$0xff] %v3560_v49  ;;  %v7319_v49 = vld [vmem:[%s10505_s3 + $0x118] sm:$0xff] }
 0x82f   :  { %3681 = vst [vmem:[#allocation1 + $0x3] ss:$9 sm:$0xff] %v3561_v46  ;;  %3398 = vmatpush.msrb.mxu2 %v7319_v49  ;;  %v7317_v46 = vld [vmem:[%s10505_s3 + $0x108] sm:$0xff] }
 0x830   :  { %3682 = vst [vmem:[#allocation1 + $0x4] ss:$9 sm:$0xff] %v3562_v50  ;;  %v3851_v50 = vrot.slane %v3806_v27, 1 }
 0x831   :  { %3683 = vst [vmem:[#allocation1 + $0x5] ss:$9 sm:$0xff] %v3478_v36  ;;  %v7318_v36 = vld [vmem:[%s10505_s3 + $0x110] sm:$0xff] }
 0x832   :  { %3684 = vst [vmem:[#allocation1 + $0x6] ss:$9 sm:$0xff] %v3563_v19  ;;  %3399 = vmatpush.msrb.mxu2 %v7318_v36  ;;  %v7316_v19 = vld [vmem:[%s10505_s3 + $0x100] sm:$0xff] }
 0x833   :  { %3685 = vst [vmem:[#allocation1 + $0x7] ss:$9 sm:$0xff] %v3564_v42  ;;  %v3852_v42 = vrot.slane %v3806_v27, 2 }
 0x834   :  { %3400 = vmatpush.msrb.mxu2 %v7317_v46 }
 0x836   :  { %3401 = vmatpush.msrb.mxu2 %v7316_v19 }
 0x837   :  { %7324 = vmatmul.msk.f32.vlgmr.msrb.gmra.mxu2 %vm1635_vm11, %v8500_v18 }
 0x83a   :  { %v8636_v38 = vld [vmem:[#allocation1] sm:$0xff] }
 0x83b   :  { %3687 = vst [vmem:[#allocation1] ss:$9 sm:$0xff] %v3565_v25 }
 0x83c   :  { %3688 = vst [vmem:[#allocation1 + $0x1] ss:$9 sm:$0xff] %v3566_v56  ;;  %v3853_v56 = vrot.slane %v3806_v27, 3 }
 0x83d   :  { %3689 = vst [vmem:[#allocation1 + $0x2] ss:$9 sm:$0xff] %v3567_v60  ;;  %v3808_v60 = vld [vmem:[#allocation2 + $0x60] ss:$2 sm:$0x7f] }
 0x83e   :  { %3690 = vst [vmem:[#allocation1 + $0x3] ss:$9 sm:$0xff] %v3568_v24  ;;  %v3855_v24 = vrot.slane %v3806_v27, 5  ;;  %v3860_v18 = vrot.slane %v3808_v60, 4 }
 0x83f   :  { %3691 = vst [vmem:[#allocation1 + $0x4] ss:$9 sm:$0xff] %v3480_v5  ;;  %v3854_v5 = vrot.slane %v3806_v27, 4  ;;  %7325 = vmatmul.msk.f32.gmra.mxu2 %vm1635_vm11, %v8514_v9 }
 0x840   :  { %3692 = vst [vmem:[#allocation1 + $0x5] ss:$9 sm:$0xff] %v3569_v41  ;;  %v3856_v41 = vrot.slane %v3806_v27, 6 }
 0x841   :  { %3693 = vst [vmem:[#allocation1 + $0x6] ss:$9 sm:$0xff] %v3570_v39  ;;  %v3857_v39 = vrot.slane %v3808_v60, 1 }
 0x842   :  { %3694 = vst [vmem:[#allocation1 + $0x7] ss:$9 sm:$0xff] %v3571_v44  ;;  %v3858_v44 = vrot.slane %v3808_v60, 2 }
 0x847   :  { %7326 = vmatmul.msk.f32.gmra.mxu2 %vm1635_vm11, %v8520_v10 }
 0x849   :  { %v8638_v51 = vld [vmem:[#allocation1] sm:$0xff] }
 0x84a   :  { %3696 = vst [vmem:[#allocation1] ss:$9 sm:$0xff] %v3572_v20  ;;  %v3859_v20 = vrot.slane %v3808_v60, 3 }
 0x84b   :  { %3697 = vst [vmem:[#allocation1 + $0x1] ss:$9 sm:$0xff] %v3573_v53  ;;  %v3810_v53 = vld [vmem:[#allocation2 + $0x80] ss:$2 sm:$0x7f] }
 0x84c   :  { %3698 = vst [vmem:[#allocation1 + $0x2] ss:$9 sm:$0xff] %v3574_v55  ;;  %v3861_v55 = vrot.slane %v3808_v60, 5  ;;  %v3865_v9 = vrot.slane %v3810_v53, 3  ;;  %v3868_v10 = vrot.slane %v3810_v53, 6 }
 0x84d   :  { %3699 = vst [vmem:[#allocation1 + $0x3] ss:$9 sm:$0xff] %v3482_v63 }
 0x84e   :  { %3700 = vst [vmem:[#allocation1 + $0x4] ss:$9 sm:$0xff] %v3575_v37  ;;  %v3862_v37 = vrot.slane %v3808_v60, 6 }
 0x84f   :  { %3701 = vst [vmem:[#allocation1 + $0x5] ss:$9 sm:$0xff] %v3576_v33  ;;  %v3863_v33 = vrot.slane %v3810_v53, 1  ;;  %7327 = vmatmul.msk.f32.gmra.mxu2 %vm1635_vm11, %v8526_v8 }
 0x850   :  { %3702 = vst [vmem:[#allocation1 + $0x6] ss:$9 sm:$0xff] %v3577_v1  ;;  %v3864_v1 = vrot.slane %v3810_v53, 2 }
 0x851   :  { %3703 = vst [vmem:[#allocation1 + $0x7] ss:$9 sm:$0xff] %v3578_v7  ;;  %v3866_v7 = vrot.slane %v3810_v53, 4 }
 0x857   :  { %7328 = vmatmul.msk.f32.gmra.mxu2 %vm1635_vm11, %v8532_v6 }
 0x858   :  { %v8640_v22 = vld [vmem:[#allocation1] sm:$0xff] }
 0x859   :  { %3705 = vst [vmem:[#allocation1] ss:$9 sm:$0xff] %v3579_v21 }
 0x85a   :  { %3706 = vst [vmem:[#allocation1 + $0x1] ss:$9 sm:$0xff] %v3580_v45  ;;  %v3812_v45 = vld [vmem:[#allocation2 + $0xa0] ss:$2 sm:$0x7f] }
 0x85b   :  { %v3870_v31 = vrot.slane %v3812_v45, 2  ;;  %v3872_v8 = vrot.slane %v3812_v45, 4  ;;  %v3873_v28 = vrot.slane %v3812_v45, 5 }
 0x85f   :  { %7329 = vmatmul.msk.f32.gmra.mxu2 %vm1635_vm11, %v8538_v57  ;;  %v3816_v57 = vld [vmem:[#allocation2 + $0xe0] ss:$2 sm:$0x7f] }
 0x860   :  { %v3881_v46 = vrot.slane %v3816_v57, 1  ;;  %v3884_v19 = vrot.slane %v3816_v57, 4 }
 0x861   :  { %v8642_v62 = vld [vmem:[#allocation1] sm:$0xff] }
 0x862   :  { %3938 = vst [vmem:[#allocation1] ss:$9 sm:$0xff] %v3804_v3  ;;  %v3867_v3 = vrot.slane %v3810_v53, 5 }
 0x863   :  { %3940 = vst [vmem:[#allocation1 + $0x1] ss:$9 sm:$0xff] %v3845_v30  ;;  %v3869_v30 = vrot.slane %v3812_v45, 1 }
 0x864   :  { %3942 = vst [vmem:[#allocation1 + $0x2] ss:$9 sm:$0xff] %v3846_v17  ;;  %v3871_v17 = vrot.slane %v3812_v45, 3 }
 0x865   :  { %3944 = vst [vmem:[#allocation1 + $0x3] ss:$9 sm:$0xff] %v3847_v14  ;;  %v3814_v14 = vld [vmem:[#allocation2 + $0xc0] ss:$2 sm:$0x7f] }
 0x866   :  { %3946 = vst [vmem:[#allocation1 + $0x4] ss:$9 sm:$0xff] %v3848_v23  ;;  %v3875_v6 = vrot.slane %v3814_v14, 1  ;;  %v3876_v40 = vrot.slane %v3814_v14, 2  ;;  %v3878_v47 = vrot.slane %v3814_v14, 4  ;;  %v3880_v49 = vrot.slane %v3814_v14, 6 }
 0x867   :  { %3948 = vst [vmem:[#allocation1 + $0x5] ss:$9 sm:$0xff] %v3849_v43  ;;  %v3874_v43 = vrot.slane %v3812_v45, 6  ;;  %7330 = vmatmul.msk.f32.gmra.mxu2 %vm1635_vm11, %v8544_v12  ;;  %v3883_v12 = vrot.slane %v3816_v57, 3 }
 0x868   :  { %3950 = vst [vmem:[#allocation1 + $0x6] ss:$9 sm:$0xff] %v3850_v29  ;;  %v3877_v29 = vrot.slane %v3814_v14, 3 }
 0x869   :  { %3952 = vst [vmem:[#allocation1 + $0x7] ss:$9 sm:$0xff] %v3806_v27  ;;  %v3879_v27 = vrot.slane %v3814_v14, 5 }
 0x86f   :  { %7331 = vmatmul.msk.f32.gmra.mxu2 %vm1635_vm11, %v8550_v26  ;;  %v3818_v26 = vld [vmem:[#allocation2 + $0x120] ss:$2 sm:$0x7f] }
 0x870   :  { %v8668_v25 = vld [vmem:[#allocation1] sm:$0xff] }
 0x871   :  { %3954 = vst [vmem:[#allocation1] ss:$9 sm:$0xff] %v3851_v50  ;;  %v3882_v50 = vrot.slane %v3816_v57, 2 }
 0x872   :  { %3955 = vst [vmem:[#allocation1 + $0x1] ss:$9 sm:$0xff] %v3852_v42  ;;  %v3885_v42 = vrot.slane %v3816_v57, 5 }
 0x873   :  { %3956 = vst [vmem:[#allocation1 + $0x2] ss:$9 sm:$0xff] %v3853_v56  ;;  %v3886_v56 = vrot.slane %v3816_v57, 6 }
 0x874   :  { %3957 = vst [vmem:[#allocation1 + $0x3] ss:$9 sm:$0xff] %v3854_v5 }
 0x875   :  { %3958 = vst [vmem:[#allocation1 + $0x4] ss:$9 sm:$0xff] %v3855_v24  ;;  %v3888_v24 = vrot.slane %v3818_v26, 2 }
 0x876   :  { %3959 = vst [vmem:[#allocation1 + $0x5] ss:$9 sm:$0xff] %v3856_v41  ;;  %v3889_v41 = vrot.slane %v3818_v26, 3 }
 0x877   :  { %3960 = vst [vmem:[#allocation1 + $0x6] ss:$9 sm:$0xff] %v3808_v60  ;;  %7332 = vmatmul.msk.f32.gmra.mxu2 %vm1635_vm11, %v8554_v48  ;;  %v3887_v60 = vrot.slane %v3818_v26, 1  ;;  %v3891_v48 = vrot.slane %v3818_v26, 5 }
 0x878   :  { %3961 = vst [vmem:[#allocation1 + $0x7] ss:$9 sm:$0xff] %v3857_v39  ;;  %v3890_v39 = vrot.slane %v3818_v26, 4 }
 0x87f   :  { %v8674_v63 = vld [vmem:[#allocation1] sm:$0xff]  ;;  %7333 = vmatmul.msk.f32.gmra.mxu2 %vm1635_vm11, %v8556_v15  ;;  %v3820_v15 = vld [vmem:[#allocation2 + $0x140] ss:$2 sm:$0x7f] }
 0x880   :  { %3963 = vst [vmem:[#allocation1] ss:$9 sm:$0xff] %v3858_v44  ;;  %v3892_v44 = vrot.slane %v3818_v26, 6 }
 0x881   :  { %3964 = vst [vmem:[#allocation1 + $0x1] ss:$9 sm:$0xff] %v3859_v20  ;;  %v8702_v20 = vpop.f32.mrf.mxu2 }
 0x882   :  { %3965 = vst [vmem:[#allocation1 + $0x2] ss:$9 sm:$0xff] %v3860_v18  ;;  %v7344_v18 = vld [vmem:[%s10505_s3 + $0x178] sm:$0xff] }
 0x883   :  { %3966 = vst [vmem:[#allocation1 + $0x3] ss:$9 sm:$0xff] %v3861_v55  ;;  %3742 = vmatpush.msrb.mxu3 %v7344_v18  ;;  %v3830_v18 = vld [vmem:[#allocation2 + $0x1e0] ss:$2 sm:$0x7f] }
 0x884   :  { %3967 = vst [vmem:[#allocation1 + $0x4] ss:$9 sm:$0xff] %v3862_v37  ;;  %v3894_v37 = vrot.slane %v3820_v15, 2 }
 0x885   :  { %3968 = vst [vmem:[#allocation1 + $0x5] ss:$9 sm:$0xff] %v3810_v53  ;;  %v3893_v53 = vrot.slane %v3820_v15, 1 }
 0x886   :  { %3969 = vst [vmem:[#allocation1 + $0x6] ss:$9 sm:$0xff] %v3863_v33  ;;  %v3895_v33 = vrot.slane %v3820_v15, 3 }
 0x887   :  { %3970 = vst [vmem:[#allocation1 + $0x7] ss:$9 sm:$0xff] %v3864_v1  ;;  %7334 = vmatmul.msk.f32.gmra.mxu2 %vm1635_vm11, %v8558_v61  ;;  %v7343_v61 = vld [vmem:[%s10505_s3 + $0x170] sm:$0xff]  ;;  %v3896_v1 = vrot.slane %v3820_v15, 4 }
 0x888   :  { %3743 = vmatpush.msrb.mxu3 %v7343_v61  ;;  %v3924_v61 = vrot.slane %v3830_v18, 2 }
 0x88e   :  { %v8680_v21 = vld [vmem:[#allocation1] sm:$0xff] }
 0x88f   :  { %3972 = vst [vmem:[#allocation1] ss:$9 sm:$0xff] %v3865_v9  ;;  %7335 = vmatmul.msk.f32.gmra.mxu2 %vm1635_vm11, %v8560_v16  ;;  %v7342_v16 = vld [vmem:[%s10505_s3 + $0x168] sm:$0xff]  ;;  %v3897_v9 = vrot.slane %v3820_v15, 5 }
 0x890   :  { %3973 = vst [vmem:[#allocation1 + $0x1] ss:$9 sm:$0xff] %v3866_v7  ;;  %3744 = vmatpush.msrb.mxu3 %v7342_v16  ;;  %v3898_v7 = vrot.slane %v3820_v15, 6  ;;  %v3928_v16 = vrot.slane %v3830_v18, 6 }
 0x891   :  { %3974 = vst [vmem:[#allocation1 + $0x2] ss:$9 sm:$0xff] %v3867_v3  ;;  %v3822_v3 = vld [vmem:[#allocation2 + $0x160] ss:$2 sm:$0x7f] }
 0x892   :  { %3975 = vst [vmem:[#allocation1 + $0x3] ss:$9 sm:$0xff] %v3868_v10  ;;  %v8720_v10 = vpop.f32.mrf.mxu2 }
 0x893   :  { %3976 = vst [vmem:[#allocation1 + $0x4] ss:$9 sm:$0xff] %v3812_v45  ;;  %v7341_v45 = vld [vmem:[%s10505_s3 + $0x160] sm:$0xff] }
 0x894   :  { %3977 = vst [vmem:[#allocation1 + $0x5] ss:$9 sm:$0xff] %v3869_v30  ;;  %3745 = vmatpush.msrb.mxu3 %v7341_v45  ;;  %v7340_v30 = vld [vmem:[%s10505_s3 + $0x158] sm:$0xff] }
 0x895   :  { %3978 = vst [vmem:[#allocation1 + $0x6] ss:$9 sm:$0xff] %v3870_v31  ;;  %v7339_v31 = vld [vmem:[%s10505_s3 + $0x150] sm:$0xff] }
 0x896   :  { %3979 = vst [vmem:[#allocation1 + $0x7] ss:$9 sm:$0xff] %v3871_v17  ;;  %3746 = vmatpush.msrb.mxu3 %v7340_v30  ;;  %v7338_v17 = vld [vmem:[%s10505_s3 + $0x148] sm:$0xff] }
 0x897   :  { %7336 = vmatmul.msk.f32.gmra.mxu2 %vm1635_vm11, %v8562_v2  ;;  %v7337_v2 = vld [vmem:[%s10505_s3 + $0x140] sm:$0xff] }
 0x898   :  { %3747 = vmatpush.msrb.mxu3 %v7339_v31 }
 0x89a   :  { %3748 = vmatpush.msrb.mxu3 %v7338_v17 }
 0x89c   :  { %3749 = vmatpush.msrb.mxu3 %v7337_v2  ;;  %v4154_v2 = vld [vmem:[#allocation2 + $0x41] ss:$2 sm:$0x7f] }
 0x89d   :  { %v8686_v23 = vld [vmem:[#allocation1] sm:$0xff]  ;;  %7345 = vmatmul.msk.f32.vlgmr.msrb.gmra.mxu3 %vm1635_vm11, %v8570_v54 }
 0x89e   :  { %3981 = vst [vmem:[#allocation1] ss:$9 sm:$0xff] %v3872_v8  ;;  %v3899_v8 = vrot.slane %v3822_v3, 1 }
 0x89f   :  { %3982 = vst [vmem:[#allocation1 + $0x1] ss:$9 sm:$0xff] %v3873_v28 }
 0x8a0   :  { %3983 = vst [vmem:[#allocation1 + $0x2] ss:$9 sm:$0xff] %v3874_v43  ;;  %v3901_v43 = vrot.slane %v3822_v3, 3 }
 0x8a1   :  { %3984 = vst [vmem:[#allocation1 + $0x3] ss:$9 sm:$0xff] %v3814_v14  ;;  %v3900_v14 = vrot.slane %v3822_v3, 2 }
 0x8a2   :  { %3985 = vst [vmem:[#allocation1 + $0x4] ss:$9 sm:$0xff] %v3875_v6  ;;  %v3902_v6 = vrot.slane %v3822_v3, 4 }
 0x8a3   :  { %3986 = vst [vmem:[#allocation1 + $0x5] ss:$9 sm:$0xff] %v3876_v40  ;;  %v3824_v40 = vld [vmem:[#allocation2 + $0x180] ss:$2 sm:$0x7f] }
 0x8a4   :  { %3987 = vst [vmem:[#allocation1 + $0x6] ss:$9 sm:$0xff] %v3877_v29  ;;  %v3903_v29 = vrot.slane %v3822_v3, 5 }
 0x8a5   :  { %3988 = vst [vmem:[#allocation1 + $0x7] ss:$9 sm:$0xff] %v3878_v47  ;;  %v3904_v47 = vrot.slane %v3822_v3, 6  ;;  %7346 = vmatmul.msk.f32.gmra.mxu3 %vm1635_vm11, %v8578_v11 }
 0x8ac   :  { %v8692_v36 = vld [vmem:[#allocation1] sm:$0xff] }
 0x8ad   :  { %3990 = vst [vmem:[#allocation1] ss:$9 sm:$0xff] %v3879_v27  ;;  %v3906_v27 = vrot.slane %v3824_v40, 2  ;;  %7347 = vmatmul.msk.f32.gmra.mxu3 %vm1635_vm11, %v8586_v52  ;;  %v3828_v52 = vld [vmem:[#allocation2 + $0x1c0] ss:$2 sm:$0x7f] }
 0x8ae   :  { %3991 = vst [vmem:[#allocation1 + $0x1] ss:$9 sm:$0xff] %v3880_v49  ;;  %v3907_v49 = vrot.slane %v3824_v40, 3 }
 0x8af   :  { %3992 = vst [vmem:[#allocation1 + $0x2] ss:$9 sm:$0xff] %v3816_v57  ;;  %v3905_v57 = vrot.slane %v3824_v40, 1 }
 0x8b0   :  { %3993 = vst [vmem:[#allocation1 + $0x3] ss:$9 sm:$0xff] %v3881_v46  ;;  %v3908_v46 = vrot.slane %v3824_v40, 4 }
 0x8b1   :  { %3994 = vst [vmem:[#allocation1 + $0x4] ss:$9 sm:$0xff] %v3882_v50  ;;  %v3826_v50 = vld [vmem:[#allocation2 + $0x1a0] ss:$2 sm:$0x7f] }
 0x8b2   :  { %3995 = vst [vmem:[#allocation1 + $0x5] ss:$9 sm:$0xff] %v3883_v12  ;;  %v3909_v12 = vrot.slane %v3824_v40, 5  ;;  %v3913_v11 = vrot.slane %v3826_v50, 3 }
 0x8b3   :  { %3996 = vst [vmem:[#allocation1 + $0x6] ss:$9 sm:$0xff] %v3884_v19  ;;  %v3910_v19 = vrot.slane %v3824_v40, 6 }
 0x8b4   :  { %3997 = vst [vmem:[#allocation1 + $0x7] ss:$9 sm:$0xff] %v3885_v42  ;;  %v3911_v42 = vrot.slane %v3826_v50, 1 }
 0x8b5   :  { %7348 = vmatmul.msk.f32.gmra.mxu3 %vm1635_vm11, %v8596_v4  ;;  %v3920_v4 = vrot.slane %v3828_v52, 4 }
 0x8bb   :  { %v8698_v5 = vld [vmem:[#allocation1] sm:$0xff] }
 0x8bc   :  { %3999 = vst [vmem:[#allocation1] ss:$9 sm:$0xff] %v3886_v56  ;;  %v3914_v56 = vrot.slane %v3826_v50, 4 }
 0x8bd   :  { %4000 = vst [vmem:[#allocation1 + $0x1] ss:$9 sm:$0xff] %v3818_v26  ;;  %v3912_v26 = vrot.slane %v3826_v50, 2  ;;  %7349 = vmatmul.msk.f32.gmra.mxu3 %vm1635_vm11, %v8602_v32  ;;  %v3923_v32 = vrot.slane %v3830_v18, 1 }
 0x8be   :  { %4001 = vst [vmem:[#allocation1 + $0x2] ss:$9 sm:$0xff] %v3887_v60 }
 0x8bf   :  { %4002 = vst [vmem:[#allocation1 + $0x3] ss:$9 sm:$0xff] %v3888_v24  ;;  %v3915_v24 = vrot.slane %v3826_v50, 5 }
 0x8c0   :  { %4003 = vst [vmem:[#allocation1 + $0x4] ss:$9 sm:$0xff] %v3889_v41  ;;  %v3916_v41 = vrot.slane %v3826_v50, 6 }
 0x8c1   :  { %4004 = vst [vmem:[#allocation1 + $0x5] ss:$9 sm:$0xff] %v3890_v39  ;;  %v3917_v39 = vrot.slane %v3828_v52, 1 }
 0x8c2   :  { %4005 = vst [vmem:[#allocation1 + $0x6] ss:$9 sm:$0xff] %v3891_v48  ;;  %v3918_v48 = vrot.slane %v3828_v52, 2 }
 0x8c3   :  { %4006 = vst [vmem:[#allocation1 + $0x7] ss:$9 sm:$0xff] %v3892_v44  ;;  %v3919_v44 = vrot.slane %v3828_v52, 3 }
 0x8c5   :  { %7350 = vmatmul.msk.f32.gmra.mxu3 %vm1635_vm11, %v8608_v59  ;;  %v3927_v59 = vrot.slane %v3830_v18, 5 }
 0x8ca   :  { %v8709_v55 = vld [vmem:[#allocation1] sm:$0xff] }
 0x8cb   :  { %4008 = vst [vmem:[#allocation1] ss:$9 sm:$0xff] %v3820_v15  ;;  %v3921_v15 = vrot.slane %v3828_v52, 5 }
 0x8cc   :  { %4009 = vst [vmem:[#allocation1 + $0x1] ss:$9 sm:$0xff] %v3893_v53 }
 0x8cd   :  { %4010 = vst [vmem:[#allocation1 + $0x2] ss:$9 sm:$0xff] %v3894_v37  ;;  %v3922_v37 = vrot.slane %v3828_v52, 6  ;;  %7351 = vmatmul.msk.f32.gmra.mxu3 %vm1635_vm11, %v8614_v0  ;;  %v4152_v0 = vld [vmem:[#allocation2 + $0x21] ss:$2 sm:$0x7f] }
 0x8ce   :  { %4011 = vst [vmem:[#allocation1 + $0x3] ss:$9 sm:$0xff] %v3895_v33  ;;  %v3925_v33 = vrot.slane %v3830_v18, 3  ;;  %v4195_v30 = vrot.slane %v4152_v0, 3  ;;  %v4196_v31 = vrot.slane %v4152_v0, 4  ;;  %v4198_v17 = vrot.slane %v4152_v0, 6 }
 0x8cf   :  { %4012 = vst [vmem:[#allocation1 + $0x4] ss:$9 sm:$0xff] %v3896_v1  ;;  %v3926_v1 = vrot.slane %v3830_v18, 4 }
 0x8d0   :  { %4013 = vst [vmem:[#allocation1 + $0x5] ss:$9 sm:$0xff] %v3897_v9 }
 0x8d1   :  { %4014 = vst [vmem:[#allocation1 + $0x6] ss:$9 sm:$0xff] %v3898_v7  ;;  %v4193_v7 = vrot.slane %v4152_v0, 1 }
 0x8d2   :  { %4015 = vst [vmem:[#allocation1 + $0x7] ss:$9 sm:$0xff] %v3822_v3  ;;  %v4194_v3 = vrot.slane %v4152_v0, 2 }
 0x8d5   :  { %7352 = vmatmul.msk.f32.gmra.mxu3 %vm1635_vm11, %v8620_v58  ;;  %v4197_v58 = vrot.slane %v4152_v0, 5 }
 0x8d9   :  { %v8736_v28 = vld [vmem:[#allocation1] sm:$0xff] }
 0x8da   :  { %4017 = vst [vmem:[#allocation1] ss:$9 sm:$0xff] %v3899_v8  ;;  %v4199_v8 = vrot.slane %v4154_v2, 1 }
 0x8db   :  { %4018 = vst [vmem:[#allocation1 + $0x1] ss:$9 sm:$0xff] %v3900_v14  ;;  %v4200_v14 = vrot.slane %v4154_v2, 2 }
 0x8dc   :  { %4019 = vst [vmem:[#allocation1 + $0x2] ss:$9 sm:$0xff] %v3901_v43 }
 0x8dd   :  { %4020 = vst [vmem:[#allocation1 + $0x3] ss:$9 sm:$0xff] %v3902_v6  ;;  %7353 = vmatmul.msk.f32.gmra.mxu3 %vm1635_vm11, %v8626_v34  ;;  %v8770_v34 = vpop.f32.mrf.mxu1  ;;  %v4201_v6 = vrot.slane %v4154_v2, 3 }
 0x8de   :  { %4021 = vst [vmem:[#allocation1 + $0x4] ss:$9 sm:$0xff] %v3903_v29  ;;  %v4156_v29 = vld [vmem:[#allocation2 + $0x61] ss:$2 sm:$0x7f] }
 0x8df   :  { %4022 = vst [vmem:[#allocation1 + $0x5] ss:$9 sm:$0xff] %v3904_v47  ;;  %v4203_v47 = vrot.slane %v4154_v2, 5 }
 0x8e0   :  { %4023 = vst [vmem:[#allocation1 + $0x6] ss:$9 sm:$0xff] %v3824_v40  ;;  %v8774_v40 = vpop.f32.mrf.mxu3 }
 0x8e1   :  { %4024 = vst [vmem:[#allocation1 + $0x7] ss:$9 sm:$0xff] %v3905_v57  ;;  %v4204_v57 = vrot.slane %v4154_v2, 6 }
 0x8e5   :  { %7354 = vmatmul.msk.f32.gmra.mxu3 %vm1635_vm11, %v8636_v38  ;;  %v4202_v38 = vrot.slane %v4154_v2, 4 }
 0x8e8   :  { %v8742_v54 = vld [vmem:[#allocation1] sm:$0xff] }
 0x8e9   :  { %4026 = vst [vmem:[#allocation1] ss:$9 sm:$0xff] %v3906_v27  ;;  %v4205_v27 = vrot.slane %v4156_v29, 1 }
 0x8ea   :  { %4027 = vst [vmem:[#allocation1 + $0x1] ss:$9 sm:$0xff] %v3907_v49  ;;  %v7364_v49 = vld [vmem:[%s10505_s3 + $0x1b0] sm:$0xff] }
 0x8eb   :  { %4028 = vst [vmem:[#allocation1 + $0x2] ss:$9 sm:$0xff] %v3908_v46  ;;  %v8784_v46 = vpop.f32.mrf.mxu1 }
 0x8ec   :  { %4029 = vst [vmem:[#allocation1 + $0x3] ss:$9 sm:$0xff] %v3909_v12  ;;  %v8792_v12 = vpop.f32.mrf.mxu3 }
 0x8ed   :  { %4030 = vst [vmem:[#allocation1 + $0x4] ss:$9 sm:$0xff] %v3910_v19  ;;  %7355 = vmatmul.msk.f32.gmra.mxu3 %vm1635_vm11, %v8638_v51  ;;  %v7365_v51 = vld [vmem:[%s10505_s3 + $0x1b8] sm:$0xff] }
 0x8ee   :  { %4031 = vst [vmem:[#allocation1 + $0x5] ss:$9 sm:$0xff] %v3826_v50  ;;  %4090 = vmatpush.msra.mxu1 %v7365_v51  ;;  %v7362_v50 = vld [vmem:[%s10505_s3 + $0x1a0] sm:$0xff]  ;;  %v7361_v19 = vld [vmem:[%s10505_s3 + $0x198] sm:$0xff] }
 0x8ef   :  { %4032 = vst [vmem:[#allocation1 + $0x6] ss:$9 sm:$0xff] %v3911_v42  ;;  %v4206_v42 = vrot.slane %v4156_v29, 2 }
 0x8f0   :  { %4033 = vst [vmem:[#allocation1 + $0x7] ss:$9 sm:$0xff] %v3912_v26  ;;  %4091 = vmatpush.msra.mxu1 %v7364_v49  ;;  %v7360_v26 = vld [vmem:[%s10505_s3 + $0x190] sm:$0xff] }
 0x8f5   :  { %7356 = vmatmul.msk.f32.gmra.mxu3 %vm1635_vm11, %v8640_v22  ;;  %v7363_v22 = vld [vmem:[%s10505_s3 + $0x1a8] sm:$0xff] }
 0x8f6   :  { %4092 = vmatpush.msra.mxu1 %v7363_v22 }
 0x8f7   :  { %v8748_v60 = vld [vmem:[#allocation1] sm:$0xff] }
 0x8f8   :  { %4035 = vst [vmem:[#allocation1] ss:$9 sm:$0xff] %v3913_v11  ;;  %4093 = vmatpush.msra.mxu1 %v7362_v50  ;;  %v4207_v11 = vrot.slane %v4156_v29, 3  ;;  %v4166_v50 = vld [vmem:[#allocation2 + $0x121] ss:$2 sm:$0x7f] }
 0x8f9   :  { %4036 = vst [vmem:[#allocation1 + $0x1] ss:$9 sm:$0xff] %v3914_v56 }
 0x8fa   :  { %4037 = vst [vmem:[#allocation1 + $0x2] ss:$9 sm:$0xff] %v3915_v24  ;;  %4094 = vmatpush.msra.mxu1 %v7361_v19  ;;  %v4158_v24 = vld [vmem:[#allocation2 + $0x81] ss:$2 sm:$0x7f] }
 0x8fb   :  { %4038 = vst [vmem:[#allocation1 + $0x3] ss:$9 sm:$0xff] %v3916_v41  ;;  %v4209_v41 = vrot.slane %v4156_v29, 5 }
 0x8fc   :  { %4039 = vst [vmem:[#allocation1 + $0x4] ss:$9 sm:$0xff] %v3828_v52  ;;  %4095 = vmatpush.msra.mxu1 %v7360_v26  ;;  %v4208_v52 = vrot.slane %v4156_v29, 4  ;;  %v4236_v26 = vrot.slane %v4166_v50, 2 }
 0x8fd   :  { %4040 = vst [vmem:[#allocation1 + $0x5] ss:$9 sm:$0xff] %v3917_v39  ;;  %7357 = vmatmul.msk.f32.gmra.mxu3 %vm1635_vm11, %v8642_v62  ;;  %v7359_v62 = vld [vmem:[%s10505_s3 + $0x188] sm:$0xff]  ;;  %v4210_v39 = vrot.slane %v4156_v29, 6 }
 0x8fe   :  { %4041 = vst [vmem:[#allocation1 + $0x6] ss:$9 sm:$0xff] %v3918_v48  ;;  %4096 = vmatpush.msra.mxu1 %v7359_v62  ;;  %v8807_v48 = vpop.f32.mrf.mxu1  ;;  %v4238_v62 = vrot.slane %v4166_v50, 4 }
 0x8ff   :  { %4042 = vst [vmem:[#allocation1 + $0x7] ss:$9 sm:$0xff] %v3919_v44  ;;  %v7358_v44 = vld [vmem:[%s10505_s3 + $0x180] sm:$0xff] }
 0x900   :  { %4097 = vmatpush.msra.mxu1 %v7358_v44 }
 0x901   :  { %7366 = vmatmul.msk.f32.vlgmr.msra.gmra.mxu1 %vm1635_vm11, %v8668_v25 }
 0x906   :  { %v8754_v53 = vld [vmem:[#allocation1] sm:$0xff] }
 0x907   :  { %4044 = vst [vmem:[#allocation1] ss:$9 sm:$0xff] %v3920_v4  ;;  %v4211_v4 = vrot.slane %v4158_v24, 1 }
 0x908   :  { %4045 = vst [vmem:[#allocation1 + $0x1] ss:$9 sm:$0xff] %v3921_v15  ;;  %v4212_v15 = vrot.slane %v4158_v24, 2 }
 0x909   :  { %4046 = vst [vmem:[#allocation1 + $0x2] ss:$9 sm:$0xff] %v3922_v37  ;;  %7367 = vmatmul.msk.f32.gmra.mxu1 %vm1635_vm11, %v8674_v63  ;;  %v4213_v37 = vrot.slane %v4158_v24, 3 }
 0x90a   :  { %4047 = vst [vmem:[#allocation1 + $0x3] ss:$9 sm:$0xff] %v3830_v18  ;;  %v8814_v18 = vpop.f32.mrf.mxu1 }
 0x90b   :  { %4048 = vst [vmem:[#allocation1 + $0x4] ss:$9 sm:$0xff] %v3923_v32  ;;  %v4214_v32 = vrot.slane %v4158_v24, 4 }
 0x90c   :  { %4049 = vst [vmem:[#allocation1 + $0x5] ss:$9 sm:$0xff] %v3924_v61 }
 0x90d   :  { %4050 = vst [vmem:[#allocation1 + $0x6] ss:$9 sm:$0xff] %v3925_v33  ;;  %v4160_v33 = vld [vmem:[#allocation2 + $0xa1] ss:$2 sm:$0x7f] }
 0x90e   :  { %4051 = vst [vmem:[#allocation1 + $0x7] ss:$9 sm:$0xff] %v3926_v1  ;;  %v4215_v1 = vrot.slane %v4158_v24, 5  ;;  %v4217_v25 = vrot.slane %v4160_v33, 1 }
 0x911   :  { %7368 = vmatmul.msk.f32.gmra.mxu1 %vm1635_vm11, %v8680_v21 }
 0x912   :  { %v8822_v63 = vpop.f32.mrf.mxu1 }
 0x915   :  { %v8760_v9 = vld [vmem:[#allocation1] sm:$0xff] }
 0x916   :  { %4053 = vst [vmem:[#allocation1] ss:$9 sm:$0xff] %v3927_v59  ;;  %v4216_v59 = vrot.slane %v4158_v24, 6 }
 0x917   :  { %4054 = vst [vmem:[#allocation1 + $0x1] ss:$9 sm:$0xff] %v3928_v16  ;;  %v4218_v16 = vrot.slane %v4160_v33, 2 }
 0x919   :  { %7369 = vmatmul.msk.f32.gmra.mxu1 %vm1635_vm11, %v8686_v23 }
 0x91e   :  { %v8764_v45 = vld [vmem:[#allocation1] sm:$0xff] }
 0x91f   :  { %4286 = vst [vmem:[#allocation1] ss:$9 sm:$0xff] %v4152_v0  ;;  %v4219_v0 = vrot.slane %v4160_v33, 3 }
 0x920   :  { %4288 = vst [vmem:[#allocation1 + $0x1] ss:$9 sm:$0xff] %v4193_v7  ;;  %v4220_v7 = vrot.slane %v4160_v33, 4 }
 0x921   :  { %4290 = vst [vmem:[#allocation1 + $0x2] ss:$9 sm:$0xff] %v4194_v3  ;;  %v4162_v3 = vld [vmem:[#allocation2 + $0xc1] ss:$2 sm:$0x7f]  ;;  %7370 = vmatmul.msk.f32.gmra.mxu1 %vm1635_vm11, %v8692_v36 }
 0x922   :  { %4292 = vst [vmem:[#allocation1 + $0x3] ss:$9 sm:$0xff] %v4195_v30  ;;  %v4221_v30 = vrot.slane %v4160_v33, 5  ;;  %v4224_v21 = vrot.slane %v4162_v3, 2 }
 0x923   :  { %4294 = vst [vmem:[#allocation1 + $0x4] ss:$9 sm:$0xff] %v4196_v31 }
 0x924   :  { %4296 = vst [vmem:[#allocation1 + $0x5] ss:$9 sm:$0xff] %v4197_v58  ;;  %v4222_v58 = vrot.slane %v4160_v33, 6 }
 0x925   :  { %4298 = vst [vmem:[#allocation1 + $0x6] ss:$9 sm:$0xff] %v4198_v17  ;;  %v4223_v17 = vrot.slane %v4162_v3, 1 }
 0x926   :  { %4300 = vst [vmem:[#allocation1 + $0x7] ss:$9 sm:$0xff] %v4154_v2  ;;  %v8828_v2 = vpop.f32.mrf.mxu1 }
 0x929   :  { %7371 = vmatmul.msk.f32.gmra.mxu1 %vm1635_vm11, %v8698_v5 }
 0x92d   :  { %v8772_v43 = vld [vmem:[#allocation1] sm:$0xff] }
 0x92e   :  { %4302 = vst [vmem:[#allocation1] ss:$9 sm:$0xff] %v4199_v8  ;;  %v4225_v8 = vrot.slane %v4162_v3, 3  ;;  %v8832_v23 = vpop.f32.mrf.mxu1 }
 0x92f   :  { %4303 = vst [vmem:[#allocation1 + $0x1] ss:$9 sm:$0xff] %v4200_v14  ;;  %v4226_v14 = vrot.slane %v4162_v3, 4 }
 0x930   :  { %4304 = vst [vmem:[#allocation1 + $0x2] ss:$9 sm:$0xff] %v4201_v6  ;;  %v4164_v6 = vld [vmem:[#allocation2 + $0xe1] ss:$2 sm:$0x7f] }
 0x931   :  { %4305 = vst [vmem:[#allocation1 + $0x3] ss:$9 sm:$0xff] %v4202_v38  ;;  %v4227_v38 = vrot.slane %v4162_v3, 5  ;;  %v4230_v51 = vrot.slane %v4164_v6, 2  ;;  %v4232_v49 = vrot.slane %v4164_v6, 4  ;;  %v4233_v36 = vrot.slane %v4164_v6, 5  ;;  %7372 = vmatmul.msk.f32.gmra.mxu1 %vm1635_vm11, %v8709_v55 }
 0x932   :  { %4306 = vst [vmem:[#allocation1 + $0x4] ss:$9 sm:$0xff] %v4203_v47  ;;  %v4234_v5 = vrot.slane %v4164_v6, 6  ;;  %v4240_v55 = vrot.slane %v4166_v50, 6 }
 0x933   :  { %4307 = vst [vmem:[#allocation1 + $0x5] ss:$9 sm:$0xff] %v4204_v57  ;;  %v4229_v57 = vrot.slane %v4164_v6, 1 }
 0x934   :  { %4308 = vst [vmem:[#allocation1 + $0x6] ss:$9 sm:$0xff] %v4156_v29  ;;  %v4228_v29 = vrot.slane %v4162_v3, 6 }
 0x935   :  { %4309 = vst [vmem:[#allocation1 + $0x7] ss:$9 sm:$0xff] %v4205_v27  ;;  %v4231_v27 = vrot.slane %v4164_v6, 3 }
 0x936   :  { %v8838_v22 = vpop.f32.mrf.mxu1 }
 0x939   :  { %7373 = vmatmul.msk.f32.gmra.mxu1 %vm1635_vm11, %v8736_v28 }
 0x93c   :  { %v8802_v56 = vld [vmem:[#allocation1] sm:$0xff] }
 0x93d   :  { %4311 = vst [vmem:[#allocation1] ss:$9 sm:$0xff] %v4206_v42  ;;  %v4235_v42 = vrot.slane %v4166_v50, 1 }
 0x93e   :  { %4312 = vst [vmem:[#allocation1 + $0x1] ss:$9 sm:$0xff] %v4207_v11  ;;  %v4237_v11 = vrot.slane %v4166_v50, 3 }
 0x93f   :  { %4313 = vst [vmem:[#allocation1 + $0x2] ss:$9 sm:$0xff] %v4208_v52  ;;  %v8846_v52 = vpop.f32.mrf.mxu1 }
 0x940   :  { %4314 = vst [vmem:[#allocation1 + $0x3] ss:$9 sm:$0xff] %v4209_v41  ;;  %v4168_v41 = vld [vmem:[#allocation2 + $0x141] ss:$2 sm:$0x7f] }
 0x941   :  { %4315 = vst [vmem:[#allocation1 + $0x4] ss:$9 sm:$0xff] %v4210_v39  ;;  %7374 = vmatmul.msk.f32.gmra.mxu1 %vm1635_vm11, %v8742_v54  ;;  %v4241_v28 = vrot.slane %v4168_v41, 1  ;;  %v4170_v54 = vld [vmem:[#allocation2 + $0x161] ss:$2 sm:$0x7f] }
 0x942   :  { %4316 = vst [vmem:[#allocation1 + $0x5] ss:$9 sm:$0xff] %v4158_v24  ;;  %v4239_v24 = vrot.slane %v4166_v50, 5 }
 0x943   :  { %4317 = vst [vmem:[#allocation1 + $0x6] ss:$9 sm:$0xff] %v4211_v4  ;;  %v4242_v4 = vrot.slane %v4168_v41, 2 }
 0x944   :  { %4318 = vst [vmem:[#allocation1 + $0x7] ss:$9 sm:$0xff] %v4212_v15  ;;  %v4243_v15 = vrot.slane %v4168_v41, 3 }
 0x947   :  { %v8850_v39 = vpop.f32.mrf.mxu1 }
 0x949   :  { %7375 = vmatmul.msk.f32.gmra.mxu1 %vm1635_vm11, %v8748_v60 }
 0x94b   :  { %v8818_v61 = vld [vmem:[#allocation1] sm:$0xff] }
 0x94c   :  { %4320 = vst [vmem:[#allocation1] ss:$9 sm:$0xff] %v4213_v37  ;;  %v4244_v37 = vrot.slane %v4168_v41, 4 }
 0x94d   :  { %4321 = vst [vmem:[#allocation1 + $0x1] ss:$9 sm:$0xff] %v4214_v32  ;;  %v4245_v32 = vrot.slane %v4168_v41, 5 }
 0x94e   :  { %4322 = vst [vmem:[#allocation1 + $0x2] ss:$9 sm:$0xff] %v4215_v1 }
 0x94f   :  { %4323 = vst [vmem:[#allocation1 + $0x3] ss:$9 sm:$0xff] %v4216_v59  ;;  %v8856_v1 = vpop.f32.mrf.mxu1  ;;  %v8860_v59 = vpop.f32.mrf.mxu2 }
 0x950   :  { %4324 = vst [vmem:[#allocation1 + $0x4] ss:$9 sm:$0xff] %v4160_v33  ;;  %v4246_v33 = vrot.slane %v4168_v41, 6 }
 0x951   :  { %4325 = vst [vmem:[#allocation1 + $0x5] ss:$9 sm:$0xff] %v4217_v25  ;;  %7376 = vmatmul.msk.f32.gmra.mxu1 %vm1635_vm11, %v8754_v53  ;;  %v4247_v25 = vrot.slane %v4170_v54, 1  ;;  %v7386_v53 = vld [vmem:[%s10505_s3 + $0x1f8] sm:$0xff] }
 0x952   :  { %4326 = vst [vmem:[#allocation1 + $0x6] ss:$9 sm:$0xff] %v4218_v16  ;;  %v4248_v16 = vrot.slane %v4170_v54, 2  ;;  %4438 = vmatpush.msra.mxu2 %v7386_v53 }
 0x953   :  { %4327 = vst [vmem:[#allocation1 + $0x7] ss:$9 sm:$0xff] %v4219_v0  ;;  %v4249_v0 = vrot.slane %v4170_v54, 3 }
 0x954   :  { %10516 = vst [vmem:[#allocation5_spill] sm:$0xff] %v8856_v1 }
 0x95a   :  { %v8826_v31 = vld [vmem:[#allocation1] sm:$0xff] }
 0x95b   :  { %4329 = vst [vmem:[#allocation1] ss:$9 sm:$0xff] %v4220_v7  ;;  %v8864_v7 = vpop.f32.mrf.mxu1  ;;  %7377 = vmatmul.msk.f32.gmra.mxu1 %vm1635_vm11, %v8760_v9  ;;  %v7384_v9 = vld [vmem:[%s10505_s3 + $0x1e8] sm:$0xff] }
 0x95c   :  { %4330 = vst [vmem:[#allocation1 + $0x1] ss:$9 sm:$0xff] %v4221_v30  ;;  %v4251_v30 = vrot.slane %v4170_v54, 5 }
 0x95d   :  { %4331 = vst [vmem:[#allocation1 + $0x2] ss:$9 sm:$0xff] %v4222_v58  ;;  %v4172_v58 = vld [vmem:[#allocation2 + $0x181] ss:$2 sm:$0x7f] }
 0x95e   :  { %4332 = vst [vmem:[#allocation1 + $0x3] ss:$9 sm:$0xff] %v4162_v3  ;;  %v4250_v3 = vrot.slane %v4170_v54, 4 }
 0x95f   :  { %4333 = vst [vmem:[#allocation1 + $0x4] ss:$9 sm:$0xff] %v4223_v17  ;;  %v4252_v17 = vrot.slane %v4170_v54, 6 }
 0x960   :  { %4334 = vst [vmem:[#allocation1 + $0x5] ss:$9 sm:$0xff] %v4224_v21  ;;  %v7385_v21 = vld [vmem:[%s10505_s3 + $0x1f0] sm:$0xff] }
 0x961   :  { %4335 = vst [vmem:[#allocation1 + $0x6] ss:$9 sm:$0xff] %v4225_v8  ;;  %v4253_v8 = vrot.slane %v4172_v58, 1  ;;  %4439 = vmatpush.msra.mxu2 %v7385_v21 }
 0x962   :  { %4336 = vst [vmem:[#allocation1 + $0x7] ss:$9 sm:$0xff] %v4226_v14  ;;  %v8874_v14 = vpop.f32.mrf.mxu2 }
 0x963   :  { %4440 = vmatpush.msra.mxu2 %v7384_v9 }
 0x969   :  { %v8834_v47 = vld [vmem:[#allocation1] sm:$0xff] }
 0x96a   :  { %4338 = vst [vmem:[#allocation1] ss:$9 sm:$0xff] %v4227_v38  ;;  %v8882_v38 = vpop.f32.mrf.mxu1  ;;  %7378 = vmatmul.msk.f32.gmra.mxu1 %vm1635_vm11, %v8764_v45  ;;  %v4257_v45 = vrot.slane %v4172_v58, 5 }
 0x96b   :  { %4339 = vst [vmem:[#allocation1 + $0x1] ss:$9 sm:$0xff] %v4228_v29  ;;  %v7382_v29 = vld [vmem:[%s10505_s3 + $0x1d8] sm:$0xff] }
 0x96c   :  { %4340 = vst [vmem:[#allocation1 + $0x2] ss:$9 sm:$0xff] %v4164_v6  ;;  %v7383_v6 = vld [vmem:[%s10505_s3 + $0x1e0] sm:$0xff] }
 0x96d   :  { %4341 = vst [vmem:[#allocation1 + $0x3] ss:$9 sm:$0xff] %v4229_v57  ;;  %4441 = vmatpush.msra.mxu2 %v7383_v6  ;;  %v7381_v57 = vld [vmem:[%s10505_s3 + $0x1d0] sm:$0xff] }
 0x96e   :  { %4342 = vst [vmem:[#allocation1 + $0x4] ss:$9 sm:$0xff] %v4230_v51  ;;  %v4254_v51 = vrot.slane %v4172_v58, 2 }
 0x96f   :  { %4343 = vst [vmem:[#allocation1 + $0x5] ss:$9 sm:$0xff] %v4231_v27  ;;  %4442 = vmatpush.msra.mxu2 %v7382_v29  ;;  %v4255_v27 = vrot.slane %v4172_v58, 3 }
 0x970   :  { %4344 = vst [vmem:[#allocation1 + $0x6] ss:$9 sm:$0xff] %v4232_v49 }
 0x971   :  { %4345 = vst [vmem:[#allocation1 + $0x7] ss:$9 sm:$0xff] %v4233_v36  ;;  %4443 = vmatpush.msra.mxu2 %v7381_v57  ;;  %v7380_v36 = vld [vmem:[%s10505_s3 + $0x1c8] sm:$0xff] }
 0x973   :  { %4444 = vmatpush.msra.mxu2 %v7380_v36  ;;  %v4500_v36 = vld [vmem:[#allocation2 + $0x22] ss:$2 sm:$0x7f] }
 0x978   :  { %v8842_v19 = vld [vmem:[#allocation1] sm:$0xff] }
 0x979   :  { %4347 = vst [vmem:[#allocation1] ss:$9 sm:$0xff] %v4234_v5  ;;  %v4174_v5 = vld [vmem:[#allocation2 + $0x1a1] ss:$2 sm:$0x7f] }
 0x97a   :  { %4348 = vst [vmem:[#allocation1 + $0x1] ss:$9 sm:$0xff] %v4166_v50  ;;  %v4256_v50 = vrot.slane %v4172_v58, 4 }
 0x97b   :  { %4349 = vst [vmem:[#allocation1 + $0x2] ss:$9 sm:$0xff] %v4235_v42  ;;  %v8897_v42 = vpop.f32.mrf.mxu2 }
 0x97c   :  { %4350 = vst [vmem:[#allocation1 + $0x3] ss:$9 sm:$0xff] %v4236_v26  ;;  %v7379_v26 = vld [vmem:[%s10505_s3 + $0x1c0] sm:$0xff] }
 0x97d   :  { %4351 = vst [vmem:[#allocation1 + $0x4] ss:$9 sm:$0xff] %v4237_v11  ;;  %v4258_v11 = vrot.slane %v4172_v58, 6  ;;  %4445 = vmatpush.msra.mxu2 %v7379_v26  ;;  %v4543_v26 = vrot.slane %v4500_v36, 3 }
 0x97e   :  { %4352 = vst [vmem:[#allocation1 + $0x5] ss:$9 sm:$0xff] %v4238_v62  ;;  %7387 = vmatmul.msk.f32.vlgmr.msra.gmra.mxu2 %vm1635_vm11, %v8772_v43  ;;  %v4259_v62 = vrot.slane %v4174_v5, 1 }
 0x97f   :  { %4353 = vst [vmem:[#allocation1 + $0x6] ss:$9 sm:$0xff] %v4239_v24  ;;  %v4260_v24 = vrot.slane %v4174_v5, 2 }
 0x980   :  { %4354 = vst [vmem:[#allocation1 + $0x7] ss:$9 sm:$0xff] %v4240_v55 }
 0x983   :  { %v8904_v55 = vpop.f32.mrf.mxu2 }
 0x986   :  { %7388 = vmatmul.msk.f32.gmra.mxu2 %vm1635_vm11, %v8802_v56 }
 0x987   :  { %v8852_v44 = vld [vmem:[#allocation1] sm:$0xff] }
 0x988   :  { %4356 = vst [vmem:[#allocation1] ss:$9 sm:$0xff] %v4168_v41  ;;  %v4261_v41 = vrot.slane %v4174_v5, 3 }
 0x989   :  { %4357 = vst [vmem:[#allocation1 + $0x1] ss:$9 sm:$0xff] %v4241_v28  ;;  %v4262_v28 = vrot.slane %v4174_v5, 4 }
 0x98a   :  { %4358 = vst [vmem:[#allocation1 + $0x2] ss:$9 sm:$0xff] %v4242_v4 }
 0x98b   :  { %4359 = vst [vmem:[#allocation1 + $0x3] ss:$9 sm:$0xff] %v4243_v15  ;;  %v4176_v15 = vld [vmem:[#allocation2 + $0x1c1] ss:$2 sm:$0x7f] }
 0x98c   :  { %4360 = vst [vmem:[#allocation1 + $0x4] ss:$9 sm:$0xff] %v4244_v37  ;;  %v4263_v37 = vrot.slane %v4174_v5, 5  ;;  %v4265_v43 = vrot.slane %v4176_v15, 1  ;;  %v4267_v56 = vrot.slane %v4176_v15, 3  ;;  %v4270_v53 = vrot.slane %v4176_v15, 6 }
 0x98d   :  { %4361 = vst [vmem:[#allocation1 + $0x5] ss:$9 sm:$0xff] %v4245_v32  ;;  %v4264_v32 = vrot.slane %v4174_v5, 6 }
 0x98e   :  { %4362 = vst [vmem:[#allocation1 + $0x6] ss:$9 sm:$0xff] %v4246_v33  ;;  %v4266_v33 = vrot.slane %v4176_v15, 2  ;;  %7389 = vmatmul.msk.f32.gmra.mxu2 %vm1635_vm11, %v8818_v61 }
 0x98f   :  { %4363 = vst [vmem:[#allocation1 + $0x7] ss:$9 sm:$0xff] %v4170_v54  ;;  %v8910_v54 = vpop.f32.mrf.mxu3 }
 0x996   :  { %v8862_v60 = vld [vmem:[#allocation1] sm:$0xff]  ;;  %7390 = vmatmul.msk.f32.gmra.mxu2 %vm1635_vm11, %v8826_v31 }
 0x997   :  { %4365 = vst [vmem:[#allocation1] ss:$9 sm:$0xff] %v4247_v25  ;;  %v8914_v25 = vpop.f32.mrf.mxu2 }
 0x998   :  { %4366 = vst [vmem:[#allocation1 + $0x1] ss:$9 sm:$0xff] %v4248_v16  ;;  %v4268_v16 = vrot.slane %v4176_v15, 4 }
 0x999   :  { %4367 = vst [vmem:[#allocation1 + $0x2] ss:$9 sm:$0xff] %v4249_v0  ;;  %v4269_v0 = vrot.slane %v4176_v15, 5 }
 0x99a   :  { %4368 = vst [vmem:[#allocation1 + $0x3] ss:$9 sm:$0xff] %v4250_v3  ;;  %v4178_v3 = vld [vmem:[#allocation2 + $0x1e1] ss:$2 sm:$0x7f] }
 0x99b   :  { %4369 = vst [vmem:[#allocation1 + $0x4] ss:$9 sm:$0xff] %v4251_v30  ;;  %v4271_v61 = vrot.slane %v4178_v3, 1  ;;  %v4272_v21 = vrot.slane %v4178_v3, 2  ;;  %v4274_v9 = vrot.slane %v4178_v3, 4  ;;  %v4275_v29 = vrot.slane %v4178_v3, 5 }
 0x99c   :  { %4370 = vst [vmem:[#allocation1 + $0x5] ss:$9 sm:$0xff] %v4252_v17  ;;  %v4276_v57 = vrot.slane %v4178_v3, 6 }
 0x99d   :  { %4371 = vst [vmem:[#allocation1 + $0x6] ss:$9 sm:$0xff] %v4172_v58  ;;  %v8920_v58 = vpop.f32.mrf.mxu3 }
 0x99e   :  { %4372 = vst [vmem:[#allocation1 + $0x7] ss:$9 sm:$0xff] %v4253_v8  ;;  %v4273_v8 = vrot.slane %v4178_v3, 3  ;;  %7391 = vmatmul.msk.f32.gmra.mxu2 %vm1635_vm11, %v8834_v47  ;;  %v4541_v47 = vrot.slane %v4500_v36, 1 }
 0x99f   :  { %v8922_v17 = vpop.f32.mrf.mxu2 }
 0x9a5   :  { %v8892_v49 = vld [vmem:[#allocation1] sm:$0xff]  ;;  %v8926_v31 = vpop.f32.mrf.mxu3 }
 0x9a6   :  { %4374 = vst [vmem:[#allocation1] ss:$9 sm:$0xff] %v4254_v51  ;;  %7392 = vmatmul.msk.f32.gmra.mxu2 %vm1635_vm11, %v8842_v19  ;;  %v4544_v19 = vrot.slane %v4500_v36, 4 }
 0x9a7   :  { %4375 = vst [vmem:[#allocation1 + $0x1] ss:$9 sm:$0xff] %v4255_v27  ;;  %v8928_v6 = vpop.f32.mrf.mxu2 }
 0x9a8   :  { %4376 = vst [vmem:[#allocation1 + $0x2] ss:$9 sm:$0xff] %v4256_v50 }
 0x9a9   :  { %4377 = vst [vmem:[#allocation1 + $0x3] ss:$9 sm:$0xff] %v4257_v45 }
 0x9aa   :  { %4378 = vst [vmem:[#allocation1 + $0x4] ss:$9 sm:$0xff] %v4258_v11  ;;  %v4545_v11 = vrot.slane %v4500_v36, 5 }
 0x9ab   :  { %4379 = vst [vmem:[#allocation1 + $0x5] ss:$9 sm:$0xff] %v4174_v5  ;;  %v4542_v5 = vrot.slane %v4500_v36, 2 }
 0x9ac   :  { %4380 = vst [vmem:[#allocation1 + $0x6] ss:$9 sm:$0xff] %v4259_v62  ;;  %v4546_v62 = vrot.slane %v4500_v36, 6 }
 0x9ad   :  { %4381 = vst [vmem:[#allocation1 + $0x7] ss:$9 sm:$0xff] %v4260_v24  ;;  %v8934_v27 = vpop.f32.mrf.mxu3 }
 0x9ae   :  { %7393 = vmatmul.msk.f32.gmra.mxu2 %vm1635_vm11, %v8852_v44  ;;  %v4502_v44 = vld [vmem:[#allocation2 + $0x42] ss:$2 sm:$0x7f] }
 0x9af   :  { %v8936_v50 = vpop.f32.mrf.mxu2 }
 0x9b4   :  { %v8908_v4 = vld [vmem:[#allocation1] sm:$0xff] }
 0x9b5   :  { %4383 = vst [vmem:[#allocation1] ss:$9 sm:$0xff] %v4261_v41  ;;  %v8942_v24 = vpop.f32.mrf.mxu3 }
 0x9b6   :  { %4384 = vst [vmem:[#allocation1 + $0x1] ss:$9 sm:$0xff] %v4262_v28  ;;  %7394 = vmatmul.msk.f32.gmra.mxu2 %vm1635_vm11, %v8862_v60  ;;  %v4547_v28 = vrot.slane %v4502_v44, 1  ;;  %v4551_v60 = vrot.slane %v4502_v44, 5 }
 0x9b7   :  { %4385 = vst [vmem:[#allocation1 + $0x2] ss:$9 sm:$0xff] %v4263_v37  ;;  %v8946_v41 = vpop.f32.mrf.mxu2 }
 0x9b8   :  { %4386 = vst [vmem:[#allocation1 + $0x3] ss:$9 sm:$0xff] %v4264_v32  ;;  %v4549_v32 = vrot.slane %v4502_v44, 3 }
 0x9b9   :  { %4387 = vst [vmem:[#allocation1 + $0x4] ss:$9 sm:$0xff] %v4176_v15  ;;  %v4548_v15 = vrot.slane %v4502_v44, 2 }
 0x9ba   :  { %4388 = vst [vmem:[#allocation1 + $0x5] ss:$9 sm:$0xff] %v4265_v43 }
 0x9bb   :  { %4389 = vst [vmem:[#allocation1 + $0x6] ss:$9 sm:$0xff] %v4266_v33  ;;  %v4550_v33 = vrot.slane %v4502_v44, 4 }
 0x9bc   :  { %4390 = vst [vmem:[#allocation1 + $0x7] ss:$9 sm:$0xff] %v4267_v56  ;;  %v4504_v56 = vld [vmem:[#allocation2 + $0x62] ss:$2 sm:$0x7f] }
 0x9bd   :  { %v8952_v43 = vpop.f32.mrf.mxu3 }
 0x9be   :  { %7395 = vmatmul.msk.f32.gmra.mxu2 %vm1635_vm11, %v8892_v49 }
 0x9c3   :  { %v8918_v30 = vld [vmem:[#allocation1] sm:$0xff] }
 0x9c4   :  { %4392 = vst [vmem:[#allocation1] ss:$9 sm:$0xff] %v4268_v16  ;;  %v8954_v16 = vpop.f32.mrf.mxu2 }
 0x9c5   :  { %4393 = vst [vmem:[#allocation1 + $0x1] ss:$9 sm:$0xff] %v4269_v0  ;;  %v4552_v0 = vrot.slane %v4502_v44, 6  ;;  %v8958_v49 = vpop.f32.mrf.mxu3 }
 0x9c6   :  { %4394 = vst [vmem:[#allocation1 + $0x2] ss:$9 sm:$0xff] %v4270_v53  ;;  %7396 = vmatmul.msk.f32.gmra.mxu2 %vm1635_vm11, %v8908_v4 }
 0x9c7   :  { %4395 = vst [vmem:[#allocation1 + $0x3] ss:$9 sm:$0xff] %v4178_v3  ;;  %v4553_v3 = vrot.slane %v4504_v56, 1 }
 0x9c8   :  { %4396 = vst [vmem:[#allocation1 + $0x4] ss:$9 sm:$0xff] %v4271_v61  ;;  %v4554_v61 = vrot.slane %v4504_v56, 2 }
 0x9c9   :  { %4397 = vst [vmem:[#allocation1 + $0x5] ss:$9 sm:$0xff] %v4272_v21  ;;  %v4555_v21 = vrot.slane %v4504_v56, 3 }
 0x9ca   :  { %4398 = vst [vmem:[#allocation1 + $0x6] ss:$9 sm:$0xff] %v4273_v8 }
 0x9cb   :  { %4399 = vst [vmem:[#allocation1 + $0x7] ss:$9 sm:$0xff] %v4274_v9  ;;  %v4556_v9 = vrot.slane %v4504_v56, 4 }
 0x9cc   :  { %v8960_v53 = vpop.f32.mrf.mxu2 }
 0x9cd   :  { %10517 = vst [vmem:[#allocation6_spill] sm:$0xff] %v8960_v53 }
 0x9ce   :  { %7397 = vmatmul.msk.f32.gmra.mxu2 %vm1635_vm11, %v8918_v30  ;;  %v7407_v30 = vld [vmem:[%s10505_s3 + $0x238] sm:$0xff] }
 0x9cf   :  { %4786 = vmatpush.msra.mxu3 %v7407_v30 }
 0x9d2   :  { %v8932_v51 = vld [vmem:[#allocation1] sm:$0xff] }
 0x9d3   :  { %4401 = vst [vmem:[#allocation1] ss:$9 sm:$0xff] %v4275_v29  ;;  %v4506_v29 = vld [vmem:[#allocation2 + $0x82] ss:$2 sm:$0x7f] }
 0x9d4   :  { %4402 = vst [vmem:[#allocation1 + $0x1] ss:$9 sm:$0xff] %v4276_v57  ;;  %v4557_v57 = vrot.slane %v4504_v56, 5  ;;  %v4559_v4 = vrot.slane %v4506_v29, 1 }
 0x9db   :  { %v8940_v45 = vld [vmem:[#allocation1] sm:$0xff] }
 0x9dc   :  { %4634 = vst [vmem:[#allocation1] ss:$9 sm:$0xff] %v4500_v36  ;;  %v4558_v36 = vrot.slane %v4504_v56, 6 }
 0x9dd   :  { %4636 = vst [vmem:[#allocation1 + $0x1] ss:$9 sm:$0xff] %v4541_v47  ;;  %v4560_v47 = vrot.slane %v4506_v29, 2 }
 0x9de   :  { %4638 = vst [vmem:[#allocation1 + $0x2] ss:$9 sm:$0xff] %v4542_v5  ;;  %v8966_v5 = vpop.f32.mrf.mxu3 }
 0x9df   :  { %4640 = vst [vmem:[#allocation1 + $0x3] ss:$9 sm:$0xff] %v4543_v26  ;;  %v8968_v26 = vpop.f32.mrf.mxu2  ;;  %7398 = vmatmul.msk.f32.gmra.mxu2 %vm1635_vm11, %v8932_v51  ;;  %v4508_v51 = vld [vmem:[#allocation2 + $0xa2] ss:$2 sm:$0x7f] }
 0x9e0   :  { %4642 = vst [vmem:[#allocation1 + $0x4] ss:$9 sm:$0xff] %v4544_v19  ;;  %v7406_v19 = vld [vmem:[%s10505_s3 + $0x230] sm:$0xff] }
 0x9e1   :  { %4644 = vst [vmem:[#allocation1 + $0x5] ss:$9 sm:$0xff] %v4545_v11  ;;  %4787 = vmatpush.msra.mxu3 %v7406_v19  ;;  %v7405_v11 = vld [vmem:[%s10505_s3 + $0x228] sm:$0xff]  ;;  %v4570_v19 = vrot.slane %v4508_v51, 6 }
 0x9e2   :  { %4646 = vst [vmem:[#allocation1 + $0x6] ss:$9 sm:$0xff] %v4546_v62  ;;  %v4561_v62 = vrot.slane %v4506_v29, 3 }
 0x9e3   :  { %4648 = vst [vmem:[#allocation1 + $0x7] ss:$9 sm:$0xff] %v4502_v44  ;;  %4788 = vmatpush.msra.mxu3 %v7405_v11  ;;  %v7404_v44 = vld [vmem:[%s10505_s3 + $0x220] sm:$0xff] }
 0x9e5   :  { %4789 = vmatpush.msra.mxu3 %v7404_v44 }
 0x9ea   :  { %v8950_v37 = vld [vmem:[#allocation1] sm:$0xff] }
 0x9eb   :  { %4650 = vst [vmem:[#allocation1] ss:$9 sm:$0xff] %v4547_v28  ;;  %v4562_v28 = vrot.slane %v4506_v29, 4 }
 0x9ec   :  { %4651 = vst [vmem:[#allocation1 + $0x1] ss:$9 sm:$0xff] %v4548_v15  ;;  %v4563_v15 = vrot.slane %v4506_v29, 5 }
 0x9ed   :  { %4652 = vst [vmem:[#allocation1 + $0x2] ss:$9 sm:$0xff] %v4549_v32 }
 0x9ee   :  { %4653 = vst [vmem:[#allocation1 + $0x3] ss:$9 sm:$0xff] %v4550_v33  ;;  %v8984_v33 = vpop.f32.mrf.mxu3 }
 0x9ef   :  { %4654 = vst [vmem:[#allocation1 + $0x4] ss:$9 sm:$0xff] %v4551_v60  ;;  %v7403_v60 = vld [vmem:[%s10505_s3 + $0x218] sm:$0xff] }
 0x9f0   :  { %4655 = vst [vmem:[#allocation1 + $0x5] ss:$9 sm:$0xff] %v4552_v0  ;;  %v4564_v0 = vrot.slane %v4506_v29, 6  ;;  %4790 = vmatpush.msra.mxu3 %v7403_v60 }
 0x9f1   :  { %4656 = vst [vmem:[#allocation1 + $0x6] ss:$9 sm:$0xff] %v4504_v56  ;;  %v8986_v56 = vpop.f32.mrf.mxu2  ;;  %7399 = vmatmul.msk.f32.gmra.mxu2 %vm1635_vm11, %v8940_v45  ;;  %v7400_v45 = vld [vmem:[%s10505_s3 + $0x200] sm:$0xff] }
 0x9f2   :  { %4657 = vst [vmem:[#allocation1 + $0x7] ss:$9 sm:$0xff] %v4553_v3  ;;  %v7402_v3 = vld [vmem:[%s10505_s3 + $0x210] sm:$0xff] }
 0x9f3   :  { %10518 = vst [vmem:[#allocation7_spill] sm:$0xff] %v8984_v33  ;;  %4791 = vmatpush.msra.mxu3 %v7402_v3 }
 0x9f9   :  { %v8962_v8 = vld [vmem:[#allocation1] sm:$0xff] }
 0x9fa   :  { %4659 = vst [vmem:[#allocation1] ss:$9 sm:$0xff] %v4554_v61  ;;  %v4565_v61 = vrot.slane %v4508_v51, 1 }
 0x9fb   :  { %4660 = vst [vmem:[#allocation1 + $0x1] ss:$9 sm:$0xff] %v4555_v21  ;;  %v4566_v21 = vrot.slane %v4508_v51, 2 }
 0x9fc   :  { %4661 = vst [vmem:[#allocation1 + $0x2] ss:$9 sm:$0xff] %v4556_v9  ;;  %v7401_v9 = vld [vmem:[%s10505_s3 + $0x208] sm:$0xff] }
 0x9fd   :  { %4662 = vst [vmem:[#allocation1 + $0x3] ss:$9 sm:$0xff] %v4557_v57  ;;  %v4567_v57 = vrot.slane %v4508_v51, 3  ;;  %4792 = vmatpush.msra.mxu3 %v7401_v9 }
 0x9fe   :  { %4663 = vst [vmem:[#allocation1 + $0x4] ss:$9 sm:$0xff] %v4558_v36  ;;  %v4568_v36 = vrot.slane %v4508_v51, 4 }
 0x9ff   :  { %4664 = vst [vmem:[#allocation1 + $0x5] ss:$9 sm:$0xff] %v4506_v29  ;;  %4793 = vmatpush.msra.mxu3 %v7400_v45  ;;  %v9004_v29 = vpop.f32.mrf.mxu3  ;;  %v9017_v45 = vpop.f32.mrf.mxu1 }
 0xa00   :  { %4665 = vst [vmem:[#allocation1 + $0x6] ss:$9 sm:$0xff] %v4559_v4  ;;  %7408 = vmatmul.msk.f32.vlgmr.msra.gmra.mxu3 %vm1635_vm11, %v8950_v37  ;;  %v4510_v4 = vld [vmem:[#allocation2 + $0xc2] ss:$2 sm:$0x7f] }
 0xa01   :  { %4666 = vst [vmem:[#allocation1 + $0x7] ss:$9 sm:$0xff] %v4560_v47  ;;  %v4569_v47 = vrot.slane %v4508_v51, 5  ;;  %v4571_v11 = vrot.slane %v4510_v4, 1  ;;  %v4573_v44 = vrot.slane %v4510_v4, 3 }
 0xa02   :  { %10519 = vst [vmem:[#allocation8_spill] sm:$0xff] %v9004_v29 }
 0xa07   :  { %v9008_v37 = vpop.f32.mrf.mxu3 }
 0xa08   :  { %v4667_v32 = vld [vmem:[#allocation1] sm:$0xff]  ;;  %7409 = vmatmul.msk.f32.gmra.mxu3 %vm1635_vm11, %v8962_v8  ;;  %10520 = vst [vmem:[#allocation9_spill] sm:$0xff] %v9008_v37 }
 0xa09   :  { %4668 = vst [vmem:[#allocation1] ss:$9 sm:$0xff] %v4561_v62  ;;  %v4572_v62 = vrot.slane %v4510_v4, 2 }
 0xa0a   :  { %4669 = vst [vmem:[#allocation1 + $0x1] ss:$9 sm:$0xff] %v4562_v28  ;;  %v4574_v28 = vrot.slane %v4510_v4, 4 }
 0xa0b   :  { %4670 = vst [vmem:[#allocation1 + $0x2] ss:$9 sm:$0xff] %v4563_v15  ;;  %v4512_v15 = vld [vmem:[#allocation2 + $0xe2] ss:$2 sm:$0x7f] }
 0xa0c   :  { %4671 = vst [vmem:[#allocation1 + $0x3] ss:$9 sm:$0xff] %v4564_v0  ;;  %v4576_v0 = vrot.slane %v4510_v4, 6  ;;  %v4577_v3 = vrot.slane %v4512_v15, 1  ;;  %v4580_v9 = vrot.slane %v4512_v15, 4 }
 0xa0d   :  { %4672 = vst [vmem:[#allocation1 + $0x4] ss:$9 sm:$0xff] %v4508_v51  ;;  %v4575_v51 = vrot.slane %v4510_v4, 5 }
 0xa0e   :  { %4673 = vst [vmem:[#allocation1 + $0x5] ss:$9 sm:$0xff] %v4565_v61  ;;  %v4578_v61 = vrot.slane %v4512_v15, 2 }
 0xa0f   :  { %4674 = vst [vmem:[#allocation1 + $0x6] ss:$9 sm:$0xff] %v4566_v21  ;;  %v9011_v60 = vpop.f32.mrf.mxu3  ;;  %v4579_v21 = vrot.slane %v4512_v15, 3 }
 0xa10   :  { %4675 = vst [vmem:[#allocation1 + $0x7] ss:$9 sm:$0xff] %v4567_v57  ;;  %7410 = vmatmul.msk.f32.gmra.mxu3 %vm1635_vm11, %v4667_v32  ;;  %v4581_v57 = vrot.slane %v4512_v15, 5 }
 0xa17   :  { %v4676_v30 = vld [vmem:[#allocation1] sm:$0xff]  ;;  %v9014_v32 = vpop.f32.mrf.mxu3 }
 0xa18   :  { %4677 = vst [vmem:[#allocation1] ss:$9 sm:$0xff] %v4568_v36  ;;  %7411 = vmatmul.msk.f32.gmra.mxu3 %vm1635_vm11, %v4676_v30  ;;  %v4514_v36 = vld [vmem:[#allocation2 + $0x122] ss:$2 sm:$0x7f] }
 0xa19   :  { %4678 = vst [vmem:[#allocation1 + $0x1] ss:$9 sm:$0xff] %v4569_v47  ;;  %v9019_v47 = vpop.f32.mrf.mxu2  ;;  %v4583_v30 = vrot.slane %v4514_v36, 1 }
 0xa1a   :  { %4679 = vst [vmem:[#allocation1 + $0x2] ss:$9 sm:$0xff] %v4570_v19 }
 0xa1b   :  { %4680 = vst [vmem:[#allocation1 + $0x3] ss:$9 sm:$0xff] %v4510_v4  ;;  %v4582_v4 = vrot.slane %v4512_v15, 6 }
 0xa1c   :  { %4681 = vst [vmem:[#allocation1 + $0x4] ss:$9 sm:$0xff] %v4571_v11  ;;  %v4584_v11 = vrot.slane %v4514_v36, 2 }
 0xa1d   :  { %4682 = vst [vmem:[#allocation1 + $0x5] ss:$9 sm:$0xff] %v4572_v62  ;;  %v4585_v62 = vrot.slane %v4514_v36, 3 }
 0xa1e   :  { %4683 = vst [vmem:[#allocation1 + $0x6] ss:$9 sm:$0xff] %v4573_v44  ;;  %v4586_v44 = vrot.slane %v4514_v36, 4 }
 0xa1f   :  { %4684 = vst [vmem:[#allocation1 + $0x7] ss:$9 sm:$0xff] %v4574_v28  ;;  %v9021_v28 = vpop.f32.mrf.mxu3 }
 0xa26   :  { %v4685_v8 = vld [vmem:[#allocation1] sm:$0xff] }
 0xa27   :  { %4686 = vst [vmem:[#allocation1] ss:$9 sm:$0xff] %v4575_v51  ;;  %7412 = vmatmul.msk.f32.gmra.mxu3 %vm1635_vm11, %v4685_v8  ;;  %v4587_v51 = vrot.slane %v4514_v36, 5  ;;  %v9026_v8 = vpop.f32.mrf.mxu2 }
 0xa28   :  { %4687 = vst [vmem:[#allocation1 + $0x1] ss:$9 sm:$0xff] %v4576_v0  ;;  %v4588_v0 = vrot.slane %v4514_v36, 6 }
 0xa29   :  { %4688 = vst [vmem:[#allocation1 + $0x2] ss:$9 sm:$0xff] %v4512_v15  ;;  %v9024_v15 = vpop.f32.mrf.mxu1 }
 0xa2a   :  { %4689 = vst [vmem:[#allocation1 + $0x3] ss:$9 sm:$0xff] %v4577_v3  ;;  %v4516_v3 = vld [vmem:[#allocation2 + $0x142] ss:$2 sm:$0x7f] }
 0xa2b   :  { %4690 = vst [vmem:[#allocation1 + $0x4] ss:$9 sm:$0xff] %v4578_v61  ;;  %v9028_v61 = vpop.f32.mrf.mxu3 }
 0xa2c   :  { %4691 = vst [vmem:[#allocation1 + $0x5] ss:$9 sm:$0xff] %v4579_v21  ;;  %v4589_v21 = vrot.slane %v4516_v3, 1 }
 0xa2d   :  { %4692 = vst [vmem:[#allocation1 + $0x6] ss:$9 sm:$0xff] %v4580_v9 }
 0xa2e   :  { %4693 = vst [vmem:[#allocation1 + $0x7] ss:$9 sm:$0xff] %v4581_v57  ;;  %v4590_v57 = vrot.slane %v4516_v3, 2 }
 0xa35   :  { %v4694_v19 = vld [vmem:[#allocation1] sm:$0xff] }
 0xa36   :  { %4695 = vst [vmem:[#allocation1] ss:$9 sm:$0xff] %v4582_v4  ;;  %7413 = vmatmul.msk.f32.gmra.mxu3 %vm1635_vm11, %v4694_v19  ;;  %v4591_v4 = vrot.slane %v4516_v3, 3  ;;  %v9031_v19 = vpop.f32.mrf.mxu1 }
 0xa37   :  { %4696 = vst [vmem:[#allocation1 + $0x1] ss:$9 sm:$0xff] %v4514_v36  ;;  %v4592_v36 = vrot.slane %v4516_v3, 4 }
 0xa38   :  { %4697 = vst [vmem:[#allocation1 + $0x2] ss:$9 sm:$0xff] %v4583_v30  ;;  %v4593_v30 = vrot.slane %v4516_v3, 5 }
 0xa39   :  { %4698 = vst [vmem:[#allocation1 + $0x3] ss:$9 sm:$0xff] %v4584_v11  ;;  %v9033_v11 = vpop.f32.mrf.mxu2 }
 0xa3a   :  { %4699 = vst [vmem:[#allocation1 + $0x4] ss:$9 sm:$0xff] %v4585_v62  ;;  %v4594_v62 = vrot.slane %v4516_v3, 6 }
 0xa3b   :  { %4700 = vst [vmem:[#allocation1 + $0x5] ss:$9 sm:$0xff] %v4586_v44  ;;  %v4518_v44 = vld [vmem:[#allocation2 + $0x162] ss:$2 sm:$0x7f] }
 0xa3c   :  { %4701 = vst [vmem:[#allocation1 + $0x6] ss:$9 sm:$0xff] %v4587_v51  ;;  %v9035_v51 = vpop.f32.mrf.mxu3  ;;  %v4596_v37 = vrot.slane %v4518_v44, 2 }
 0xa3d   :  { %4702 = vst [vmem:[#allocation1 + $0x7] ss:$9 sm:$0xff] %v4588_v0 }
 0xa3e   :  { %10521 = vst [vmem:[#allocation10_spill] sm:$0xff] %v9035_v51  ;;  %v9037_v0 = vpop.f32.mrf.mxu1 }
 0xa44   :  { %v4703_v9 = vld [vmem:[#allocation1] sm:$0xff] }
 0xa45   :  { %4704 = vst [vmem:[#allocation1] ss:$9 sm:$0xff] %v4516_v3  ;;  %7414 = vmatmul.msk.f32.gmra.mxu3 %vm1635_vm11, %v4703_v9  ;;  %v4595_v9 = vrot.slane %v4518_v44, 1  ;;  %v4520_v3 = vld [vmem:[#allocation2 + $0x182] ss:$2 sm:$0x7f] }
 0xa46   :  { %4705 = vst [vmem:[#allocation1 + $0x1] ss:$9 sm:$0xff] %v4589_v21  ;;  %v9039_v21 = vpop.f32.mrf.mxu2  ;;  %v4601_v1 = vrot.slane %v4520_v3, 1  ;;  %v9044_v29 = vpop.f32.mrf.mxu1 }
 0xa47   :  { %4706 = vst [vmem:[#allocation1 + $0x2] ss:$9 sm:$0xff] %v4590_v57  ;;  %v4597_v57 = vrot.slane %v4518_v44, 3 }
 0xa48   :  { %4707 = vst [vmem:[#allocation1 + $0x3] ss:$9 sm:$0xff] %v4591_v4  ;;  %v4598_v4 = vrot.slane %v4518_v44, 4 }
 0xa49   :  { %4708 = vst [vmem:[#allocation1 + $0x4] ss:$9 sm:$0xff] %v4592_v36  ;;  %v4599_v36 = vrot.slane %v4518_v44, 5 }
 0xa4a   :  { %4709 = vst [vmem:[#allocation1 + $0x5] ss:$9 sm:$0xff] %v4593_v30  ;;  %v4600_v30 = vrot.slane %v4518_v44, 6 }
 0xa4b   :  { %4710 = vst [vmem:[#allocation1 + $0x6] ss:$9 sm:$0xff] %v4594_v62  ;;  %v9042_v62 = vpop.f32.mrf.mxu3 }
 0xa4c   :  { %4711 = vst [vmem:[#allocation1 + $0x7] ss:$9 sm:$0xff] %v4518_v44  ;;  %v4522_v44 = vld [vmem:[#allocation2 + $0x1a2] ss:$2 sm:$0x7f] }
 0xa4d   :  { %10522 = vst [vmem:[#allocation11_spill] sm:$0xff] %v9039_v21  ;;  %v4604_v21 = vrot.slane %v4520_v3, 4 }
 0xa4e   :  { %10523 = vst [vmem:[#allocation12_spill] sm:$0xff] %v9042_v62  ;;  %v9046_v33 = vpop.f32.mrf.mxu2  ;;  %v4608_v62 = vrot.slane %v4522_v44, 2 }
 0xa4f   :  { %10524 = vst [vmem:[#allocation13_spill] sm:$0xff] %v9044_v29 }
 0xa50   :  { %10525 = vst [vmem:[#allocation14_spill] sm:$0xff] %v9046_v33 }
 0xa53   :  { %v4712_v53 = vld [vmem:[#allocation1] sm:$0xff] }
 0xa54   :  { %4713 = vst [vmem:[#allocation1] ss:$9 sm:$0xff] %v4595_v9  ;;  %7415 = vmatmul.msk.f32.gmra.mxu3 %vm1635_vm11, %v4712_v53  ;;  %v4602_v9 = vrot.slane %v4520_v3, 2  ;;  %v9048_v53 = vpop.f32.mrf.mxu3 }
 0xa55   :  { %4714 = vst [vmem:[#allocation1 + $0x1] ss:$9 sm:$0xff] %v4596_v37  ;;  %v4603_v37 = vrot.slane %v4520_v3, 3 }
 0xa56   :  { %4715 = vst [vmem:[#allocation1 + $0x2] ss:$9 sm:$0xff] %v4597_v57  ;;  %v4605_v57 = vrot.slane %v4520_v3, 5 }
 0xa57   :  { %4716 = vst [vmem:[#allocation1 + $0x3] ss:$9 sm:$0xff] %v4598_v4  ;;  %v9051_v4 = vpop.f32.mrf.mxu1 }
 0xa58   :  { %4717 = vst [vmem:[#allocation1 + $0x4] ss:$9 sm:$0xff] %v4599_v36  ;;  %v4606_v36 = vrot.slane %v4520_v3, 6 }
 0xa59   :  { %4718 = vst [vmem:[#allocation1 + $0x5] ss:$9 sm:$0xff] %v4600_v30  ;;  %v4607_v30 = vrot.slane %v4522_v44, 1 }
 0xa5a   :  { %4719 = vst [vmem:[#allocation1 + $0x6] ss:$9 sm:$0xff] %v4520_v3  ;;  %v4524_v3 = vld [vmem:[#allocation2 + $0x1c2] ss:$2 sm:$0x7f] }
 0xa5b   :  { %4720 = vst [vmem:[#allocation1 + $0x7] ss:$9 sm:$0xff] %v4601_v1  ;;  %v9053_v1 = vpop.f32.mrf.mxu2 }
 0xa5c   :  { %10526 = vst [vmem:[#allocation15_spill] sm:$0xff] %v9048_v53  ;;  %v9055_v53 = vpop.f32.mrf.mxu3 }
 0xa5d   :  { %10527 = vst [vmem:[#allocation16_spill] sm:$0xff] %v9051_v4 }
 0xa5e   :  { %10528 = vst [vmem:[#allocation17_spill] sm:$0xff] %v9053_v1 }
 0xa5f   :  { %10529 = vst [vmem:[#allocation18_spill] sm:$0xff] %v9055_v53  ;;  %v4615_v53 = vrot.slane %v4524_v3, 3 }
 0xa62   :  { %v4721_v51 = vld [vmem:[#allocation1] sm:$0xff] }
 0xa63   :  { %4722 = vst [vmem:[#allocation1] ss:$9 sm:$0xff] %v4602_v9  ;;  %7416 = vmatmul.msk.f32.gmra.mxu3 %vm1635_vm11, %v4721_v51  ;;  %v9057_v9 = vpop.f32.mrf.mxu1  ;;  %v4609_v51 = vrot.slane %v4522_v44, 3  ;;  %v9059_v33 = vpop.f32.mrf.mxu2 }
 0xa64   :  { %4723 = vst [vmem:[#allocation1 + $0x1] ss:$9 sm:$0xff] %v4603_v37  ;;  %v4610_v37 = vrot.slane %v4522_v44, 4 }
 0xa65   :  { %4724 = vst [vmem:[#allocation1 + $0x2] ss:$9 sm:$0xff] %v4604_v21  ;;  %v4611_v21 = vrot.slane %v4522_v44, 5 }
 0xa66   :  { %4725 = vst [vmem:[#allocation1 + $0x3] ss:$9 sm:$0xff] %v4605_v57  ;;  %v4612_v57 = vrot.slane %v4522_v44, 6 }
 0xa67   :  { %4726 = vst [vmem:[#allocation1 + $0x4] ss:$9 sm:$0xff] %v4606_v36  ;;  %v4613_v36 = vrot.slane %v4524_v3, 1 }
 0xa68   :  { %4727 = vst [vmem:[#allocation1 + $0x5] ss:$9 sm:$0xff] %v4522_v44  ;;  %v4617_v44 = vrot.slane %v4524_v3, 5 }
 0xa69   :  { %4728 = vst [vmem:[#allocation1 + $0x6] ss:$9 sm:$0xff] %v4607_v30  ;;  %v4614_v30 = vrot.slane %v4524_v3, 2 }
 0xa6a   :  { %4729 = vst [vmem:[#allocation1 + $0x7] ss:$9 sm:$0xff] %v4608_v62  ;;  %v9062_v62 = vpop.f32.mrf.mxu3 }
 0xa6b   :  { %10530 = vst [vmem:[#allocation19_spill] sm:$0xff] %v9057_v9  ;;  %v9066_v1 = vpop.f32.mrf.mxu2 }
 0xa6c   :  { %10531 = vst [vmem:[#allocation20_spill] sm:$0xff] %v9059_v33  ;;  %v9064_v33 = vpop.f32.mrf.mxu1 }
 0xa6d   :  { %10532 = vst [vmem:[#allocation21_spill] sm:$0xff] %v9062_v62 }
 0xa6e   :  { %10533 = vst [vmem:[#allocation22_spill] sm:$0xff] %v9064_v33 }
 0xa6f   :  { %10534 = vst [vmem:[#allocation23_spill] sm:$0xff] %v9066_v1 }
 0xa71   :  { %v4730_v4 = vld [vmem:[#allocation1] sm:$0xff] }
 0xa72   :  { %4731 = vst [vmem:[#allocation1] ss:$9 sm:$0xff] %v4609_v51  ;;  %7417 = vmatmul.msk.f32.gmra.mxu3 %vm1635_vm11, %v4730_v4  ;;  %v4616_v51 = vrot.slane %v4524_v3, 4  ;;  %v9068_v9 = vpop.f32.mrf.mxu3  ;;  %v4526_v4 = vld [vmem:[#allocation2 + $0x1e2] ss:$2 sm:$0x7f] }
 0xa73   :  { %4732 = vst [vmem:[#allocation1 + $0x1] ss:$9 sm:$0xff] %v4610_v37  ;;  %v9073_v62 = vpop.f32.mrf.mxu2  ;;  %v4622_v1 = vrot.slane %v4526_v4, 4 }
 0xa74   :  { %4733 = vst [vmem:[#allocation1 + $0x2] ss:$9 sm:$0xff] %v4611_v21  ;;  %v4618_v21 = vrot.slane %v4524_v3, 6 }
 0xa75   :  { %4734 = vst [vmem:[#allocation1 + $0x3] ss:$9 sm:$0xff] %v4612_v57  ;;  %v9071_v57 = vpop.f32.mrf.mxu1 }
 0xa76   :  { %4735 = vst [vmem:[#allocation1 + $0x4] ss:$9 sm:$0xff] %v4524_v3 }
 0xa77   :  { %4736 = vst [vmem:[#allocation1 + $0x5] ss:$9 sm:$0xff] %v4613_v36  ;;  %v4619_v36 = vrot.slane %v4526_v4, 1 }
 0xa78   :  { %4737 = vst [vmem:[#allocation1 + $0x6] ss:$9 sm:$0xff] %v4614_v30  ;;  %v4620_v30 = vrot.slane %v4526_v4, 2 }
 0xa79   :  { %4738 = vst [vmem:[#allocation1 + $0x7] ss:$9 sm:$0xff] %v4615_v53  ;;  %v4621_v53 = vrot.slane %v4526_v4, 3 }
 0xa7a   :  { %10535 = vst [vmem:[#allocation24_spill] sm:$0xff] %v9068_v9  ;;  %v9075_v9 = vpop.f32.mrf.mxu3 }
 0xa7b   :  { %10536 = vst [vmem:[#allocation25_spill] sm:$0xff] %v9071_v57 }
 0xa7c   :  { %10537 = vst [vmem:[#allocation26_spill] sm:$0xff] %v9073_v62 }
 0xa7d   :  { %10538 = vst [vmem:[#allocation27_spill] sm:$0xff] %v9075_v9  ;;  %v9077_v3 = vpop.f32.mrf.mxu1 }
 0xa7e   :  { %10539 = vst [vmem:[#allocation28_spill] sm:$0xff] %v9077_v3 }
 0xa80   :  { %v4739_v37 = vld [vmem:[#allocation1] sm:$0xff] }
 0xa81   :  { %7418 = vmatmul.msk.f32.gmra.mxu3 %vm1635_vm11, %v4739_v37  ;;  %4740 = vst [vmem:[#allocation1] ss:$9 sm:$0xff] %v4616_v51  ;;  %v4623_v51 = vrot.slane %v4526_v4, 5  ;;  %v9079_v37 = vpop.f32.mrf.mxu2 }
 0xa82   :  { %4741 = vst [vmem:[#allocation1 + $0x1] ss:$9 sm:$0xff] %v4617_v44  ;;  %v4624_v44 = vrot.slane %v4526_v4, 6 }
 0xa83   :  { %4742 = vst [vmem:[#allocation1 + $0x2] ss:$9 sm:$0xff] %v4618_v21  ;;  %v9082_v21 = vpop.f32.mrf.mxu3 }
 0xa84   :  { %4743 = vst [vmem:[#allocation1 + $0x3] ss:$9 sm:$0xff] %v4526_v4  ;;  %v7644_v4 = vld [vmem:[%s10509_s7 + $0x7f8] sm:$0xff] }
 0xa85   :  { %4744 = vst [vmem:[#allocation1 + $0x4] ss:$9 sm:$0xff] %v4619_v36  ;;  %v9084_v36 = vpop.f32.mrf.mxu1  ;;  %6456 = vmatpush.msrb.mxu0 %v7644_v4 }
 0xa86   :  { %4745 = vst [vmem:[#allocation1 + $0x5] ss:$9 sm:$0xff] %v4620_v30 }
 0xa87   :  { %4746 = vst [vmem:[#allocation1 + $0x6] ss:$9 sm:$0xff] %v4621_v53 }
 0xa88   :  { %4747 = vst [vmem:[#allocation1 + $0x7] ss:$9 sm:$0xff] %v4622_v1 }
 0xa89   :  { %10540 = vst [vmem:[#allocation29_spill] sm:$0xff] %v9079_v37  ;;  %v9086_v30 = vpop.f32.mrf.mxu2 }
 0xa8a   :  { %10541 = vst [vmem:[#allocation30_spill] sm:$0xff] %v9082_v21 }
 0xa8b   :  { %10542 = vst [vmem:[#allocation31_spill] sm:$0xff] %v9084_v36  ;;  %v9089_v53 = vpop.f32.mrf.mxu3 }
 0xa8c   :  { %10543 = vst [vmem:[#allocation32_spill] sm:$0xff] %v9086_v30 }
 0xa8d   :  { %10544 = vst [vmem:[#allocation33_spill] sm:$0xff] %v9089_v53  ;;  %v9091_v9 = vpop.f32.mrf.mxu1 }
 0xa8f   :  { %v4748_v57 = vld [vmem:[#allocation1] sm:$0xff] }
 0xa90   :  { %7419 = vmatmul.msk.f32.gmra.mxu3 %vm1635_vm11, %v4748_v57  ;;  %4749 = vst [vmem:[#allocation1] ss:$9 sm:$0xff] %v4623_v51 }
 0xa91   :  { %4750 = vst [vmem:[#allocation1 + $0x1] ss:$9 sm:$0xff] %v4624_v44  ;;  %v9093_v37 = vpop.f32.mrf.mxu2 }
 0xa92   :  { %10545 = vst [vmem:[#allocation34_spill] sm:$0xff] %v9093_v37 }
 0xa93   :  { %v9098_v57 = vpop.f32.mrf.mxu3 }
 0xa94   :  { %10546 = vst [vmem:[#allocation35_spill] sm:$0xff] %v9098_v57 }
 0xa95   :  { %v4102_v51 = vpop.f32.mrf.mxu1 }
 0xa98   :  { %v4751_v1 = vld [vmem:[#allocation1] sm:$0xff] }
 0xa99   :  { %7420 = vmatmul.msk.f32.gmra.mxu3 %vm1635_vm11, %v4751_v1  ;;  %v9100_v44 = vpop.f32.mrf.mxu2  ;;  %vm4877_vm11 = vcmask 1041408  }
 0xa9b   :  { %v9102_v30 = vpop.f32.mrf.mxu3 }
 0xa9c   :  { %10547 = vst [vmem:[#allocation36_spill] sm:$0xff] %v9102_v30 }
 0xa9d   :  { %v9104_v36 = vpop.f32.mrf.mxu1 }
 0xaa1   :  { %v9106_v1 = vpop.f32.mrf.mxu2 }
 0xaa2   :  { %10548 = vst [vmem:[#allocation37_spill] sm:$0xff] %v9106_v1 }
 0xaa3   :  { %v9108_v53 = vpop.f32.mrf.mxu3 }
 0xaa4   :  { %10549 = vst [vmem:[#allocation38_spill] sm:$0xff] %v9108_v53  ;;  %v7642_v53 = vld [vmem:[%s10509_s7 + $0x7e8] sm:$0xff] }
 0xaa5   :  { %v9110_v21 = vpop.f32.mrf.mxu1  ;;  %6457 = vmatpush.msrb.mxu0 %v7642_v53  ;;  %v2373_v53 = vadd.f32 %v8702_v20, %v8628_v13  ;;  %v2385_v13 = vadd.f32 %v8897_v42, %v8807_v48  ;;  %v2388_v20 = vadd.f32 %v8904_v55, %v8814_v18  ;;  %v2397_v48 = vadd.f32 %v8928_v6, %v8832_v23 }
 0xaa6   :  { %v2400_v18 = vadd.f32 %v8936_v50, %v8838_v22  ;;  %v2406_v55 = vadd.f32 %v8954_v16, %v8850_v39 }
 0xaa7   :  { %v2751_v23 = vadd.f32 %v8934_v27, %v2388_v20  ;;  %v2754_v50 = vadd.f32 %v8958_v49, %v2397_v48 }
 0xaa9   :  { %v9112_v62 = vpop.f32.mrf.mxu2  ;;  %v3099_v39 = vadd.f32 %v9037_v0, %v2751_v23  ;;  %v10571_v0 = vld [vmem:[#allocation36_spill] sm:$0xff] }
 0xaaa   :  { %10550 = vst [vmem:[#allocation39_spill] sm:$0xff] %v9112_v62 }
 0xaab   :  { %v9114_v3 = vpop.f32.mrf.mxu3 }
 0xaac   :  { %10551 = vst [vmem:[#allocation40_spill] sm:$0xff] %v9114_v3 }
 0xaad   :  { %v9116_v4 = vpop.f32.mrf.mxu1 }
 0xaae   :  { %10552 = vst [vmem:[#allocation41_spill] sm:$0xff] %v9116_v4  ;;  %v2376_v4 = vadd.f32 %v8720_v10, %v8632_v35  ;;  %v2391_v10 = vadd.f32 %v8914_v25, %v8822_v63  ;;  %v2403_v63 = vadd.f32 %v8946_v41, %v8846_v52 }
 0xab0   :  { %v2752_v22 = vadd.f32 %v8942_v24, %v2391_v10  ;;  %v9228_v10 = vld [vmem:[%s10506_s4] ss:$0 sm:$0xff] }
 0xab1   :  { %v9118_v33 = vpop.f32.mrf.mxu2 }
 0xab2   :  { %10553 = vst [vmem:[#allocation42_spill] sm:$0xff] %v9118_v33 }
 0xab3   :  { %v9120_v57 = vpop.f32.mrf.mxu3 }
 0xab4   :  { %10554 = vst [vmem:[#allocation43_spill] sm:$0xff] %v9120_v57 }
 0xab5   :  { %v9122_v37 = vpop.f32.mrf.mxu1 }
 0xab6   :  { %10555 = vst [vmem:[#allocation44_spill] sm:$0xff] %v9122_v37 }
 0xab9   :  { %v9124_v30 = vpop.f32.mrf.mxu2 }
 0xaba   :  { %10556 = vst [vmem:[#allocation45_spill] sm:$0xff] %v9124_v30 }
 0xabb   :  { %v9126_v29 = vpop.f32.mrf.mxu3 }
 0xabc   :  { %10557 = vst [vmem:[#allocation46_spill] sm:$0xff] %v9126_v29 }
 0xabd   :  { %v9128_v1 = vpop.f32.mrf.mxu1 }
 0xabe   :  { %10558 = vst [vmem:[#allocation47_spill] sm:$0xff] %v9128_v1 }
 0xac1   :  { %v9133_v3 = vpop.f32.mrf.mxu2 }
 0xac2   :  { %10559 = vst [vmem:[#allocation48_spill] sm:$0xff] %v9133_v3  ;;  %v2747_v3 = vadd.f32 %v8792_v12, %v2376_v4 }
 0xac5   :  { %v9137_v33 = vpop.f32.mrf.mxu1 }
 0xac8   :  { %v9135_v62 = vpop.f32.mrf.mxu3 }
 0xac9   :  { %10560 = vst [vmem:[#allocation49_spill] sm:$0xff] %v9135_v62  ;;  %v9139_v57 = vpop.f32.mrf.mxu2  ;;  %v2379_v62 = vadd.f32 %v8860_v59, %v8770_v34  ;;  %v2394_v34 = vadd.f32 %v8922_v17, %v8828_v2 }
 0xaca   :  { %10561 = vst [vmem:[#allocation50_spill] sm:$0xff] %v9139_v57 }
 0xacb   :  { %v2753_v6 = vadd.f32 %v8952_v43, %v2394_v34  ;;  %v10579_v34 = vld [vmem:[#allocation38_spill] sm:$0xff] }
 0xacd   :  { %v9143_v30 = vpop.f32.mrf.mxu1 }
 0xace   :  { %10563 = vst [vmem:[#allocation52_spill] sm:$0xff] %v9143_v30  ;;  %v3095_v30 = vadd.f32 %v8882_v38, %v2747_v3 }
 0xad0   :  { %v3443_v59 = vadd.f32 %v8986_v56, %v3095_v30 }
 0xad1   :  { %v9145_v29 = vpop.f32.mrf.mxu2 }
 0xad2   :  { %10564 = vst [vmem:[#allocation53_spill] sm:$0xff] %v9145_v29  ;;  %v2746_v29 = vadd.f32 %v8774_v40, %v2373_v53  ;;  %v3791_v42 = vadd.f32 %v9014_v32, %v3443_v59  ;;  %v10567_v32 = vld [vmem:[#allocation11_spill] sm:$0xff] }
 0xad3   :  { %v3447_v49 = vadd.f32 %v10567_v32, %v3099_v39  ;;  %v10577_v53 = vld [vmem:[#allocation39_spill] sm:$0xff] }
 0xad4   :  { %v10581_v59 = vld [vmem:[#allocation19_spill] sm:$0xff] }
 0xad5   :  { %v9156_v57 = vpop.f32.mrf.mxu1  ;;  %v3102_v48 = vadd.f32 %v10581_v59, %v2754_v50  ;;  %v10590_v50 = vld [vmem:[#allocation47_spill] sm:$0xff]  ;;  %v10604_v59 = vld [vmem:[#allocation5_spill] sm:$0xff] }
 0xad7   :  { %v9141_v37 = vpop.f32.mrf.mxu3 }
 0xad8   :  { %10562 = vst [vmem:[#allocation51_spill] sm:$0xff] %v9141_v37  ;;  %v2382_v37 = vadd.f32 %v8874_v14, %v8784_v46  ;;  %v3094_v46 = vadd.f32 %v8864_v7, %v2746_v29  ;;  %v2750_v14 = vadd.f32 %v8926_v31, %v2385_v13  ;;  %v4139_v31 = vadd.f32 %v4102_v51, %v3791_v42  ;;  %v10575_v51 = vld [vmem:[#allocation12_spill] sm:$0xff]  ;;  %v10578_v13 = vld [vmem:[#allocation35_spill] sm:$0xff]  ;;  %v10585_v42 = vld [vmem:[#allocation42_spill] sm:$0xff] }
 0xad9   :  { %v9163_v35 = vpop.f32.mrf.mxu2  ;;  %v2755_v29 = vadd.f32 %v8966_v5, %v2400_v18  ;;  %v10582_v18 = vld [vmem:[#allocation17_spill] sm:$0xff] }
 0xada   :  { %v2749_v40 = vadd.f32 %v8920_v58, %v2382_v37  ;;  %v3442_v38 = vadd.f32 %v8968_v26, %v3094_v46  ;;  %v4487_v56 = vadd.f32 %v9100_v44, %v4139_v31  ;;  %v10573_v37 = vld [vmem:[#allocation16_spill] sm:$0xff]  ;;  %v3795_v44 = vadd.f32 %v10575_v51, %v3447_v49  ;;  %v10593_v49 = vld [vmem:[#allocation25_spill] sm:$0xff] }
 0xadb   :  { %v3101_v5 = vadd.f32 %v10573_v37, %v2753_v6  ;;  %v10580_v46 = vld [vmem:[#allocation8_spill] sm:$0xff]  ;;  %v10597_v37 = vld [vmem:[#allocation46_spill] sm:$0xff] }
 0xadc   :  { %v3097_v2 = vadd.f32 %v9024_v15, %v2749_v40  ;;  %v3790_v58 = vadd.f32 %v9011_v60, %v3442_v38  ;;  %v10566_v60 = vld [vmem:[#allocation13_spill] sm:$0xff]  ;;  %v10569_v15 = vld [vmem:[#allocation34_spill] sm:$0xff]  ;;  %v10584_v38 = vld [vmem:[#allocation44_spill] sm:$0xff] }
 0xadd   :  { %v9205_v26 = vpop.f32.mrf.mxu1  ;;  %v3100_v43 = vadd.f32 %v10566_v60, %v2752_v22  ;;  %v10588_v31 = vld [vmem:[#allocation20_spill] sm:$0xff] }
 0xade   :  { %v3445_v25 = vadd.f32 %v9026_v8, %v3097_v2  ;;  %v4138_v41 = vadd.f32 %v9091_v9, %v3790_v58  ;;  %v4835_v9 = vadd.f32 %v10571_v0, %v4487_v56  ;;  %v10587_v58 = vld [vmem:[#allocation22_spill] sm:$0xff]  ;;  %v3450_v6 = vadd.f32 %v10588_v31, %v3102_v48 }
 0xadf   :  { %v10605_v48 = vld [vmem:[#allocation6_spill] sm:$0xff] }
 0xae0   :  { %v3793_v24 = vadd.f32 %v9028_v61, %v3445_v25  ;;  %v4486_v8 = vadd.f32 %v10569_v15, %v4138_v41  ;;  %v10570_v61 = vld [vmem:[#allocation37_spill] sm:$0xff]  ;;  %v9238_v22 = vadd.f32 %v9228_v10, %v4835_v9 }
 0xae1   :  { %v10591_v41 = vld [vmem:[#allocation45_spill] sm:$0xff] }
 0xae2   :  { %v4834_v20 = vadd.f32 %v10578_v13, %v4486_v8 }
 0xae4   :  { %v9247_v56 = vadd.f32 %v9228_v10, %v4834_v20 }
 0xae6   :  { %v9147_v1 = vpop.f32.mrf.mxu3  ;;  %v4866_v9 = vadd.f32 %v9238_v22, %v9247_v56 }
 0xae7   :  { %10565 = vst [vmem:[#allocation54_spill] sm:$0xff] %v9147_v1  ;;  %v2748_v1 = vadd.f32 %v8910_v54, %v2379_v62  ;;  %v3098_v54 = vadd.f32 %v9031_v19, %v2750_v14  ;;  %v10572_v62 = vld [vmem:[#allocation7_spill] sm:$0xff] }
 0xae8   :  { %v2756_v3 = vadd.f32 %v10572_v62, %v2403_v63  ;;  %v3449_v63 = vadd.f32 %v10582_v18, %v3101_v5  ;;  %v10583_v14 = vld [vmem:[#allocation15_spill] sm:$0xff]  ;;  %v2409_v18 = vadd.f32 %v10605_v48, %v10604_v59 }
 0xae9   :  { %v3096_v12 = vadd.f32 %v9017_v45, %v2748_v1  ;;  %v3446_v27 = vadd.f32 %v9033_v11, %v3098_v54  ;;  %v10568_v45 = vld [vmem:[#allocation10_spill] sm:$0xff]  ;;  %v9215_v11 = vpop.f32.mrf.mxu2  ;;  %v10576_v1 = vld [vmem:[#allocation41_spill] sm:$0xff]  ;;  %v10586_v54 = vld [vmem:[#allocation40_spill] sm:$0xff] }
 0xaeb   :  { %v3444_v7 = vadd.f32 %v9019_v47, %v3096_v12  ;;  %v3794_v47 = vadd.f32 %v10568_v45, %v3446_v27  ;;  %v2757_v12 = vadd.f32 %v10580_v46, %v2406_v55  ;;  %v10589_v55 = vld [vmem:[#allocation18_spill] sm:$0xff]  ;;  %v3104_v45 = vadd.f32 %v10593_v49, %v2756_v3 }
 0xaec   :  { %v3797_v39 = vadd.f32 %v10589_v55, %v3449_v63  ;;  %v10599_v3 = vld [vmem:[#allocation26_spill] sm:$0xff] }
 0xaed   :  { %v3792_v17 = vadd.f32 %v9021_v28, %v3444_v7  ;;  %v4141_v28 = vadd.f32 %v9110_v21, %v3793_v24  ;;  %v4142_v4 = vadd.f32 %v10576_v1, %v3794_v47  ;;  %v4143_v7 = vadd.f32 %v10584_v38, %v3795_v44  ;;  %v10600_v44 = vld [vmem:[#allocation24_spill] sm:$0xff] }
 0xaee   :  { %v4145_v8 = vadd.f32 %v9137_v33, %v3797_v39  ;;  %v3452_v51 = vadd.f32 %v10599_v3, %v3104_v45  ;;  %v10602_v33 = vld [vmem:[#allocation50_spill] sm:$0xff] }
 0xaef   :  { %v4140_v16 = vadd.f32 %v9104_v36, %v3792_v17  ;;  %v10574_v36 = vld [vmem:[#allocation14_spill] sm:$0xff]  ;;  %v4489_v21 = vadd.f32 %v10577_v53, %v4141_v28  ;;  %v4490_v23 = vadd.f32 %v10585_v42, %v4142_v4  ;;  %v3103_v17 = vadd.f32 %v10587_v58, %v2755_v29  ;;  %v10594_v29 = vld [vmem:[#allocation23_spill] sm:$0xff]  ;;  %v10595_v28 = vld [vmem:[#allocation21_spill] sm:$0xff] }
 0xaf0   :  { %v3448_v30 = vadd.f32 %v10574_v36, %v3100_v43  ;;  %v10592_v43 = vld [vmem:[#allocation43_spill] sm:$0xff]  ;;  %v3798_v15 = vadd.f32 %v10595_v28, %v3450_v6  ;;  %v10598_v36 = vld [vmem:[#allocation28_spill] sm:$0xff]  ;;  %v10611_v6 = vld [vmem:[#allocation30_spill] sm:$0xff] }
 0xaf1   :  { %v4488_v19 = vadd.f32 %v10570_v61, %v4140_v16  ;;  %v4837_v25 = vadd.f32 %v10586_v54, %v4489_v21  ;;  %v4491_v16 = vadd.f32 %v10591_v41, %v4143_v7  ;;  %v4838_v32 = vadd.f32 %v10592_v43, %v4490_v23  ;;  %v4132_v61 = vpop.f32.mrf.mxu1  ;;  %v10601_v4 = vld [vmem:[#allocation52_spill] sm:$0xff]  ;;  %v4480_v13 = vpop.f32.mrf.mxu2  ;;  %v10608_v7 = vld [vmem:[#allocation53_spill] sm:$0xff]  ;;  %v10612_v41 = vld [vmem:[#allocation54_spill] sm:$0xff] }
 0xaf2   :  { %v3796_v2 = vadd.f32 %v10583_v14, %v3448_v30  ;;  %v3451_v47 = vadd.f32 %v10594_v29, %v3103_v17  ;;  %v3105_v30 = vadd.f32 %v10598_v36, %v2757_v12  ;;  %v4146_v53 = vadd.f32 %v10601_v4, %v3798_v15  ;;  %v10606_v12 = vld [vmem:[#allocation29_spill] sm:$0xff]  ;;  %v10607_v14 = vld [vmem:[#allocation27_spill] sm:$0xff] }
 0xaf3   :  { %v4836_v40 = vadd.f32 %v10579_v34, %v4488_v19  ;;  %v10596_v19 = vld [vmem:[#allocation48_spill] sm:$0xff]  ;;  %v9261_v62 = vadd.f32 %v9228_v10, %v4837_v25  ;;  %v4839_v5 = vadd.f32 %v10597_v37, %v4491_v16  ;;  %v4493_v21 = vadd.f32 %v10602_v33, %v4145_v8  ;;  %v10609_v25 = vld [vmem:[#allocation51_spill] sm:$0xff]  ;;  %v10610_v17 = vld [vmem:[#allocation9_spill] sm:$0xff] }
 0xaf4   :  { %v4144_v27 = vadd.f32 %v10590_v50, %v3796_v2  ;;  %v3799_v1 = vadd.f32 %v10600_v44, %v3451_v47  ;;  %v9271_v34 = vadd.f32 %v9228_v10, %v4838_v32  ;;  %v3453_v63 = vadd.f32 %v10606_v12, %v3105_v30  ;;  %v10613_v43 = vld [vmem:[#allocation31_spill] sm:$0xff] }
 0xaf5   :  { %v9193_v52 = vpop.f32.mrf.mxu3  ;;  %v9250_v60 = vadd.f32 %v9228_v10, %v4836_v40  ;;  %v10603_v40 = vld [vmem:[#allocation49_spill] sm:$0xff]  ;;  %v3800_v2 = vadd.f32 %v10607_v14, %v3452_v51  ;;  %v4494_v42 = vadd.f32 %v10608_v7, %v4146_v53  ;;  %v9282_v54 = vadd.f32 %v9228_v10, %v4839_v5 }
 0xaf6   :  { %v4492_v0 = vadd.f32 %v10596_v19, %v4144_v27  ;;  %v4147_v38 = vadd.f32 %v9156_v57, %v3799_v1  ;;  %v4841_v58 = vadd.f32 %v10609_v25, %v4493_v21  ;;  %v2758_v31 = vadd.f32 %v10610_v17, %v2409_v18 }
 0xaf7   :  { %v4867_v20 = vadd.f32 %v4866_v9, %v9250_v60  ;;  %v3801_v55 = vadd.f32 %v10611_v6, %v3453_v63  ;;  %v4148_v39 = vadd.f32 %v9205_v26, %v3800_v2  ;;  %v4842_v16 = vadd.f32 %v10612_v41, %v4494_v42 }
 0xaf8   :  { %v4840_v46 = vadd.f32 %v10603_v40, %v4492_v0  ;;  %v4495_v50 = vadd.f32 %v9163_v35, %v4147_v38  ;;  %v3106_v32 = vadd.f32 %v10613_v43, %v2758_v31  ;;  %v4858_v28 = vadd.f32 %v9228_v10, %v4841_v58  ;;  %v10614_v35 = vld [vmem:[#allocation32_spill] sm:$0xff] }
 0xaf9   :  { %v4868_v23 = vadd.f32 %v4867_v20, %v9261_v62  ;;  %v4149_v49 = vadd.f32 %v4132_v61, %v3801_v55  ;;  %v4496_v45 = vadd.f32 %v9215_v11, %v4148_v39  ;;  %v7741_v15 = vmov 98.0   ;;  %v4135_v19 = vpop.f32.mrf.mxu1  ;;  %v10615_v61 = vld [vmem:[#allocation33_spill] sm:$0xff]  ;;  %v4483_v11 = vpop.f32.mrf.mxu2 }
 0xafa   :  { %v4857_v57 = vadd.f32 %v9228_v10, %v4840_v46  ;;  %v4843_v26 = vadd.f32 %v9193_v52, %v4495_v50  ;;  %7721 = vrcp.f32 %v7741_v15  ;;  %v3454_v8 = vadd.f32 %v10614_v35, %v3106_v32 }
 0xafb   :  { %v4869_v27 = vadd.f32 %v4868_v23, %v9271_v34  ;;  %v4497_v0 = vadd.f32 %v4480_v13, %v4149_v49  ;;  %v4859_v37 = vadd.f32 %v9228_v10, %v4842_v16 }
 0xafc   :  { %v3802_v36 = vadd.f32 %v10615_v61, %v3454_v8  ;;  %v4860_v3 = vadd.f32 %v9228_v10, %v4843_v26 }
 0xafd   :  { %v4870_v47 = vadd.f32 %v4869_v27, %v9282_v54 }
 0xafe   :  { %v4150_v44 = vadd.f32 %v4135_v19, %v3802_v36 }
 0xaff   :  { %v4871_v9 = vadd.f32 %v4870_v47, %v4857_v57 }
 0xb00   :  { %v7722_v1 = vpop.eup %7721  ;;  %v4498_v53 = vadd.f32 %v4483_v11, %v4150_v44 }
 0xb01   :  { %v4872_v30 = vadd.f32 %v4871_v9, %v4858_v28  ;;  %v4887_v40 = vmul.f32 98.0, %v7722_v1  ;;  %vm4891_vm12 = vweird.f32 %v7722_v1 }
 0xb03   :  { %v4873_v52 = vadd.f32 %v4872_v30, %v4859_v37  ;;  %v4888_v18 = vsub.f32 1.0, %v4887_v40 }
 0xb04   :  { %v4825_v24 = vpop.f32.mrf.mxu3 }
 0xb05   :  { %v4844_v5 = vadd.f32 %v4825_v24, %v4496_v45  ;;  %v4874_v33 = vadd.f32 %v4873_v52, %v4860_v3  ;;  %v4889_v14 = vmul.f32 %v7722_v1, %v4888_v18 }
 0xb07   :  { %v4861_v4 = vadd.f32 %v9228_v10, %v4844_v5  ;;  %v4890_v7 = vadd.f32 %v7722_v1, %v4889_v14 }
 0xb09   :  { %v4875_v24 = vadd.f32 %v4874_v33, %v4861_v4  ;;  %v4892_v25 = vsel %vm4891_vm12, %v7722_v1, %v4890_v7 }
 0xb13   :  { %v4828_v29 = vpop.f32.mrf.mxu3 }
 0xb14   :  { %v4845_v51 = vadd.f32 %v4828_v29, %v4497_v0 }
 0xb16   :  { %v4862_v21 = vadd.f32 %v9228_v10, %v4845_v51 }
 0xb18   :  { %v4876_v59 = vadd.f32 %v4875_v24, %v4862_v21 }
 0xb1c   :  { %v4831_v13 = vpop.f32.mrf.mxu3 }
 0xb1d   :  { %v4846_v20 = vadd.f32 %v4831_v13, %v4498_v53 }
 0xb1f   :  { %v4863_v46 = vadd.f32 %v9228_v10, %v4846_v20 }
 0xb21   :  { %v4878_v48 = vsel %vm4877_vm11, %v4863_v46, 0.0 }
 0xb22   :  { %v4879_v12 = vadd.f32 %v4878_v48, %v4876_v59 }
 0xb24   :  { %v4880_v63 = vrot.slane %v4879_v12, 4 }
 0xb26   :  { %v4881_v2 = vadd.f32 %v4880_v63, %v4879_v12  ;;  %v9329_v63 = vld [vmem:[%s10507_s5] ss:$0 sm:$0xff] }
 0xb28   :  { %v4882_v38 = vrot.slane %v4881_v2, 2 }
 0xb2a   :  { %v4883_v42 = vadd.f32 %v4882_v38, %v4881_v2 }
 0xb2c   :  { %v4884_v23 = vrot.slane %v4883_v42, 1 }
 0xb2e   :  { %v4885_v58 = vadd.f32 %v4884_v23, %v4883_v42 }
 0xb30   :  { %v4893_v17 = vmul.f32 %v4892_v25, %v4885_v58 }
 0xb32   :  { %v4894_v31 = vsub.f32 %v9247_v56, %v4893_v17  ;;  %v9307_v10 = vsub.f32 %v9238_v22, %v4893_v17  ;;  %v9310_v6 = vsub.f32 %v9250_v60, %v4893_v17  ;;  %v9315_v50 = vsub.f32 %v9261_v62, %v4893_v17 }
 0xb33   :  { %v4898_v27 = vsub.f32 %v9271_v34, %v4893_v17  ;;  %v4899_v56 = vsub.f32 %v9282_v54, %v4893_v17  ;;  %v4900_v43 = vsub.f32 %v4857_v57, %v4893_v17  ;;  %v4901_v45 = vsub.f32 %v4858_v28, %v4893_v17 }
 0xb34   :  { %v4907_v55 = vmul.f32 %v4894_v31, %v4894_v31  ;;  %v4908_v39 = vmul.f32 %v9307_v10, %v9307_v10  ;;  %v4909_v41 = vmul.f32 %v9310_v6, %v9310_v6  ;;  %v4910_v22 = vmul.f32 %v9315_v50, %v9315_v50 }
 0xb35   :  { %v4911_v32 = vmul.f32 %v4898_v27, %v4898_v27  ;;  %v4912_v29 = vmul.f32 %v4899_v56, %v4899_v56  ;;  %v4902_v62 = vsub.f32 %v4859_v37, %v4893_v17  ;;  %v4913_v26 = vmul.f32 %v4900_v43, %v4900_v43 }
 0xb36   :  { %v4920_v16 = vadd.f32 %v4908_v39, %v4907_v55  ;;  %v4903_v34 = vsub.f32 %v4860_v3, %v4893_v17  ;;  %v4914_v35 = vmul.f32 %v4901_v45, %v4901_v45  ;;  %v4904_v19 = vsub.f32 %v4861_v4, %v4893_v17  ;;  %v9345_v39 = vld [vmem:[%s10508_s6] ss:$0 sm:$0xff] }
 0xb37   :  { %v4915_v0 = vmul.f32 %v4902_v62, %v4902_v62  ;;  %v4906_v54 = vsub.f32 %v4863_v46, %v4893_v17  ;;  %v4905_v5 = vsub.f32 %v4862_v21, %v4893_v17 }
 0xb38   :  { %v4921_v60 = vadd.f32 %v4920_v16, %v4909_v41  ;;  %v4916_v61 = vmul.f32 %v4903_v34, %v4903_v34  ;;  %v4917_v11 = vmul.f32 %v4904_v19, %v4904_v19 }
 0xb39   :  { %v4919_v30 = vmul.f32 %v4906_v54, %v4906_v54  ;;  %v4918_v51 = vmul.f32 %v4905_v5, %v4905_v5 }
 0xb3a   :  { %v4922_v49 = vadd.f32 %v4921_v60, %v4910_v22 }
 0xb3b   :  { %v4931_v37 = vsel %vm4877_vm11, %v4919_v30, 0.0 }
 0xb3c   :  { %v4923_v47 = vadd.f32 %v4922_v49, %v4911_v32 }
 0xb3e   :  { %v4924_v15 = vadd.f32 %v4923_v47, %v4912_v29 }
 0xb40   :  { %v4925_v8 = vadd.f32 %v4924_v15, %v4913_v26 }
 0xb42   :  { %v4926_v9 = vadd.f32 %v4925_v8, %v4914_v35 }
 0xb44   :  { %v4927_v36 = vadd.f32 %v4926_v9, %v4915_v0 }
 0xb46   :  { %v4928_v57 = vadd.f32 %v4927_v36, %v4916_v61 }
 0xb48   :  { %v4929_v28 = vadd.f32 %v4928_v57, %v4917_v11 }
 0xb4a   :  { %v4930_v44 = vadd.f32 %v4929_v28, %v4918_v51 }
 0xb4c   :  { %v4932_v1 = vadd.f32 %v4931_v37, %v4930_v44 }
 0xb4e   :  { %v4933_v52 = vrot.slane %v4932_v1, 4 }
 0xb50   :  { %v4934_v3 = vadd.f32 %v4933_v52, %v4932_v1 }
 0xb52   :  { %v4935_v53 = vrot.slane %v4934_v3, 2 }
 0xb54   :  { %v4936_v33 = vadd.f32 %v4935_v53, %v4934_v3 }
 0xb56   :  { %v4937_v4 = vrot.slane %v4936_v33, 1 }
 0xb58   :  { %v4938_v13 = vadd.f32 %v4937_v4, %v4936_v33 }
 0xb5a   :  { %v4939_v20 = vmul.f32 %v4938_v13, %v4892_v25 }
 0xb5c   :  { %v4940_v40 = vadd.f32 1e-05, %v4939_v20 }
 0xb5e   :  { %7723 = vrsqrt.f32 %v4940_v40  ;;  %vm4947_vm4 = vweird.f32 %v4940_v40 }
 0xb64   :  { %v7724_v21 = vpop.eup %7723 }
 0xb65   :  { %v4942_v24 = vmul.f32 %v7724_v21, %v4940_v40  ;;  %vm4948_vm3 = vweird.f32 %v7724_v21 }
 0xb66   :  { %vm4949_vm5 = vmor %vm4947_vm4, %vm4948_vm3 }
 0xb67   :  { %v4943_v46 = vmul.f32 %v7724_v21, %v4942_v24 }
 0xb69   :  { %v4944_v59 = vmul.f32 0.5, %v4943_v46 }
 0xb6b   :  { %v4945_v48 = vsub.f32 1.5, %v4944_v59 }
 0xb6d   :  { %v4946_v18 = vmul.f32 %v7724_v21, %v4945_v48 }
 0xb6f   :  { %v9324_v12 = vsel %vm4949_vm5, %v7724_v21, %v4946_v18 }
 0xb70   :  { %v4951_v14 = vmul.f32 %v9324_v12, %v4894_v31  ;;  %v4955_v2 = vmul.f32 %v9324_v12, %v4898_v27  ;;  %v4956_v38 = vmul.f32 %v9324_v12, %v4899_v56  ;;  %v4957_v7 = vmul.f32 %v9324_v12, %v4900_v43 }
 0xb71   :  { %v4958_v42 = vmul.f32 %v9324_v12, %v4901_v45  ;;  %v4959_v23 = vmul.f32 %v9324_v12, %v4902_v62  ;;  %v4960_v25 = vmul.f32 %v9324_v12, %v4903_v34  ;;  %v4961_v58 = vmul.f32 %v9324_v12, %v4904_v19 }
 0xb72   :  { %v4962_v17 = vmul.f32 %v9324_v12, %v4905_v5  ;;  %v4963_v55 = vmul.f32 %v9324_v12, %v4906_v54  ;;  %v4967_v31 = vmul.f32 %v9329_v63, %v4951_v14  ;;  %v4971_v27 = vmul.f32 %v9329_v63, %v4955_v2 }
 0xb73   :  { %v4972_v41 = vmul.f32 %v9329_v63, %v4956_v38  ;;  %v4973_v16 = vmul.f32 %v9329_v63, %v4957_v7  ;;  %v4974_v56 = vmul.f32 %v9329_v63, %v4958_v42  ;;  %v4975_v22 = vmul.f32 %v9329_v63, %v4959_v23 }
 0xb74   :  { %v4976_v60 = vmul.f32 %v9329_v63, %v4960_v25  ;;  %v4977_v43 = vmul.f32 %v9329_v63, %v4961_v58  ;;  %v4978_v32 = vmul.f32 %v9329_v63, %v4962_v17  ;;  %v4979_v49 = vmul.f32 %v9329_v63, %v4963_v55 }
 0xb75   :  { %v4983_v45 = vadd.f32 %v9345_v39, %v4967_v31  ;;  %v9358_v29 = vadd.f32 %v9345_v39, %v4971_v27  ;;  %v9361_v47 = vadd.f32 %v9345_v39, %v4972_v41  ;;  %v9364_v62 = vadd.f32 %v9345_v39, %v4973_v16 }
 0xb76   :  { %v9367_v26 = vadd.f32 %v9345_v39, %v4974_v56  ;;  %v9370_v15 = vadd.f32 %v9345_v39, %v4975_v22  ;;  %v9373_v34 = vadd.f32 %v9345_v39, %v4976_v60  ;;  %v9376_v35 = vadd.f32 %v9345_v39, %v4977_v43 }
 0xb77   :  { %v9379_v8 = vadd.f32 %v9345_v39, %v4978_v32  ;;  %v9382_v19 = vadd.f32 %v9345_v39, %v4979_v49  ;;  %vm4996_vm6 = vcmp.ge.f32.partialorder %v4983_v45, 0.0  ;;  %v5009_v0 = vmul.f32 0.01, %v4983_v45 }
 0xb78   :  { %v4952_v54 = vmul.f32 %v9324_v12, %v9307_v10  ;;  %v4953_v10 = vmul.f32 %v9324_v12, %v9310_v6  ;;  %v4954_v21 = vmul.f32 %v9324_v12, %v9315_v50  ;;  %vm5000_vm10 = vcmp.ge.f32.partialorder %v9358_v29, 0.0 }
 0xb79   :  { %v5022_v9 = vsel %vm4996_vm6, %v4983_v45, %v5009_v0  ;;  %v5014_v49 = vmul.f32 0.01, %v9361_v47  ;;  %vm5001_vm13 = vcmp.ge.f32.partialorder %v9361_v47, 0.0  ;;  %vm5002_vm14 = vcmp.ge.f32.partialorder %v9364_v62, 0.0 }
 0xb7a   :  { %5133 = vst [vmem:[#allocation1] ss:$9 sm:$0xff] %v5022_v9  ;;  %v4968_v5 = vmul.f32 %v9329_v63, %v4952_v54  ;;  %v5048_v61 = vrot.slane %v5022_v9, 1  ;;  %v5049_v36 = vrot.slane %v5022_v9, 2  ;;  %v5050_v11 = vrot.slane %v5022_v9, 3 }
 0xb7b   :  { %v5051_v57 = vrot.slane %v5022_v9, 4  ;;  %v5052_v30 = vrot.slane %v5022_v9, 5  ;;  %v5053_v51 = vrot.slane %v5022_v9, 6  ;;  %v5054_v1 = vrot.slane %v5022_v9, 7 }
 0xb7c   :  { %5135 = vst [vmem:[#allocation1 + $0x1] ss:$9 sm:$0xff] %v5048_v61  ;;  %v4984_v28 = vadd.f32 %v9345_v39, %v4968_v5  ;;  %v4969_v3 = vmul.f32 %v9329_v63, %v4953_v10  ;;  %v4970_v18 = vmul.f32 %v9329_v63, %v4954_v21  ;;  %v9402_v54 = vsel %vm5001_vm13, %v9361_v47, %v5014_v49  ;;  %v7441_v49 = vld [vmem:[%s10509_s7 + $0x1a0] sm:$0xff] }
 0xb7d   :  { %5137 = vst [vmem:[#allocation1 + $0x2] ss:$9 sm:$0xff] %v5049_v36  ;;  %v5083_v36 = vrot.slane %v9402_v54, 1  ;;  %vm5003_vm15 = vcmp.ge.f32.partialorder %v9367_v26, 0.0  ;;  %vm5004_vm0 = vcmp.ge.f32.partialorder %v9370_v15, 0.0  ;;  %vm5005_vm2 = vcmp.ge.f32.partialorder %v9373_v34, 0.0 }
 0xb7e   :  { %5139 = vst [vmem:[#allocation1 + $0x3] ss:$9 sm:$0xff] %v5050_v11  ;;  %v5010_v44 = vmul.f32 0.01, %v4984_v28  ;;  %vm4997_vm7 = vcmp.ge.f32.partialorder %v4984_v28, 0.0  ;;  %v4985_v20 = vadd.f32 %v9345_v39, %v4969_v3  ;;  %v4986_v42 = vadd.f32 %v9345_v39, %v4970_v18 }
 0xb7f   :  { %5141 = vst [vmem:[#allocation1 + $0x4] ss:$9 sm:$0xff] %v5051_v57  ;;  %v5013_v39 = vmul.f32 0.01, %v9358_v29  ;;  %v5015_v11 = vmul.f32 0.01, %v9364_v62 }
 0xb80   :  { %5143 = vst [vmem:[#allocation1 + $0x5] ss:$9 sm:$0xff] %v5052_v30  ;;  %v5023_v37 = vsel %vm4997_vm7, %v4984_v28, %v5010_v44  ;;  %v5011_v6 = vmul.f32 0.01, %v4985_v20  ;;  %vm4998_vm8 = vcmp.ge.f32.partialorder %v4985_v20, 0.0  ;;  %vm4999_vm9 = vcmp.ge.f32.partialorder %v4986_v42, 0.0 }
 0xb81   :  { %5145 = vst [vmem:[#allocation1 + $0x6] ss:$9 sm:$0xff] %v5053_v51  ;;  %v5055_v53 = vrot.slane %v5023_v37, 1  ;;  %v5056_v33 = vrot.slane %v5023_v37, 2  ;;  %v5057_v4 = vrot.slane %v5023_v37, 3  ;;  %v5058_v13 = vrot.slane %v5023_v37, 4 }
 0xb82   :  { %v5059_v40 = vrot.slane %v5023_v37, 5  ;;  %v5024_v24 = vsel %vm4998_vm8, %v4985_v20, %v5011_v6  ;;  %v5060_v46 = vrot.slane %v5023_v37, 6  ;;  %v5061_v59 = vrot.slane %v5023_v37, 7 }
 0xb83   :  { %v5062_v14 = vrot.slane %v5024_v24, 1  ;;  %v5063_v2 = vrot.slane %v5024_v24, 2  ;;  %v5064_v38 = vrot.slane %v5024_v24, 3  ;;  %v5065_v7 = vrot.slane %v5024_v24, 4 }
 0xb84   :  { %v5012_v50 = vmul.f32 0.01, %v4986_v42  ;;  %v5066_v12 = vrot.slane %v5024_v24, 5  ;;  %v5067_v25 = vrot.slane %v5024_v24, 6  ;;  %v5068_v63 = vrot.slane %v5024_v24, 7 }
 0xb85   :  { %v5026_v56 = vsel %vm5000_vm10, %v9358_v29, %v5013_v39  ;;  %v9409_v57 = vsel %vm5002_vm14, %v9364_v62, %v5015_v11  ;;  %v5017_v6 = vmul.f32 0.01, %v9370_v15  ;;  %vm5006_vm1 = vcmp.ge.f32.partialorder %v9376_v35, 0.0  ;;  %v7442_v11 = vld [vmem:[%s10509_s7 + $0x1a8] sm:$0xff] }
 0xb86   :  { %v5025_v23 = vsel %vm4999_vm9, %v4986_v42, %v5012_v50  ;;  %v5076_v43 = vrot.slane %v5026_v56, 1  ;;  %v5077_v32 = vrot.slane %v5026_v56, 2  ;;  %v5078_v45 = vrot.slane %v5026_v56, 3 }
 0xb87   :  { %v5069_v17 = vrot.slane %v5025_v23, 1  ;;  %v5070_v55 = vrot.slane %v5025_v23, 2  ;;  %v5071_v31 = vrot.slane %v5025_v23, 3  ;;  %v5072_v27 = vrot.slane %v5025_v23, 4 }
 0xb88   :  { %v5146_v52 = vld [vmem:[#allocation1] sm:$0xff]  ;;  %v5073_v41 = vrot.slane %v5025_v23, 5  ;;  %v5074_v22 = vrot.slane %v5025_v23, 6  ;;  %v5075_v60 = vrot.slane %v5025_v23, 7  ;;  %v5079_v0 = vrot.slane %v5026_v56, 4 }
 0xb89   :  { %5147 = vst [vmem:[#allocation1] ss:$9 sm:$0xff] %v5054_v1  ;;  %v5080_v29 = vrot.slane %v5026_v56, 5  ;;  %v5081_v5 = vrot.slane %v5026_v56, 6  ;;  %v5082_v61 = vrot.slane %v5026_v56, 7  ;;  %v5090_v47 = vrot.slane %v9409_v57, 1 }
 0xb8a   :  { %5148 = vst [vmem:[#allocation1 + $0x1] ss:$9 sm:$0xff] %v5023_v37  ;;  %v5091_v30 = vrot.slane %v9409_v57, 2  ;;  %v5092_v28 = vrot.slane %v9409_v57, 3  ;;  %v5093_v44 = vrot.slane %v9409_v57, 4  ;;  %v5094_v10 = vrot.slane %v9409_v57, 5 }
 0xb8b   :  { %5149 = vst [vmem:[#allocation1 + $0x2] ss:$9 sm:$0xff] %v5055_v53  ;;  %v5095_v37 = vrot.slane %v9409_v57, 6  ;;  %v5096_v62 = vrot.slane %v9409_v57, 7  ;;  %v5016_v1 = vmul.f32 0.01, %v9367_v26 }
 0xb8c   :  { %5150 = vst [vmem:[#allocation1 + $0x3] ss:$9 sm:$0xff] %v5056_v33  ;;  %vm5007_vm12 = vcmp.ge.f32.partialorder %v9379_v8, 0.0  ;;  %vm5008_vm3 = vcmp.ge.f32.partialorder %v9382_v19, 0.0  ;;  %vm6790_vm10 = vcmask 1040384   ;;  %vm6792_vm13 = vcmask 1041409  }
 0xb8d   :  { %5151 = vst [vmem:[#allocation1 + $0x4] ss:$9 sm:$0xff] %v5057_v4  ;;  %vm6810_vm14 = vcmask 1046528  }
 0xb8e   :  { %5152 = vst [vmem:[#allocation1 + $0x5] ss:$9 sm:$0xff] %v5058_v13 }
 0xb8f   :  { %5153 = vst [vmem:[#allocation1 + $0x6] ss:$9 sm:$0xff] %v5059_v40 }
 0xb90   :  { %5247 = vst [vmem:[#allocation3] sm:$0x7f] %v5146_v52  ;;  %v5029_v52 = vsel %vm5003_vm15, %v9367_v26, %v5016_v1  ;;  %v5030_v26 = vsel %vm5004_vm0, %v9370_v15, %v5017_v6  ;;  %v7425_v6 = vld [vmem:[%s10509_s7 + $0x120] sm:$0xff]  ;;  %vm6795_vm15 = vcmask 1042434   ;;  %vm6798_vm0 = vcmask 1043459  }
 0xb91   :  { %v5097_v3 = vrot.slane %v5029_v52, 1  ;;  %v5098_v33 = vrot.slane %v5029_v52, 2  ;;  %v5099_v4 = vrot.slane %v5029_v52, 3  ;;  %v5100_v13 = vrot.slane %v5029_v52, 4 }
 0xb92   :  { %v5101_v20 = vrot.slane %v5029_v52, 5  ;;  %v5102_v40 = vrot.slane %v5029_v52, 6  ;;  %v5103_v21 = vrot.slane %v5029_v52, 7  ;;  %v5107_v18 = vrot.slane %v5030_v26, 4 }
 0xb96   :  { %v5154_v48 = vld [vmem:[#allocation1] sm:$0xff] }
 0xb97   :  { %5155 = vst [vmem:[#allocation1] ss:$9 sm:$0xff] %v5060_v46  ;;  %v5104_v46 = vrot.slane %v5030_v26, 1 }
 0xb98   :  { %5156 = vst [vmem:[#allocation1 + $0x1] ss:$9 sm:$0xff] %v5061_v59  ;;  %v5105_v59 = vrot.slane %v5030_v26, 2 }
 0xb99   :  { %5157 = vst [vmem:[#allocation1 + $0x2] ss:$9 sm:$0xff] %v5024_v24 }
 0xb9a   :  { %5158 = vst [vmem:[#allocation1 + $0x3] ss:$9 sm:$0xff] %v5062_v14  ;;  %v5108_v14 = vrot.slane %v5030_v26, 5 }
 0xb9b   :  { %5159 = vst [vmem:[#allocation1 + $0x4] ss:$9 sm:$0xff] %v5063_v2  ;;  %v5018_v2 = vmul.f32 0.01, %v9373_v34 }
 0xb9c   :  { %5160 = vst [vmem:[#allocation1 + $0x5] ss:$9 sm:$0xff] %v5064_v38  ;;  %v5109_v38 = vrot.slane %v5030_v26, 6 }
 0xb9d   :  { %5161 = vst [vmem:[#allocation1 + $0x6] ss:$9 sm:$0xff] %v5065_v7  ;;  %v5031_v15 = vsel %vm5005_vm2, %v9373_v34, %v5018_v2  ;;  %v5110_v7 = vrot.slane %v5030_v26, 7  ;;  %v5019_v34 = vmul.f32 0.01, %v9376_v35  ;;  %v7634_v2 = vld [vmem:[%s10509_s7 + $0x7a8] sm:$0xff] }
 0xb9e   :  { %5248 = vst [vmem:[#allocation3 + $0x8] sm:$0x7f] %v5154_v48  ;;  %v5106_v48 = vrot.slane %v5030_v26, 3  ;;  %v5111_v50 = vrot.slane %v5031_v15, 1  ;;  %v5116_v39 = vrot.slane %v5031_v15, 6  ;;  %vm6801_vm2 = vcmask 1044484  }
 0xba4   :  { %v5162_v58 = vld [vmem:[#allocation1] sm:$0xff] }
 0xba5   :  { %5163 = vst [vmem:[#allocation1] ss:$9 sm:$0xff] %v5066_v12  ;;  %v5112_v12 = vrot.slane %v5031_v15, 2 }
 0xba6   :  { %5164 = vst [vmem:[#allocation1 + $0x1] ss:$9 sm:$0xff] %v5067_v25  ;;  %v5114_v25 = vrot.slane %v5031_v15, 4 }
 0xba7   :  { %5165 = vst [vmem:[#allocation1 + $0x2] ss:$9 sm:$0xff] %v5068_v63  ;;  %v7449_v63 = vld [vmem:[%s10509_s7 + $0x1e0] sm:$0xff] }
 0xba8   :  { %5166 = vst [vmem:[#allocation1 + $0x3] ss:$9 sm:$0xff] %v5025_v23  ;;  %v5113_v23 = vrot.slane %v5031_v15, 3 }
 0xba9   :  { %5167 = vst [vmem:[#allocation1 + $0x4] ss:$9 sm:$0xff] %v5069_v17  ;;  %v5115_v17 = vrot.slane %v5031_v15, 5 }
 0xbaa   :  { %5168 = vst [vmem:[#allocation1 + $0x5] ss:$9 sm:$0xff] %v5070_v55  ;;  %v7447_v55 = vld [vmem:[%s10509_s7 + $0x1d0] sm:$0xff] }
 0xbab   :  { %5169 = vst [vmem:[#allocation1 + $0x6] ss:$9 sm:$0xff] %v5071_v31  ;;  %v5032_v31 = vsel %vm5006_vm1, %v9376_v35, %v5019_v34  ;;  %v7443_v35 = vld [vmem:[%s10509_s7 + $0x1b0] sm:$0xff]  ;;  %v5087_v34 = vrot.slane %v9402_v54, 5  ;;  %vm6804_vm1 = vcmask 1045509  }
 0xbac   :  { %5249 = vst [vmem:[#allocation3 + $0x10] sm:$0x7f] %v5162_v58  ;;  %v7451_v58 = vld [vmem:[%s10509_s7 + $0x1f0] sm:$0xff]  ;;  %v5124_v1 = vrot.slane %v5032_v31, 7 }
 0xbad   :  { %5441 = vmatpush.msrb.mxu1 %v7451_v58  ;;  %v7426_v58 = vld [vmem:[%s10509_s7 + $0x128] sm:$0xff] }
 0xbaf   :  { %5442 = vmatpush.msrb.mxu1 %v7449_v63  ;;  %v5344_v63 = vld [vmem:[%s10509_s7 + $0xe8] sm:$0xff] }
 0xbb1   :  { %5443 = vmatpush.msrb.mxu1 %v7447_v55  ;;  %v7424_v55 = vld [vmem:[%s10509_s7 + $0x118] sm:$0xff] }
 0xbb2   :  { %v5170_v16 = vld [vmem:[#allocation1] sm:$0xff] }
 0xbb3   :  { %5171 = vst [vmem:[#allocation1] ss:$9 sm:$0xff] %v5072_v27 }
 0xbb4   :  { %5172 = vst [vmem:[#allocation1 + $0x1] ss:$9 sm:$0xff] %v5073_v41  ;;  %v5117_v41 = vrot.slane %v5031_v15, 7 }
 0xbb5   :  { %5173 = vst [vmem:[#allocation1 + $0x2] ss:$9 sm:$0xff] %v5074_v22  ;;  %v5118_v22 = vrot.slane %v5032_v31, 1 }
 0xbb6   :  { %5174 = vst [vmem:[#allocation1 + $0x3] ss:$9 sm:$0xff] %v5075_v60  ;;  %v5119_v60 = vrot.slane %v5032_v31, 2 }
 0xbb7   :  { %5175 = vst [vmem:[#allocation1 + $0x4] ss:$9 sm:$0xff] %v5026_v56  ;;  %v7452_v56 = vld [vmem:[%s10509_s7 + $0x1f8] sm:$0xff] }
 0xbb8   :  { %5176 = vst [vmem:[#allocation1 + $0x5] ss:$9 sm:$0xff] %v5076_v43  ;;  %5467 = vmatpush.msrb.mxu2 %v7452_v56  ;;  %v7450_v43 = vld [vmem:[%s10509_s7 + $0x1e8] sm:$0xff] }
 0xbb9   :  { %5177 = vst [vmem:[#allocation1 + $0x6] ss:$9 sm:$0xff] %v5077_v32  ;;  %v5120_v32 = vrot.slane %v5032_v31, 3  ;;  %v7422_v56 = vld [vmem:[%s10509_s7 + $0x108] sm:$0xff] }
 0xbba   :  { %5250 = vst [vmem:[#allocation3 + $0x18] sm:$0x7f] %v5170_v16  ;;  %v7445_v16 = vld [vmem:[%s10509_s7 + $0x1c0] sm:$0xff]  ;;  %5468 = vmatpush.msrb.mxu2 %v7450_v43  ;;  %v5021_v43 = vmul.f32 0.01, %v9382_v19 }
 0xbbb   :  { %5444 = vmatpush.msrb.mxu1 %v7445_v16  ;;  %v5333_v16 = vld [vmem:[%s10509_s7 + $0x90] sm:$0xff] }
 0xbbd   :  { %5445 = vmatpush.msrb.mxu1 %v7443_v35  ;;  %v7628_v35 = vld [vmem:[%s10509_s7 + $0x778] sm:$0xff] }
 0xbbf   :  { %5446 = vmatpush.msrb.mxu1 %v7441_v49  ;;  %v5338_v49 = vld [vmem:[%s10509_s7 + $0xb8] sm:$0xff] }
 0xbc0   :  { %v5178_v9 = vld [vmem:[#allocation1] sm:$0xff] }
 0xbc1   :  { %5179 = vst [vmem:[#allocation1] ss:$9 sm:$0xff] %v5078_v45  ;;  %v7448_v45 = vld [vmem:[%s10509_s7 + $0x1d8] sm:$0xff] }
 0xbc2   :  { %5180 = vst [vmem:[#allocation1 + $0x1] ss:$9 sm:$0xff] %v5079_v0  ;;  %5469 = vmatpush.msrb.mxu2 %v7448_v45  ;;  %v7439_v0 = vld [vmem:[%s10509_s7 + $0x190] sm:$0xff] }
 0xbc3   :  { %5181 = vst [vmem:[#allocation1 + $0x2] ss:$9 sm:$0xff] %v5080_v29  ;;  %5447 = vmatpush.msrb.mxu1 %v7439_v0  ;;  %v7437_v29 = vld [vmem:[%s10509_s7 + $0x180] sm:$0xff]  ;;  %v5329_v45 = vld [vmem:[%s10509_s7 + $0x70] sm:$0xff]  ;;  %v5336_v0 = vld [vmem:[%s10509_s7 + $0xa8] sm:$0xff] }
 0xbc4   :  { %5182 = vst [vmem:[#allocation1 + $0x3] ss:$9 sm:$0xff] %v5081_v5  ;;  %v7444_v5 = vld [vmem:[%s10509_s7 + $0x1b8] sm:$0xff] }
 0xbc5   :  { %5183 = vst [vmem:[#allocation1 + $0x4] ss:$9 sm:$0xff] %v5082_v61  ;;  %5448 = vmatpush.msrb.mxu1 %v7437_v29  ;;  %v5020_v61 = vmul.f32 0.01, %v9379_v8 }
 0xbc6   :  { %5184 = vst [vmem:[#allocation1 + $0x5] ss:$9 sm:$0xff] %v9402_v54 }
 0xbc7   :  { %5185 = vst [vmem:[#allocation1 + $0x6] ss:$9 sm:$0xff] %v5083_v36  ;;  %v7435_v36 = vld [vmem:[%s10509_s7 + $0x170] sm:$0xff] }
 0xbc8   :  { %5251 = vst [vmem:[#allocation3 + $0x20] sm:$0x7f] %v5178_v9  ;;  %v7446_v9 = vld [vmem:[%s10509_s7 + $0x1c8] sm:$0xff]  ;;  %5449 = vmatpush.msrb.mxu1 %v7435_v36  ;;  %v5334_v36 = vld [vmem:[%s10509_s7 + $0x98] sm:$0xff] }
 0xbc9   :  { %5470 = vmatpush.msrb.mxu2 %v7446_v9 }
 0xbcb   :  { %5471 = vmatpush.msrb.mxu2 %v7444_v5  ;;  %v5327_v5 = vld [vmem:[%s10509_s7 + $0x60] sm:$0xff] }
 0xbcd   :  { %5472 = vmatpush.msrb.mxu2 %v7442_v11  ;;  %v5034_v11 = vsel %vm5008_vm3, %v9382_v19, %v5021_v43  ;;  %v5348_v19 = vld [vmem:[#allocation3 + $0x1] ss:$2 sm:$0x7]  ;;  %v7465_v43 = vld [vmem:[%s10509_s7 + $0x260] sm:$0xff] }
 0xbce   :  { %v5186_v51 = vld [vmem:[#allocation1] sm:$0xff] }
 0xbcf   :  { %5187 = vst [vmem:[#allocation1] ss:$9 sm:$0xff] %v5090_v47  ;;  %v5121_v47 = vrot.slane %v5032_v31, 4 }
 0xbd0   :  { %5188 = vst [vmem:[#allocation1 + $0x1] ss:$9 sm:$0xff] %v5091_v30  ;;  %v7433_v30 = vld [vmem:[%s10509_s7 + $0x160] sm:$0xff] }
 0xbd1   :  { %5189 = vst [vmem:[#allocation1 + $0x2] ss:$9 sm:$0xff] %v5092_v28  ;;  %5450 = vmatpush.msrb.mxu1 %v7433_v30  ;;  %v5325_v30 = vld [vmem:[%s10509_s7 + $0x50] sm:$0xff] }
 0xbd2   :  { %5190 = vst [vmem:[#allocation1 + $0x3] ss:$9 sm:$0xff] %v5093_v44  ;;  %v7440_v44 = vld [vmem:[%s10509_s7 + $0x198] sm:$0xff] }
 0xbd3   :  { %5191 = vst [vmem:[#allocation1 + $0x4] ss:$9 sm:$0xff] %v5094_v10  ;;  %v9484_v10 = vsel %vm5007_vm12, %v9379_v8, %v5020_v61  ;;  %5473 = vmatpush.msrb.mxu2 %v7440_v44  ;;  %v7429_v8 = vld [vmem:[%s10509_s7 + $0x140] sm:$0xff]  ;;  %v5132_v44 = vrot.slane %v5034_v11, 1  ;;  %vm6807_vm12 = vcmask 1046534  }
 0xbd4   :  { %5192 = vst [vmem:[#allocation1 + $0x5] ss:$9 sm:$0xff] %v5095_v37  ;;  %v5123_v37 = vrot.slane %v5032_v31, 6  ;;  %v5128_v9 = vrot.slane %v9484_v10, 4  ;;  %v5129_v61 = vrot.slane %v9484_v10, 5 }
 0xbd5   :  { %5193 = vst [vmem:[#allocation1 + $0x6] ss:$9 sm:$0xff] %v5096_v62  ;;  %v7431_v62 = vld [vmem:[%s10509_s7 + $0x150] sm:$0xff] }
 0xbd6   :  { %5252 = vst [vmem:[#allocation3 + $0x28] sm:$0x7f] %v5186_v51  ;;  %v5122_v51 = vrot.slane %v5032_v31, 5  ;;  %5451 = vmatpush.msrb.mxu1 %v7431_v62  ;;  %v5350_v62 = vld [vmem:[#allocation3 + $0x11] ss:$2 sm:$0x7] }
 0xbd8   :  { %5452 = vmatpush.msrb.mxu1 %v7429_v8  ;;  %v5321_v8 = vld [vmem:[%s10509_s7 + $0x30] sm:$0xff] }
 0xbdc   :  { %v5194_v53 = vld [vmem:[#allocation1] sm:$0xff] }
 0xbdd   :  { %5195 = vst [vmem:[#allocation1] ss:$9 sm:$0xff] %v5029_v52  ;;  %v7438_v52 = vld [vmem:[%s10509_s7 + $0x188] sm:$0xff] }
 0xbde   :  { %5196 = vst [vmem:[#allocation1 + $0x1] ss:$9 sm:$0xff] %v5097_v3  ;;  %5474 = vmatpush.msrb.mxu2 %v7438_v52  ;;  %v5125_v3 = vrot.slane %v9484_v10, 1  ;;  %v5330_v52 = vld [vmem:[%s10509_s7 + $0x78] sm:$0xff] }
 0xbdf   :  { %5197 = vst [vmem:[#allocation1 + $0x2] ss:$9 sm:$0xff] %v5098_v33  ;;  %v5126_v33 = vrot.slane %v9484_v10, 2 }
 0xbe0   :  { %5198 = vst [vmem:[#allocation1 + $0x3] ss:$9 sm:$0xff] %v5099_v4  ;;  %v5345_v4 = vld [vmem:[%s10509_s7 + $0xf0] sm:$0xff] }
 0xbe1   :  { %5199 = vst [vmem:[#allocation1 + $0x4] ss:$9 sm:$0xff] %v5100_v13  ;;  %v7427_v13 = vld [vmem:[%s10509_s7 + $0x130] sm:$0xff]  ;;  %5524 = vmatpush.msrb.mxu3 %v5345_v4  ;;  %v5319_v4 = vld [vmem:[%s10509_s7 + $0x20] sm:$0xff] }
 0xbe2   :  { %5200 = vst [vmem:[#allocation1 + $0x5] ss:$9 sm:$0xff] %v5101_v20  ;;  %5453 = vmatpush.msrb.mxu1 %v7427_v13  ;;  %v7434_v20 = vld [vmem:[%s10509_s7 + $0x168] sm:$0xff]  ;;  %v7481_v13 = vld [vmem:[%s10509_s7 + $0x2e0] sm:$0xff] }
 0xbe3   :  { %5201 = vst [vmem:[#allocation1 + $0x6] ss:$9 sm:$0xff] %v5102_v40  ;;  %v5343_v40 = vld [vmem:[%s10509_s7 + $0xe0] sm:$0xff] }
 0xbe4   :  { %5253 = vst [vmem:[#allocation3 + $0x40] sm:$0x7f] %v5194_v53  ;;  %v7436_v53 = vld [vmem:[%s10509_s7 + $0x178] sm:$0xff]  ;;  %5525 = vmatpush.msrb.mxu3 %v5343_v40  ;;  %5454 = vmatpush.msrb.mxu1 %v7425_v6  ;;  %v7479_v6 = vld [vmem:[%s10509_s7 + $0x2d0] sm:$0xff] }
 0xbe5   :  { %5475 = vmatpush.msrb.mxu2 %v7436_v53  ;;  %v5366_v53 = vrot.slane %v5348_v19, 2  ;;  %v5326_v40 = vld [vmem:[%s10509_s7 + $0x58] sm:$0xff] }
 0xbe7   :  { %5476 = vmatpush.msrb.mxu2 %v7434_v20  ;;  %v5367_v20 = vrot.slane %v5350_v62, 1 }
 0xbea   :  { %v5202_v24 = vld [vmem:[#allocation1] sm:$0xff] }
 0xbeb   :  { %5203 = vst [vmem:[#allocation1] ss:$9 sm:$0xff] %v5103_v21  ;;  %v7423_v21 = vld [vmem:[%s10509_s7 + $0x110] sm:$0xff] }
 0xbec   :  { %5204 = vst [vmem:[#allocation1 + $0x1] ss:$9 sm:$0xff] %v5030_v26  ;;  %v7432_v26 = vld [vmem:[%s10509_s7 + $0x158] sm:$0xff]  ;;  %5455 = vmatpush.msrb.mxu1 %v7423_v21  ;;  %v5317_v21 = vld [vmem:[%s10509_s7 + $0x10] sm:$0xff] }
 0xbed   :  { %5205 = vst [vmem:[#allocation1 + $0x2] ss:$9 sm:$0xff] %v5104_v46  ;;  %5477 = vmatpush.msrb.mxu2 %v7432_v26  ;;  %v7430_v46 = vld [vmem:[%s10509_s7 + $0x148] sm:$0xff] }
 0xbee   :  { %5206 = vst [vmem:[#allocation1 + $0x3] ss:$9 sm:$0xff] %v5105_v59  ;;  %v7640_v59 = vld [vmem:[%s10509_s7 + $0x7d8] sm:$0xff]  ;;  %v5352_v26 = vld [vmem:[#allocation3 + $0x21] ss:$2 sm:$0x7] }
 0xbef   :  { %5207 = vst [vmem:[#allocation1 + $0x4] ss:$9 sm:$0xff] %v5106_v48  ;;  %v7638_v48 = vld [vmem:[%s10509_s7 + $0x7c8] sm:$0xff]  ;;  %5478 = vmatpush.msrb.mxu2 %v7430_v46  ;;  %6458 = vmatpush.msrb.mxu0 %v7640_v59  ;;  %v5369_v59 = vrot.slane %v5352_v26, 1 }
 0xbf0   :  { %5208 = vst [vmem:[#allocation1 + $0x5] ss:$9 sm:$0xff] %v5107_v18  ;;  %v5084_v18 = vrot.slane %v9402_v54, 2  ;;  %v5324_v46 = vld [vmem:[%s10509_s7 + $0x48] sm:$0xff] }
 0xbf1   :  { %5209 = vst [vmem:[#allocation1 + $0x6] ss:$9 sm:$0xff] %v5108_v14  ;;  %v7636_v14 = vld [vmem:[%s10509_s7 + $0x7b8] sm:$0xff]  ;;  %6459 = vmatpush.msrb.mxu0 %v7638_v48  ;;  %v5315_v48 = vld [vmem:[%s10509_s7] sm:$0xff] }
 0xbf2   :  { %5254 = vst [vmem:[#allocation3 + $0x48] sm:$0x7f] %v5202_v24  ;;  %v5341_v24 = vld [vmem:[%s10509_s7 + $0xd0] sm:$0xff] }
 0xbf3   :  { %5526 = vmatpush.msrb.mxu3 %v5341_v24  ;;  %6460 = vmatpush.msrb.mxu0 %v7636_v14  ;;  %v5368_v24 = vrot.slane %v5350_v62, 2  ;;  %v5322_v14 = vld [vmem:[%s10509_s7 + $0x38] sm:$0xff] }
 0xbf5   :  { %6461 = vmatpush.msrb.mxu0 %v7634_v2  ;;  %v7484_v2 = vld [vmem:[%s10509_s7 + $0x2f8] sm:$0xff] }
 0xbf8   :  { %v5210_v42 = vld [vmem:[#allocation1] sm:$0xff] }
 0xbf9   :  { %5211 = vst [vmem:[#allocation1] ss:$9 sm:$0xff] %v5109_v38  ;;  %v5085_v38 = vrot.slane %v9402_v54, 3 }
 0xbfa   :  { %5212 = vst [vmem:[#allocation1 + $0x1] ss:$9 sm:$0xff] %v5110_v7 }
 0xbfb   :  { %5213 = vst [vmem:[#allocation1 + $0x2] ss:$9 sm:$0xff] %v5031_v15  ;;  %v7421_v15 = vld [vmem:[%s10509_s7 + $0x100] sm:$0xff] }
 0xbfc   :  { %5214 = vst [vmem:[#allocation1 + $0x3] ss:$9 sm:$0xff] %v5111_v50  ;;  %5456 = vmatpush.msrb.mxu1 %v7421_v15  ;;  %v7428_v50 = vld [vmem:[%s10509_s7 + $0x138] sm:$0xff]  ;;  %v7475_v15 = vld [vmem:[%s10509_s7 + $0x2b0] sm:$0xff] }
 0xbfd   :  { %5215 = vst [vmem:[#allocation1 + $0x4] ss:$9 sm:$0xff] %v5112_v12  ;;  %v5086_v12 = vrot.slane %v9402_v54, 4  ;;  %5479 = vmatpush.msrb.mxu2 %v7428_v50  ;;  %v7473_v50 = vld [vmem:[%s10509_s7 + $0x2a0] sm:$0xff] }
 0xbfe   :  { %5216 = vst [vmem:[#allocation1 + $0x5] ss:$9 sm:$0xff] %v5113_v23  ;;  %v5346_v23 = vld [vmem:[%s10509_s7 + $0xf8] sm:$0xff] }
 0xbff   :  { %5217 = vst [vmem:[#allocation1 + $0x6] ss:$9 sm:$0xff] %v5114_v25  ;;  %v5337_v25 = vld [vmem:[%s10509_s7 + $0xb0] sm:$0xff]  ;;  %5550 = vmatpush.msra.mxu1 %v5346_v23  ;;  %5480 = vmatpush.msrb.mxu2 %v7426_v58  ;;  %v7480_v23 = vld [vmem:[%s10509_s7 + $0x2d8] sm:$0xff]  ;;  %v5316_v58 = vld [vmem:[%s10509_s7 + $0x8] sm:$0xff] }
 0xc00   :  { %5255 = vst [vmem:[#allocation3 + $0x50] sm:$0x7f] %v5210_v42  ;;  %v5339_v42 = vld [vmem:[%s10509_s7 + $0xc0] sm:$0xff] }
 0xc01   :  { %5527 = vmatpush.msrb.mxu3 %v5339_v42  ;;  %5551 = vmatpush.msra.mxu1 %v5344_v63  ;;  %v7482_v42 = vld [vmem:[%s10509_s7 + $0x2e8] sm:$0xff] }
 0xc02   :  { %5481 = vmatpush.msrb.mxu2 %v7424_v55  ;;  %v5354_v63 = vld [vmem:[#allocation3 + $0x41] ss:$2 sm:$0x7] }
 0xc03   :  { %5528 = vmatpush.msrb.mxu3 %v5337_v25  ;;  %v7471_v25 = vld [vmem:[%s10509_s7 + $0x290] sm:$0xff] }
 0xc04   :  { %5482 = vmatpush.msrb.mxu2 %v7422_v56 }
 0xc06   :  { %v5218_v27 = vld [vmem:[#allocation1] sm:$0xff] }
 0xc07   :  { %5219 = vst [vmem:[#allocation1] ss:$9 sm:$0xff] %v5115_v17  ;;  %v5335_v17 = vld [vmem:[%s10509_s7 + $0xa0] sm:$0xff] }
 0xc08   :  { %5220 = vst [vmem:[#allocation1 + $0x1] ss:$9 sm:$0xff] %v5116_v39  ;;  %v7632_v39 = vld [vmem:[%s10509_s7 + $0x798] sm:$0xff]  ;;  %5529 = vmatpush.msrb.mxu3 %v5335_v17  ;;  %v5370_v17 = vrot.slane %v5352_v26, 2 }
 0xc09   :  { %5221 = vst [vmem:[#allocation1 + $0x2] ss:$9 sm:$0xff] %v5117_v41  ;;  %v5089_v41 = vrot.slane %v9402_v54, 7  ;;  %6462 = vmatpush.msrb.mxu0 %v7632_v39  ;;  %v5371_v39 = vrot.slane %v5354_v63, 1 }
 0xc0a   :  { %5222 = vst [vmem:[#allocation1 + $0x3] ss:$9 sm:$0xff] %v5032_v31  ;;  %v5088_v31 = vrot.slane %v9402_v54, 6  ;;  %v5340_v54 = vld [vmem:[%s10509_s7 + $0xc8] sm:$0xff]  ;;  %5530 = vmatpush.msrb.mxu3 %v5333_v16 }
 0xc0b   :  { %5223 = vst [vmem:[#allocation1 + $0x4] ss:$9 sm:$0xff] %v5118_v22  ;;  %v7630_v22 = vld [vmem:[%s10509_s7 + $0x788] sm:$0xff] }
 0xc0c   :  { %5224 = vst [vmem:[#allocation1 + $0x5] ss:$9 sm:$0xff] %v5119_v60  ;;  %6463 = vmatpush.msrb.mxu0 %v7630_v22  ;;  %v7626_v60 = vld [vmem:[%s10509_s7 + $0x768] sm:$0xff]  ;;  %v7469_v22 = vld [vmem:[%s10509_s7 + $0x280] sm:$0xff] }
 0xc0d   :  { %5225 = vst [vmem:[#allocation1 + $0x6] ss:$9 sm:$0xff] %v5120_v32  ;;  %v5127_v32 = vrot.slane %v9484_v10, 3 }
 0xc0e   :  { %5256 = vst [vmem:[#allocation3 + $0x58] sm:$0x7f] %v5218_v27  ;;  %v5342_v27 = vld [vmem:[%s10509_s7 + $0xd8] sm:$0xff]  ;;  %6464 = vmatpush.msrb.mxu0 %v7628_v35  ;;  %v7467_v35 = vld [vmem:[%s10509_s7 + $0x270] sm:$0xff] }
 0xc0f   :  { %5552 = vmatpush.msra.mxu1 %v5342_v27  ;;  %v5372_v27 = vrot.slane %v5354_v63, 2 }
 0xc10   :  { %6465 = vmatpush.msrb.mxu0 %v7626_v60  ;;  %v7474_v60 = vld [vmem:[%s10509_s7 + $0x2a8] sm:$0xff] }
 0xc11   :  { %5553 = vmatpush.msra.mxu1 %v5340_v54  ;;  %v7476_v54 = vld [vmem:[%s10509_s7 + $0x2b8] sm:$0xff] }
 0xc13   :  { %5554 = vmatpush.msra.mxu1 %v5338_v49  ;;  %v7470_v49 = vld [vmem:[%s10509_s7 + $0x288] sm:$0xff] }
 0xc14   :  { %v5226_v28 = vld [vmem:[#allocation1] sm:$0xff] }
 0xc15   :  { %5227 = vst [vmem:[#allocation1] ss:$9 sm:$0xff] %v5121_v47  ;;  %v5130_v47 = vrot.slane %v9484_v10, 6  ;;  %5555 = vmatpush.msra.mxu1 %v5336_v0 }
 0xc16   :  { %5228 = vst [vmem:[#allocation1 + $0x1] ss:$9 sm:$0xff] %v5122_v51  ;;  %v5131_v51 = vrot.slane %v9484_v10, 7 }
 0xc17   :  { %5229 = vst [vmem:[#allocation1 + $0x2] ss:$9 sm:$0xff] %v5123_v37  ;;  %5556 = vmatpush.msra.mxu1 %v5334_v36 }
 0xc18   :  { %5230 = vst [vmem:[#allocation1 + $0x3] ss:$9 sm:$0xff] %v5124_v1  ;;  %v5365_v1 = vrot.slane %v5348_v19, 1 }
 0xc19   :  { %5231 = vst [vmem:[#allocation1 + $0x4] ss:$9 sm:$0xff] %v9484_v10  ;;  %v5323_v10 = vld [vmem:[%s10509_s7 + $0x40] sm:$0xff] }
 0xc1a   :  { %5232 = vst [vmem:[#allocation1 + $0x5] ss:$9 sm:$0xff] %v5125_v3  ;;  %v7483_v3 = vld [vmem:[%s10509_s7 + $0x2f0] sm:$0xff] }
 0xc1b   :  { %5233 = vst [vmem:[#allocation1 + $0x6] ss:$9 sm:$0xff] %v5126_v33  ;;  %5670 = vmatpush.msra.mxu2 %v7483_v3  ;;  %v5328_v33 = vld [vmem:[%s10509_s7 + $0x68] sm:$0xff]  ;;  %v7511_v3 = vld [vmem:[%s10509_s7 + $0x3d0] sm:$0xff] }
 0xc1c   :  { %5257 = vst [vmem:[#allocation3 + $0x60] sm:$0x7f] %v5226_v28  ;;  %v5332_v28 = vld [vmem:[%s10509_s7 + $0x88] sm:$0xff] }
 0xc1d   :  { %5557 = vmatpush.msra.mxu1 %v5332_v28  ;;  %5671 = vmatpush.msra.mxu2 %v7481_v13  ;;  %v7515_v28 = vld [vmem:[%s10509_s7 + $0x3f0] sm:$0xff]  ;;  %v7509_v13 = vld [vmem:[%s10509_s7 + $0x3c0] sm:$0xff] }
 0xc1f   :  { %5558 = vmatpush.msra.mxu1 %v5330_v52  ;;  %5672 = vmatpush.msra.mxu2 %v7479_v6  ;;  %v7455_v52 = vld [vmem:[%s10509_s7 + $0x210] sm:$0xff] }
 0xc20   :  { %v7507_v6 = vld [vmem:[%s10509_s7 + $0x3b0] sm:$0xff] }
 0xc21   :  { %5559 = vmatpush.msra.mxu1 %v5328_v33 }
 0xc22   :  { %v5234_v7 = vld [vmem:[#allocation1] sm:$0xff] }
 0xc23   :  { %5259 = vst [vmem:[#allocation1] ss:$9 sm:$0xff] %v5084_v18  ;;  %5560 = vmatpush.msra.mxu1 %v5326_v40  ;;  %v7477_v18 = vld [vmem:[%s10509_s7 + $0x2c0] sm:$0xff]  ;;  %v5358_v56 = vld [vmem:[#allocation3 + $0x61] ss:$2 sm:$0x7] }
 0xc24   :  { %5261 = vst [vmem:[#allocation1 + $0x1] ss:$9 sm:$0xff] %v5085_v38  ;;  %5673 = vmatpush.msra.mxu2 %v7477_v18  ;;  %v7624_v38 = vld [vmem:[%s10509_s7 + $0x758] sm:$0xff]  ;;  %v5376_v0 = vrot.slane %v5358_v56, 2  ;;  %v7503_v18 = vld [vmem:[%s10509_s7 + $0x390] sm:$0xff] }
 0xc25   :  { %5263 = vst [vmem:[#allocation1 + $0x2] ss:$9 sm:$0xff] %v5086_v12  ;;  %5561 = vmatpush.msra.mxu1 %v5324_v46  ;;  %6466 = vmatpush.msrb.mxu0 %v7624_v38  ;;  %v5318_v12 = vld [vmem:[%s10509_s7 + $0x18] sm:$0xff]  ;;  %v7454_v38 = vld [vmem:[%s10509_s7 + $0x208] sm:$0xff] }
 0xc26   :  { %5265 = vst [vmem:[#allocation1 + $0x3] ss:$9 sm:$0xff] %v5087_v34  ;;  %5674 = vmatpush.msra.mxu2 %v7475_v15  ;;  %v7478_v34 = vld [vmem:[%s10509_s7 + $0x2c8] sm:$0xff]  ;;  %v7516_v40 = vld [vmem:[%s10509_s7 + $0x3f8] sm:$0xff] }
 0xc27   :  { %5267 = vst [vmem:[#allocation1 + $0x4] ss:$9 sm:$0xff] %v5088_v31  ;;  %5562 = vmatpush.msra.mxu1 %v5322_v14  ;;  %v5356_v31 = vld [vmem:[#allocation3 + $0x51] ss:$2 sm:$0x7]  ;;  %v7510_v14 = vld [vmem:[%s10509_s7 + $0x3c8] sm:$0xff] }
 0xc28   :  { %5269 = vst [vmem:[#allocation1 + $0x5] ss:$9 sm:$0xff] %v5089_v41  ;;  %5675 = vmatpush.msra.mxu2 %v7473_v50  ;;  %v5373_v41 = vrot.slane %v5356_v31, 1  ;;  %v5374_v16 = vrot.slane %v5356_v31, 2  ;;  %v7512_v46 = vld [vmem:[%s10509_s7 + $0x3d8] sm:$0xff] }
 0xc29   :  { %5271 = vst [vmem:[#allocation1 + $0x6] ss:$9 sm:$0xff] %v9409_v57  ;;  %v5331_v57 = vld [vmem:[%s10509_s7 + $0x80] sm:$0xff] }
 0xc2a   :  { %5258 = vst [vmem:[#allocation3 + $0x68] sm:$0x7f] %v5234_v7  ;;  %5531 = vmatpush.msrb.mxu3 %v5331_v57  ;;  %v5320_v7 = vld [vmem:[%s10509_s7 + $0x28] sm:$0xff]  ;;  %5676 = vmatpush.msra.mxu2 %v7471_v25  ;;  %v7472_v57 = vld [vmem:[%s10509_s7 + $0x298] sm:$0xff] }
 0xc2b   :  { %5563 = vmatpush.msra.mxu1 %v5320_v7 }
 0xc2c   :  { %5532 = vmatpush.msrb.mxu3 %v5329_v45  ;;  %5677 = vmatpush.msra.mxu2 %v7469_v22  ;;  %v5375_v45 = vrot.slane %v5358_v56, 1 }
 0xc2d   :  { %5564 = vmatpush.msra.mxu1 %v5318_v12 }
 0xc2e   :  { %5533 = vmatpush.msrb.mxu3 %v5327_v5  ;;  %5678 = vmatpush.msra.mxu2 %v7467_v35  ;;  %v5288_v5 = vld [vmem:[#allocation3 + $0x10] ss:$2 sm:$0x7] }
 0xc2f   :  { %5565 = vmatpush.msra.mxu1 %v5316_v58  ;;  %v5296_v58 = vld [vmem:[#allocation3 + $0x60] ss:$2 sm:$0x7]  ;;  %v5579_v35 = vld [vmem:[#allocation3 + $0x12] ss:$2 sm:$0x7] }
 0xc30   :  { %v5272_v29 = vld [vmem:[#allocation1] sm:$0xff]  ;;  %5534 = vmatpush.msrb.mxu3 %v5325_v30  ;;  %5679 = vmatpush.msra.mxu2 %v7465_v43  ;;  %v7459_v30 = vld [vmem:[%s10509_s7 + $0x230] sm:$0xff] }
 0xc31   :  { %5273 = vst [vmem:[#allocation1] ss:$9 sm:$0xff] %v5127_v32  ;;  %v7463_v32 = vld [vmem:[%s10509_s7 + $0x250] sm:$0xff] }
 0xc32   :  { %5274 = vst [vmem:[#allocation1 + $0x1] ss:$9 sm:$0xff] %v5128_v9  ;;  %5535 = vmatpush.msrb.mxu3 %v5323_v10  ;;  %5680 = vmatpush.msra.mxu2 %v7463_v32  ;;  %v5305_v10 = vrot.slane %v5288_v5, 1  ;;  %v7500_v32 = vld [vmem:[%s10509_s7 + $0x378] sm:$0xff] }
 0xc33   :  { %5275 = vst [vmem:[#allocation1 + $0x2] ss:$9 sm:$0xff] %v5129_v61  ;;  %v7461_v61 = vld [vmem:[%s10509_s7 + $0x240] sm:$0xff] }
 0xc34   :  { %5276 = vst [vmem:[#allocation1 + $0x3] ss:$9 sm:$0xff] %v5130_v47  ;;  %5536 = vmatpush.msrb.mxu3 %v5321_v8  ;;  %5681 = vmatpush.msra.mxu2 %v7461_v61  ;;  %v7468_v47 = vld [vmem:[%s10509_s7 + $0x278] sm:$0xff]  ;;  %v5306_v8 = vrot.slane %v5288_v5, 2  ;;  %v7545_v61 = vld [vmem:[%s10509_s7 + $0x4e0] sm:$0xff] }
 0xc35   :  { %5277 = vst [vmem:[#allocation1 + $0x4] ss:$9 sm:$0xff] %v5131_v51 }
 0xc36   :  { %5278 = vst [vmem:[#allocation1 + $0x5] ss:$9 sm:$0xff] %v5034_v11  ;;  %5537 = vmatpush.msrb.mxu3 %v5319_v4  ;;  %5682 = vmatpush.msra.mxu2 %v7459_v30  ;;  %v7453_v4 = vld [vmem:[%s10509_s7 + $0x200] sm:$0xff]  ;;  %v5597_v30 = vrot.slane %v5579_v35, 2 }
 0xc37   :  { %5279 = vst [vmem:[#allocation1 + $0x6] ss:$9 sm:$0xff] %v5132_v44  ;;  %v7466_v44 = vld [vmem:[%s10509_s7 + $0x268] sm:$0xff] }
 0xc38   :  { %5284 = vst [vmem:[#allocation3 + $0x30] sm:$0x7f] %v5272_v29  ;;  %5538 = vmatpush.msrb.mxu3 %v5317_v21  ;;  %v5286_v29 = vld [vmem:[#allocation3] ss:$2 sm:$0x7] }
 0xc39   :  { %v5303_v11 = vrot.slane %v5286_v29, 1  ;;  %v5304_v51 = vrot.slane %v5286_v29, 2  ;;  %v7514_v21 = vld [vmem:[%s10509_s7 + $0x3e8] sm:$0xff] }
 0xc3a   :  { %5539 = vmatpush.msrb.mxu3 %v5315_v48  ;;  %v7622_v48 = vld [vmem:[%s10509_s7 + $0x748] sm:$0xff] }
 0xc3b   :  { %6467 = vmatpush.msrb.mxu0 %v7622_v48 }
 0xc3c   :  { %5696 = vmatpush.msra.mxu3 %v7484_v2  ;;  %v5292_v2 = vld [vmem:[#allocation3 + $0x40] ss:$2 sm:$0x7] }
 0xc3d   :  { %v5309_v50 = vrot.slane %v5292_v2, 1  ;;  %v5310_v12 = vrot.slane %v5292_v2, 2 }
 0xc3e   :  { %v5280_v37 = vld [vmem:[#allocation1] sm:$0xff]  ;;  %5697 = vmatpush.msra.mxu3 %v7482_v42  ;;  %v5294_v42 = vld [vmem:[#allocation3 + $0x50] ss:$2 sm:$0x7] }
 0xc3f   :  { %5285 = vst [vmem:[#allocation3 + $0x70] sm:$0x7f] %v5280_v37  ;;  %v5290_v37 = vld [vmem:[#allocation3 + $0x20] ss:$2 sm:$0x7]  ;;  %v5312_v25 = vrot.slane %v5294_v42, 2 }
 0xc40   :  { %5410 = vst [vmem:[#allocation1] ss:$9 sm:$0xff] %v5348_v19  ;;  %5698 = vmatpush.msra.mxu3 %v7480_v23  ;;  %v7457_v19 = vld [vmem:[%s10509_s7 + $0x220] sm:$0xff]  ;;  %v5307_v33 = vrot.slane %v5290_v37, 1  ;;  %v5308_v15 = vrot.slane %v5290_v37, 2  ;;  %v5311_v23 = vrot.slane %v5294_v42, 1 }
 0xc41   :  { %5412 = vst [vmem:[#allocation1 + $0x1] ss:$9 sm:$0xff] %v5365_v1  ;;  %v7464_v1 = vld [vmem:[%s10509_s7 + $0x258] sm:$0xff]  ;;  %5683 = vmatpush.msra.mxu2 %v7457_v19  ;;  %v7485_v19 = vld [vmem:[%s10509_s7 + $0x300] sm:$0xff] }
 0xc42   :  { %5414 = vst [vmem:[#allocation1 + $0x2] ss:$9 sm:$0xff] %v5366_v53  ;;  %5699 = vmatpush.msra.mxu3 %v7478_v34  ;;  %v7462_v53 = vld [vmem:[%s10509_s7 + $0x248] sm:$0xff]  ;;  %v7501_v34 = vld [vmem:[%s10509_s7 + $0x380] sm:$0xff] }
 0xc43   :  { %5416 = vst [vmem:[#allocation1 + $0x3] ss:$9 sm:$0xff] %v5350_v62  ;;  %v7513_v62 = vld [vmem:[%s10509_s7 + $0x3e0] sm:$0xff]  ;;  %5684 = vmatpush.msra.mxu2 %v7455_v52  ;;  %v7490_v52 = vld [vmem:[%s10509_s7 + $0x328] sm:$0xff] }
 0xc44   :  { %5418 = vst [vmem:[#allocation1 + $0x4] ss:$9 sm:$0xff] %v5367_v20  ;;  %5700 = vmatpush.msra.mxu3 %v7476_v54  ;;  %v7460_v20 = vld [vmem:[%s10509_s7 + $0x238] sm:$0xff]  ;;  %v5577_v54 = vld [vmem:[#allocation3 + $0x2] ss:$2 sm:$0x7] }
 0xc45   :  { %5420 = vst [vmem:[#allocation1 + $0x5] ss:$9 sm:$0xff] %v5368_v24  ;;  %5685 = vmatpush.msra.mxu2 %v7453_v4  ;;  %v7505_v24 = vld [vmem:[%s10509_s7 + $0x3a0] sm:$0xff]  ;;  %v7535_v4 = vld [vmem:[%s10509_s7 + $0x490] sm:$0xff] }
 0xc46   :  { %5422 = vst [vmem:[#allocation1 + $0x6] ss:$9 sm:$0xff] %v5352_v26  ;;  %5701 = vmatpush.msra.mxu3 %v7474_v60  ;;  %v7458_v26 = vld [vmem:[%s10509_s7 + $0x228] sm:$0xff]  ;;  %v7493_v60 = vld [vmem:[%s10509_s7 + $0x340] sm:$0xff] }
 0xc47   :  { %5424 = vst [vmem:[#allocation1 + $0x7] ss:$9 sm:$0xff] %v5369_v59  ;;  %v7456_v59 = vld [vmem:[%s10509_s7 + $0x218] sm:$0xff] }
 0xc48   :  { %5702 = vmatpush.msra.mxu3 %v7472_v57  ;;  %v5594_v57 = vrot.slane %v5577_v54, 1 }
 0xc4a   :  { %5703 = vmatpush.msra.mxu3 %v7470_v49  ;;  %v7491_v49 = vld [vmem:[%s10509_s7 + $0x330] sm:$0xff] }
 0xc4c   :  { %5704 = vmatpush.msra.mxu3 %v7468_v47  ;;  %v7487_v47 = vld [vmem:[%s10509_s7 + $0x310] sm:$0xff] }
 0xc4e   :  { %v5425_v55 = vld [vmem:[#allocation1] sm:$0xff]  ;;  %5705 = vmatpush.msra.mxu3 %v7466_v44 }
 0xc4f   :  { %5457 = vmatmul.f32.vlgmr.msrb.gmra.mxu1 %v5425_v55  ;;  %5426 = vst [vmem:[#allocation1] ss:$9 sm:$0xff] %v5370_v17  ;;  %5483 = vmatmul.f32.vlgmr.msrb.gmra.mxu2 %v5425_v55  ;;  %v7499_v17 = vld [vmem:[%s10509_s7 + $0x370] sm:$0xff]  ;;  %v7506_v55 = vld [vmem:[%s10509_s7 + $0x3a8] sm:$0xff] }
 0xc50   :  { %5427 = vst [vmem:[#allocation1 + $0x1] ss:$9 sm:$0xff] %v5354_v63  ;;  %5822 = vmatpush.msrb.mxu1 %v7515_v28  ;;  %5706 = vmatpush.msra.mxu3 %v7464_v1  ;;  %v7508_v63 = vld [vmem:[%s10509_s7 + $0x3b8] sm:$0xff]  ;;  %v7494_v28 = vld [vmem:[%s10509_s7 + $0x348] sm:$0xff]  ;;  %v7539_v1 = vld [vmem:[%s10509_s7 + $0x4b0] sm:$0xff] }
 0xc51   :  { %5428 = vst [vmem:[#allocation1 + $0x2] ss:$9 sm:$0xff] %v5371_v39  ;;  %5848 = vmatpush.msrb.mxu2 %v7516_v40  ;;  %v7504_v39 = vld [vmem:[%s10509_s7 + $0x398] sm:$0xff] }
 0xc52   :  { %5429 = vst [vmem:[#allocation1 + $0x3] ss:$9 sm:$0xff] %v5372_v27  ;;  %5823 = vmatpush.msrb.mxu1 %v7513_v62  ;;  %5707 = vmatpush.msra.mxu3 %v7462_v53  ;;  %v7495_v27 = vld [vmem:[%s10509_s7 + $0x350] sm:$0xff]  ;;  %v7492_v62 = vld [vmem:[%s10509_s7 + $0x338] sm:$0xff] }
 0xc53   :  { %5430 = vst [vmem:[#allocation1 + $0x4] ss:$9 sm:$0xff] %v5356_v31  ;;  %5849 = vmatpush.msrb.mxu2 %v7514_v21  ;;  %v7497_v31 = vld [vmem:[%s10509_s7 + $0x360] sm:$0xff]  ;;  %v7544_v53 = vld [vmem:[%s10509_s7 + $0x4d8] sm:$0xff] }
 0xc54   :  { %5431 = vst [vmem:[#allocation1 + $0x5] ss:$9 sm:$0xff] %v5373_v41  ;;  %5824 = vmatpush.msrb.mxu1 %v7511_v3  ;;  %5708 = vmatpush.msra.mxu3 %v7460_v20  ;;  %v7502_v41 = vld [vmem:[%s10509_s7 + $0x388] sm:$0xff]  ;;  %v7537_v3 = vld [vmem:[%s10509_s7 + $0x4a0] sm:$0xff] }
 0xc55   :  { %5432 = vst [vmem:[#allocation1 + $0x6] ss:$9 sm:$0xff] %v5374_v16  ;;  %5850 = vmatpush.msrb.mxu2 %v7512_v46  ;;  %v5313_v16 = vrot.slane %v5296_v58, 1  ;;  %v5583_v20 = vld [vmem:[#allocation3 + $0x42] ss:$2 sm:$0x7] }
 0xc56   :  { %5433 = vst [vmem:[#allocation1 + $0x7] ss:$9 sm:$0xff] %v5358_v56  ;;  %5825 = vmatpush.msrb.mxu1 %v7509_v13  ;;  %5709 = vmatpush.msra.mxu3 %v7458_v26  ;;  %v5314_v56 = vrot.slane %v5296_v58, 2  ;;  %v7542_v13 = vld [vmem:[%s10509_s7 + $0x4c8] sm:$0xff]  ;;  %v5601_v46 = vrot.slane %v5583_v20, 2 }
 0xc57   :  { %5851 = vmatpush.msrb.mxu2 %v7510_v14  ;;  %v5585_v21 = vld [vmem:[#allocation3 + $0x52] ss:$2 sm:$0x7]  ;;  %v7533_v14 = vld [vmem:[%s10509_s7 + $0x480] sm:$0xff] }
 0xc58   :  { %5826 = vmatpush.msrb.mxu1 %v7507_v6  ;;  %5710 = vmatpush.msra.mxu3 %v7456_v59  ;;  %v7486_v6 = vld [vmem:[%s10509_s7 + $0x308] sm:$0xff]  ;;  %v5602_v59 = vrot.slane %v5585_v21, 1  ;;  %v5603_v48 = vrot.slane %v5585_v21, 2 }
 0xc59   :  { %5852 = vmatpush.msrb.mxu2 %v7508_v63  ;;  %v5729_v63 = vld [vmem:[#allocation3 + $0x8] ss:$2 sm:$0x7] }
 0xc5a   :  { %5827 = vmatpush.msrb.mxu1 %v7505_v24  ;;  %5711 = vmatpush.msra.mxu3 %v7454_v38  ;;  %v5600_v24 = vrot.slane %v5583_v20, 1  ;;  %v7538_v38 = vld [vmem:[%s10509_s7 + $0x4a8] sm:$0xff] }
 0xc5b   :  { %5853 = vmatpush.msrb.mxu2 %v7506_v55  ;;  %v7525_v55 = vld [vmem:[%s10509_s7 + $0x440] sm:$0xff] }
 0xc5c   :  { %5828 = vmatpush.msrb.mxu1 %v7503_v18  ;;  %v5587_v18 = vld [vmem:[#allocation3 + $0x62] ss:$2 sm:$0x7] }
 0xc5d   :  { %v5434_v9 = vld [vmem:[#allocation1] sm:$0xff]  ;;  %5854 = vmatpush.msrb.mxu2 %v7504_v39  ;;  %v5746_v39 = vrot.slane %v5729_v63, 1 }
 0xc5e   :  { %5460 = vmatmul.f32.gmra.mxu1 %v5434_v9  ;;  %5435 = vst [vmem:[#allocation1] ss:$9 sm:$0xff] %v5375_v45  ;;  %5486 = vmatmul.f32.gmra.mxu2 %v5434_v9  ;;  %v5595_v45 = vrot.slane %v5577_v54, 2  ;;  %v7498_v9 = vld [vmem:[%s10509_s7 + $0x368] sm:$0xff] }
 0xc5f   :  { %5436 = vst [vmem:[#allocation1 + $0x1] ss:$9 sm:$0xff] %v5376_v0  ;;  %5829 = vmatpush.msrb.mxu1 %v7501_v34  ;;  %5855 = vmatpush.msrb.mxu2 %v7502_v41  ;;  %v7547_v0 = vld [vmem:[%s10509_s7 + $0x4f0] sm:$0xff] }
 0xc60   :  { %v7523_v41 = vld [vmem:[%s10509_s7 + $0x430] sm:$0xff] }
 0xc61   :  { %5830 = vmatpush.msrb.mxu1 %v7499_v17  ;;  %5856 = vmatpush.msrb.mxu2 %v7500_v32  ;;  %v5731_v17 = vld [vmem:[#allocation3 + $0x18] ss:$2 sm:$0x7]  ;;  %v7519_v32 = vld [vmem:[%s10509_s7 + $0x410] sm:$0xff] }
 0xc63   :  { %5831 = vmatpush.msrb.mxu1 %v7497_v31  ;;  %5857 = vmatpush.msrb.mxu2 %v7498_v9 }
 0xc65   :  { %5832 = vmatpush.msrb.mxu1 %v7495_v27  ;;  %v7532_v27 = vld [vmem:[%s10509_s7 + $0x478] sm:$0xff] }
 0xc66   :  { %v5437_v36 = vld [vmem:[#allocation1] sm:$0xff] }
 0xc67   :  { %5463 = vmatmul.f32.gmra.mxu1 %v5437_v36  ;;  %5489 = vmatmul.f32.gmra.mxu2 %v5437_v36  ;;  %5493 = vst [vmem:[#allocation1] ss:$9 sm:$0xff] %v5286_v29  ;;  %v7489_v29 = vld [vmem:[%s10509_s7 + $0x320] sm:$0xff]  ;;  %v5596_v36 = vrot.slane %v5579_v35, 1 }
 0xc68   :  { %5495 = vst [vmem:[#allocation1 + $0x1] ss:$9 sm:$0xff] %v5303_v11  ;;  %5833 = vmatpush.msrb.mxu1 %v7493_v60  ;;  %v7496_v11 = vld [vmem:[%s10509_s7 + $0x358] sm:$0xff]  ;;  %v7577_v60 = vld [vmem:[%s10509_s7 + $0x5e0] sm:$0xff] }
 0xc69   :  { %5497 = vst [vmem:[#allocation1 + $0x2] ss:$9 sm:$0xff] %v5304_v51  ;;  %v7543_v51 = vld [vmem:[%s10509_s7 + $0x4d0] sm:$0xff]  ;;  %5858 = vmatpush.msrb.mxu2 %v7496_v11 }
 0xc6a   :  { %5499 = vst [vmem:[#allocation1 + $0x3] ss:$9 sm:$0xff] %v5288_v5  ;;  %v5581_v5 = vld [vmem:[#allocation3 + $0x22] ss:$2 sm:$0x7]  ;;  %5834 = vmatpush.msrb.mxu1 %v7491_v49  ;;  %v5749_v49 = vrot.slane %v5731_v17, 2 }
 0xc6b   :  { %5501 = vst [vmem:[#allocation1 + $0x4] ss:$9 sm:$0xff] %v5305_v10  ;;  %v5598_v44 = vrot.slane %v5581_v5, 1  ;;  %5859 = vmatpush.msrb.mxu2 %v7494_v28  ;;  %v7548_v10 = vld [vmem:[%s10509_s7 + $0x4f8] sm:$0xff]  ;;  %v5599_v40 = vrot.slane %v5581_v5, 2  ;;  %v7571_v11 = vld [vmem:[%s10509_s7 + $0x5b0] sm:$0xff] }
 0xc6c   :  { %5503 = vst [vmem:[#allocation1 + $0x5] ss:$9 sm:$0xff] %v5306_v8  ;;  %5835 = vmatpush.msrb.mxu1 %v7489_v29  ;;  %v7546_v8 = vld [vmem:[%s10509_s7 + $0x4e8] sm:$0xff]  ;;  %v7517_v29 = vld [vmem:[%s10509_s7 + $0x400] sm:$0xff]  ;;  %v7576_v28 = vld [vmem:[%s10509_s7 + $0x5d8] sm:$0xff] }
 0xc6d   :  { %5505 = vst [vmem:[#allocation1 + $0x6] ss:$9 sm:$0xff] %v5290_v37  ;;  %v7541_v37 = vld [vmem:[%s10509_s7 + $0x4c0] sm:$0xff]  ;;  %5860 = vmatpush.msrb.mxu2 %v7492_v62  ;;  %v5735_v62 = vld [vmem:[#allocation3 + $0x48] ss:$2 sm:$0x7] }
 0xc6e   :  { %5507 = vst [vmem:[#allocation1 + $0x7] ss:$9 sm:$0xff] %v5307_v33  ;;  %5836 = vmatpush.msrb.mxu1 %v7487_v47  ;;  %v7488_v33 = vld [vmem:[%s10509_s7 + $0x318] sm:$0xff]  ;;  %v7522_v47 = vld [vmem:[%s10509_s7 + $0x428] sm:$0xff] }
 0xc6f   :  { %5861 = vmatpush.msrb.mxu2 %v7490_v52 }
 0xc70   :  { %5837 = vmatpush.msrb.mxu1 %v7485_v19  ;;  %v7567_v19 = vld [vmem:[%s10509_s7 + $0x590] sm:$0xff] }
 0xc71   :  { %5862 = vmatpush.msrb.mxu2 %v7488_v33 }
 0xc73   :  { %5863 = vmatpush.msrb.mxu2 %v7486_v6  ;;  %v7563_v6 = vld [vmem:[%s10509_s7 + $0x570] sm:$0xff] }
 0xc75   :  { %v5508_v7 = vld [vmem:[#allocation1] sm:$0xff] }
 0xc76   :  { %5540 = vmatmul.f32.vlgmr.msrb.gmra.mxu3 %v5508_v7  ;;  %5509 = vst [vmem:[#allocation1] ss:$9 sm:$0xff] %v5308_v15  ;;  %5566 = vmatmul.f32.vlgmr.msra.gmra.mxu1 %v5508_v7  ;;  %v7531_v15 = vld [vmem:[%s10509_s7 + $0x470] sm:$0xff]  ;;  %v7620_v7 = vld [vmem:[%s10509_s7 + $0x738] sm:$0xff] }
 0xc77   :  { %5510 = vst [vmem:[#allocation1 + $0x1] ss:$9 sm:$0xff] %v5292_v2  ;;  %5974 = vmatpush.msrb.mxu3 %v7547_v0  ;;  %6000 = vmatpush.msra.mxu1 %v7548_v10  ;;  %v7540_v2 = vld [vmem:[%s10509_s7 + $0x4b8] sm:$0xff]  ;;  %v7526_v0 = vld [vmem:[%s10509_s7 + $0x448] sm:$0xff] }
 0xc78   :  { %5511 = vst [vmem:[#allocation1 + $0x2] ss:$9 sm:$0xff] %v5309_v50  ;;  %6468 = vmatpush.msrb.mxu0 %v7620_v7  ;;  %v7536_v50 = vld [vmem:[%s10509_s7 + $0x498] sm:$0xff] }
 0xc79   :  { %5512 = vst [vmem:[#allocation1 + $0x3] ss:$9 sm:$0xff] %v5310_v12  ;;  %5975 = vmatpush.msrb.mxu3 %v7545_v61  ;;  %6001 = vmatpush.msra.mxu1 %v7546_v8  ;;  %v7527_v12 = vld [vmem:[%s10509_s7 + $0x450] sm:$0xff]  ;;  %v7524_v61 = vld [vmem:[%s10509_s7 + $0x438] sm:$0xff] }
 0xc7a   :  { %5513 = vst [vmem:[#allocation1 + $0x4] ss:$9 sm:$0xff] %v5294_v42  ;;  %v7529_v42 = vld [vmem:[%s10509_s7 + $0x460] sm:$0xff] }
 0xc7b   :  { %5514 = vst [vmem:[#allocation1 + $0x5] ss:$9 sm:$0xff] %v5311_v23  ;;  %5976 = vmatpush.msrb.mxu3 %v7543_v51  ;;  %6002 = vmatpush.msra.mxu1 %v7544_v53  ;;  %v7534_v23 = vld [vmem:[%s10509_s7 + $0x488] sm:$0xff]  ;;  %v7569_v51 = vld [vmem:[%s10509_s7 + $0x5a0] sm:$0xff]  ;;  %v5753_v53 = vrot.slane %v5735_v62, 2 }
 0xc7c   :  { %5515 = vst [vmem:[#allocation1 + $0x6] ss:$9 sm:$0xff] %v5312_v25  ;;  %v5604_v25 = vrot.slane %v5587_v18, 1  ;;  %v5737_v8 = vld [vmem:[#allocation3 + $0x58] ss:$2 sm:$0x7] }
 0xc7d   :  { %5516 = vst [vmem:[#allocation1 + $0x7] ss:$9 sm:$0xff] %v5296_v58  ;;  %5977 = vmatpush.msrb.mxu3 %v7541_v37  ;;  %6003 = vmatpush.msra.mxu1 %v7542_v13  ;;  %v5605_v58 = vrot.slane %v5587_v18, 2  ;;  %v7574_v37 = vld [vmem:[%s10509_s7 + $0x5c8] sm:$0xff]  ;;  %v5754_v33 = vrot.slane %v5737_v8, 1 }
 0xc7e   :  { %v5739_v13 = vld [vmem:[#allocation3 + $0x68] ss:$2 sm:$0x7] }
 0xc7f   :  { %5978 = vmatpush.msrb.mxu3 %v7539_v1  ;;  %6004 = vmatpush.msra.mxu1 %v7540_v2  ;;  %v7518_v1 = vld [vmem:[%s10509_s7 + $0x408] sm:$0xff]  ;;  %v5881_v2 = vld [vmem:[#allocation3 + $0x9] ss:$2 sm:$0x7] }
 0xc81   :  { %5979 = vmatpush.msrb.mxu3 %v7537_v3  ;;  %6005 = vmatpush.msra.mxu1 %v7538_v38  ;;  %v5752_v3 = vrot.slane %v5735_v62, 1  ;;  %v7557_v38 = vld [vmem:[%s10509_s7 + $0x540] sm:$0xff] }
 0xc83   :  { %5980 = vmatpush.msrb.mxu3 %v7535_v4  ;;  %6006 = vmatpush.msra.mxu1 %v7536_v50  ;;  %v5755_v4 = vrot.slane %v5737_v8, 2  ;;  %v7618_v50 = vld [vmem:[%s10509_s7 + $0x728] sm:$0xff] }
 0xc84   :  { %v5517_v22 = vld [vmem:[#allocation1] sm:$0xff]  ;;  %6469 = vmatpush.msrb.mxu0 %v7618_v50  ;;  %v7590_v50 = vld [vmem:[%s10509_s7 + $0x648] sm:$0xff] }
 0xc85   :  { %5543 = vmatmul.f32.gmra.mxu3 %v5517_v22  ;;  %5518 = vst [vmem:[#allocation1] ss:$9 sm:$0xff] %v5313_v16  ;;  %5569 = vmatmul.f32.gmra.mxu1 %v5517_v22  ;;  %v5747_v16 = vrot.slane %v5729_v63, 2  ;;  %v7530_v22 = vld [vmem:[%s10509_s7 + $0x468] sm:$0xff] }
 0xc86   :  { %5519 = vst [vmem:[#allocation1 + $0x1] ss:$9 sm:$0xff] %v5314_v56  ;;  %5981 = vmatpush.msrb.mxu3 %v7533_v14  ;;  %6007 = vmatpush.msra.mxu1 %v7534_v23  ;;  %v7579_v56 = vld [vmem:[%s10509_s7 + $0x5f0] sm:$0xff]  ;;  %v5899_v23 = vrot.slane %v5881_v2, 2 }
 0xc88   :  { %5982 = vmatpush.msrb.mxu3 %v7531_v15  ;;  %6008 = vmatpush.msra.mxu1 %v7532_v27  ;;  %v5883_v15 = vld [vmem:[#allocation3 + $0x19] ss:$2 sm:$0x7]  ;;  %v7558_v27 = vld [vmem:[%s10509_s7 + $0x548] sm:$0xff] }
 0xc8a   :  { %5983 = vmatpush.msrb.mxu3 %v7529_v42  ;;  %6009 = vmatpush.msra.mxu1 %v7530_v22  ;;  %v5898_v42 = vrot.slane %v5881_v2, 1  ;;  %v7611_v22 = vld [vmem:[%s10509_s7 + $0x6f0] sm:$0xff] }
 0xc8c   :  { %5984 = vmatpush.msrb.mxu3 %v7527_v12  ;;  %v7564_v12 = vld [vmem:[%s10509_s7 + $0x578] sm:$0xff] }
 0xc8d   :  { %v5520_v43 = vld [vmem:[#allocation1] sm:$0xff] }
 0xc8e   :  { %5546 = vmatmul.f32.gmra.mxu3 %v5520_v43  ;;  %5572 = vmatmul.f32.gmra.mxu1 %v5520_v43  ;;  %5639 = vst [vmem:[#allocation1] ss:$9 sm:$0xff] %v5577_v54  ;;  %v7521_v54 = vld [vmem:[%s10509_s7 + $0x420] sm:$0xff]  ;;  %v5748_v43 = vrot.slane %v5731_v17, 1 }
 0xc8f   :  { %5641 = vst [vmem:[#allocation1 + $0x1] ss:$9 sm:$0xff] %v5594_v57  ;;  %5985 = vmatpush.msrb.mxu3 %v7525_v55  ;;  %v7528_v57 = vld [vmem:[%s10509_s7 + $0x458] sm:$0xff] }
 0xc90   :  { %5643 = vst [vmem:[#allocation1 + $0x2] ss:$9 sm:$0xff] %v5595_v45  ;;  %v7575_v45 = vld [vmem:[%s10509_s7 + $0x5d0] sm:$0xff]  ;;  %6010 = vmatpush.msra.mxu1 %v7528_v57  ;;  %v7560_v55 = vld [vmem:[%s10509_s7 + $0x558] sm:$0xff] }
 0xc91   :  { %5645 = vst [vmem:[#allocation1 + $0x3] ss:$9 sm:$0xff] %v5579_v35  ;;  %v5733_v35 = vld [vmem:[#allocation3 + $0x28] ss:$2 sm:$0x7]  ;;  %5986 = vmatpush.msrb.mxu3 %v7523_v41 }
 0xc92   :  { %5647 = vst [vmem:[#allocation1 + $0x4] ss:$9 sm:$0xff] %v5596_v36  ;;  %v5750_v9 = vrot.slane %v5733_v35, 1  ;;  %6011 = vmatpush.msra.mxu1 %v7526_v0  ;;  %v7580_v36 = vld [vmem:[%s10509_s7 + $0x5f8] sm:$0xff]  ;;  %v5751_v10 = vrot.slane %v5733_v35, 2  ;;  %v7607_v57 = vld [vmem:[%s10509_s7 + $0x6d0] sm:$0xff] }
 0xc93   :  { %5649 = vst [vmem:[#allocation1 + $0x5] ss:$9 sm:$0xff] %v5597_v30  ;;  %5987 = vmatpush.msrb.mxu3 %v7521_v54  ;;  %v7578_v30 = vld [vmem:[%s10509_s7 + $0x5e8] sm:$0xff]  ;;  %v7612_v54 = vld [vmem:[%s10509_s7 + $0x6f8] sm:$0xff] }
 0xc94   :  { %5651 = vst [vmem:[#allocation1 + $0x6] ss:$9 sm:$0xff] %v5581_v5  ;;  %v7573_v5 = vld [vmem:[%s10509_s7 + $0x5c0] sm:$0xff]  ;;  %6012 = vmatpush.msra.mxu1 %v7524_v61  ;;  %v5887_v0 = vld [vmem:[#allocation3 + $0x49] ss:$2 sm:$0x7] }
 0xc95   :  { %5653 = vst [vmem:[#allocation1 + $0x7] ss:$9 sm:$0xff] %v5598_v44  ;;  %5988 = vmatpush.msrb.mxu3 %v7519_v32  ;;  %v7520_v44 = vld [vmem:[%s10509_s7 + $0x418] sm:$0xff] }
 0xc96   :  { %6013 = vmatpush.msra.mxu1 %v7522_v47  ;;  %v7552_v32 = vld [vmem:[%s10509_s7 + $0x518] sm:$0xff]  ;;  %v5905_v47 = vrot.slane %v5887_v0, 2 }
 0xc97   :  { %5989 = vmatpush.msrb.mxu3 %v7517_v29  ;;  %v7550_v29 = vld [vmem:[%s10509_s7 + $0x508] sm:$0xff] }
 0xc98   :  { %6014 = vmatpush.msra.mxu1 %v7520_v44  ;;  %v7603_v44 = vld [vmem:[%s10509_s7 + $0x6b0] sm:$0xff] }
 0xc9a   :  { %6015 = vmatpush.msra.mxu1 %v7518_v1  ;;  %v7600_v1 = vld [vmem:[%s10509_s7 + $0x698] sm:$0xff] }
 0xc9c   :  { %v5654_v26 = vld [vmem:[#allocation1] sm:$0xff] }
 0xc9d   :  { %5686 = vmatmul.f32.vlgmr.msra.gmra.mxu2 %v5654_v26  ;;  %5655 = vst [vmem:[#allocation1] ss:$9 sm:$0xff] %v5599_v40  ;;  %5712 = vmatmul.f32.vlgmr.msra.gmra.mxu3 %v5654_v26  ;;  %v7572_v40 = vld [vmem:[%s10509_s7 + $0x5b8] sm:$0xff]  ;;  %v7570_v26 = vld [vmem:[%s10509_s7 + $0x5a8] sm:$0xff] }
 0xc9e   :  { %5656 = vst [vmem:[#allocation1 + $0x1] ss:$9 sm:$0xff] %v5583_v20  ;;  %6126 = vmatpush.msra.mxu2 %v7579_v56  ;;  %6152 = vmatpush.msra.mxu3 %v7580_v36  ;;  %v7565_v20 = vld [vmem:[%s10509_s7 + $0x580] sm:$0xff]  ;;  %v7556_v56 = vld [vmem:[%s10509_s7 + $0x538] sm:$0xff] }
 0xc9f   :  { %5657 = vst [vmem:[#allocation1 + $0x2] ss:$9 sm:$0xff] %v5600_v24  ;;  %v7568_v24 = vld [vmem:[%s10509_s7 + $0x598] sm:$0xff]  ;;  %v5889_v36 = vld [vmem:[#allocation3 + $0x59] ss:$2 sm:$0x7] }
 0xca0   :  { %5658 = vst [vmem:[#allocation1 + $0x3] ss:$9 sm:$0xff] %v5601_v46  ;;  %6127 = vmatpush.msra.mxu2 %v7577_v60  ;;  %6153 = vmatpush.msra.mxu3 %v7578_v30  ;;  %v7559_v46 = vld [vmem:[%s10509_s7 + $0x550] sm:$0xff]  ;;  %v7609_v60 = vld [vmem:[%s10509_s7 + $0x6e0] sm:$0xff]  ;;  %v5906_v30 = vrot.slane %v5889_v36, 1 }
 0xca1   :  { %5659 = vst [vmem:[#allocation1 + $0x4] ss:$9 sm:$0xff] %v5585_v21  ;;  %v7561_v21 = vld [vmem:[%s10509_s7 + $0x560] sm:$0xff] }
 0xca2   :  { %5660 = vst [vmem:[#allocation1 + $0x5] ss:$9 sm:$0xff] %v5602_v59  ;;  %6128 = vmatpush.msra.mxu2 %v7575_v45  ;;  %6154 = vmatpush.msra.mxu3 %v7576_v28  ;;  %v7566_v59 = vld [vmem:[%s10509_s7 + $0x588] sm:$0xff]  ;;  %v7605_v45 = vld [vmem:[%s10509_s7 + $0x6c0] sm:$0xff] }
 0xca3   :  { %5661 = vst [vmem:[#allocation1 + $0x6] ss:$9 sm:$0xff] %v5603_v48  ;;  %v5756_v48 = vrot.slane %v5739_v13, 1  ;;  %v5891_v28 = vld [vmem:[#allocation3 + $0x69] ss:$2 sm:$0x7] }
 0xca4   :  { %5662 = vst [vmem:[#allocation1 + $0x7] ss:$9 sm:$0xff] %v5587_v18  ;;  %6129 = vmatpush.msra.mxu2 %v7573_v5  ;;  %6155 = vmatpush.msra.mxu3 %v7574_v37  ;;  %v5757_v18 = vrot.slane %v5739_v13, 2  ;;  %v7606_v5 = vld [vmem:[%s10509_s7 + $0x6c8] sm:$0xff]  ;;  %v7601_v37 = vld [vmem:[%s10509_s7 + $0x6a0] sm:$0xff] }
 0xca6   :  { %6130 = vmatpush.msra.mxu2 %v7571_v11  ;;  %6156 = vmatpush.msra.mxu3 %v7572_v40  ;;  %v5904_v11 = vrot.slane %v5887_v0, 1 }
 0xca8   :  { %6131 = vmatpush.msra.mxu2 %v7569_v51  ;;  %6157 = vmatpush.msra.mxu3 %v7570_v26  ;;  %v5907_v51 = vrot.slane %v5889_v36, 2  ;;  %v7595_v26 = vld [vmem:[%s10509_s7 + $0x670] sm:$0xff] }
 0xcaa   :  { %6132 = vmatpush.msra.mxu2 %v7567_v19  ;;  %6158 = vmatpush.msra.mxu3 %v7568_v24  ;;  %v7604_v19 = vld [vmem:[%s10509_s7 + $0x6b8] sm:$0xff] }
 0xcab   :  { %v5663_v34 = vld [vmem:[#allocation1] sm:$0xff] }
 0xcac   :  { %5689 = vmatmul.f32.gmra.mxu2 %v5663_v34  ;;  %5664 = vst [vmem:[#allocation1] ss:$9 sm:$0xff] %v5604_v25  ;;  %5715 = vmatmul.f32.gmra.mxu3 %v5663_v34  ;;  %v7555_v25 = vld [vmem:[%s10509_s7 + $0x530] sm:$0xff]  ;;  %v5900_v34 = vrot.slane %v5883_v15, 1 }
 0xcad   :  { %5665 = vst [vmem:[#allocation1 + $0x1] ss:$9 sm:$0xff] %v5605_v58  ;;  %6133 = vmatpush.msra.mxu2 %v7565_v20  ;;  %6159 = vmatpush.msra.mxu3 %v7566_v59  ;;  %v7562_v58 = vld [vmem:[%s10509_s7 + $0x568] sm:$0xff]  ;;  %v6035_v20 = vld [vmem:[#allocation3 + $0x1a] ss:$2 sm:$0x7] }
 0xcae   :  { %v7594_v59 = vld [vmem:[%s10509_s7 + $0x668] sm:$0xff] }
 0xcaf   :  { %6134 = vmatpush.msra.mxu2 %v7563_v6  ;;  %6160 = vmatpush.msra.mxu3 %v7564_v12 }
 0xcb1   :  { %6135 = vmatpush.msra.mxu2 %v7561_v21  ;;  %6161 = vmatpush.msra.mxu3 %v7562_v58  ;;  %v7596_v21 = vld [vmem:[%s10509_s7 + $0x678] sm:$0xff]  ;;  %v7643_v58 = vld [vmem:[%s10509_s7 + $0x7f0] sm:$0xff] }
 0xcb3   :  { %6136 = vmatpush.msra.mxu2 %v7559_v46  ;;  %6162 = vmatpush.msra.mxu3 %v7560_v55  ;;  %v7593_v46 = vld [vmem:[%s10509_s7 + $0x660] sm:$0xff]  ;;  %v7639_v55 = vld [vmem:[%s10509_s7 + $0x7d0] sm:$0xff] }
 0xcb4   :  { %v5666_v31 = vld [vmem:[#allocation1] sm:$0xff] }
 0xcb5   :  { %5692 = vmatmul.f32.gmra.mxu2 %v5666_v31  ;;  %5718 = vmatmul.f32.gmra.mxu3 %v5666_v31  ;;  %5791 = vst [vmem:[#allocation1] ss:$9 sm:$0xff] %v5729_v63  ;;  %v7553_v63 = vld [vmem:[%s10509_s7 + $0x520] sm:$0xff]  ;;  %v5901_v31 = vrot.slane %v5883_v15, 2 }
 0xcb6   :  { %5793 = vst [vmem:[#allocation1 + $0x1] ss:$9 sm:$0xff] %v5746_v39  ;;  %6137 = vmatpush.msra.mxu2 %v7557_v38  ;;  %v7551_v39 = vld [vmem:[%s10509_s7 + $0x510] sm:$0xff]  ;;  %6163 = vmatpush.msra.mxu3 %v7558_v27  ;;  %v7592_v38 = vld [vmem:[%s10509_s7 + $0x658] sm:$0xff]  ;;  %v7637_v27 = vld [vmem:[%s10509_s7 + $0x7c0] sm:$0xff] }
 0xcb7   :  { %5795 = vst [vmem:[#allocation1 + $0x2] ss:$9 sm:$0xff] %v5747_v16  ;;  %v7549_v16 = vld [vmem:[%s10509_s7 + $0x500] sm:$0xff] }
 0xcb8   :  { %5797 = vst [vmem:[#allocation1 + $0x3] ss:$9 sm:$0xff] %v5731_v17  ;;  %v5885_v17 = vld [vmem:[#allocation3 + $0x29] ss:$2 sm:$0x7]  ;;  %6138 = vmatpush.msra.mxu2 %v7555_v25  ;;  %6164 = vmatpush.msra.mxu3 %v7556_v56  ;;  %v7588_v25 = vld [vmem:[%s10509_s7 + $0x638] sm:$0xff] }
 0xcb9   :  { %5799 = vst [vmem:[#allocation1 + $0x4] ss:$9 sm:$0xff] %v5748_v43  ;;  %v5902_v41 = vrot.slane %v5885_v17, 1  ;;  %v7610_v43 = vld [vmem:[%s10509_s7 + $0x6e8] sm:$0xff] }
 0xcba   :  { %5801 = vst [vmem:[#allocation1 + $0x5] ss:$9 sm:$0xff] %v5749_v49  ;;  %6139 = vmatpush.msra.mxu2 %v7553_v63  ;;  %v7608_v49 = vld [vmem:[%s10509_s7 + $0x6d8] sm:$0xff]  ;;  %v7586_v63 = vld [vmem:[%s10509_s7 + $0x628] sm:$0xff] }
 0xcbb   :  { %5803 = vst [vmem:[#allocation1 + $0x6] ss:$9 sm:$0xff] %v5733_v35  ;;  %v7554_v35 = vld [vmem:[%s10509_s7 + $0x528] sm:$0xff] }
 0xcbc   :  { %5805 = vst [vmem:[#allocation1 + $0x7] ss:$9 sm:$0xff] %v5750_v9  ;;  %6140 = vmatpush.msra.mxu2 %v7551_v39  ;;  %6165 = vmatpush.msra.mxu3 %v7554_v35  ;;  %v5903_v9 = vrot.slane %v5885_v17, 2  ;;  %v7584_v39 = vld [vmem:[%s10509_s7 + $0x618] sm:$0xff] }
 0xcbe   :  { %6141 = vmatpush.msra.mxu2 %v7549_v16  ;;  %6166 = vmatpush.msra.mxu3 %v7552_v32 }
 0xcc0   :  { %6167 = vmatpush.msra.mxu3 %v7550_v29  ;;  %v7633_v29 = vld [vmem:[%s10509_s7 + $0x7a0] sm:$0xff] }
 0xcc3   :  { %v5806_v52 = vld [vmem:[#allocation1] sm:$0xff] }
 0xcc4   :  { %5838 = vmatmul.f32.vlgmr.msrb.gmra.mxu1 %v5806_v52  ;;  %5807 = vst [vmem:[#allocation1] ss:$9 sm:$0xff] %v5751_v10  ;;  %5864 = vmatmul.f32.vlgmr.msrb.gmra.mxu2 %v5806_v52  ;;  %v7599_v10 = vld [vmem:[%s10509_s7 + $0x690] sm:$0xff]  ;;  %v7597_v52 = vld [vmem:[%s10509_s7 + $0x680] sm:$0xff] }
 0xcc5   :  { %5808 = vst [vmem:[#allocation1 + $0x1] ss:$9 sm:$0xff] %v5735_v62  ;;  %6278 = vmatpush.msrb.mxu1 %v7611_v22  ;;  %6304 = vmatpush.msrb.mxu2 %v7612_v54  ;;  %v7602_v62 = vld [vmem:[%s10509_s7 + $0x6a8] sm:$0xff]  ;;  %v7581_v22 = vld [vmem:[%s10509_s7 + $0x600] sm:$0xff] }
 0xcc6   :  { %5809 = vst [vmem:[#allocation1 + $0x2] ss:$9 sm:$0xff] %v5752_v3  ;;  %v5908_v3 = vrot.slane %v5891_v28, 1  ;;  %v7582_v54 = vld [vmem:[%s10509_s7 + $0x608] sm:$0xff] }
 0xcc7   :  { %5810 = vst [vmem:[#allocation1 + $0x3] ss:$9 sm:$0xff] %v5753_v53  ;;  %6279 = vmatpush.msrb.mxu1 %v7609_v60  ;;  %6305 = vmatpush.msrb.mxu2 %v7610_v43  ;;  %v5909_v53 = vrot.slane %v5891_v28, 2  ;;  %v6041_v60 = vld [vmem:[#allocation3 + $0x5a] ss:$2 sm:$0x7] }
 0xcc8   :  { %5811 = vst [vmem:[#allocation1 + $0x4] ss:$9 sm:$0xff] %v5737_v8  ;;  %v7598_v8 = vld [vmem:[%s10509_s7 + $0x688] sm:$0xff]  ;;  %v6058_v32 = vrot.slane %v6041_v60, 1 }
 0xcc9   :  { %5812 = vst [vmem:[#allocation1 + $0x5] ss:$9 sm:$0xff] %v5754_v33  ;;  %6280 = vmatpush.msrb.mxu1 %v7607_v57  ;;  %6306 = vmatpush.msrb.mxu2 %v7608_v49  ;;  %v6059_v49 = vrot.slane %v6041_v60, 2 }
 0xcca   :  { %5813 = vst [vmem:[#allocation1 + $0x6] ss:$9 sm:$0xff] %v5755_v4 }
 0xccb   :  { %5814 = vst [vmem:[#allocation1 + $0x7] ss:$9 sm:$0xff] %v5739_v13  ;;  %6281 = vmatpush.msrb.mxu1 %v7605_v45  ;;  %6307 = vmatpush.msrb.mxu2 %v7606_v5  ;;  %v6033_v13 = vld [vmem:[#allocation3 + $0xa] ss:$2 sm:$0x7] }
 0xccc   :  { %v10113_v4 = vpop.f32.mrf.mxu1  ;;  %v6050_v6 = vrot.slane %v6033_v13, 1  ;;  %v6051_v24 = vrot.slane %v6033_v13, 2  ;;  %v6043_v45 = vld [vmem:[#allocation3 + $0x6a] ss:$2 sm:$0x7] }
 0xccd   :  { %6282 = vmatpush.msrb.mxu1 %v7603_v44  ;;  %6308 = vmatpush.msrb.mxu2 %v7604_v19  ;;  %v6185_v44 = vld [vmem:[#allocation3 + $0x10] ss:$2 sm:$0x7]  ;;  %v6187_v19 = vld [vmem:[#allocation3 + $0x20] ss:$2 sm:$0x7] }
 0xccf   :  { %6283 = vmatpush.msrb.mxu1 %v7601_v37  ;;  %6309 = vmatpush.msrb.mxu2 %v7602_v62  ;;  %v6202_v62 = vrot.slane %v6185_v44, 1 }
 0xcd1   :  { %6284 = vmatpush.msrb.mxu1 %v7599_v10  ;;  %6310 = vmatpush.msrb.mxu2 %v7600_v1  ;;  %v7627_v10 = vld [vmem:[%s10509_s7 + $0x770] sm:$0xff] }
 0xcd2   :  { %v5815_v14 = vld [vmem:[#allocation1] sm:$0xff] }
 0xcd3   :  { %5841 = vmatmul.f32.gmra.mxu1 %v5815_v14  ;;  %5816 = vst [vmem:[#allocation1] ss:$9 sm:$0xff] %v5756_v48  ;;  %5867 = vmatmul.f32.gmra.mxu2 %v5815_v14  ;;  %v7616_v48 = vld [vmem:[%s10509_s7 + $0x718] sm:$0xff]  ;;  %v6052_v14 = vrot.slane %v6035_v20, 1 }
 0xcd4   :  { %5817 = vst [vmem:[#allocation1 + $0x1] ss:$9 sm:$0xff] %v5757_v18  ;;  %6285 = vmatpush.msrb.mxu1 %v7597_v52  ;;  %6311 = vmatpush.msrb.mxu2 %v7598_v8  ;;  %v6037_v18 = vld [vmem:[#allocation3 + $0x2a] ss:$2 sm:$0x7]  ;;  %v6203_v8 = vrot.slane %v6185_v44, 2 }
 0xcd5   :  { %6470 = vmatpush.msrb.mxu0 %v7616_v48  ;;  %v6054_v12 = vrot.slane %v6037_v18, 1  ;;  %v6055_v56 = vrot.slane %v6037_v18, 2  ;;  %v7676_v48 = vld [vmem:[%s10509_s7 + $0x8f8] sm:$0xff] }
 0xcd6   :  { %6286 = vmatpush.msrb.mxu1 %v7595_v26  ;;  %6312 = vmatpush.msrb.mxu2 %v7596_v21 }
 0xcd8   :  { %6287 = vmatpush.msrb.mxu1 %v7593_v46  ;;  %6313 = vmatpush.msrb.mxu2 %v7594_v59  ;;  %v7619_v46 = vld [vmem:[%s10509_s7 + $0x730] sm:$0xff] }
 0xcd9   :  { %v7675_v59 = vld [vmem:[%s10509_s7 + $0x8f0] sm:$0xff] }
 0xcda   :  { %6314 = vmatpush.msrb.mxu2 %v7592_v38  ;;  %v7617_v38 = vld [vmem:[%s10509_s7 + $0x720] sm:$0xff] }
 0xcdb   :  { %v5818_v7 = vld [vmem:[#allocation1] sm:$0xff] }
 0xcdc   :  { %5844 = vmatmul.f32.gmra.mxu1 %v5818_v7  ;;  %5870 = vmatmul.f32.gmra.mxu2 %v5818_v7  ;;  %5943 = vst [vmem:[#allocation1] ss:$9 sm:$0xff] %v5881_v2  ;;  %v10130_v2 = vpop.f32.mrf.mxu1  ;;  %v6053_v7 = vrot.slane %v6035_v20, 2 }
 0xcdd   :  { %5945 = vst [vmem:[#allocation1 + $0x1] ss:$9 sm:$0xff] %v5898_v42  ;;  %v7589_v42 = vld [vmem:[%s10509_s7 + $0x640] sm:$0xff]  ;;  %6315 = vmatpush.msrb.mxu2 %v7590_v50 }
 0xcde   :  { %5947 = vst [vmem:[#allocation1 + $0x2] ss:$9 sm:$0xff] %v5899_v23  ;;  %v7587_v23 = vld [vmem:[%s10509_s7 + $0x630] sm:$0xff] }
 0xcdf   :  { %5949 = vst [vmem:[#allocation1 + $0x3] ss:$9 sm:$0xff] %v5883_v15  ;;  %v7591_v15 = vld [vmem:[%s10509_s7 + $0x650] sm:$0xff]  ;;  %6316 = vmatpush.msrb.mxu2 %v7588_v25  ;;  %v7669_v25 = vld [vmem:[%s10509_s7 + $0x8c0] sm:$0xff] }
 0xce0   :  { %5951 = vst [vmem:[#allocation1 + $0x4] ss:$9 sm:$0xff] %v5900_v34  ;;  %6288 = vmatpush.msrb.mxu1 %v7591_v15  ;;  %v7585_v34 = vld [vmem:[%s10509_s7 + $0x620] sm:$0xff] }
 0xce1   :  { %5953 = vst [vmem:[#allocation1 + $0x5] ss:$9 sm:$0xff] %v5901_v31  ;;  %v7583_v31 = vld [vmem:[%s10509_s7 + $0x610] sm:$0xff]  ;;  %6317 = vmatpush.msrb.mxu2 %v7586_v63 }
 0xce2   :  { %5955 = vst [vmem:[#allocation1 + $0x6] ss:$9 sm:$0xff] %v5885_v17  ;;  %6289 = vmatpush.msrb.mxu1 %v7589_v42  ;;  %v7641_v17 = vld [vmem:[%s10509_s7 + $0x7e0] sm:$0xff]  ;;  %v7674_v42 = vld [vmem:[%s10509_s7 + $0x8e8] sm:$0xff] }
 0xce3   :  { %5957 = vst [vmem:[#allocation1 + $0x7] ss:$9 sm:$0xff] %v5902_v41  ;;  %v6039_v41 = vld [vmem:[#allocation3 + $0x4a] ss:$2 sm:$0x7]  ;;  %6318 = vmatpush.msrb.mxu2 %v7584_v39 }
 0xce4   :  { %6290 = vmatpush.msrb.mxu1 %v7587_v23  ;;  %v10174_v16 = vpop.f32.mrf.mxu1  ;;  %v6056_v43 = vrot.slane %v6039_v41, 1  ;;  %v6057_v57 = vrot.slane %v6039_v41, 2  ;;  %v7615_v23 = vld [vmem:[%s10509_s7 + $0x710] sm:$0xff] }
 0xce5   :  { %6319 = vmatpush.msrb.mxu2 %v7582_v54  ;;  %v7667_v54 = vld [vmem:[%s10509_s7 + $0x8b0] sm:$0xff] }
 0xce6   :  { %6291 = vmatpush.msrb.mxu1 %v7585_v34  ;;  %v6191_v34 = vld [vmem:[#allocation3 + $0x50] ss:$2 sm:$0x7] }
 0xce7   :  { %v6208_v39 = vrot.slane %v6191_v34, 1 }
 0xce8   :  { %6292 = vmatpush.msrb.mxu1 %v7583_v31  ;;  %v6193_v31 = vld [vmem:[#allocation3 + $0x60] ss:$2 sm:$0x7] }
 0xcea   :  { %v5958_v61 = vld [vmem:[#allocation1] sm:$0xff]  ;;  %6293 = vmatpush.msrb.mxu1 %v7581_v22  ;;  %v6195_v22 = vld [vmem:[#allocation3 + $0x70] ss:$2 sm:$0x7] }
 0xceb   :  { %5990 = vmatmul.f32.vlgmr.msrb.gmra.mxu3 %v5958_v61  ;;  %5959 = vst [vmem:[#allocation1] ss:$9 sm:$0xff] %v5903_v9  ;;  %6016 = vmatmul.f32.vlgmr.msra.gmra.mxu1 %v5958_v61  ;;  %v7635_v9 = vld [vmem:[%s10509_s7 + $0x7b0] sm:$0xff] }
 0xcec   :  { %5960 = vst [vmem:[#allocation1 + $0x1] ss:$9 sm:$0xff] %v5887_v0  ;;  %6430 = vmatpush.msrb.mxu3 %v7643_v58  ;;  %v5484_v0 = vpop.f32.mrf.mxu2  ;;  %6582 = vmatpush.msra.mxu1 %v7675_v59  ;;  %v7670_v58 = vld [vmem:[%s10509_s7 + $0x8c8] sm:$0xff] }
 0xced   :  { %5961 = vst [vmem:[#allocation1 + $0x2] ss:$9 sm:$0xff] %v5904_v11  ;;  %v7629_v11 = vld [vmem:[%s10509_s7 + $0x780] sm:$0xff] }
 0xcee   :  { %5962 = vst [vmem:[#allocation1 + $0x3] ss:$9 sm:$0xff] %v5905_v47  ;;  %6431 = vmatpush.msrb.mxu3 %v7641_v17  ;;  %v6060_v47 = vrot.slane %v6043_v45, 1  ;;  %v7613_v17 = vld [vmem:[%s10509_s7 + $0x700] sm:$0xff] }
 0xcef   :  { %5963 = vst [vmem:[#allocation1 + $0x4] ss:$9 sm:$0xff] %v5889_v36  ;;  %v7631_v36 = vld [vmem:[%s10509_s7 + $0x790] sm:$0xff] }
 0xcf0   :  { %5964 = vst [vmem:[#allocation1 + $0x5] ss:$9 sm:$0xff] %v5906_v30  ;;  %6432 = vmatpush.msrb.mxu3 %v7639_v55  ;;  %v6061_v30 = vrot.slane %v6043_v45, 2 }
 0xcf1   :  { %5965 = vst [vmem:[#allocation1 + $0x6] ss:$9 sm:$0xff] %v5907_v51 }
 0xcf2   :  { %5966 = vst [vmem:[#allocation1 + $0x7] ss:$9 sm:$0xff] %v5891_v28  ;;  %6433 = vmatpush.msrb.mxu3 %v7637_v27  ;;  %v6209_v27 = vrot.slane %v6191_v34, 2 }
 0xcf3   :  { %v5567_v5 = vpop.f32.mrf.mxu1 }
 0xcf4   :  { %6434 = vmatpush.msrb.mxu3 %v7635_v9  ;;  %v10188_v61 = vadd.f32 %v5567_v5, %v5484_v0  ;;  %v5487_v28 = vpop.f32.mrf.mxu2  ;;  %v7662_v0 = vld [vmem:[%s10509_s7 + $0x888] sm:$0xff]  ;;  %v6212_v9 = vrot.slane %v6195_v22, 1 }
 0xcf6   :  { %6435 = vmatpush.msrb.mxu3 %v7633_v29  ;;  %v6213_v29 = vrot.slane %v6195_v22, 2 }
 0xcf8   :  { %6436 = vmatpush.msrb.mxu3 %v7631_v36  ;;  %v6337_v36 = vld [vmem:[#allocation3 + $0x11] ss:$2 sm:$0x7] }
 0xcf9   :  { %v5967_v33 = vld [vmem:[#allocation1] sm:$0xff]  ;;  %v5541_v1 = vpop.f32.mrf.mxu3 }
 0xcfa   :  { %5993 = vmatmul.f32.gmra.mxu3 %v5967_v33  ;;  %5968 = vst [vmem:[#allocation1] ss:$9 sm:$0xff] %v5908_v3  ;;  %6019 = vmatmul.f32.gmra.mxu1 %v5967_v33  ;;  %v10200_v3 = vadd.f32 %v5541_v1, %v10113_v4  ;;  %v7621_v4 = vld [vmem:[%s10509_s7 + $0x740] sm:$0xff] }
 0xcfb   :  { %5969 = vst [vmem:[#allocation1 + $0x1] ss:$9 sm:$0xff] %v5909_v53  ;;  %6437 = vmatpush.msrb.mxu3 %v7629_v11  ;;  %v7625_v53 = vld [vmem:[%s10509_s7 + $0x760] sm:$0xff]  ;;  %v6339_v11 = vld [vmem:[#allocation3 + $0x21] ss:$2 sm:$0x7] }
 0xcfc   :  { %v5490_v21 = vpop.f32.mrf.mxu2  ;;  %v7657_v1 = vld [vmem:[%s10509_s7 + $0x860] sm:$0xff] }
 0xcfd   :  { %6438 = vmatpush.msrb.mxu3 %v7627_v10 }
 0xcff   :  { %6439 = vmatpush.msrb.mxu3 %v7625_v53  ;;  %v6356_v53 = vrot.slane %v6339_v11, 1 }
 0xd02   :  { %v5970_v40 = vld [vmem:[#allocation1] sm:$0xff]  ;;  %v5570_v52 = vpop.f32.mrf.mxu1 }
 0xd03   :  { %5996 = vmatmul.f32.gmra.mxu3 %v5970_v40  ;;  %6022 = vmatmul.f32.gmra.mxu1 %v5970_v40  ;;  %6095 = vst [vmem:[#allocation1] ss:$9 sm:$0xff] %v6033_v13  ;;  %v10205_v33 = vadd.f32 %v5570_v52, %v5487_v28  ;;  %v6204_v13 = vrot.slane %v6187_v19, 1  ;;  %v7623_v40 = vld [vmem:[%s10509_s7 + $0x750] sm:$0xff]  ;;  %v7660_v28 = vld [vmem:[%s10509_s7 + $0x878] sm:$0xff]  ;;  %v7658_v52 = vld [vmem:[%s10509_s7 + $0x868] sm:$0xff] }
 0xd04   :  { %6097 = vst [vmem:[#allocation1 + $0x1] ss:$9 sm:$0xff] %v6050_v6  ;;  %v6205_v6 = vrot.slane %v6187_v19, 2  ;;  %6440 = vmatpush.msrb.mxu3 %v7623_v40  ;;  %v7654_v40 = vld [vmem:[%s10509_s7 + $0x848] sm:$0xff] }
 0xd05   :  { %6099 = vst [vmem:[#allocation1 + $0x2] ss:$9 sm:$0xff] %v6051_v24  ;;  %v7614_v24 = vld [vmem:[%s10509_s7 + $0x708] sm:$0xff] }
 0xd06   :  { %6101 = vst [vmem:[#allocation1 + $0x3] ss:$9 sm:$0xff] %v6035_v20  ;;  %v6189_v20 = vld [vmem:[#allocation3 + $0x30] ss:$2 sm:$0x7]  ;;  %6441 = vmatpush.msrb.mxu3 %v7621_v4  ;;  %6471 = vmatpush.msrb.mxu0 %v7614_v24  ;;  %v7651_v4 = vld [vmem:[%s10509_s7 + $0x830] sm:$0xff] }
 0xd07   :  { %6103 = vst [vmem:[#allocation1 + $0x4] ss:$9 sm:$0xff] %v6052_v14  ;;  %v6206_v26 = vrot.slane %v6189_v20, 1  ;;  %v6207_v63 = vrot.slane %v6189_v20, 2 }
 0xd08   :  { %6105 = vst [vmem:[#allocation1 + $0x5] ss:$9 sm:$0xff] %v6053_v7  ;;  %6608 = vmatpush.msra.mxu0 %v7676_v48  ;;  %v7673_v7 = vld [vmem:[%s10509_s7 + $0x8e0] sm:$0xff]  ;;  %6442 = vmatpush.msrb.mxu3 %v7619_v46 }
 0xd09   :  { %6107 = vst [vmem:[#allocation1 + $0x6] ss:$9 sm:$0xff] %v6037_v18  ;;  %v5544_v18 = vpop.f32.mrf.mxu3  ;;  %6583 = vmatpush.msra.mxu1 %v7673_v7 }
 0xd0a   :  { %6109 = vst [vmem:[#allocation1 + $0x7] ss:$9 sm:$0xff] %v6054_v12  ;;  %v10226_v15 = vadd.f32 %v5544_v18, %v10130_v2  ;;  %v7671_v2 = vld [vmem:[%s10509_s7 + $0x8d0] sm:$0xff]  ;;  %v7672_v12 = vld [vmem:[%s10509_s7 + $0x8d8] sm:$0xff]  ;;  %6609 = vmatpush.msra.mxu0 %v7674_v42  ;;  %6443 = vmatpush.msrb.mxu3 %v7617_v38  ;;  %v7650_v18 = vld [vmem:[%s10509_s7 + $0x828] sm:$0xff] }
 0xd0b   :  { %v5573_v14 = vpop.f32.mrf.mxu1  ;;  %6584 = vmatpush.msra.mxu1 %v7671_v2 }
 0xd0c   :  { %v10237_v50 = vadd.f32 %v5573_v14, %v5490_v21  ;;  %6610 = vmatpush.msra.mxu0 %v7672_v12  ;;  %6444 = vmatpush.msrb.mxu3 %v7615_v23  ;;  %v7647_v14 = vld [vmem:[%s10509_s7 + $0x810] sm:$0xff] }
 0xd0d   :  { %6585 = vmatpush.msra.mxu1 %v7669_v25 }
 0xd0e   :  { %6611 = vmatpush.msra.mxu0 %v7670_v58  ;;  %6445 = vmatpush.msrb.mxu3 %v7613_v17 }
 0xd0f   :  { %6586 = vmatpush.msra.mxu1 %v7667_v54 }
 0xd11   :  { %v6110_v35 = vld [vmem:[#allocation1] sm:$0xff] }
 0xd12   :  { %6142 = vmatmul.f32.vlgmr.msra.gmra.mxu2 %v6110_v35  ;;  %6111 = vst [vmem:[#allocation1] ss:$9 sm:$0xff] %v6055_v56  ;;  %6168 = vmatmul.f32.vlgmr.msra.gmra.mxu3 %v6110_v35  ;;  %v6211_v56 = vrot.slane %v6193_v31, 2  ;;  %v7668_v35 = vld [vmem:[%s10509_s7 + $0x8b8] sm:$0xff] }
 0xd13   :  { %6112 = vst [vmem:[#allocation1 + $0x1] ss:$9 sm:$0xff] %v6039_v41  ;;  %7693 = vmatpush.msra.mxu2 %v7676_v48  ;;  %7677 = vmatpush.msra.mxu3 %v7675_v59  ;;  %v6210_v41 = vrot.slane %v6193_v31, 1  ;;  %v7649_v48 = vld [vmem:[%s10509_s7 + $0x820] sm:$0xff] }
 0xd14   :  { %6113 = vst [vmem:[#allocation1 + $0x2] ss:$9 sm:$0xff] %v6056_v43  ;;  %v7665_v43 = vld [vmem:[%s10509_s7 + $0x8a0] sm:$0xff]  ;;  %6612 = vmatpush.msra.mxu0 %v7668_v35 }
 0xd15   :  { %6114 = vst [vmem:[#allocation1 + $0x3] ss:$9 sm:$0xff] %v6057_v57  ;;  %7694 = vmatpush.msra.mxu2 %v7674_v42  ;;  %7678 = vmatpush.msra.mxu3 %v7673_v7  ;;  %v7645_v7 = vld [vmem:[%s10509_s7 + $0x800] sm:$0xff]  ;;  %v7646_v42 = vld [vmem:[%s10509_s7 + $0x808] sm:$0xff] }
 0xd16   :  { %6115 = vst [vmem:[#allocation1 + $0x4] ss:$9 sm:$0xff] %v6041_v60  ;;  %v5547_v60 = vpop.f32.mrf.mxu3  ;;  %6587 = vmatpush.msra.mxu1 %v7665_v43 }
 0xd17   :  { %6116 = vst [vmem:[#allocation1 + $0x5] ss:$9 sm:$0xff] %v6058_v32  ;;  %7695 = vmatpush.msra.mxu2 %v7672_v12  ;;  %7679 = vmatpush.msra.mxu3 %v7671_v2  ;;  %v10267_v57 = vadd.f32 %v5547_v60, %v10174_v16  ;;  %v7666_v32 = vld [vmem:[%s10509_s7 + $0x8a8] sm:$0xff]  ;;  %v7661_v16 = vld [vmem:[%s10509_s7 + $0x880] sm:$0xff] }
 0xd18   :  { %6117 = vst [vmem:[#allocation1 + $0x6] ss:$9 sm:$0xff] %v6059_v49  ;;  %v7663_v49 = vld [vmem:[%s10509_s7 + $0x890] sm:$0xff]  ;;  %6613 = vmatpush.msra.mxu0 %v7666_v32  ;;  %v6345_v12 = vld [vmem:[#allocation3 + $0x61] ss:$2 sm:$0x7] }
 0xd19   :  { %6118 = vst [vmem:[#allocation1 + $0x7] ss:$9 sm:$0xff] %v6043_v45  ;;  %7696 = vmatpush.msra.mxu2 %v7670_v58  ;;  %v7664_v45 = vld [vmem:[%s10509_s7 + $0x898] sm:$0xff]  ;;  %7680 = vmatpush.msra.mxu3 %v7669_v25  ;;  %v6362_v58 = vrot.slane %v6345_v12, 1 }
 0xd1a   :  { %6588 = vmatpush.msra.mxu1 %v7663_v49  ;;  %6614 = vmatpush.msra.mxu0 %v7664_v45 }
 0xd1b   :  { %7697 = vmatpush.msra.mxu2 %v7668_v35  ;;  %7681 = vmatpush.msra.mxu3 %v7667_v54  ;;  %v6491_v35 = vld [vmem:[#allocation3 + $0x22] ss:$2 sm:$0x7] }
 0xd1c   :  { %6589 = vmatpush.msra.mxu1 %v7661_v16  ;;  %6615 = vmatpush.msra.mxu0 %v7662_v0 }
 0xd1d   :  { %7698 = vmatpush.msra.mxu2 %v7666_v32  ;;  %7682 = vmatpush.msra.mxu3 %v7665_v43 }
 0xd1e   :  { %6616 = vmatpush.msra.mxu0 %v7660_v28 }
 0xd1f   :  { %7699 = vmatpush.msra.mxu2 %v7664_v45  ;;  %7683 = vmatpush.msra.mxu3 %v7663_v49  ;;  %v6508_v49 = vrot.slane %v6491_v35, 1  ;;  %v6509_v45 = vrot.slane %v6491_v35, 2 }
 0xd20   :  { %v6119_v51 = vld [vmem:[#allocation1] sm:$0xff]  ;;  %6617 = vmatpush.msra.mxu0 %v7658_v52 }
 0xd21   :  { %6145 = vmatmul.f32.gmra.mxu2 %v6119_v51  ;;  %6120 = vst [vmem:[#allocation1] ss:$9 sm:$0xff] %v6060_v47  ;;  %6171 = vmatmul.f32.gmra.mxu3 %v6119_v51  ;;  %v7659_v51 = vld [vmem:[%s10509_s7 + $0x870] sm:$0xff] }
 0xd22   :  { %6121 = vst [vmem:[#allocation1 + $0x1] ss:$9 sm:$0xff] %v6061_v30  ;;  %7700 = vmatpush.msra.mxu2 %v7662_v0  ;;  %7684 = vmatpush.msra.mxu3 %v7661_v16  ;;  %v6354_v30 = vrot.slane %v6337_v36, 1 }
 0xd23   :  { %6590 = vmatpush.msra.mxu1 %v7659_v51 }
 0xd24   :  { %7685 = vmatpush.msra.mxu3 %v7659_v51  ;;  %7701 = vmatpush.msra.mxu2 %v7660_v28 }
 0xd25   :  { %6591 = vmatpush.msra.mxu1 %v7657_v1 }
 0xd26   :  { %7686 = vmatpush.msra.mxu3 %v7657_v1  ;;  %7702 = vmatpush.msra.mxu2 %v7658_v52 }
 0xd29   :  { %v6122_v37 = vld [vmem:[#allocation1] sm:$0xff] }
 0xd2a   :  { %6148 = vmatmul.f32.gmra.mxu2 %v6122_v37  ;;  %6174 = vmatmul.f32.gmra.mxu3 %v6122_v37  ;;  %6247 = vst [vmem:[#allocation1] ss:$9 sm:$0xff] %v6185_v44  ;;  %v5687_v44 = vpop.f32.mrf.mxu2  ;;  %v6355_v37 = vrot.slane %v6337_v36, 2 }
 0xd2b   :  { %6249 = vst [vmem:[#allocation1 + $0x1] ss:$9 sm:$0xff] %v6202_v62  ;;  %v10291_v62 = vadd.f32 %v5687_v44, %v10200_v3  ;;  %v7655_v3 = vld [vmem:[%s10509_s7 + $0x850] sm:$0xff] }
 0xd2c   :  { %6251 = vst [vmem:[#allocation1 + $0x2] ss:$9 sm:$0xff] %v6203_v8  ;;  %v6341_v8 = vld [vmem:[#allocation3 + $0x31] ss:$2 sm:$0x7]  ;;  %6592 = vmatpush.msra.mxu1 %v7655_v3  ;;  %7687 = vmatpush.msra.mxu3 %v7655_v3 }
 0xd2d   :  { %6253 = vst [vmem:[#allocation1 + $0x3] ss:$9 sm:$0xff] %v6187_v19  ;;  %v5713_v19 = vpop.f32.mrf.mxu3  ;;  %v6359_v38 = vrot.slane %v6341_v8, 2 }
 0xd2e   :  { %6255 = vst [vmem:[#allocation1 + $0x4] ss:$9 sm:$0xff] %v6204_v13  ;;  %v10294_v10 = vadd.f32 %v5713_v19, %v10188_v61  ;;  %v7656_v61 = vld [vmem:[%s10509_s7 + $0x858] sm:$0xff]  ;;  %v6357_v13 = vrot.slane %v6339_v11, 2 }
 0xd2f   :  { %6257 = vst [vmem:[#allocation1 + $0x5] ss:$9 sm:$0xff] %v6205_v6  ;;  %v6358_v6 = vrot.slane %v6341_v8, 1  ;;  %6618 = vmatpush.msra.mxu0 %v7656_v61  ;;  %7703 = vmatpush.msra.mxu2 %v7656_v61 }
 0xd30   :  { %6259 = vst [vmem:[#allocation1 + $0x6] ss:$9 sm:$0xff] %v6189_v20  ;;  %v7653_v20 = vld [vmem:[%s10509_s7 + $0x840] sm:$0xff] }
 0xd31   :  { %6261 = vst [vmem:[#allocation1 + $0x7] ss:$9 sm:$0xff] %v6206_v26  ;;  %6593 = vmatpush.msra.mxu1 %v7653_v20  ;;  %6619 = vmatpush.msra.mxu0 %v7654_v40  ;;  %v7652_v26 = vld [vmem:[%s10509_s7 + $0x838] sm:$0xff] }
 0xd32   :  { %v5690_v21 = vpop.f32.mrf.mxu2  ;;  %7688 = vmatpush.msra.mxu3 %v7653_v20  ;;  %7704 = vmatpush.msra.mxu2 %v7654_v40 }
 0xd33   :  { %v10321_v46 = vadd.f32 %v5690_v21, %v10226_v15  ;;  %6594 = vmatpush.msra.mxu1 %v7651_v4  ;;  %6620 = vmatpush.msra.mxu0 %v7652_v26  ;;  %v6343_v15 = vld [vmem:[#allocation3 + $0x51] ss:$2 sm:$0x7] }
 0xd34   :  { %7689 = vmatpush.msra.mxu3 %v7651_v4  ;;  %7705 = vmatpush.msra.mxu2 %v7652_v26  ;;  %v6360_v23 = vrot.slane %v6343_v15, 1  ;;  %v6361_v25 = vrot.slane %v6343_v15, 2 }
 0xd35   :  { %v5716_v24 = vpop.f32.mrf.mxu3  ;;  %6595 = vmatpush.msra.mxu1 %v7649_v48  ;;  %6621 = vmatpush.msra.mxu0 %v7650_v18 }
 0xd36   :  { %v10324_v59 = vadd.f32 %v5716_v24, %v10205_v33  ;;  %v7648_v33 = vld [vmem:[%s10509_s7 + $0x818] sm:$0xff]  ;;  %7690 = vmatpush.msra.mxu3 %v7649_v48  ;;  %7706 = vmatpush.msra.mxu2 %v7650_v18 }
 0xd37   :  { %6596 = vmatpush.msra.mxu1 %v7647_v14  ;;  %6622 = vmatpush.msra.mxu0 %v7648_v33 }
 0xd38   :  { %v6262_v55 = vld [vmem:[#allocation1] sm:$0xff]  ;;  %7691 = vmatpush.msra.mxu3 %v7647_v14  ;;  %7707 = vmatpush.msra.mxu2 %v7648_v33 }
 0xd39   :  { %6294 = vmatmul.f32.vlgmr.msrb.gmra.mxu1 %v6262_v55  ;;  %6263 = vst [vmem:[#allocation1] ss:$9 sm:$0xff] %v6207_v63  ;;  %6320 = vmatmul.f32.vlgmr.msrb.gmra.mxu2 %v6262_v55  ;;  %v6347_v63 = vld [vmem:[#allocation3 + $0x71] ss:$2 sm:$0x7] }
 0xd3a   :  { %6264 = vst [vmem:[#allocation1 + $0x1] ss:$9 sm:$0xff] %v6191_v34  ;;  %6597 = vmatpush.msra.mxu1 %v7645_v7  ;;  %6623 = vmatpush.msra.mxu0 %v7646_v42  ;;  %v6363_v34 = vrot.slane %v6345_v12, 2  ;;  %v5693_v17 = vpop.f32.mrf.mxu2 }
 0xd3b   :  { %6265 = vst [vmem:[#allocation1 + $0x2] ss:$9 sm:$0xff] %v6208_v39  ;;  %7692 = vmatpush.msra.mxu3 %v7645_v7  ;;  %7708 = vmatpush.msra.mxu2 %v7646_v42 }
 0xd3c   :  { %6266 = vst [vmem:[#allocation1 + $0x3] ss:$9 sm:$0xff] %v6209_v27  ;;  %v6364_v27 = vrot.slane %v6347_v63, 1 }
 0xd3d   :  { %6267 = vst [vmem:[#allocation1 + $0x4] ss:$9 sm:$0xff] %v6193_v31  ;;  %v5719_v55 = vpop.f32.mrf.mxu3  ;;  %v10345_v31 = vadd.f32 %v5693_v17, %v10267_v57 }
 0xd3e   :  { %6268 = vst [vmem:[#allocation1 + $0x5] ss:$9 sm:$0xff] %v6210_v41  ;;  %v10348_v39 = vadd.f32 %v5719_v55, %v10237_v50  ;;  %v6365_v41 = vrot.slane %v6347_v63, 2  ;;  %v6493_v50 = vld [vmem:[#allocation3 + $0x32] ss:$2 sm:$0x7] }
 0xd3f   :  { %6269 = vst [vmem:[#allocation1 + $0x6] ss:$9 sm:$0xff] %v6211_v56  ;;  %v6510_v0 = vrot.slane %v6493_v50, 1 }
 0xd40   :  { %6270 = vst [vmem:[#allocation1 + $0x7] ss:$9 sm:$0xff] %v6195_v22  ;;  %v6489_v22 = vld [vmem:[#allocation3 + $0x12] ss:$2 sm:$0x7] }
 0xd41   :  { %v6506_v60 = vrot.slane %v6489_v22, 1  ;;  %v6507_v32 = vrot.slane %v6489_v22, 2  ;;  %v5839_v16 = vpop.f32.mrf.mxu1 }
 0xd47   :  { %v6271_v5 = vld [vmem:[#allocation1] sm:$0xff]  ;;  %v5865_v43 = vpop.f32.mrf.mxu2 }
 0xd48   :  { %6297 = vmatmul.f32.gmra.mxu1 %v6271_v5  ;;  %6272 = vst [vmem:[#allocation1] ss:$9 sm:$0xff] %v6212_v9  ;;  %6323 = vmatmul.f32.gmra.mxu2 %v6271_v5  ;;  %v10351_v57 = vadd.f32 %v5865_v43, %v10294_v10  ;;  %v5874_v9 = vadd.f32 %v5839_v16, %v10291_v62 }
 0xd49   :  { %6273 = vst [vmem:[#allocation1 + $0x1] ss:$9 sm:$0xff] %v6213_v29 }
 0xd50   :  { %v6274_v47 = vld [vmem:[#allocation1] sm:$0xff] }
 0xd51   :  { %6300 = vmatmul.f32.gmra.mxu1 %v6274_v47  ;;  %6326 = vmatmul.f32.gmra.mxu2 %v6274_v47  ;;  %6399 = vst [vmem:[#allocation1] ss:$9 sm:$0xff] %v6337_v36  ;;  %v6495_v36 = vld [vmem:[#allocation3 + $0x52] ss:$2 sm:$0x7] }
 0xd52   :  { %6401 = vst [vmem:[#allocation1 + $0x1] ss:$9 sm:$0xff] %v6354_v30  ;;  %v6497_v30 = vld [vmem:[#allocation3 + $0x62] ss:$2 sm:$0x7]  ;;  %v6512_v51 = vrot.slane %v6495_v36, 1 }
 0xd53   :  { %6403 = vst [vmem:[#allocation1 + $0x2] ss:$9 sm:$0xff] %v6355_v37  ;;  %v6513_v28 = vrot.slane %v6495_v36, 2  ;;  %v6514_v44 = vrot.slane %v6497_v30, 1  ;;  %v6515_v19 = vrot.slane %v6497_v30, 2 }
 0xd54   :  { %6405 = vst [vmem:[#allocation1 + $0x3] ss:$9 sm:$0xff] %v6339_v11  ;;  %v6511_v11 = vrot.slane %v6493_v50, 2  ;;  %v6499_v37 = vld [vmem:[#allocation3 + $0x72] ss:$2 sm:$0x7] }
 0xd55   :  { %6407 = vst [vmem:[#allocation1 + $0x4] ss:$9 sm:$0xff] %v6356_v53  ;;  %v6516_v62 = vrot.slane %v6499_v37, 1  ;;  %v6517_v10 = vrot.slane %v6499_v37, 2 }
 0xd56   :  { %6409 = vst [vmem:[#allocation1 + $0x5] ss:$9 sm:$0xff] %v6357_v13  ;;  %v5868_v53 = vpop.f32.mrf.mxu2 }
 0xd57   :  { %6411 = vst [vmem:[#allocation1 + $0x6] ss:$9 sm:$0xff] %v6341_v8  ;;  %v5842_v8 = vpop.f32.mrf.mxu1 }
 0xd58   :  { %6413 = vst [vmem:[#allocation1 + $0x7] ss:$9 sm:$0xff] %v6358_v6 }
 0xd5f   :  { %v6414_v2 = vld [vmem:[#allocation1] sm:$0xff]  ;;  %v5845_v61 = vpop.f32.mrf.mxu1  ;;  %v5871_v13 = vpop.f32.mrf.mxu2 }
 0xd60   :  { %6446 = vmatmul.f32.vlgmr.msrb.gmra.mxu3 %v6414_v2  ;;  %6415 = vst [vmem:[#allocation1] ss:$9 sm:$0xff] %v6359_v38  ;;  %6472 = vmatmul.f32.vlgmr.msrb.gmra.mxu0 %v6414_v2 }
 0xd61   :  { %6416 = vst [vmem:[#allocation1 + $0x1] ss:$9 sm:$0xff] %v6343_v15 }
 0xd62   :  { %6417 = vst [vmem:[#allocation1 + $0x2] ss:$9 sm:$0xff] %v6360_v23 }
 0xd63   :  { %6418 = vst [vmem:[#allocation1 + $0x3] ss:$9 sm:$0xff] %v6361_v25 }
 0xd64   :  { %6419 = vst [vmem:[#allocation1 + $0x4] ss:$9 sm:$0xff] %v6345_v12 }
 0xd65   :  { %6420 = vst [vmem:[#allocation1 + $0x5] ss:$9 sm:$0xff] %v6362_v58 }
 0xd66   :  { %6421 = vst [vmem:[#allocation1 + $0x6] ss:$9 sm:$0xff] %v6363_v34  ;;  %v5876_v34 = vadd.f32 %v5842_v8, %v10321_v46 }
 0xd67   :  { %6422 = vst [vmem:[#allocation1 + $0x7] ss:$9 sm:$0xff] %v6347_v63  ;;  %v5877_v63 = vadd.f32 %v5868_v53, %v10324_v59 }
 0xd68   :  { %v6017_v40 = vpop.f32.mrf.mxu1 }
 0xd69   :  { %v6027_v17 = vadd.f32 %v6017_v40, %v10351_v57 }
 0xd6e   :  { %v6423_v56 = vld [vmem:[#allocation1] sm:$0xff]  ;;  %v5991_v29 = vpop.f32.mrf.mxu3 }
 0xd6f   :  { %6449 = vmatmul.f32.gmra.mxu3 %v6423_v56  ;;  %6424 = vst [vmem:[#allocation1] ss:$9 sm:$0xff] %v6364_v27  ;;  %6475 = vmatmul.f32.gmra.mxu0 %v6423_v56  ;;  %v10354_v5 = vadd.f32 %v5991_v29, %v5874_v9 }
 0xd70   :  { %6425 = vst [vmem:[#allocation1 + $0x1] ss:$9 sm:$0xff] %v6365_v41 }
 0xd77   :  { %v6426_v54 = vld [vmem:[#allocation1] sm:$0xff]  ;;  %v6020_v26 = vpop.f32.mrf.mxu1 }
 0xd78   :  { %6452 = vmatmul.f32.gmra.mxu3 %v6426_v54  ;;  %6478 = vmatmul.f32.gmra.mxu0 %v6426_v54  ;;  %6551 = vst [vmem:[#allocation1] ss:$9 sm:$0xff] %v6489_v22  ;;  %v6029_v41 = vadd.f32 %v6020_v26, %v5877_v63 }
 0xd79   :  { %6553 = vst [vmem:[#allocation1 + $0x1] ss:$9 sm:$0xff] %v6506_v60 }
 0xd7a   :  { %6555 = vst [vmem:[#allocation1 + $0x2] ss:$9 sm:$0xff] %v6507_v32 }
 0xd7b   :  { %6557 = vst [vmem:[#allocation1 + $0x3] ss:$9 sm:$0xff] %v6491_v35 }
 0xd7c   :  { %6559 = vst [vmem:[#allocation1 + $0x4] ss:$9 sm:$0xff] %v6508_v49 }
 0xd7d   :  { %6561 = vst [vmem:[#allocation1 + $0x5] ss:$9 sm:$0xff] %v6509_v45  ;;  %v5994_v3 = vpop.f32.mrf.mxu3 }
 0xd7e   :  { %6563 = vst [vmem:[#allocation1 + $0x6] ss:$9 sm:$0xff] %v6493_v50  ;;  %v6028_v56 = vadd.f32 %v5994_v3, %v5876_v34  ;;  %v6640_v50 = vld [vmem:[%s10510_s8] sm:$0x3] }
 0xd7f   :  { %6565 = vst [vmem:[#allocation1 + $0x7] ss:$9 sm:$0xff] %v6510_v0  ;;  %v6642_v0 = vperm.slane %v6640_v50, 0  ;;  %v6643_v9 = vperm.slane %v6640_v50, 1 }
 0xd80   :  { %v6023_v48 = vpop.f32.mrf.mxu1 }
 0xd86   :  { %v6566_v47 = vld [vmem:[#allocation1] sm:$0xff]  ;;  %v5997_v20 = vpop.f32.mrf.mxu3 }
 0xd87   :  { %6598 = vmatmul.f32.vlgmr.msra.gmra.mxu1 %v6566_v47  ;;  %6567 = vst [vmem:[#allocation1] ss:$9 sm:$0xff] %v6511_v11  ;;  %6624 = vmatmul.f32.vlgmr.msra.gmra.mxu0 %v6566_v47  ;;  %v5878_v47 = vadd.f32 %v5845_v61, %v10345_v31 }
 0xd88   :  { %6568 = vst [vmem:[#allocation1 + $0x1] ss:$9 sm:$0xff] %v6495_v36 }
 0xd89   :  { %6569 = vst [vmem:[#allocation1 + $0x2] ss:$9 sm:$0xff] %v6512_v51 }
 0xd8a   :  { %6570 = vst [vmem:[#allocation1 + $0x3] ss:$9 sm:$0xff] %v6513_v28 }
 0xd8b   :  { %6571 = vst [vmem:[#allocation1 + $0x4] ss:$9 sm:$0xff] %v6497_v30  ;;  %v5879_v30 = vadd.f32 %v5871_v13, %v10348_v39 }
 0xd8c   :  { %6572 = vst [vmem:[#allocation1 + $0x5] ss:$9 sm:$0xff] %v6514_v44 }
 0xd8d   :  { %6573 = vst [vmem:[#allocation1 + $0x6] ss:$9 sm:$0xff] %v6515_v19 }
 0xd8e   :  { %6574 = vst [vmem:[#allocation1 + $0x7] ss:$9 sm:$0xff] %v6499_v37  ;;  %v7742_v37 = vmov 18.0  }
 0xd8f   :  { %7725 = vrcp.f32 %v7742_v37 }
 0xd95   :  { %v6575_v1 = vld [vmem:[#allocation1] sm:$0xff]  ;;  %v6143_v6 = vpop.f32.mrf.mxu2  ;;  %v6169_v4 = vpop.f32.mrf.mxu3 }
 0xd96   :  { %6601 = vmatmul.f32.vlgmr.msra.gmra.mxu3 %v6575_v1  ;;  %6576 = vst [vmem:[#allocation1] ss:$9 sm:$0xff] %v6516_v62  ;;  %6627 = vmatmul.f32.vlgmr.msra.gmra.mxu2 %v6575_v1  ;;  %v6178_v22 = vadd.f32 %v6143_v6, %v10354_v5  ;;  %v6179_v54 = vadd.f32 %v6169_v4, %v6027_v17  ;;  %v7726_v61 = vpop.eup %7725 }
 0xd97   :  { %6577 = vst [vmem:[#allocation1 + $0x1] ss:$9 sm:$0xff] %v6517_v10  ;;  %v6031_v62 = vadd.f32 %v6023_v48, %v5879_v30  ;;  %v6030_v10 = vadd.f32 %v5997_v20, %v5878_v47  ;;  %vm6677_vm4 = vweird.f32 %v7726_v61 }
 0xd9e   :  { %v6578_v52 = vld [vmem:[#allocation1] sm:$0xff] }
 0xd9f   :  { %6604 = vmatmul.f32.gmra.mxu3 %v6578_v52  ;;  %6630 = vmatmul.f32.gmra.mxu2 %v6578_v52 }
 0xda4   :  { %v6146_v21 = vpop.f32.mrf.mxu2  ;;  %v6172_v24 = vpop.f32.mrf.mxu3 }
 0xda5   :  { %v6180_v35 = vadd.f32 %v6146_v21, %v6028_v56  ;;  %v6181_v60 = vadd.f32 %v6172_v24, %v6029_v41 }
 0xdad   :  { %v6149_v18 = vpop.f32.mrf.mxu2  ;;  %v6175_v14 = vpop.f32.mrf.mxu3 }
 0xdae   :  { %v6182_v3 = vadd.f32 %v6149_v18, %v6030_v10  ;;  %v6183_v40 = vadd.f32 %v6175_v14, %v6031_v62 }
 0xdb6   :  { %v6295_v15 = vpop.f32.mrf.mxu1 }
 0xdb7   :  { %v6330_v43 = vadd.f32 %v6295_v15, %v6178_v22  ;;  %v6673_v15 = vmul.f32 18.0, %v7726_v61 }
 0xdbc   :  { %v6321_v38 = vpop.f32.mrf.mxu2 }
 0xdbd   :  { %v6331_v32 = vadd.f32 %v6321_v38, %v6179_v54 }
 0xdc5   :  { %v6298_v2 = vpop.f32.mrf.mxu1 }
 0xdc6   :  { %v6332_v59 = vadd.f32 %v6298_v2, %v6180_v35 }
 0xdcb   :  { %v6324_v12 = vpop.f32.mrf.mxu2 }
 0xdcc   :  { %v6333_v45 = vadd.f32 %v6324_v12, %v6181_v60 }
 0xdce   :  { %v6301_v58 = vpop.f32.mrf.mxu1 }
 0xdcf   :  { %v6334_v26 = vadd.f32 %v6301_v58, %v6182_v3 }
 0xdd4   :  { %v6327_v55 = vpop.f32.mrf.mxu2 }
 0xdd5   :  { %v6335_v31 = vadd.f32 %v6327_v55, %v6183_v40 }
 0xddd   :  { %v6473_v33 = vpop.f32.mrf.mxu0 }
 0xdde   :  { %v6483_v57 = vadd.f32 %v6473_v33, %v6331_v32 }
 0xde3   :  { %v6447_v7 = vpop.f32.mrf.mxu3 }
 0xde4   :  { %v6482_v16 = vadd.f32 %v6447_v7, %v6330_v43 }
 0xdec   :  { %v6476_v42 = vpop.f32.mrf.mxu0 }
 0xded   :  { %v6485_v29 = vadd.f32 %v6476_v42, %v6333_v45  ;;  %v6674_v42 = vsub.f32 1.0, %v6673_v15 }
 0xdef   :  { %v6675_v58 = vmul.f32 %v7726_v61, %v6674_v42 }
 0xdf1   :  { %v6676_v55 = vadd.f32 %v7726_v61, %v6675_v58 }
 0xdf2   :  { %v6450_v23 = vpop.f32.mrf.mxu3 }
 0xdf3   :  { %v6484_v36 = vadd.f32 %v6450_v23, %v6332_v59  ;;  %v6678_v54 = vsel %vm6677_vm4, %v7726_v61, %v6676_v55  ;;  %v6850_v55 = vld [vmem:[%s10513_s11 + $0x8] sm:$0xff] }
 0xdf5   :  { %v6479_v25 = vpop.f32.mrf.mxu0 }
 0xdf6   :  { %v6487_v39 = vadd.f32 %v6479_v25, %v6335_v31 }
 0xdfb   :  { %v6453_v27 = vpop.f32.mrf.mxu3 }
 0xdfc   :  { %v6486_v13 = vadd.f32 %v6453_v27, %v6334_v26 }
 0xe04   :  { %v6599_v46 = vpop.f32.mrf.mxu1  ;;  %v6625_v49 = vpop.f32.mrf.mxu0 }
 0xe05   :  { %v6634_v5 = vadd.f32 %v6599_v46, %v6482_v16  ;;  %v6635_v11 = vadd.f32 %v6625_v49, %v6483_v57 }
 0xe07   :  { %v6646_v1 = vadd.f32 %v6642_v0, %v6634_v5  ;;  %v6647_v52 = vadd.f32 %v6643_v9, %v6635_v11 }
 0xe19   :  { %v6602_v51 = vpop.f32.mrf.mxu3  ;;  %v6628_v28 = vpop.f32.mrf.mxu2 }
 0xe1a   :  { %v6636_v44 = vadd.f32 %v6602_v51, %v6484_v36  ;;  %v6637_v19 = vadd.f32 %v6628_v28, %v6485_v29 }
 0xe1c   :  { %v6648_v8 = vadd.f32 %v6642_v0, %v6636_v44  ;;  %v6649_v53 = vadd.f32 %v6643_v9, %v6637_v19 }
 0xe1e   :  { %v6654_v6 = vadd.f32 %v6648_v8, %v6646_v1  ;;  %v6663_v4 = vadd.f32 %v6649_v53, %v6647_v52 }
 0xe22   :  { %v6605_v21 = vpop.f32.mrf.mxu3  ;;  %v6631_v24 = vpop.f32.mrf.mxu2 }
 0xe23   :  { %v6638_v33 = vadd.f32 %v6605_v21, %v6486_v13  ;;  %v6639_v38 = vadd.f32 %v6631_v24, %v6487_v39 }
 0xe25   :  { %v6650_v48 = vadd.f32 %v6642_v0, %v6638_v33  ;;  %v6651_v20 = vadd.f32 %v6643_v9, %v6639_v38 }
 0xe27   :  { %v6655_v7 = vsel %vm4877_vm11, %v6650_v48, 0.0  ;;  %v6664_v18 = vsel %vm4877_vm11, %v6651_v20, 0.0 }
 0xe28   :  { %v6656_v14 = vadd.f32 %v6655_v7, %v6654_v6  ;;  %v6665_v2 = vadd.f32 %v6664_v18, %v6663_v4  ;;  %v6653_v7 = vld [vmem:[%s10512_s10] sm:$0x3] }
 0xe2a   :  { %v6657_v12 = vrot.slane %v6656_v14, 4  ;;  %v6666_v23 = vrot.slane %v6665_v2, 4 }
 0xe2c   :  { %v6658_v34 = vadd.f32 %v6657_v12, %v6656_v14  ;;  %v6667_v25 = vadd.f32 %v6666_v23, %v6665_v2  ;;  %v6753_v23 = vperm.slane %v6653_v7, 0 }
 0xe2e   :  { %v6659_v63 = vrot.slane %v6658_v34, 2  ;;  %v6668_v17 = vrot.slane %v6667_v25, 2 }
 0xe30   :  { %v6660_v27 = vadd.f32 %v6659_v63, %v6658_v34  ;;  %v6669_v41 = vadd.f32 %v6668_v17, %v6667_v25  ;;  %v6754_v25 = vperm.slane %v6653_v7, 1  ;;  %v7002_v63 = vlaneseq }
 0xe32   :  { %v6661_v56 = vrot.slane %v6660_v27, 1  ;;  %v6670_v22 = vrot.slane %v6669_v41, 1 }
 0xe34   :  { %v6662_v35 = vadd.f32 %v6661_v56, %v6660_v27  ;;  %v6671_v60 = vadd.f32 %v6670_v22, %v6669_v41 }
 0xe36   :  { %v6679_v43 = vmul.f32 %v6678_v54, %v6662_v35  ;;  %v6680_v32 = vmul.f32 %v6678_v54, %v6671_v60 }
 0xe38   :  { %v10367_v50 = vsub.f32 %v6646_v1, %v6679_v43  ;;  %v10369_v46 = vsub.f32 %v6648_v8, %v6679_v43  ;;  %v10371_v49 = vsub.f32 %v6650_v48, %v6679_v43  ;;  %v10373_v59 = vsub.f32 %v6647_v52, %v6680_v32  ;;  %v6652_v48 = vld [vmem:[%s10511_s9] sm:$0x3] }
 0xe39   :  { %v10375_v45 = vsub.f32 %v6649_v53, %v6680_v32  ;;  %v10377_v57 = vsub.f32 %v6651_v20, %v6680_v32  ;;  %v6742_v14 = vperm.slane %v6652_v48, 0  ;;  %v6743_v58 = vperm.slane %v6652_v48, 1 }
 0xe3a   :  { %v6687_v16 = vmul.f32 %v10367_v50, %v10367_v50  ;;  %v6689_v0 = vmul.f32 %v10369_v46, %v10369_v46  ;;  %v6691_v9 = vmul.f32 %v10371_v49, %v10371_v49  ;;  %v6688_v29 = vmul.f32 %v10373_v59, %v10373_v59 }
 0xe3b   :  { %v6690_v36 = vmul.f32 %v10375_v45, %v10375_v45  ;;  %v6692_v5 = vmul.f32 %v10377_v57, %v10377_v57  ;;  %v7003_v43 = vshrl.u32 %v7002_v63, 7 }
 0xe3c   :  { %v6693_v11 = vadd.f32 %v6689_v0, %v6687_v16  ;;  %v6694_v47 = vsel %vm4877_vm11, %v6691_v9, 0.0  ;;  %v6857_v0 = vrot.slane %v6850_v55, 7 }
 0xe3d   :  { %v6702_v30 = vadd.f32 %v6690_v36, %v6688_v29  ;;  %v6703_v51 = vsel %vm4877_vm11, %v6692_v5, 0.0  ;;  %7712 = vset.pattern.permute.xlu1 %v7003_v43 }
 0xe3e   :  { %v6695_v28 = vadd.f32 %v6694_v47, %v6693_v11 }
 0xe3f   :  { %v6704_v44 = vadd.f32 %v6703_v51, %v6702_v30 }
 0xe40   :  { %v6696_v19 = vrot.slane %v6695_v28, 4 }
 0xe41   :  { %v6705_v37 = vrot.slane %v6704_v44, 4 }
 0xe42   :  { %v6697_v62 = vadd.f32 %v6696_v19, %v6695_v28 }
 0xe43   :  { %v6706_v10 = vadd.f32 %v6705_v37, %v6704_v44 }
 0xe44   :  { %v6698_v1 = vrot.slane %v6697_v62, 2 }
 0xe45   :  { %v6707_v52 = vrot.slane %v6706_v10, 2 }
 0xe46   :  { %v6699_v8 = vadd.f32 %v6698_v1, %v6697_v62 }
 0xe47   :  { %v6708_v53 = vadd.f32 %v6707_v52, %v6706_v10 }
 0xe48   :  { %v6700_v3 = vrot.slane %v6699_v8, 1 }
 0xe49   :  { %v6709_v40 = vrot.slane %v6708_v53, 1 }
 0xe4a   :  { %v6701_v6 = vadd.f32 %v6700_v3, %v6699_v8 }
 0xe4b   :  { %v6710_v4 = vadd.f32 %v6709_v40, %v6708_v53 }
 0xe4c   :  { %v6711_v26 = vmul.f32 %v6701_v6, %v6678_v54 }
 0xe4d   :  { %v6712_v31 = vmul.f32 %v6710_v4, %v6678_v54 }
 0xe4e   :  { %v6713_v61 = vadd.f32 1e-05, %v6711_v26 }
 0xe4f   :  { %v6714_v39 = vadd.f32 1e-05, %v6712_v31 }
 0xe50   :  { %7727 = vrsqrt.f32 %v6713_v61  ;;  %vm6721_vm6 = vweird.f32 %v6713_v61 }
 0xe51   :  { %7729 = vrsqrt.f32 %v6714_v39  ;;  %vm6731_vm8 = vweird.f32 %v6714_v39 }
 0xe56   :  { %v7728_v13 = vpop.eup %7727 }
 0xe57   :  { %v7730_v21 = vpop.eup %7729  ;;  %v6716_v24 = vmul.f32 %v7728_v13, %v6713_v61  ;;  %vm6722_vm11 = vweird.f32 %v7728_v13 }
 0xe58   :  { %v6726_v33 = vmul.f32 %v7730_v21, %v6714_v39  ;;  %vm6732_vm5 = vweird.f32 %v7730_v21  ;;  %vm6723_vm7 = vmor %vm6721_vm6, %vm6722_vm11 }
 0xe59   :  { %v6717_v15 = vmul.f32 %v7728_v13, %v6716_v24  ;;  %vm6733_vm9 = vmor %vm6731_vm8, %vm6732_vm5 }
 0xe5a   :  { %v6727_v38 = vmul.f32 %v7730_v21, %v6726_v33 }
 0xe5b   :  { %v6718_v20 = vmul.f32 0.5, %v6717_v15 }
 0xe5c   :  { %v6728_v42 = vmul.f32 0.5, %v6727_v38 }
 0xe5d   :  { %v6719_v18 = vsub.f32 1.5, %v6718_v20 }
 0xe5e   :  { %v6729_v2 = vsub.f32 1.5, %v6728_v42 }
 0xe5f   :  { %v6720_v12 = vmul.f32 %v7728_v13, %v6719_v18 }
 0xe60   :  { %v6730_v34 = vmul.f32 %v7730_v21, %v6729_v2 }
 0xe61   :  { %v6724_v17 = vsel %vm6723_vm7, %v7728_v13, %v6720_v12 }
 0xe62   :  { %v6735_v27 = vmul.f32 %v6724_v17, %v10367_v50  ;;  %v6737_v41 = vmul.f32 %v6724_v17, %v10369_v46  ;;  %v6739_v56 = vmul.f32 %v6724_v17, %v10371_v49  ;;  %v6734_v22 = vsel %vm6733_vm9, %v7730_v21, %v6730_v34  ;;  %v6849_v50 = vld [vmem:[%s10513_s11] sm:$0xff] }
 0xe63   :  { %v6736_v54 = vmul.f32 %v6734_v22, %v10373_v59  ;;  %v6738_v35 = vmul.f32 %v6734_v22, %v10375_v45  ;;  %v6740_v60 = vmul.f32 %v6734_v22, %v10377_v57  ;;  %v10412_v49 = vsel %vm6792_vm13, %v6849_v50, %v6857_v0 }
 0xe64   :  { %v6746_v32 = vmul.f32 %v6742_v14, %v6735_v27  ;;  %v6748_v16 = vmul.f32 %v6742_v14, %v6737_v41  ;;  %v6750_v5 = vmul.f32 %v6742_v14, %v6739_v56  ;;  %v10415_v47 = vsel %vm6795_vm15, %v6849_v50, %v6857_v0 }
 0xe65   :  { %v6747_v9 = vmul.f32 %v6743_v58, %v6736_v54  ;;  %v6749_v29 = vmul.f32 %v6743_v58, %v6738_v35  ;;  %v6751_v36 = vmul.f32 %v6743_v58, %v6740_v60  ;;  %v10418_v30 = vsel %vm6810_vm14, %v6857_v0, %v6849_v50 }
 0xe66   :  { %v6757_v46 = vadd.f32 %v6753_v23, %v6746_v32  ;;  %v6759_v11 = vadd.f32 %v6753_v23, %v6748_v16  ;;  %v10421_v51 = vsel %vm6790_vm10, %v6849_v50, %v6857_v0  ;;  %v6861_v28 = vrot.slane %v10412_v49, 1 }
 0xe67   :  { %v6758_v59 = vadd.f32 %v6754_v25, %v6747_v9  ;;  %v6760_v45 = vadd.f32 %v6754_v25, %v6749_v29  ;;  %v6762_v57 = vadd.f32 %v6754_v25, %v6751_v36  ;;  %v10425_v62 = vsel %vm6798_vm0, %v6849_v50, %v6857_v0 }
 0xe68   :  { %v6769_v44 = vmul.f32 0.01, %v6757_v46  ;;  %vm6763_vm11 = vcmp.ge.f32.partialorder %v6757_v46, 0.0  ;;  %v6863_v1 = vrot.slane %v10415_v47, 2  ;;  %v6761_v52 = vadd.f32 %v6753_v23, %v6750_v5 }
 0xe69   :  { %vm6764_vm3 = vcmp.ge.f32.partialorder %v6758_v59, 0.0  ;;  %vm6766_vm4 = vcmp.ge.f32.partialorder %v6760_v45, 0.0  ;;  %v6770_v19 = vmul.f32 0.01, %v6758_v59  ;;  %v6772_v37 = vmul.f32 0.01, %v6760_v45 }
 0xe6a   :  { %vm6768_vm5 = vcmp.ge.f32.partialorder %v6762_v57, 0.0  ;;  %v6774_v10 = vmul.f32 0.01, %v6762_v57  ;;  %v6771_v8 = vmul.f32 0.01, %v6759_v11  ;;  %vm6765_vm6 = vcmp.ge.f32.partialorder %v6759_v11, 0.0 }
 0xe6b   :  { %v6776_v53 = vsel %vm6764_vm3, %v6758_v59, %v6770_v19  ;;  %v6778_v3 = vsel %vm6766_vm4, %v6760_v45, %v6772_v37  ;;  %v6865_v6 = vrot.slane %v10425_v62, 3  ;;  %v10430_v4 = vsel %vm6801_vm2, %v6849_v50, %v6857_v0 }
 0xe6c   :  { %v6787_v40 = vrot.slane %v6776_v53, 7  ;;  %v6775_v26 = vsel %vm6763_vm11, %v6757_v46, %v6769_v44  ;;  %v6780_v31 = vsel %vm6768_vm5, %v6762_v57, %v6774_v10  ;;  %v6788_v61 = vrot.slane %v6778_v3, 7 }
 0xe6d   :  { %v10433_v39 = vsel %vm6804_vm1, %v6849_v50, %v6857_v0  ;;  %vm6767_vm7 = vcmp.ge.f32.partialorder %v6761_v52, 0.0  ;;  %v6773_v15 = vmul.f32 0.01, %v6761_v52  ;;  %v6777_v38 = vsel %vm6765_vm6, %v6759_v11, %v6771_v8  ;;  %v6852_v11 = vld [vmem:[%s10513_s11 + $0x18] sm:$0x1] }
 0xe6e   :  { %v6791_v13 = vsel %vm6790_vm10, %v6775_v26, %v6787_v40  ;;  %v6793_v21 = vsel %vm6792_vm13, %v6775_v26, %v6787_v40  ;;  %v6796_v24 = vsel %vm6795_vm15, %v6775_v26, %v6787_v40  ;;  %v6799_v33 = vsel %vm6798_vm0, %v6775_v26, %v6787_v40 }
 0xe6f   :  { %v6802_v48 = vsel %vm6801_vm2, %v6775_v26, %v6787_v40  ;;  %v6789_v20 = vrot.slane %v6780_v31, 7  ;;  %v6805_v7 = vsel %vm6804_vm1, %v6775_v26, %v6787_v40  ;;  %v6808_v42 = vsel %vm6807_vm12, %v6775_v26, %v6787_v40 }
 0xe70   :  { %v6811_v18 = vsel %vm6810_vm14, %v6787_v40, %v6775_v26  ;;  %v6794_v14 = vrot.slane %v6793_v21, 1  ;;  %v6797_v2 = vrot.slane %v6796_v24, 2  ;;  %v6813_v12 = vsel %vm6790_vm10, %v6777_v38, %v6788_v61 }
 0xe71   :  { %v10445_v23 = vsel %vm6807_vm12, %v6849_v50, %v6857_v0  ;;  %v6814_v58 = vsel %vm6792_vm13, %v6777_v38, %v6788_v61  ;;  %v6816_v34 = vsel %vm6795_vm15, %v6777_v38, %v6788_v61  ;;  %v6818_v25 = vsel %vm6798_vm0, %v6777_v38, %v6788_v61 }
 0xe72   :  { %v6820_v63 = vsel %vm6801_vm2, %v6777_v38, %v6788_v61  ;;  %v6779_v17 = vsel %vm6767_vm7, %v6761_v52, %v6773_v15  ;;  %v6800_v55 = vrot.slane %v6799_v33, 3  ;;  %v6803_v27 = vrot.slane %v6802_v48, 4 }
 0xe73   :  { %v6867_v41 = vrot.slane %v10430_v4, 4  ;;  %v6822_v56 = vsel %vm6804_vm1, %v6777_v38, %v6788_v61  ;;  %v6824_v22 = vsel %vm6807_vm12, %v6777_v38, %v6788_v61  ;;  %v10456_v54 = vsel %vm6810_vm14, %v6788_v61, %v6777_v38 }
 0xe74   :  { %v10459_v35 = vsel %vm6790_vm10, %v6779_v17, %v6789_v20  ;;  %v6806_v60 = vrot.slane %v6805_v7, 5  ;;  %v10462_v43 = vsel %vm6792_vm13, %v6779_v17, %v6789_v20  ;;  %v6869_v32 = vrot.slane %v10433_v39, 5 }
 0xe75   :  { %v6871_v16 = vrot.slane %v10445_v23, 6  ;;  %v6809_v0 = vrot.slane %v6808_v42, 6  ;;  %v6884_v9 = vmul.f32 %v10421_v51, %v6791_v13  ;;  %v6885_v29 = vmul.f32 %v6861_v28, %v6794_v14 }
 0xe76   :  { %v6886_v36 = vmul.f32 %v6863_v1, %v6797_v2  ;;  %v6812_v50 = vrot.slane %v6811_v18, 7  ;;  %v6887_v46 = vmul.f32 %v6865_v6, %v6800_v55  ;;  %v6888_v59 = vmul.f32 %v6867_v41, %v6803_v27 }
 0xe77   :  { %6920 = vst [vmem:[#allocation1] ss:$9 sm:$0xff] %v6884_v9  ;;  %v6873_v45 = vrot.slane %v10418_v30, 7  ;;  %v6889_v57 = vmul.f32 %v6869_v32, %v6806_v60  ;;  %v6890_v5 = vmul.f32 %v6871_v16, %v6809_v0  ;;  %v6858_v19 = vrot.slane %v6852_v11, 7  ;;  %v6851_v30 = vld [vmem:[%s10513_s11 + $0x10] sm:$0x1] }
 0xe78   :  { %6922 = vst [vmem:[#allocation1 + $0x1] ss:$9 sm:$0xff] %v6885_v29  ;;  %v18_v37 = vstv %s10514_s12  ;;  %v6815_v40 = vrot.slane %v6814_v58, 1  ;;  %v6817_v4 = vrot.slane %v6816_v34, 2  ;;  %v6819_v26 = vrot.slane %v6818_v25, 3 }
 0xe79   :  { %6924 = vst [vmem:[#allocation1 + $0x2] ss:$9 sm:$0xff] %v6886_v36  ;;  %v6891_v44 = vmul.f32 %v6873_v45, %v6812_v50  ;;  %v6874_v10 = vsel %vm6790_vm10, %v6851_v30, %v6858_v19  ;;  %v6821_v31 = vrot.slane %v6820_v63, 4  ;;  %v6823_v61 = vrot.slane %v6822_v56, 5 }
 0xe7a   :  { %6926 = vst [vmem:[#allocation1 + $0x3] ss:$9 sm:$0xff] %v6887_v46  ;;  %v6892_v52 = vmul.f32 %v6874_v10, %v6813_v12  ;;  %v6893_v39 = vmul.f32 %v10421_v51, %v6815_v40  ;;  %v6825_v13 = vrot.slane %v6824_v22, 6  ;;  %v6894_v21 = vmul.f32 %v6861_v28, %v6817_v4 }
 0xe7b   :  { %6928 = vst [vmem:[#allocation1 + $0x4] ss:$9 sm:$0xff] %v6888_v59  ;;  %v6827_v15 = vrot.slane %v10456_v54, 7  ;;  %v6895_v38 = vmul.f32 %v6863_v1, %v6819_v26  ;;  %v6896_v7 = vmul.f32 %v6865_v6, %v6821_v31  ;;  %v6897_v49 = vmul.f32 %v6867_v41, %v6823_v61 }
 0xe7c   :  { %6930 = vst [vmem:[#allocation1 + $0x5] ss:$9 sm:$0xff] %v6889_v57  ;;  %v6898_v28 = vmul.f32 %v6869_v32, %v6825_v13  ;;  %v6900_v47 = vmul.f32 %v6873_v45, %v10459_v35  ;;  %v6830_v6 = vrot.slane %v10462_v43, 1 }
 0xe7d   :  { %6932 = vst [vmem:[#allocation1 + $0x6] ss:$9 sm:$0xff] %v6890_v5  ;;  %v6899_v2 = vmul.f32 %v6871_v16, %v6827_v15 }
 0xe7e   :  { %6934 = vst [vmem:[#allocation1 + $0x7] ss:$9 sm:$0xff] %v6891_v44  ;;  %v6901_v17 = vmul.f32 %v6874_v10, %v6830_v6 }
 0xe7f   :  { %19 = vst [vmem:[#allocation4] sm:$0x1] %v18_v37 }
 0xe85   :  { %v6935_v8 = vld [vmem:[#allocation1] sm:$0xff]  ;;  %v6936_v53 = vld [vmem:[#allocation1 + $0x9] sm:$0xff] }
 0xe86   :  { %6937 = vst [vmem:[#allocation1] ss:$9 sm:$0xff] %v6892_v52  ;;  %v7720_v3 = vld [vmem:[#allocation4] ss:$0 sm:$0xff] }
 0xe87   :  { %7006 = vperm.xlu1 %7712, %v7720_v3  }
 0xe8d   :  { %v6938_v24 = vld [vmem:[#allocation1] sm:$0xff]  ;;  %v6939_v33 = vld [vmem:[#allocation1 + $0x9] sm:$0xff] }
 0xe8e   :  { %v6961_v48 = vsel %vm6790_vm10, %v6938_v24, 0.0  ;;  %v6969_v20 = vsel %vm6790_vm10, %v6939_v33, 0.0  ;;  %6940 = vst [vmem:[#allocation1] ss:$9 sm:$0xff] %v6893_v39 }
 0xe8f   :  { %v6962_v51 = vadd.f32 %v6961_v48, %v6935_v8  ;;  %v6970_v42 = vadd.f32 %v6969_v20, %v6936_v53  ;;  %6941 = vst [vmem:[#allocation1 + $0x1] ss:$9 sm:$0xff] %v6894_v21  ;;  %v7743_v53 = vmov 0  }
 0xe90   :  { %6942 = vst [vmem:[#allocation1 + $0x2] ss:$9 sm:$0xff] %v6895_v38  ;;  %7713 = vset.pattern.permute.xlu1 %v7743_v53  ;;  %7714 = vset.pattern.permute.xlu2 %v7743_v53 }
 0xe91   :  { %v6963_v18 = vrot.slane %v6962_v51, 4  ;;  %v6971_v14 = vrot.slane %v6970_v42, 4  ;;  %6943 = vst [vmem:[#allocation1 + $0x3] ss:$9 sm:$0xff] %v6896_v7  ;;  %7715 = vset.pattern.permute.xlu0 %v7743_v53 }
 0xe92   :  { %6944 = vst [vmem:[#allocation1 + $0x4] ss:$9 sm:$0xff] %v6897_v49 }
 0xe93   :  { %v6964_v1 = vadd.f32 %v6963_v18, %v6962_v51  ;;  %v6972_v12 = vadd.f32 %v6971_v14, %v6970_v42  ;;  %6945 = vst [vmem:[#allocation1 + $0x5] ss:$9 sm:$0xff] %v6898_v28 }
 0xe94   :  { %6946 = vst [vmem:[#allocation1 + $0x6] ss:$9 sm:$0xff] %v6899_v2 }
 0xe95   :  { %v6965_v23 = vrot.slane %v6964_v1, 2  ;;  %v6973_v62 = vrot.slane %v6972_v12, 2  ;;  %6947 = vst [vmem:[#allocation1 + $0x7] ss:$9 sm:$0xff] %v6900_v47 }
 0xe97   :  { %v6966_v58 = vadd.f32 %v6965_v23, %v6964_v1  ;;  %v6974_v34 = vadd.f32 %v6973_v62, %v6972_v12 }
 0xe99   :  { %v6967_v25 = vrot.slane %v6966_v58, 1  ;;  %v6975_v63 = vrot.slane %v6974_v34, 1 }
 0xe9b   :  { %v6968_v55 = vadd.f32 %v6967_v25, %v6966_v58  ;;  %v6976_v27 = vadd.f32 %v6975_v63, %v6974_v34 }
 0xe9c   :  { %v6948_v41 = vld [vmem:[#allocation1] sm:$0xff]  ;;  %v6949_v56 = vld [vmem:[#allocation1 + $0x9] sm:$0xff] }
 0xe9d   :  { %v6993_v22 = vadd.f32 %v6976_v27, %v6968_v55  ;;  %6950 = vst [vmem:[#allocation1] ss:$9 sm:$0xff] %v6901_v17 }
 0xe9f   :  { %6994 = vadd.xlane.f32.xlu0 %v6993_v22 }
 0xea4   :  { %v6951_v54 = vld [vmem:[#allocation1] sm:$0xff]  ;;  %v6952_v35 = vld [vmem:[#allocation1 + $0x9] sm:$0xff] }
 0xea5   :  { %v6977_v60 = vsel %vm6790_vm10, %v6951_v54, 0.0  ;;  %v6985_v32 = vsel %vm6790_vm10, %v6952_v35, 0.0 }
 0xea6   :  { %v6978_v16 = vadd.f32 %v6977_v60, %v6948_v41  ;;  %v6986_v43 = vadd.f32 %v6985_v32, %v6949_v56 }
 0xea8   :  { %v6979_v0 = vrot.slane %v6978_v16, 4  ;;  %v6987_v9 = vrot.slane %v6986_v43, 4 }
 0xeaa   :  { %v6980_v29 = vadd.f32 %v6979_v0, %v6978_v16  ;;  %v6988_v36 = vadd.f32 %v6987_v9, %v6986_v43 }
 0xeac   :  { %v6981_v50 = vrot.slane %v6980_v29, 2  ;;  %v6989_v46 = vrot.slane %v6988_v36, 2 }
 0xeae   :  { %v6982_v59 = vadd.f32 %v6981_v50, %v6980_v29  ;;  %v6990_v45 = vadd.f32 %v6989_v46, %v6988_v36 }
 0xeb0   :  { %v6983_v57 = vrot.slane %v6982_v59, 1  ;;  %v6991_v5 = vrot.slane %v6990_v45, 1 }
 0xeb2   :  { %v6984_v11 = vadd.f32 %v6983_v57, %v6982_v59  ;;  %v6992_v44 = vadd.f32 %v6991_v5, %v6990_v45 }
 0xeb4   :  { %v6996_v19 = vadd.f32 %v6992_v44, %v6984_v11 }
 0xeb6   :  { %6997 = vadd.xlane.f32.xlu0 %v6996_v19 }
 0xef9   :  { %v7007_v37 = vpop.permute.xlu1 %7006 }
 0xf12   :  { %v6995_v30 = vpop.xlane.xlu0 %6994 }
 0xf13   :  { %v7009_v10 = vadd.f32 %v7007_v37, %v6995_v30 }
 0xf15   :  { %v7011_v52 = vsub.f32 0.0, %v7009_v10 }
 0xf17   :  { %v7013_v8 = vmul.f32 1.442695, %v7011_v52 }
 0xf19   :  { %7731 = vpow2.f32 %v7013_v8 }
 0xf1f   :  { %v7732_v3 = vpop.eup %7731 }
 0xf20   :  { %v7017_v40 = vadd.f32 1.0, %v7732_v3 }
 0xf22   :  { %7733 = vrcp.f32 %v7017_v40  ;;  %v7030_v21 = vand.u32 2147483648, %v7017_v40  ;;  %v7028_v33 = vand.u32 2147483647, %v7017_v40  ;;  %vm7024_vm9 = vweird.f32 %v7017_v40 }
 0xf24   :  { %v7031_v48 = vor.u32 1.1754944e-38, %v7030_v21  ;;  %vm7029_vm14 = vcmp.eq.f32.partialorder %v7028_v33, 8.507059e+37 }
 0xf28   :  { %v7734_v4 = vpop.eup %7733 }
 0xf29   :  { %v6998_v26 = vpop.xlane.xlu0 %6997  ;;  %v7020_v31 = vmul.f32 %v7734_v4, %v7017_v40  ;;  %vm7025_vm8 = vweird.f32 %v7734_v4 }
 0xf2a   :  { %v7010_v61 = vadd.f32 %v7007_v37, %v6998_v26  ;;  %vm7026_vm10 = vmor %vm7024_vm9, %vm7025_vm8 }
 0xf2b   :  { %v7021_v39 = vsub.f32 1.0, %v7020_v31 }
 0xf2c   :  { %v7012_v13 = vsub.f32 0.0, %v7010_v61 }
 0xf2d   :  { %v7022_v24 = vmul.f32 %v7734_v4, %v7021_v39 }
 0xf2e   :  { %v7015_v15 = vmul.f32 1.442695, %v7012_v13 }
 0xf2f   :  { %v7023_v38 = vadd.f32 %v7734_v4, %v7022_v24 }
 0xf30   :  { %7735 = vpow2.f32 %v7015_v15 }
 0xf31   :  { %v7027_v20 = vsel %vm7026_vm10, %v7734_v4, %v7023_v38 }
 0xf32   :  { %v7032_v7 = vsel %vm7029_vm14, %v7031_v48, %v7027_v20 }
 0xf33   :  { %v7049_v51 = vperm.slane %v7032_v7, 0 }
 0xf35   :  { %7054 = vperm.xlu1 %7713, %v7049_v51  }
 0xf36   :  { %v7736_v42 = vpop.eup %7735 }
 0xf37   :  { %v7018_v49 = vadd.f32 1.0, %v7736_v42 }
 0xf39   :  { %7737 = vrcp.f32 %v7018_v49  ;;  %v7045_v2 = vand.u32 2147483648, %v7018_v49  ;;  %v7043_v1 = vand.u32 2147483647, %v7018_v49  ;;  %vm7039_vm0 = vweird.f32 %v7018_v49 }
 0xf3b   :  { %v7046_v23 = vor.u32 1.1754944e-38, %v7045_v2  ;;  %vm7044_vm1 = vcmp.eq.f32.partialorder %v7043_v1, 8.507059e+37 }
 0xf3f   :  { %v7738_v28 = vpop.eup %7737 }
 0xf40   :  { %v7035_v18 = vmul.f32 %v7738_v28, %v7018_v49  ;;  %vm7040_vm15 = vweird.f32 %v7738_v28 }
 0xf41   :  { %vm7041_vm2 = vmor %vm7039_vm0, %vm7040_vm15 }
 0xf42   :  { %v7036_v14 = vsub.f32 1.0, %v7035_v18 }
 0xf44   :  { %v7037_v47 = vmul.f32 %v7738_v28, %v7036_v14 }
 0xf46   :  { %v7038_v12 = vadd.f32 %v7738_v28, %v7037_v47 }
 0xf48   :  { %v7042_v62 = vsel %vm7041_vm2, %v7738_v28, %v7038_v12 }
 0xf49   :  { %v7047_v6 = vsel %vm7044_vm1, %v7046_v23, %v7042_v62 }
 0xf4a   :  { %v7050_v58 = vperm.slane %v7047_v6, 0 }
 0xf4c   :  { %7057 = vperm.xlu2 %7714, %v7050_v58  }
 0xfa6   :  { %v7058_v34 = vpop.permute.xlu2 %7057 }
 0xfa7   :  { %v7055_v25 = vpop.permute.xlu1 %7054 }
 0xfa8   :  { %v7059_v63 = vsel %vm6792_vm13, %v7058_v34, %v7055_v25 }
 0xfa9   :  { %7061 = vst [vmem:[%s10515_s13] sm:$0x3] %v7059_v63 }

</bundles_post_ra>
